<compile_context>
chip_gen: v6e
topology: v6e:2x2x1
jax: 0.10.0
libtpu: 0.0.40
codegen_flags: <defaults>
</compile_context>

<pallas_src>
import numpy as np
import jax
import jax.numpy as jnp
from jax.experimental import pallas as pl
from jax.experimental.pallas import tpu as pltpu

NEG_SLOPE = 0.01   # nn.LeakyReLU default
GN_EPS = 1e-5      # nn.GroupNorm default


# ---------------------------------------------------------------------------
# Weight folding (init-time, numpy): Conv3d -> per-kz (Y*X*Cin, Yo*Xo*Cout)
# ---------------------------------------------------------------------------
def _fold_conv_per_kz(w_torch, stride, pad, hin, win, ho, wo):
    """w_torch: (Cout, Cin, k, k, k) torch-layout conv weight.

    Returns Wf of shape (k, hin*win*Cin, ho*wo*Cout) with
      Wf[kz, (y*win + x)*Cin + ci, (dy*wo + dx)*Cout + co]
          = w_torch[co, ci, kz, ky, kx]
    where y = stride*dy + ky - pad, x = stride*dx + kx - pad (zero otherwise).
    """
    w = np.asarray(w_torch, np.float32)
    cout, cin, k = w.shape[0], w.shape[1], w.shape[2]
    out = np.zeros((k, hin * win * cin, ho * wo * cout), np.float32)
    for kz in range(k):
        for dy in range(ho):
            for ky in range(k):
                y = stride * dy + ky - pad
                if y < 0 or y >= hin:
                    continue
                for dx in range(wo):
                    for kx in range(k):
                        x = stride * dx + kx - pad
                        if x < 0 or x >= win:
                            continue
                        r0 = (y * win + x) * cin
                        c0 = (dy * wo + dx) * cout
                        out[kz, r0:r0 + cin, c0:c0 + cout] = w[:, :, kz, ky, kx].T
    return out


# ---------------------------------------------------------------------------
# Parameter init (deterministic, torch-like uniform fan-in scaling)
# ---------------------------------------------------------------------------
def init_params(key, in_channels, start_channels, fac=1):
    f = lambda n: int(n // fac)
    c1, c2 = f(start_channels), f(start_channels * 2)
    ks = iter(jax.random.split(key, 12))

    def conv_w(k, cin, cout):
        bound = 1.0 / float(np.sqrt(cin * k ** 3))
        w = jax.random.uniform(next(ks), (cout, cin, k, k, k), jnp.float32, -bound, bound)
        b = jax.random.uniform(next(ks), (cout,), jnp.float32, -bound, bound)
        return np.asarray(w), np.asarray(b)

    w1, b1 = conv_w(5, in_channels, c1)   # step1: k5 s1 p2, spatial 8 -> 8
    w3, b3 = conv_w(3, c1, c2)            # step3: k3 s2 p1, spatial 8 -> 4
    w6, b6 = conv_w(3, c2, c2)            # step6: k3 s1 p1, spatial 4 -> 4
    w9, b9 = conv_w(4, c2, c1)            # step9: k4 s1 p0, spatial 4 -> 1

    p = {}
    p["w1"] = jnp.asarray(_fold_conv_per_kz(w1, 1, 2, 8, 8, 8, 8))   # (5, 64*Cin, 64*c1)
    p["b1"] = jnp.asarray(np.tile(b1, 8 * 8)[None, :])               # (1, 64*c1)
    p["w3"] = jnp.asarray(_fold_conv_per_kz(w3, 2, 1, 8, 8, 4, 4))   # (3, 64*c1, 16*c2)
    p["b3"] = jnp.asarray(np.tile(b3, 4 * 4)[None, :])               # (1, 16*c2)
    p["w6"] = jnp.asarray(_fold_conv_per_kz(w6, 1, 1, 4, 4, 4, 4))   # (3, 16*c2, 16*c2)
    p["b6"] = jnp.asarray(np.tile(b6, 4 * 4)[None, :])               # (1, 16*c2)
    p["w9"] = jnp.asarray(_fold_conv_per_kz(w9, 1, 0, 4, 4, 1, 1))   # (4, 16*c2, c1)
    p["b9"] = jnp.asarray(b9[None, :])                               # (1, c1)

    # GroupNorm(1) affine params (torch default gamma=1, beta=0), pre-tiled
    # channel-fastest to match the (dy, dx, c) column layout of each stage.
    p["g4"], p["be4"] = jnp.ones((1, 16 * c2), jnp.float32), jnp.zeros((1, 16 * c2), jnp.float32)
    p["g7"], p["be7"] = jnp.ones((1, 16 * c2), jnp.float32), jnp.zeros((1, 16 * c2), jnp.float32)
    p["g10"], p["be10"] = jnp.ones((1, c1), jnp.float32), jnp.zeros((1, c1), jnp.float32)

    # Final linear: torch nn.Linear(c1, 1)
    bound = 1.0 / float(np.sqrt(c1))
    p["wl"] = jax.random.uniform(next(ks), (1, c1), jnp.float32, -bound, bound)
    p["bl"] = jax.random.uniform(next(ks), (1, 1), jnp.float32, -bound, bound)
    return p


# ---------------------------------------------------------------------------
# Fused kernel: entire AtomCrit_tiny forward for one batch sample
# ---------------------------------------------------------------------------
def _fused_forward_kernel(x_ref, w1_ref, b1_ref,
                          w3_ref, b3_ref, g4_ref, be4_ref,
                          w6_ref, b6_ref, g7_ref, be7_ref,
                          w9_ref, b9_ref, g10_ref, be10_ref,
                          wl_ref, bl_ref, out_ref, scr_ref):
    f32 = jnp.float32

    def leaky(v):
        return jnp.where(v >= 0, v, NEG_SLOPE * v)

    def full_mean(v):  # (R, C) -> (1, 1), lane reduce then sublane reduce
        return jnp.mean(jnp.mean(v, axis=1, keepdims=True), axis=0, keepdims=True)

    def groupnorm_leaky(v, g_ref, be_ref):
        m = full_mean(v)
        var = full_mean((v - m) * (v - m))          # biased variance, like torch
        vn = (v - m) * jax.lax.rsqrt(var + GN_EPS)
        return leaky(vn * g_ref[...] + be_ref[...])

    # ---- step1/2: Conv3d(k=5, s=1, p=2) + LeakyReLU -------------------------
    xz = x_ref[0]                                   # (12, 8*8*Cin), z-padded
    a1 = jnp.dot(xz[0:8, :], w1_ref[0], preferred_element_type=f32)
    for kz in range(1, 5):
        a1 = a1 + jnp.dot(xz[kz:kz + 8, :], w1_ref[kz], preferred_element_type=f32)
    a1 = leaky(a1 + b1_ref[...])                    # (8, 8*8*c1)

    # ---- step3/4/5: Conv3d(k=3, s=2, p=1) + GroupNorm(1) + LeakyReLU --------
    for dz in range(4):
        r = None
        for kz in range(3):
            z = 2 * dz + kz - 1                     # input z-plane (pad=1, stride=2)
            if 0 <= z < 8:
                t = jnp.dot(a1[z:z + 1, :], w3_ref[kz], preferred_element_type=f32)
                r = t if r is None else r + t
        scr_ref[dz:dz + 1, :] = r
    a3 = scr_ref[0:4, :] + b3_ref[...]              # (4, 4*4*c2)
    a3 = groupnorm_leaky(a3, g4_ref, be4_ref)

    # ---- step6/7/8: Conv3d(k=3, s=1, p=1) + GroupNorm(1) + LeakyReLU --------
    zero_row = jnp.zeros_like(a3[0:1, :])
    scr_ref[0:1, :] = zero_row                      # z padding (front)
    scr_ref[1:5, :] = a3
    scr_ref[5:6, :] = zero_row                      # z padding (back)
    a6 = jnp.dot(scr_ref[0:4, :], w6_ref[0], preferred_element_type=f32)
    a6 = a6 + jnp.dot(scr_ref[1:5, :], w6_ref[1], preferred_element_type=f32)
    a6 = a6 + jnp.dot(scr_ref[2:6, :], w6_ref[2], preferred_element_type=f32)
    a6 = a6 + b6_ref[...]                           # (4, 4*4*c2)
    a6 = groupnorm_leaky(a6, g7_ref, be7_ref)

    # ---- step9/10/11: Conv3d(k=4, s=1, p=0) + GroupNorm(1) + LeakyReLU ------
    a9 = jnp.dot(a6[0:1, :], w9_ref[0], preferred_element_type=f32)
    for kz in range(1, 4):
        a9 = a9 + jnp.dot(a6[kz:kz + 1, :], w9_ref[kz], preferred_element_type=f32)
    a9 = a9 + b9_ref[...]                           # (1, c1), spatial is 1x1x1 here
    a9 = groupnorm_leaky(a9, g10_ref, be10_ref)

    # ---- flatten + Linear(c1, 1) --------------------------------------------
    val = jnp.sum(a9 * wl_ref[...], axis=1, keepdims=True) + bl_ref[...]   # (1, 1)
    out_ref[0] = val


# ---------------------------------------------------------------------------
# Wrapper: one pallas_call for the whole forward pass
# ---------------------------------------------------------------------------
@jax.jit
def atom_crit_tiny_forward(params, x_ncdhw):
    B, cin, D, H, W = x_ncdhw.shape
    if (D, H, W) != (8, 8, 8):
        # flatten + Linear(c1, 1) requires the spatial extent to reduce to 1^3
        raise ValueError("AtomCrit_tiny kernel requires 8x8x8 spatial input")

    # Minimal glue: NCDHW -> (B, Z, Y*X*C) with z-padding of 2 for conv1.
    x = jnp.transpose(x_ncdhw, (0, 2, 3, 4, 1)).reshape(B, D, H * W * cin)
    x = jnp.pad(x, ((0, 0), (2, 2), (0, 0)))        # (B, 12, 8*8*Cin)

    n3 = params["w3"].shape[2]                      # 4*4*c2 (scratch width)

    def const_spec(a):
        zeros = (0,) * a.ndim
        return pl.BlockSpec(a.shape, lambda b, _z=zeros: _z)

    operands = [
        params["w1"], params["b1"],
        params["w3"], params["b3"], params["g4"], params["be4"],
        params["w6"], params["b6"], params["g7"], params["be7"],
        params["w9"], params["b9"], params["g10"], params["be10"],
        params["wl"], params["bl"],
    ]
    in_specs = [pl.BlockSpec((1, x.shape[1], x.shape[2]), lambda b: (b, 0, 0))]
    in_specs += [const_spec(a) for a in operands]

    out = pl.pallas_call(
        _fused_forward_kernel,
        out_shape=jax.ShapeDtypeStruct((B, 1, 1), jnp.float32),
        grid_spec=pltpu.PrefetchScalarGridSpec(
            num_scalar_prefetch=0,
            grid=(B,),
            in_specs=in_specs,
            out_specs=pl.BlockSpec((1, 1, 1), lambda b: (b, 0, 0)),
            scratch_shapes=[pltpu.VMEM((6, n3), jnp.float32)],
        ),
        compiler_params=pltpu.CompilerParams(
            dimension_semantics=("parallel",),        # v7x: split batch over 2 TCs
            vmem_limit_bytes=32 * 1024 * 1024,
        ),
    )(x, *operands)
    return out.reshape(B, 1)


# ---------------------------------------------------------------------------
if __name__ == "__main__":
    key = jax.random.PRNGKey(0)
    k_param, k_x = jax.random.split(key)

    in_channels, start_channels, fac = 4, 8, 1
    B, S = 2, 8                                      # spatial must reduce to 1^3
    x = jax.random.normal(k_x, (B, in_channels, S, S, S), jnp.float32)

    params = init_params(k_param, in_channels, start_channels, fac)
    out = atom_crit_tiny_forward(params, x)
    out = jax.block_until_ready(out)
    assert out.shape == (B, 1), out.shape
    assert bool(jnp.all(jnp.isfinite(out)))
    print("KERNEL_OK")
</pallas_src>

<mosaic_0001>
module attributes {stable_mosaic.version = 11 : i64} {
  func.func @_fused_forward_kernel(%arg0: i32, %arg1: memref<1x12x256xf32, #tpu.memory_space<vmem>>, %arg2: memref<5x256x512xf32, #tpu.memory_space<vmem>>, %arg3: memref<1x512xf32, #tpu.memory_space<vmem>>, %arg4: memref<3x512x256xf32, #tpu.memory_space<vmem>>, %arg5: memref<1x256xf32, #tpu.memory_space<vmem>>, %arg6: memref<1x256xf32, #tpu.memory_space<vmem>>, %arg7: memref<1x256xf32, #tpu.memory_space<vmem>>, %arg8: memref<3x256x256xf32, #tpu.memory_space<vmem>>, %arg9: memref<1x256xf32, #tpu.memory_space<vmem>>, %arg10: memref<1x256xf32, #tpu.memory_space<vmem>>, %arg11: memref<1x256xf32, #tpu.memory_space<vmem>>, %arg12: memref<4x256x8xf32, #tpu.memory_space<vmem>>, %arg13: memref<1x8xf32, #tpu.memory_space<vmem>>, %arg14: memref<1x8xf32, #tpu.memory_space<vmem>>, %arg15: memref<1x8xf32, #tpu.memory_space<vmem>>, %arg16: memref<1x8xf32, #tpu.memory_space<vmem>>, %arg17: memref<1x1xf32, #tpu.memory_space<vmem>>, %arg18: memref<1x1x1xf32, #tpu.memory_space<vmem>>, %arg19: memref<6x256xf32, #tpu.memory_space<vmem>>) attributes {dimension_semantics = [#tpu.dimension_semantics<parallel>], iteration_bounds = array<i64: 2>, scalar_prefetch = 0 : i64, scratch_operands = 1 : i64, tpu.core_type = #tpu.core_type<tc>, window_params = [{transform_indices = @transform_0, window_bounds = array<i64: 1, 12, 256>}, {pipeline_mode = #tpu.pipeline_mode<synchronous>, transform_indices = @transform_1, window_bounds = array<i64: 5, 256, 512>}, {pipeline_mode = #tpu.pipeline_mode<synchronous>, transform_indices = @transform_2, window_bounds = array<i64: 1, 512>}, {pipeline_mode = #tpu.pipeline_mode<synchronous>, transform_indices = @transform_3, window_bounds = array<i64: 3, 512, 256>}, {pipeline_mode = #tpu.pipeline_mode<synchronous>, transform_indices = @transform_4, window_bounds = array<i64: 1, 256>}, {pipeline_mode = #tpu.pipeline_mode<synchronous>, transform_indices = @transform_5, window_bounds = array<i64: 1, 256>}, {pipeline_mode = #tpu.pipeline_mode<synchronous>, transform_indices = @transform_6, window_bounds = array<i64: 1, 256>}, {pipeline_mode = #tpu.pipeline_mode<synchronous>, transform_indices = @transform_7, window_bounds = array<i64: 3, 256, 256>}, {pipeline_mode = #tpu.pipeline_mode<synchronous>, transform_indices = @transform_8, window_bounds = array<i64: 1, 256>}, {pipeline_mode = #tpu.pipeline_mode<synchronous>, transform_indices = @transform_9, window_bounds = array<i64: 1, 256>}, {pipeline_mode = #tpu.pipeline_mode<synchronous>, transform_indices = @transform_10, window_bounds = array<i64: 1, 256>}, {pipeline_mode = #tpu.pipeline_mode<synchronous>, transform_indices = @transform_11, window_bounds = array<i64: 4, 256, 8>}, {pipeline_mode = #tpu.pipeline_mode<synchronous>, transform_indices = @transform_12, window_bounds = array<i64: 1, 8>}, {pipeline_mode = #tpu.pipeline_mode<synchronous>, transform_indices = @transform_13, window_bounds = array<i64: 1, 8>}, {pipeline_mode = #tpu.pipeline_mode<synchronous>, transform_indices = @transform_14, window_bounds = array<i64: 1, 8>}, {pipeline_mode = #tpu.pipeline_mode<synchronous>, transform_indices = @transform_15, window_bounds = array<i64: 1, 8>}, {pipeline_mode = #tpu.pipeline_mode<synchronous>, transform_indices = @transform_16, window_bounds = array<i64: 1, 1>}, {transform_indices = @transform_17, window_bounds = array<i64: 1, 1, 1>}]} {
    %c0 = arith.constant 0 : index
    %c0_0 = arith.constant 0 : index
    %c0_1 = arith.constant 0 : index
    %0 = vector.load %arg1[%c0, %c0_0, %c0_1] : memref<1x12x256xf32, #tpu.memory_space<vmem>>, vector<1x12x256xf32>
    %1 = vector.shape_cast %0 : vector<1x12x256xf32> to vector<12x256xf32>
    %2 = vector.extract_strided_slice %1 {offsets = [0, 0], sizes = [8, 256], strides = [1, 1]} : vector<12x256xf32> to vector<8x256xf32>
    %c0_2 = arith.constant 0 : index
    %c0_3 = arith.constant 0 : index
    %c0_4 = arith.constant 0 : index
    %3 = vector.load %arg2[%c0_2, %c0_3, %c0_4] : memref<5x256x512xf32, #tpu.memory_space<vmem>>, vector<1x256x512xf32>
    %4 = vector.shape_cast %3 : vector<1x256x512xf32> to vector<256x512xf32>
    %cst = arith.constant dense<0.000000e+00> : vector<8x512xf32>
    %5 = tpu.matmul %2, %4, %cst {dimension_numbers = #tpu.dot_dimension_numbers<[1], [0], [0], [1], [0, 0, 1, 1], [], []>} : vector<8x256xf32>, vector<256x512xf32>, vector<8x512xf32> -> vector<8x512xf32>
    %6 = vector.extract_strided_slice %1 {offsets = [1, 0], sizes = [8, 256], strides = [1, 1]} : vector<12x256xf32> to vector<8x256xf32>
    %c1 = arith.constant 1 : index
    %c0_5 = arith.constant 0 : index
    %c0_6 = arith.constant 0 : index
    %7 = vector.load %arg2[%c1, %c0_5, %c0_6] : memref<5x256x512xf32, #tpu.memory_space<vmem>>, vector<1x256x512xf32>
    %8 = vector.shape_cast %7 : vector<1x256x512xf32> to vector<256x512xf32>
    %cst_7 = arith.constant dense<0.000000e+00> : vector<8x512xf32>
    %9 = tpu.matmul %6, %8, %cst_7 {dimension_numbers = #tpu.dot_dimension_numbers<[1], [0], [0], [1], [0, 0, 1, 1], [], []>} : vector<8x256xf32>, vector<256x512xf32>, vector<8x512xf32> -> vector<8x512xf32>
    %10 = arith.addf %5, %9 : vector<8x512xf32>
    %11 = vector.extract_strided_slice %1 {offsets = [2, 0], sizes = [8, 256], strides = [1, 1]} : vector<12x256xf32> to vector<8x256xf32>
    %c2 = arith.constant 2 : index
    %c0_8 = arith.constant 0 : index
    %c0_9 = arith.constant 0 : index
    %12 = vector.load %arg2[%c2, %c0_8, %c0_9] : memref<5x256x512xf32, #tpu.memory_space<vmem>>, vector<1x256x512xf32>
    %13 = vector.shape_cast %12 : vector<1x256x512xf32> to vector<256x512xf32>
    %cst_10 = arith.constant dense<0.000000e+00> : vector<8x512xf32>
    %14 = tpu.matmul %11, %13, %cst_10 {dimension_numbers = #tpu.dot_dimension_numbers<[1], [0], [0], [1], [0, 0, 1, 1], [], []>} : vector<8x256xf32>, vector<256x512xf32>, vector<8x512xf32> -> vector<8x512xf32>
    %15 = arith.addf %10, %14 : vector<8x512xf32>
    %16 = vector.extract_strided_slice %1 {offsets = [3, 0], sizes = [8, 256], strides = [1, 1]} : vector<12x256xf32> to vector<8x256xf32>
    %c3 = arith.constant 3 : index
    %c0_11 = arith.constant 0 : index
    %c0_12 = arith.constant 0 : index
    %17 = vector.load %arg2[%c3, %c0_11, %c0_12] : memref<5x256x512xf32, #tpu.memory_space<vmem>>, vector<1x256x512xf32>
    %18 = vector.shape_cast %17 : vector<1x256x512xf32> to vector<256x512xf32>
    %cst_13 = arith.constant dense<0.000000e+00> : vector<8x512xf32>
    %19 = tpu.matmul %16, %18, %cst_13 {dimension_numbers = #tpu.dot_dimension_numbers<[1], [0], [0], [1], [0, 0, 1, 1], [], []>} : vector<8x256xf32>, vector<256x512xf32>, vector<8x512xf32> -> vector<8x512xf32>
    %20 = arith.addf %15, %19 : vector<8x512xf32>
    %21 = vector.extract_strided_slice %1 {offsets = [4, 0], sizes = [8, 256], strides = [1, 1]} : vector<12x256xf32> to vector<8x256xf32>
    %c4 = arith.constant 4 : index
    %c0_14 = arith.constant 0 : index
    %c0_15 = arith.constant 0 : index
    %22 = vector.load %arg2[%c4, %c0_14, %c0_15] : memref<5x256x512xf32, #tpu.memory_space<vmem>>, vector<1x256x512xf32>
    %23 = vector.shape_cast %22 : vector<1x256x512xf32> to vector<256x512xf32>
    %cst_16 = arith.constant dense<0.000000e+00> : vector<8x512xf32>
    %24 = tpu.matmul %21, %23, %cst_16 {dimension_numbers = #tpu.dot_dimension_numbers<[1], [0], [0], [1], [0, 0, 1, 1], [], []>} : vector<8x256xf32>, vector<256x512xf32>, vector<8x512xf32> -> vector<8x512xf32>
    %25 = arith.addf %20, %24 : vector<8x512xf32>
    %c0_17 = arith.constant 0 : index
    %c0_18 = arith.constant 0 : index
    %26 = vector.load %arg3[%c0_17, %c0_18] : memref<1x512xf32, #tpu.memory_space<vmem>>, vector<1x512xf32>
    %27 = vector.broadcast %26 : vector<1x512xf32> to vector<8x512xf32>
    %28 = arith.addf %25, %27 : vector<8x512xf32>
    %cst_19 = arith.constant 0.000000e+00 : f32
    %29 = vector.broadcast %cst_19 : f32 to vector<8x512xf32>
    %30 = arith.cmpf oge, %28, %29 : vector<8x512xf32>
    %cst_20 = arith.constant 0.00999999977 : f32
    %31 = vector.broadcast %cst_20 : f32 to vector<8x512xf32>
    %32 = arith.mulf %31, %28 : vector<8x512xf32>
    %33 = arith.select %30, %28, %32 : vector<8x512xi1>, vector<8x512xf32>
    %34 = vector.extract_strided_slice %33 {offsets = [0, 0], sizes = [1, 512], strides = [1, 1]} : vector<8x512xf32> to vector<1x512xf32>
    %c1_21 = arith.constant 1 : index
    %c0_22 = arith.constant 0 : index
    %c0_23 = arith.constant 0 : index
    %35 = vector.load %arg4[%c1_21, %c0_22, %c0_23] : memref<3x512x256xf32, #tpu.memory_space<vmem>>, vector<1x512x256xf32>
    %36 = vector.shape_cast %35 : vector<1x512x256xf32> to vector<512x256xf32>
    %cst_24 = arith.constant dense<0.000000e+00> : vector<1x256xf32>
    %37 = tpu.matmul %34, %36, %cst_24 {dimension_numbers = #tpu.dot_dimension_numbers<[1], [0], [0], [1], [0, 0, 1, 1], [], []>} : vector<1x512xf32>, vector<512x256xf32>, vector<1x256xf32> -> vector<1x256xf32>
    %38 = vector.extract_strided_slice %33 {offsets = [1, 0], sizes = [1, 512], strides = [1, 1]} : vector<8x512xf32> to vector<1x512xf32>
    %c2_25 = arith.constant 2 : index
    %c0_26 = arith.constant 0 : index
    %c0_27 = arith.constant 0 : index
    %39 = vector.load %arg4[%c2_25, %c0_26, %c0_27] : memref<3x512x256xf32, #tpu.memory_space<vmem>>, vector<1x512x256xf32>
    %40 = vector.shape_cast %39 : vector<1x512x256xf32> to vector<512x256xf32>
    %cst_28 = arith.constant dense<0.000000e+00> : vector<1x256xf32>
    %41 = tpu.matmul %38, %40, %cst_28 {dimension_numbers = #tpu.dot_dimension_numbers<[1], [0], [0], [1], [0, 0, 1, 1], [], []>} : vector<1x512xf32>, vector<512x256xf32>, vector<1x256xf32> -> vector<1x256xf32>
    %42 = arith.addf %37, %41 : vector<1x256xf32>
    %c0_29 = arith.constant 0 : index
    %c0_30 = arith.constant 0 : index
    %43 = vector.load %arg19[%c0_29, %c0_30] : memref<6x256xf32, #tpu.memory_space<vmem>>, vector<1x256xf32>
    tpu.vector_store %arg19[%c0_29, %c0_30], %42 {strides = array<i32>} : memref<6x256xf32, #tpu.memory_space<vmem>>, vector<1x256xf32>,
    %44 = vector.extract_strided_slice %33 {offsets = [1, 0], sizes = [1, 512], strides = [1, 1]} : vector<8x512xf32> to vector<1x512xf32>
    %c0_31 = arith.constant 0 : index
    %c0_32 = arith.constant 0 : index
    %c0_33 = arith.constant 0 : index
    %45 = vector.load %arg4[%c0_31, %c0_32, %c0_33] : memref<3x512x256xf32, #tpu.memory_space<vmem>>, vector<1x512x256xf32>
    %46 = vector.shape_cast %45 : vector<1x512x256xf32> to vector<512x256xf32>
    %cst_34 = arith.constant dense<0.000000e+00> : vector<1x256xf32>
    %47 = tpu.matmul %44, %46, %cst_34 {dimension_numbers = #tpu.dot_dimension_numbers<[1], [0], [0], [1], [0, 0, 1, 1], [], []>} : vector<1x512xf32>, vector<512x256xf32>, vector<1x256xf32> -> vector<1x256xf32>
    %48 = vector.extract_strided_slice %33 {offsets = [2, 0], sizes = [1, 512], strides = [1, 1]} : vector<8x512xf32> to vector<1x512xf32>
    %c1_35 = arith.constant 1 : index
    %c0_36 = arith.constant 0 : index
    %c0_37 = arith.constant 0 : index
    %49 = vector.load %arg4[%c1_35, %c0_36, %c0_37] : memref<3x512x256xf32, #tpu.memory_space<vmem>>, vector<1x512x256xf32>
    %50 = vector.shape_cast %49 : vector<1x512x256xf32> to vector<512x256xf32>
    %cst_38 = arith.constant dense<0.000000e+00> : vector<1x256xf32>
    %51 = tpu.matmul %48, %50, %cst_38 {dimension_numbers = #tpu.dot_dimension_numbers<[1], [0], [0], [1], [0, 0, 1, 1], [], []>} : vector<1x512xf32>, vector<512x256xf32>, vector<1x256xf32> -> vector<1x256xf32>
    %52 = arith.addf %47, %51 : vector<1x256xf32>
    %53 = vector.extract_strided_slice %33 {offsets = [3, 0], sizes = [1, 512], strides = [1, 1]} : vector<8x512xf32> to vector<1x512xf32>
    %c2_39 = arith.constant 2 : index
    %c0_40 = arith.constant 0 : index
    %c0_41 = arith.constant 0 : index
    %54 = vector.load %arg4[%c2_39, %c0_40, %c0_41] : memref<3x512x256xf32, #tpu.memory_space<vmem>>, vector<1x512x256xf32>
    %55 = vector.shape_cast %54 : vector<1x512x256xf32> to vector<512x256xf32>
    %cst_42 = arith.constant dense<0.000000e+00> : vector<1x256xf32>
    %56 = tpu.matmul %53, %55, %cst_42 {dimension_numbers = #tpu.dot_dimension_numbers<[1], [0], [0], [1], [0, 0, 1, 1], [], []>} : vector<1x512xf32>, vector<512x256xf32>, vector<1x256xf32> -> vector<1x256xf32>
    %57 = arith.addf %52, %56 : vector<1x256xf32>
    %c1_43 = arith.constant 1 : index
    %c0_44 = arith.constant 0 : index
    %58 = vector.load %arg19[%c1_43, %c0_44] : memref<6x256xf32, #tpu.memory_space<vmem>>, vector<1x256xf32>
    tpu.vector_store %arg19[%c1_43, %c0_44], %57 {strides = array<i32>} : memref<6x256xf32, #tpu.memory_space<vmem>>, vector<1x256xf32>,
    %59 = vector.extract_strided_slice %33 {offsets = [3, 0], sizes = [1, 512], strides = [1, 1]} : vector<8x512xf32> to vector<1x512xf32>
    %c0_45 = arith.constant 0 : index
    %c0_46 = arith.constant 0 : index
    %c0_47 = arith.constant 0 : index
    %60 = vector.load %arg4[%c0_45, %c0_46, %c0_47] : memref<3x512x256xf32, #tpu.memory_space<vmem>>, vector<1x512x256xf32>
    %61 = vector.shape_cast %60 : vector<1x512x256xf32> to vector<512x256xf32>
    %cst_48 = arith.constant dense<0.000000e+00> : vector<1x256xf32>
    %62 = tpu.matmul %59, %61, %cst_48 {dimension_numbers = #tpu.dot_dimension_numbers<[1], [0], [0], [1], [0, 0, 1, 1], [], []>} : vector<1x512xf32>, vector<512x256xf32>, vector<1x256xf32> -> vector<1x256xf32>
    %63 = vector.extract_strided_slice %33 {offsets = [4, 0], sizes = [1, 512], strides = [1, 1]} : vector<8x512xf32> to vector<1x512xf32>
    %c1_49 = arith.constant 1 : index
    %c0_50 = arith.constant 0 : index
    %c0_51 = arith.constant 0 : index
    %64 = vector.load %arg4[%c1_49, %c0_50, %c0_51] : memref<3x512x256xf32, #tpu.memory_space<vmem>>, vector<1x512x256xf32>
    %65 = vector.shape_cast %64 : vector<1x512x256xf32> to vector<512x256xf32>
    %cst_52 = arith.constant dense<0.000000e+00> : vector<1x256xf32>
    %66 = tpu.matmul %63, %65, %cst_52 {dimension_numbers = #tpu.dot_dimension_numbers<[1], [0], [0], [1], [0, 0, 1, 1], [], []>} : vector<1x512xf32>, vector<512x256xf32>, vector<1x256xf32> -> vector<1x256xf32>
    %67 = arith.addf %62, %66 : vector<1x256xf32>
    %68 = vector.extract_strided_slice %33 {offsets = [5, 0], sizes = [1, 512], strides = [1, 1]} : vector<8x512xf32> to vector<1x512xf32>
    %c2_53 = arith.constant 2 : index
    %c0_54 = arith.constant 0 : index
    %c0_55 = arith.constant 0 : index
    %69 = vector.load %arg4[%c2_53, %c0_54, %c0_55] : memref<3x512x256xf32, #tpu.memory_space<vmem>>, vector<1x512x256xf32>
    %70 = vector.shape_cast %69 : vector<1x512x256xf32> to vector<512x256xf32>
    %cst_56 = arith.constant dense<0.000000e+00> : vector<1x256xf32>
    %71 = tpu.matmul %68, %70, %cst_56 {dimension_numbers = #tpu.dot_dimension_numbers<[1], [0], [0], [1], [0, 0, 1, 1], [], []>} : vector<1x512xf32>, vector<512x256xf32>, vector<1x256xf32> -> vector<1x256xf32>
    %72 = arith.addf %67, %71 : vector<1x256xf32>
    %c2_57 = arith.constant 2 : index
    %c0_58 = arith.constant 0 : index
    %73 = vector.load %arg19[%c2_57, %c0_58] : memref<6x256xf32, #tpu.memory_space<vmem>>, vector<1x256xf32>
    tpu.vector_store %arg19[%c2_57, %c0_58], %72 {strides = array<i32>} : memref<6x256xf32, #tpu.memory_space<vmem>>, vector<1x256xf32>,
    %74 = vector.extract_strided_slice %33 {offsets = [5, 0], sizes = [1, 512], strides = [1, 1]} : vector<8x512xf32> to vector<1x512xf32>
    %c0_59 = arith.constant 0 : index
    %c0_60 = arith.constant 0 : index
    %c0_61 = arith.constant 0 : index
    %75 = vector.load %arg4[%c0_59, %c0_60, %c0_61] : memref<3x512x256xf32, #tpu.memory_space<vmem>>, vector<1x512x256xf32>
    %76 = vector.shape_cast %75 : vector<1x512x256xf32> to vector<512x256xf32>
    %cst_62 = arith.constant dense<0.000000e+00> : vector<1x256xf32>
    %77 = tpu.matmul %74, %76, %cst_62 {dimension_numbers = #tpu.dot_dimension_numbers<[1], [0], [0], [1], [0, 0, 1, 1], [], []>} : vector<1x512xf32>, vector<512x256xf32>, vector<1x256xf32> -> vector<1x256xf32>
    %78 = vector.extract_strided_slice %33 {offsets = [6, 0], sizes = [1, 512], strides = [1, 1]} : vector<8x512xf32> to vector<1x512xf32>
    %c1_63 = arith.constant 1 : index
    %c0_64 = arith.constant 0 : index
    %c0_65 = arith.constant 0 : index
    %79 = vector.load %arg4[%c1_63, %c0_64, %c0_65] : memref<3x512x256xf32, #tpu.memory_space<vmem>>, vector<1x512x256xf32>
    %80 = vector.shape_cast %79 : vector<1x512x256xf32> to vector<512x256xf32>
    %cst_66 = arith.constant dense<0.000000e+00> : vector<1x256xf32>
    %81 = tpu.matmul %78, %80, %cst_66 {dimension_numbers = #tpu.dot_dimension_numbers<[1], [0], [0], [1], [0, 0, 1, 1], [], []>} : vector<1x512xf32>, vector<512x256xf32>, vector<1x256xf32> -> vector<1x256xf32>
    %82 = arith.addf %77, %81 : vector<1x256xf32>
    %83 = vector.extract_strided_slice %33 {offsets = [7, 0], sizes = [1, 512], strides = [1, 1]} : vector<8x512xf32> to vector<1x512xf32>
    %c2_67 = arith.constant 2 : index
    %c0_68 = arith.constant 0 : index
    %c0_69 = arith.constant 0 : index
    %84 = vector.load %arg4[%c2_67, %c0_68, %c0_69] : memref<3x512x256xf32, #tpu.memory_space<vmem>>, vector<1x512x256xf32>
    %85 = vector.shape_cast %84 : vector<1x512x256xf32> to vector<512x256xf32>
    %cst_70 = arith.constant dense<0.000000e+00> : vector<1x256xf32>
    %86 = tpu.matmul %83, %85, %cst_70 {dimension_numbers = #tpu.dot_dimension_numbers<[1], [0], [0], [1], [0, 0, 1, 1], [], []>} : vector<1x512xf32>, vector<512x256xf32>, vector<1x256xf32> -> vector<1x256xf32>
    %87 = arith.addf %82, %86 : vector<1x256xf32>
    %c3_71 = arith.constant 3 : index
    %c0_72 = arith.constant 0 : index
    %88 = vector.load %arg19[%c3_71, %c0_72] : memref<6x256xf32, #tpu.memory_space<vmem>>, vector<1x256xf32>
    tpu.vector_store %arg19[%c3_71, %c0_72], %87 {strides = array<i32>} : memref<6x256xf32, #tpu.memory_space<vmem>>, vector<1x256xf32>,
    %c0_73 = arith.constant 0 : index
    %c0_74 = arith.constant 0 : index
    %89 = vector.load %arg19[%c0_73, %c0_74] : memref<6x256xf32, #tpu.memory_space<vmem>>, vector<4x256xf32>
    %c0_75 = arith.constant 0 : index
    %c0_76 = arith.constant 0 : index
    %90 = vector.load %arg5[%c0_75, %c0_76] : memref<1x256xf32, #tpu.memory_space<vmem>>, vector<1x256xf32>
    %91 = vector.broadcast %90 : vector<1x256xf32> to vector<4x256xf32>
    %92 = arith.addf %89, %91 : vector<4x256xf32>
    %cst_77 = arith.constant dense<0.000000e+00> : vector<4xf32>
    %93 = vector.multi_reduction <add>, %92, %cst_77 [1] : vector<4x256xf32> to vector<4xf32>
    %94 = vector.shape_cast %93 : vector<4xf32> to vector<4x1xf32>
    %cst_78 = arith.constant 2.560000e+02 : f32
    %95 = vector.broadcast %cst_78 : f32 to vector<4x1xf32>
    %96 = arith.divf %94, %95 : vector<4x1xf32>
    %cst_79 = arith.constant dense<0.000000e+00> : vector<1xf32>
    %97 = vector.multi_reduction <add>, %96, %cst_79 [0] : vector<4x1xf32> to vector<1xf32>
    %98 = vector.shape_cast %97 : vector<1xf32> to vector<1x1xf32>
    %cst_80 = arith.constant 4.000000e+00 : f32
    %99 = vector.broadcast %cst_80 : f32 to vector<1x1xf32>
    %100 = arith.divf %98, %99 : vector<1x1xf32>
    %101 = vector.broadcast %100 : vector<1x1xf32> to vector<4x256xf32>
    %102 = arith.subf %92, %101 : vector<4x256xf32>
    %103 = vector.broadcast %100 : vector<1x1xf32> to vector<4x256xf32>
    %104 = arith.subf %92, %103 : vector<4x256xf32>
    %105 = arith.mulf %102, %104 : vector<4x256xf32>
    %cst_81 = arith.constant dense<0.000000e+00> : vector<4xf32>
    %106 = vector.multi_reduction <add>, %105, %cst_81 [1] : vector<4x256xf32> to vector<4xf32>
    %107 = vector.shape_cast %106 : vector<4xf32> to vector<4x1xf32>
    %cst_82 = arith.constant 2.560000e+02 : f32
    %108 = vector.broadcast %cst_82 : f32 to vector<4x1xf32>
    %109 = arith.divf %107, %108 : vector<4x1xf32>
    %cst_83 = arith.constant dense<0.000000e+00> : vector<1xf32>
    %110 = vector.multi_reduction <add>, %109, %cst_83 [0] : vector<4x1xf32> to vector<1xf32>
    %111 = vector.shape_cast %110 : vector<1xf32> to vector<1x1xf32>
    %cst_84 = arith.constant 4.000000e+00 : f32
    %112 = vector.broadcast %cst_84 : f32 to vector<1x1xf32>
    %113 = arith.divf %111, %112 : vector<1x1xf32>
    %114 = vector.broadcast %100 : vector<1x1xf32> to vector<4x256xf32>
    %115 = arith.subf %92, %114 : vector<4x256xf32>
    %cst_85 = arith.constant 9.99999974E-6 : f32
    %116 = vector.broadcast %cst_85 : f32 to vector<1x1xf32>
    %117 = arith.addf %113, %116 : vector<1x1xf32>
    %118 = math.rsqrt %117 : vector<1x1xf32>
    %119 = vector.broadcast %118 : vector<1x1xf32> to vector<4x256xf32>
    %120 = arith.mulf %115, %119 : vector<4x256xf32>
    %c0_86 = arith.constant 0 : index
    %c0_87 = arith.constant 0 : index
    %121 = vector.load %arg6[%c0_86, %c0_87] : memref<1x256xf32, #tpu.memory_space<vmem>>, vector<1x256xf32>
    %122 = vector.broadcast %121 : vector<1x256xf32> to vector<4x256xf32>
    %123 = arith.mulf %120, %122 : vector<4x256xf32>
    %c0_88 = arith.constant 0 : index
    %c0_89 = arith.constant 0 : index
    %124 = vector.load %arg7[%c0_88, %c0_89] : memref<1x256xf32, #tpu.memory_space<vmem>>, vector<1x256xf32>
    %125 = vector.broadcast %124 : vector<1x256xf32> to vector<4x256xf32>
    %126 = arith.addf %123, %125 : vector<4x256xf32>
    %cst_90 = arith.constant 0.000000e+00 : f32
    %127 = vector.broadcast %cst_90 : f32 to vector<4x256xf32>
    %128 = arith.cmpf oge, %126, %127 : vector<4x256xf32>
    %cst_91 = arith.constant 0.00999999977 : f32
    %129 = vector.broadcast %cst_91 : f32 to vector<4x256xf32>
    %130 = arith.mulf %129, %126 : vector<4x256xf32>
    %131 = arith.select %128, %126, %130 : vector<4x256xi1>, vector<4x256xf32>
    %cst_92 = arith.constant 0.000000e+00 : f32
    %132 = vector.broadcast %cst_92 : f32 to vector<1x256xf32>
    %c0_93 = arith.constant 0 : index
    %c0_94 = arith.constant 0 : index
    %133 = vector.load %arg19[%c0_93, %c0_94] : memref<6x256xf32, #tpu.memory_space<vmem>>, vector<1x256xf32>
    tpu.vector_store %arg19[%c0_93, %c0_94], %132 {strides = array<i32>} : memref<6x256xf32, #tpu.memory_space<vmem>>, vector<1x256xf32>,
    %c1_95 = arith.constant 1 : index
    %c0_96 = arith.constant 0 : index
    %134 = vector.load %arg19[%c1_95, %c0_96] : memref<6x256xf32, #tpu.memory_space<vmem>>, vector<4x256xf32>
    tpu.vector_store %arg19[%c1_95, %c0_96], %131 {strides = array<i32>} : memref<6x256xf32, #tpu.memory_space<vmem>>, vector<4x256xf32>,
    %c5 = arith.constant 5 : index
    %c0_97 = arith.constant 0 : index
    %135 = vector.load %arg19[%c5, %c0_97] : memref<6x256xf32, #tpu.memory_space<vmem>>, vector<1x256xf32>
    tpu.vector_store %arg19[%c5, %c0_97], %132 {strides = array<i32>} : memref<6x256xf32, #tpu.memory_space<vmem>>, vector<1x256xf32>,
    %c0_98 = arith.constant 0 : index
    %c0_99 = arith.constant 0 : index
    %136 = vector.load %arg19[%c0_98, %c0_99] : memref<6x256xf32, #tpu.memory_space<vmem>>, vector<4x256xf32>
    %c0_100 = arith.constant 0 : index
    %c0_101 = arith.constant 0 : index
    %c0_102 = arith.constant 0 : index
    %137 = vector.load %arg8[%c0_100, %c0_101, %c0_102] : memref<3x256x256xf32, #tpu.memory_space<vmem>>, vector<1x256x256xf32>
    %138 = vector.shape_cast %137 : vector<1x256x256xf32> to vector<256x256xf32>
    %cst_103 = arith.constant dense<0.000000e+00> : vector<4x256xf32>
    %139 = tpu.matmul %136, %138, %cst_103 {dimension_numbers = #tpu.dot_dimension_numbers<[1], [0], [0], [1], [0, 0, 1, 1], [], []>} : vector<4x256xf32>, vector<256x256xf32>, vector<4x256xf32> -> vector<4x256xf32>
    %c1_104 = arith.constant 1 : index
    %c0_105 = arith.constant 0 : index
    %140 = vector.load %arg19[%c1_104, %c0_105] : memref<6x256xf32, #tpu.memory_space<vmem>>, vector<4x256xf32>
    %c1_106 = arith.constant 1 : index
    %c0_107 = arith.constant 0 : index
    %c0_108 = arith.constant 0 : index
    %141 = vector.load %arg8[%c1_106, %c0_107, %c0_108] : memref<3x256x256xf32, #tpu.memory_space<vmem>>, vector<1x256x256xf32>
    %142 = vector.shape_cast %141 : vector<1x256x256xf32> to vector<256x256xf32>
    %cst_109 = arith.constant dense<0.000000e+00> : vector<4x256xf32>
    %143 = tpu.matmul %140, %142, %cst_109 {dimension_numbers = #tpu.dot_dimension_numbers<[1], [0], [0], [1], [0, 0, 1, 1], [], []>} : vector<4x256xf32>, vector<256x256xf32>, vector<4x256xf32> -> vector<4x256xf32>
    %144 = arith.addf %139, %143 : vector<4x256xf32>
    %c2_110 = arith.constant 2 : index
    %c0_111 = arith.constant 0 : index
    %145 = vector.load %arg19[%c2_110, %c0_111] : memref<6x256xf32, #tpu.memory_space<vmem>>, vector<4x256xf32>
    %c2_112 = arith.constant 2 : index
    %c0_113 = arith.constant 0 : index
    %c0_114 = arith.constant 0 : index
    %146 = vector.load %arg8[%c2_112, %c0_113, %c0_114] : memref<3x256x256xf32, #tpu.memory_space<vmem>>, vector<1x256x256xf32>
    %147 = vector.shape_cast %146 : vector<1x256x256xf32> to vector<256x256xf32>
    %cst_115 = arith.constant dense<0.000000e+00> : vector<4x256xf32>
    %148 = tpu.matmul %145, %147, %cst_115 {dimension_numbers = #tpu.dot_dimension_numbers<[1], [0], [0], [1], [0, 0, 1, 1], [], []>} : vector<4x256xf32>, vector<256x256xf32>, vector<4x256xf32> -> vector<4x256xf32>
    %149 = arith.addf %144, %148 : vector<4x256xf32>
    %c0_116 = arith.constant 0 : index
    %c0_117 = arith.constant 0 : index
    %150 = vector.load %arg9[%c0_116, %c0_117] : memref<1x256xf32, #tpu.memory_space<vmem>>, vector<1x256xf32>
    %151 = vector.broadcast %150 : vector<1x256xf32> to vector<4x256xf32>
    %152 = arith.addf %149, %151 : vector<4x256xf32>
    %cst_118 = arith.constant dense<0.000000e+00> : vector<4xf32>
    %153 = vector.multi_reduction <add>, %152, %cst_118 [1] : vector<4x256xf32> to vector<4xf32>
    %154 = vector.shape_cast %153 : vector<4xf32> to vector<4x1xf32>
    %cst_119 = arith.constant 2.560000e+02 : f32
    %155 = vector.broadcast %cst_119 : f32 to vector<4x1xf32>
    %156 = arith.divf %154, %155 : vector<4x1xf32>
    %cst_120 = arith.constant dense<0.000000e+00> : vector<1xf32>
    %157 = vector.multi_reduction <add>, %156, %cst_120 [0] : vector<4x1xf32> to vector<1xf32>
    %158 = vector.shape_cast %157 : vector<1xf32> to vector<1x1xf32>
    %cst_121 = arith.constant 4.000000e+00 : f32
    %159 = vector.broadcast %cst_121 : f32 to vector<1x1xf32>
    %160 = arith.divf %158, %159 : vector<1x1xf32>
    %161 = vector.broadcast %160 : vector<1x1xf32> to vector<4x256xf32>
    %162 = arith.subf %152, %161 : vector<4x256xf32>
    %163 = vector.broadcast %160 : vector<1x1xf32> to vector<4x256xf32>
    %164 = arith.subf %152, %163 : vector<4x256xf32>
    %165 = arith.mulf %162, %164 : vector<4x256xf32>
    %cst_122 = arith.constant dense<0.000000e+00> : vector<4xf32>
    %166 = vector.multi_reduction <add>, %165, %cst_122 [1] : vector<4x256xf32> to vector<4xf32>
    %167 = vector.shape_cast %166 : vector<4xf32> to vector<4x1xf32>
    %cst_123 = arith.constant 2.560000e+02 : f32
    %168 = vector.broadcast %cst_123 : f32 to vector<4x1xf32>
    %169 = arith.divf %167, %168 : vector<4x1xf32>
    %cst_124 = arith.constant dense<0.000000e+00> : vector<1xf32>
    %170 = vector.multi_reduction <add>, %169, %cst_124 [0] : vector<4x1xf32> to vector<1xf32>
    %171 = vector.shape_cast %170 : vector<1xf32> to vector<1x1xf32>
    %cst_125 = arith.constant 4.000000e+00 : f32
    %172 = vector.broadcast %cst_125 : f32 to vector<1x1xf32>
    %173 = arith.divf %171, %172 : vector<1x1xf32>
    %174 = vector.broadcast %160 : vector<1x1xf32> to vector<4x256xf32>
    %175 = arith.subf %152, %174 : vector<4x256xf32>
    %cst_126 = arith.constant 9.99999974E-6 : f32
    %176 = vector.broadcast %cst_126 : f32 to vector<1x1xf32>
    %177 = arith.addf %173, %176 : vector<1x1xf32>
    %178 = math.rsqrt %177 : vector<1x1xf32>
    %179 = vector.broadcast %178 : vector<1x1xf32> to vector<4x256xf32>
    %180 = arith.mulf %175, %179 : vector<4x256xf32>
    %c0_127 = arith.constant 0 : index
    %c0_128 = arith.constant 0 : index
    %181 = vector.load %arg10[%c0_127, %c0_128] : memref<1x256xf32, #tpu.memory_space<vmem>>, vector<1x256xf32>
    %182 = vector.broadcast %181 : vector<1x256xf32> to vector<4x256xf32>
    %183 = arith.mulf %180, %182 : vector<4x256xf32>
    %c0_129 = arith.constant 0 : index
    %c0_130 = arith.constant 0 : index
    %184 = vector.load %arg11[%c0_129, %c0_130] : memref<1x256xf32, #tpu.memory_space<vmem>>, vector<1x256xf32>
    %185 = vector.broadcast %184 : vector<1x256xf32> to vector<4x256xf32>
    %186 = arith.addf %183, %185 : vector<4x256xf32>
    %cst_131 = arith.constant 0.000000e+00 : f32
    %187 = vector.broadcast %cst_131 : f32 to vector<4x256xf32>
    %188 = arith.cmpf oge, %186, %187 : vector<4x256xf32>
    %cst_132 = arith.constant 0.00999999977 : f32
    %189 = vector.broadcast %cst_132 : f32 to vector<4x256xf32>
    %190 = arith.mulf %189, %186 : vector<4x256xf32>
    %191 = arith.select %188, %186, %190 : vector<4x256xi1>, vector<4x256xf32>
    %192 = vector.extract_strided_slice %191 {offsets = [0, 0], sizes = [1, 256], strides = [1, 1]} : vector<4x256xf32> to vector<1x256xf32>
    %c0_133 = arith.constant 0 : index
    %c0_134 = arith.constant 0 : index
    %c0_135 = arith.constant 0 : index
    %193 = vector.load %arg12[%c0_133, %c0_134, %c0_135] : memref<4x256x8xf32, #tpu.memory_space<vmem>>, vector<1x256x8xf32>
    %194 = vector.shape_cast %193 : vector<1x256x8xf32> to vector<256x8xf32>
    %cst_136 = arith.constant dense<0.000000e+00> : vector<1x8xf32>
    %195 = tpu.matmul %192, %194, %cst_136 {dimension_numbers = #tpu.dot_dimension_numbers<[1], [0], [0], [1], [0, 0, 1, 1], [], []>} : vector<1x256xf32>, vector<256x8xf32>, vector<1x8xf32> -> vector<1x8xf32>
    %196 = vector.extract_strided_slice %191 {offsets = [1, 0], sizes = [1, 256], strides = [1, 1]} : vector<4x256xf32> to vector<1x256xf32>
    %c1_137 = arith.constant 1 : index
    %c0_138 = arith.constant 0 : index
    %c0_139 = arith.constant 0 : index
    %197 = vector.load %arg12[%c1_137, %c0_138, %c0_139] : memref<4x256x8xf32, #tpu.memory_space<vmem>>, vector<1x256x8xf32>
    %198 = vector.shape_cast %197 : vector<1x256x8xf32> to vector<256x8xf32>
    %cst_140 = arith.constant dense<0.000000e+00> : vector<1x8xf32>
    %199 = tpu.matmul %196, %198, %cst_140 {dimension_numbers = #tpu.dot_dimension_numbers<[1], [0], [0], [1], [0, 0, 1, 1], [], []>} : vector<1x256xf32>, vector<256x8xf32>, vector<1x8xf32> -> vector<1x8xf32>
    %200 = arith.addf %195, %199 : vector<1x8xf32>
    %201 = vector.extract_strided_slice %191 {offsets = [2, 0], sizes = [1, 256], strides = [1, 1]} : vector<4x256xf32> to vector<1x256xf32>
    %c2_141 = arith.constant 2 : index
    %c0_142 = arith.constant 0 : index
    %c0_143 = arith.constant 0 : index
    %202 = vector.load %arg12[%c2_141, %c0_142, %c0_143] : memref<4x256x8xf32, #tpu.memory_space<vmem>>, vector<1x256x8xf32>
    %203 = vector.shape_cast %202 : vector<1x256x8xf32> to vector<256x8xf32>
    %cst_144 = arith.constant dense<0.000000e+00> : vector<1x8xf32>
    %204 = tpu.matmul %201, %203, %cst_144 {dimension_numbers = #tpu.dot_dimension_numbers<[1], [0], [0], [1], [0, 0, 1, 1], [], []>} : vector<1x256xf32>, vector<256x8xf32>, vector<1x8xf32> -> vector<1x8xf32>
    %205 = arith.addf %200, %204 : vector<1x8xf32>
    %206 = vector.extract_strided_slice %191 {offsets = [3, 0], sizes = [1, 256], strides = [1, 1]} : vector<4x256xf32> to vector<1x256xf32>
    %c3_145 = arith.constant 3 : index
    %c0_146 = arith.constant 0 : index
    %c0_147 = arith.constant 0 : index
    %207 = vector.load %arg12[%c3_145, %c0_146, %c0_147] : memref<4x256x8xf32, #tpu.memory_space<vmem>>, vector<1x256x8xf32>
    %208 = vector.shape_cast %207 : vector<1x256x8xf32> to vector<256x8xf32>
    %cst_148 = arith.constant dense<0.000000e+00> : vector<1x8xf32>
    %209 = tpu.matmul %206, %208, %cst_148 {dimension_numbers = #tpu.dot_dimension_numbers<[1], [0], [0], [1], [0, 0, 1, 1], [], []>} : vector<1x256xf32>, vector<256x8xf32>, vector<1x8xf32> -> vector<1x8xf32>
    %210 = arith.addf %205, %209 : vector<1x8xf32>
    %c0_149 = arith.constant 0 : index
    %c0_150 = arith.constant 0 : index
    %211 = vector.load %arg13[%c0_149, %c0_150] : memref<1x8xf32, #tpu.memory_space<vmem>>, vector<1x8xf32>
    %212 = arith.addf %210, %211 : vector<1x8xf32>
    %cst_151 = arith.constant dense<0.000000e+00> : vector<1xf32>
    %213 = vector.multi_reduction <add>, %212, %cst_151 [1] : vector<1x8xf32> to vector<1xf32>
    %214 = vector.shape_cast %213 : vector<1xf32> to vector<1x1xf32>
    %cst_152 = arith.constant 8.000000e+00 : f32
    %215 = vector.broadcast %cst_152 : f32 to vector<1x1xf32>
    %216 = arith.divf %214, %215 : vector<1x1xf32>
    %cst_153 = arith.constant dense<0.000000e+00> : vector<1xf32>
    %217 = vector.multi_reduction <add>, %216, %cst_153 [0] : vector<1x1xf32> to vector<1xf32>
    %218 = vector.shape_cast %217 : vector<1xf32> to vector<1x1xf32>
    %cst_154 = arith.constant 1.000000e+00 : f32
    %219 = vector.broadcast %cst_154 : f32 to vector<1x1xf32>
    %220 = arith.divf %218, %219 : vector<1x1xf32>
    %221 = vector.broadcast %220 : vector<1x1xf32> to vector<1x8xf32>
    %222 = arith.subf %212, %221 : vector<1x8xf32>
    %223 = vector.broadcast %220 : vector<1x1xf32> to vector<1x8xf32>
    %224 = arith.subf %212, %223 : vector<1x8xf32>
    %225 = arith.mulf %222, %224 : vector<1x8xf32>
    %cst_155 = arith.constant dense<0.000000e+00> : vector<1xf32>
    %226 = vector.multi_reduction <add>, %225, %cst_155 [1] : vector<1x8xf32> to vector<1xf32>
    %227 = vector.shape_cast %226 : vector<1xf32> to vector<1x1xf32>
    %cst_156 = arith.constant 8.000000e+00 : f32
    %228 = vector.broadcast %cst_156 : f32 to vector<1x1xf32>
    %229 = arith.divf %227, %228 : vector<1x1xf32>
    %cst_157 = arith.constant dense<0.000000e+00> : vector<1xf32>
    %230 = vector.multi_reduction <add>, %229, %cst_157 [0] : vector<1x1xf32> to vector<1xf32>
    %231 = vector.shape_cast %230 : vector<1xf32> to vector<1x1xf32>
    %cst_158 = arith.constant 1.000000e+00 : f32
    %232 = vector.broadcast %cst_158 : f32 to vector<1x1xf32>
    %233 = arith.divf %231, %232 : vector<1x1xf32>
    %234 = vector.broadcast %220 : vector<1x1xf32> to vector<1x8xf32>
    %235 = arith.subf %212, %234 : vector<1x8xf32>
    %cst_159 = arith.constant 9.99999974E-6 : f32
    %236 = vector.broadcast %cst_159 : f32 to vector<1x1xf32>
    %237 = arith.addf %233, %236 : vector<1x1xf32>
    %238 = math.rsqrt %237 : vector<1x1xf32>
    %239 = vector.broadcast %238 : vector<1x1xf32> to vector<1x8xf32>
    %240 = arith.mulf %235, %239 : vector<1x8xf32>
    %c0_160 = arith.constant 0 : index
    %c0_161 = arith.constant 0 : index
    %241 = vector.load %arg14[%c0_160, %c0_161] : memref<1x8xf32, #tpu.memory_space<vmem>>, vector<1x8xf32>
    %242 = arith.mulf %240, %241 : vector<1x8xf32>
    %c0_162 = arith.constant 0 : index
    %c0_163 = arith.constant 0 : index
    %243 = vector.load %arg15[%c0_162, %c0_163] : memref<1x8xf32, #tpu.memory_space<vmem>>, vector<1x8xf32>
    %244 = arith.addf %242, %243 : vector<1x8xf32>
    %cst_164 = arith.constant 0.000000e+00 : f32
    %245 = vector.broadcast %cst_164 : f32 to vector<1x8xf32>
    %246 = arith.cmpf oge, %244, %245 : vector<1x8xf32>
    %cst_165 = arith.constant 0.00999999977 : f32
    %247 = vector.broadcast %cst_165 : f32 to vector<1x8xf32>
    %248 = arith.mulf %247, %244 : vector<1x8xf32>
    %249 = arith.select %246, %244, %248 : vector<1x8xi1>, vector<1x8xf32>
    %c0_166 = arith.constant 0 : index
    %c0_167 = arith.constant 0 : index
    %250 = vector.load %arg16[%c0_166, %c0_167] : memref<1x8xf32, #tpu.memory_space<vmem>>, vector<1x8xf32>
    %251 = arith.mulf %249, %250 : vector<1x8xf32>
    %cst_168 = arith.constant dense<0.000000e+00> : vector<1xf32>
    %252 = vector.multi_reduction <add>, %251, %cst_168 [1] : vector<1x8xf32> to vector<1xf32>
    %253 = vector.shape_cast %252 : vector<1xf32> to vector<1x1xf32>
    %c0_169 = arith.constant 0 : index
    %c0_170 = arith.constant 0 : index
    %254 = vector.load %arg17[%c0_169, %c0_170] : memref<1x1xf32, #tpu.memory_space<vmem>>, vector<1x1xf32>
    %255 = arith.addf %253, %254 : vector<1x1xf32>
    %c0_171 = arith.constant 0 : index
    %c0_172 = arith.constant 0 : index
    %c0_173 = arith.constant 0 : index
    %256 = vector.load %arg18[%c0_171, %c0_172, %c0_173] : memref<1x1x1xf32, #tpu.memory_space<vmem>>, vector<1x1x1xf32>
    %257 = vector.shape_cast %256 : vector<1x1x1xf32> to vector<1x1xf32>
    %258 = vector.shape_cast %255 : vector<1x1xf32> to vector<1x1x1xf32>
    tpu.vector_store %arg18[%c0_171, %c0_172, %c0_173], %258 {strides = array<i32>} : memref<1x1x1xf32, #tpu.memory_space<vmem>>, vector<1x1x1xf32>,
    return
  }
  func.func @transform_0(%arg0: i32) -> (i32, i32, i32) {
    %c0_i32 = arith.constant 0 : i32
    %c0_i32_0 = arith.constant 0 : i32
    %c0_i32_1 = arith.constant 0 : i32
    return %arg0, %c0_i32, %c0_i32_0 : i32, i32, i32
  }
  func.func @transform_1(%arg0: i32) -> (i32, i32, i32) {
    %c0_i32 = arith.constant 0 : i32
    %c0_i32_0 = arith.constant 0 : i32
    %c0_i32_1 = arith.constant 0 : i32
    %c0_i32_2 = arith.constant 0 : i32
    return %c0_i32, %c0_i32_0, %c0_i32_1 : i32, i32, i32
  }
  func.func @transform_2(%arg0: i32) -> (i32, i32) {
    %c0_i32 = arith.constant 0 : i32
    %c0_i32_0 = arith.constant 0 : i32
    %c0_i32_1 = arith.constant 0 : i32
    return %c0_i32, %c0_i32_0 : i32, i32
  }
  func.func @transform_3(%arg0: i32) -> (i32, i32, i32) {
    %c0_i32 = arith.constant 0 : i32
    %c0_i32_0 = arith.constant 0 : i32
    %c0_i32_1 = arith.constant 0 : i32
    %c0_i32_2 = arith.constant 0 : i32
    return %c0_i32, %c0_i32_0, %c0_i32_1 : i32, i32, i32
  }
  func.func @transform_4(%arg0: i32) -> (i32, i32) {
    %c0_i32 = arith.constant 0 : i32
    %c0_i32_0 = arith.constant 0 : i32
    %c0_i32_1 = arith.constant 0 : i32
    return %c0_i32, %c0_i32_0 : i32, i32
  }
  func.func @transform_5(%arg0: i32) -> (i32, i32) {
    %c0_i32 = arith.constant 0 : i32
    %c0_i32_0 = arith.constant 0 : i32
    %c0_i32_1 = arith.constant 0 : i32
    return %c0_i32, %c0_i32_0 : i32, i32
  }
  func.func @transform_6(%arg0: i32) -> (i32, i32) {
    %c0_i32 = arith.constant 0 : i32
    %c0_i32_0 = arith.constant 0 : i32
    %c0_i32_1 = arith.constant 0 : i32
    return %c0_i32, %c0_i32_0 : i32, i32
  }
  func.func @transform_7(%arg0: i32) -> (i32, i32, i32) {
    %c0_i32 = arith.constant 0 : i32
    %c0_i32_0 = arith.constant 0 : i32
    %c0_i32_1 = arith.constant 0 : i32
    %c0_i32_2 = arith.constant 0 : i32
    return %c0_i32, %c0_i32_0, %c0_i32_1 : i32, i32, i32
  }
  func.func @transform_8(%arg0: i32) -> (i32, i32) {
    %c0_i32 = arith.constant 0 : i32
    %c0_i32_0 = arith.constant 0 : i32
    %c0_i32_1 = arith.constant 0 : i32
    return %c0_i32, %c0_i32_0 : i32, i32
  }
  func.func @transform_9(%arg0: i32) -> (i32, i32) {
    %c0_i32 = arith.constant 0 : i32
    %c0_i32_0 = arith.constant 0 : i32
    %c0_i32_1 = arith.constant 0 : i32
    return %c0_i32, %c0_i32_0 : i32, i32
  }
  func.func @transform_10(%arg0: i32) -> (i32, i32) {
    %c0_i32 = arith.constant 0 : i32
    %c0_i32_0 = arith.constant 0 : i32
    %c0_i32_1 = arith.constant 0 : i32
    return %c0_i32, %c0_i32_0 : i32, i32
  }
  func.func @transform_11(%arg0: i32) -> (i32, i32, i32) {
    %c0_i32 = arith.constant 0 : i32
    %c0_i32_0 = arith.constant 0 : i32
    %c0_i32_1 = arith.constant 0 : i32
    %c0_i32_2 = arith.constant 0 : i32
    return %c0_i32, %c0_i32_0, %c0_i32_1 : i32, i32, i32
  }
  func.func @transform_12(%arg0: i32) -> (i32, i32) {
    %c0_i32 = arith.constant 0 : i32
    %c0_i32_0 = arith.constant 0 : i32
    %c0_i32_1 = arith.constant 0 : i32
    return %c0_i32, %c0_i32_0 : i32, i32
  }
  func.func @transform_13(%arg0: i32) -> (i32, i32) {
    %c0_i32 = arith.constant 0 : i32
    %c0_i32_0 = arith.constant 0 : i32
    %c0_i32_1 = arith.constant 0 : i32
    return %c0_i32, %c0_i32_0 : i32, i32
  }
  func.func @transform_14(%arg0: i32) -> (i32, i32) {
    %c0_i32 = arith.constant 0 : i32
    %c0_i32_0 = arith.constant 0 : i32
    %c0_i32_1 = arith.constant 0 : i32
    return %c0_i32, %c0_i32_0 : i32, i32
  }
  func.func @transform_15(%arg0: i32) -> (i32, i32) {
    %c0_i32 = arith.constant 0 : i32
    %c0_i32_0 = arith.constant 0 : i32
    %c0_i32_1 = arith.constant 0 : i32
    return %c0_i32, %c0_i32_0 : i32, i32
  }
  func.func @transform_16(%arg0: i32) -> (i32, i32) {
    %c0_i32 = arith.constant 0 : i32
    %c0_i32_0 = arith.constant 0 : i32
    %c0_i32_1 = arith.constant 0 : i32
    return %c0_i32, %c0_i32_0 : i32, i32
  }
  func.func @transform_17(%arg0: i32) -> (i32, i32, i32) {
    %c0_i32 = arith.constant 0 : i32
    %c0_i32_0 = arith.constant 0 : i32
    %c0_i32_1 = arith.constant 0 : i32
    return %arg0, %c0_i32, %c0_i32_0 : i32, i32, i32
  }
}

</mosaic_0001>

<bundles_post_ra>
// kernel: atom_crit_tiny_forward.1
= control target key start
LH: loop header
LB: loop body
LE: loop exit
PB: predicated region body
PF: predicated region fallthrough
CT: control target
= control target key end

     0   :  { %s8849_s0 = inlined_call_operand.vmem [shape: f32[2,12,256], index: 0, kind: input, shape index: {}]   ;;  %s8850_s1 = inlined_call_operand.hbm [shape: f32[5,256,512], index: 1, kind: input, shape index: {}]   ;;  %s8851_s2 = inlined_call_operand.hbm [shape: f32[1,512], index: 2, kind: input, shape index: {}]   ;;  %s8852_s3 = inlined_call_operand.hbm [shape: f32[3,512,256], index: 3, kind: input, shape index: {}]   ;;  %s8853_s4 = inlined_call_operand.hbm [shape: f32[1,256], index: 4, kind: input, shape index: {}]   ;;  %s8854_s5 = inlined_call_operand.hbm [shape: f32[1,256], index: 5, kind: input, shape index: {}]   ;;  %s8855_s6 = inlined_call_operand.hbm [shape: f32[1,256], index: 6, kind: input, shape index: {}]   ;;  %s8856_s7 = inlined_call_operand.hbm [shape: f32[3,256,256], index: 7, kind: input, shape index: {}]   ;;  %s8857_s8 = inlined_call_operand.hbm [shape: f32[1,256], index: 8, kind: input, shape index: {}]   ;;  %s8858_s9 = inlined_call_operand.hbm [shape: f32[1,256], index: 9, kind: input, shape index: {}]   ;;  %s8859_s10 = inlined_call_operand.hbm [shape: f32[1,256], index: 10, kind: input, shape index: {}]   ;;  %s8860_s11 = inlined_call_operand.vmem [shape: f32[4,256,8], index: 11, kind: input, shape index: {}]   ;;  %s8861_s12 = inlined_call_operand.hbm [shape: f32[1,8], index: 12, kind: input, shape index: {}]   ;;  %s8862_s13 = inlined_call_operand.hbm [shape: f32[1,8], index: 13, kind: input, shape index: {}]   ;;  %s8863_s14 = inlined_call_operand.hbm [shape: f32[1,8], index: 14, kind: input, shape index: {}]   ;;  %s8864_s15 = inlined_call_operand.hbm [shape: f32[1,8], index: 15, kind: input, shape index: {}]   ;;  %s8865_s16 = inlined_call_operand.<no memory space> [shape: f32[1,1], index: 16, kind: input, shape index: {}]   ;;  %s8866_s17 = inlined_call_operand.vmem [shape: f32[2,1,1], index: 17, kind: output, shape index: {}]  }
   0x1   :  { %8949 = sst [smem:[#allocation107_spill]] %s8849_s0  ;;  %v22_v0 = vstv %s8865_s16 }
   0x2   :  { %8950 = sst [smem:[#allocation108_spill]] %s8850_s1  ;;  %23 = vst [vmem:[#allocation3] sm:$0x1] %v22_v0 }
   0x3   :  { %24 = vsyncpa [#allocation5], 0 }
   0x4   :  { %25 = vsyncpa [#allocation7], 0 }
   0x5   :  { %26 = vsyncpa [#allocation10], 0 }
   0x6   :  { %27 = vsyncpa [#allocation13], 0 }
   0x7   :  { %28 = vsyncpa [#allocation16], 0 }
   0x8   :  { %29 = vsyncpa [#allocation19], 0 }
   0x9   :  { %30 = vsyncpa [#allocation22], 0 }
   0xa   :  { %31 = vsyncpa [#allocation25], 0  ;;  %s7519_s26 = smov 0  }
   0xb LB: > { %s7406_s16 = smov [#allocation6]   ;;  %s7525_s28 = sadd.s32 4294967295, %s7404_s26   ;;  %s7404_s26 = sphi %s7519_s26, %s37_s26  }
   0xc   : > { %s456_s27 = sshll.u32 %s7406_s16, 4  ;;  %p6561_p0 = scmp.ge.s32.totalorder %s7404_s26, 1  ;;  %s457_s27 = int_to_ptr.vmem [resolvable:$true] %s456_s27 }
   0xd   : > { %p430_p1 = scmp.lt.s32.totalorder %s7404_s26, 3  ;;  %p8867_p2 = scmp.eq.s32.totalorder %s7525_s28, 0 }
   0xe   : > { %s7407_s0 = smov [#allocation9]   ;;  %s7408_s18 = smov [#allocation12]  }
   0xf   : > { %p7530_p3 = pnand %p6561_p0, %p430_p1  ;;  %s480_s30 = sshll.u32 %s7407_s0, 4  ;;  %s481_s30 = int_to_ptr.vmem [resolvable:$true] %s480_s30 }
  0x10   : > { %s502_s19 = sshll.u32 %s7408_s18, 4  ;;  %s7409_s20 = smov [#allocation15]   ;;  %s7542_s19 = int_to_ptr.vmem [resolvable:$true] %s502_s19 }
  0x11   : > { %s8951_s29 = scalar_select %p7530_p3, 1, 0 }
  0x12   : > { %p6889_p4 = pneg %p7530_p3  ;;  %s526_s21 = sshll.u32 %s7409_s20, 4  ;;  %s7544_s21 = int_to_ptr.vmem [resolvable:$true] %s526_s21 }
  0x13   : > { %s7013_s23 = scalar_lea.vmem %s457_s27, 64  ;;  %p7021_p10 = scmp.lt.s32.totalorder %s457_s27, %s457_s27 }
  0x14   : > { %p7538_p5 = pnand %p8867_p2, %p6889_p4  ;;  %p7014_p7 = scmp.ne.s32.totalorder %s457_s27, %s7013_s23 }
  0x15   : > { %p7022_p11 = scmp.lt.s32.totalorder %s7013_s23, %s7013_s23 }
  0x16   : > { %p7548_p6 = pneg %p7538_p5 }
  0x17   : > { %p7023_p12 = por %p7022_p11, %p7021_p10 }
  0x18   : > { %p7016_p8 = pnand %p7014_p7, %p7548_p6 }
  0x1a   : > { %p7017_p9 = pneg %p7016_p8 }
  0x1c   : > { %p7024_p13 = pnand %p7023_p12, %p7017_p9 }
  0x1e   : > { %7027 = shalt.err (!%p7024_p13)
}
  0x1f   : > { %6895 = dma.hbm_to_vmem [thread:$0]  (!%p7538_p5), %s8851_s2, 64, %s457_s27, [#allocation7]  }
  0x20   : > { %s7039_s16 = scalar_lea.vmem %s481_s30, 32  ;;  %p7047_p2 = scmp.lt.s32.totalorder %s481_s30, %s481_s30 }
  0x21   : > { %p7040_p0 = scmp.ne.s32.totalorder %s481_s30, %s7039_s16  ;;  %p7048_p7 = scmp.lt.s32.totalorder %s7039_s16, %s7039_s16 }
  0x23   : > { %p7042_p1 = pnand %p7040_p0, %p7548_p6  ;;  %p7049_p8 = por %p7048_p7, %p7047_p2 }
  0x25   : > { %p7043_p4 = pneg %p7042_p1 }
  0x27   : > { %p7050_p3 = pnand %p7049_p8, %p7043_p4 }
  0x29   : > { %7053 = shalt.err (!%p7050_p3)
}
  0x2a   : > { %6901 = dma.hbm_to_vmem [thread:$0]  (!%p7538_p5), %s8853_s4, 32, %s481_s30, [#allocation10]  }
  0x2b   : > { %s7065_s27 = scalar_lea.vmem %s7542_s19, 32  ;;  %p7073_p12 = scmp.lt.s32.totalorder %s7542_s19, %s7542_s19 }
  0x2c   : > { %p7066_p9 = scmp.ne.s32.totalorder %s7542_s19, %s7065_s27  ;;  %p7074_p2 = scmp.lt.s32.totalorder %s7065_s27, %s7065_s27 }
  0x2e   : > { %p7068_p10 = pnand %p7066_p9, %p7548_p6  ;;  %p7075_p13 = por %p7074_p2, %p7073_p12 }
  0x30   : > { %p7069_p11 = pneg %p7068_p10 }
  0x32   : > { %p7076_p3 = pnand %p7075_p13, %p7069_p11 }
  0x34   : > { %7079 = shalt.err (!%p7076_p3)
}
  0x35   : > { %6907 = dma.hbm_to_vmem [thread:$0]  (!%p7538_p5), %s8855_s6, 32, %s7542_s19, [#allocation13]  }
  0x36   : > { %s7091_s30 = scalar_lea.vmem %s7544_s21, 32  ;;  %p7099_p7 = scmp.lt.s32.totalorder %s7544_s21, %s7544_s21 }
  0x37   : > { %p7092_p0 = scmp.ne.s32.totalorder %s7544_s21, %s7091_s30  ;;  %p7100_p8 = scmp.lt.s32.totalorder %s7091_s30, %s7091_s30 }
  0x39   : > { %p7094_p1 = pnand %p7092_p0, %p7548_p6  ;;  %p7101_p9 = por %p7100_p8, %p7099_p7 }
  0x3b   : > { %p7095_p4 = pneg %p7094_p1 }
  0x3d   : > { %p7102_p10 = pnand %p7101_p9, %p7095_p4 }
  0x3f   : > { %7105 = shalt.err (!%p7102_p10)
}
  0x40   : > { %6913 = dma.hbm_to_vmem [thread:$0]  (!%p7538_p5), %s8857_s8, 32, %s7544_s21, [#allocation16]  }
  0x41   : > { %s7410_s19 = smov [#allocation18]   ;;  %s7411_s0 = smov [#allocation21]  }
  0x42   : > { %s548_s16 = sshll.u32 %s7410_s19, 4  ;;  %s573_s18 = sshll.u32 %s7411_s0, 4  ;;  %s549_s16 = int_to_ptr.vmem [resolvable:$true] %s548_s16  ;;  %s574_s18 = int_to_ptr.vmem [resolvable:$true] %s573_s18 }
  0x43   : > { %s7117_s27 = scalar_lea.vmem %s549_s16, 32  ;;  %p7125_p13 = scmp.lt.s32.totalorder %s549_s16, %s549_s16 }
  0x44   : > { %p7118_p11 = scmp.ne.s32.totalorder %s549_s16, %s7117_s27  ;;  %p7126_p3 = scmp.lt.s32.totalorder %s7117_s27, %s7117_s27 }
  0x46   : > { %p7120_p12 = pnand %p7118_p11, %p7548_p6  ;;  %p7127_p0 = por %p7126_p3, %p7125_p13 }
  0x48   : > { %p7121_p2 = pneg %p7120_p12 }
  0x4a   : > { %p7128_p1 = pnand %p7127_p0, %p7121_p2 }
  0x4c   : > { %7131 = shalt.err (!%p7128_p1)
}
  0x4d   : > { %6919 = dma.hbm_to_vmem [thread:$0]  (!%p7538_p5), %s8859_s10, 32, %s549_s16, [#allocation19]  }
  0x4e   : > { %s7143_s21 = scalar_lea.vmem %s574_s18, 16  ;;  %s7150_s30 = scalar_lea.vmem %s574_s18, 32 }
  0x4f   : > { %p7144_p4 = scmp.ne.s32.totalorder %s574_s18, %s7143_s21  ;;  %p7151_p9 = scmp.lt.s32.totalorder %s574_s18, %s574_s18 }
  0x50   : > { %p7152_p10 = scmp.lt.s32.totalorder %s7150_s30, %s7143_s21 }
  0x51   : > { %p7146_p7 = pnand %p7144_p4, %p7548_p6 }
  0x52   : > { %p7153_p11 = por %p7152_p10, %p7151_p9 }
  0x53   : > { %p7147_p8 = pneg %p7146_p7 }
  0x55   : > { %p7154_p12 = pnand %p7153_p11, %p7147_p8 }
  0x57   : > { %7157 = shalt.err (!%p7154_p12)
}
  0x58   : > { %6925 = dma.hbm_to_vmem [thread:$0]  (!%p7538_p5), %s8862_s13, 16, %s574_s18, [#allocation22]  }
  0x59   : > { %s7412_s19 = smov [#allocation4]  }
  0x5a   : > { %s442_s16 = sshll.u32 %s7412_s19, 4  ;;  %s443_s16 = int_to_ptr.vmem [resolvable:$true] %s442_s16 }
  0x5b   : > { %s7169_s0 = scalar_lea.vmem %s443_s16, 81920  ;;  %p7177_p0 = scmp.lt.s32.totalorder %s443_s16, %s443_s16 }
  0x5c   : > { %p7170_p2 = scmp.ne.s32.totalorder %s443_s16, %s7169_s0  ;;  %p7178_p1 = scmp.lt.s32.totalorder %s7169_s0, %s7169_s0 }
  0x5e   : > { %p7172_p13 = pnand %p7170_p2, %p7548_p6  ;;  %p7179_p4 = por %p7178_p1, %p7177_p0 }
  0x60   : > { %p7173_p3 = pneg %p7172_p13 }
  0x62   : > { %p7180_p7 = pnand %p7179_p4, %p7173_p3 }
  0x64   : > { %7183 = shalt.err (!%p7180_p7)
}
  0x65   : > { %s7413_s27 = smov 512   ;;  %s7414_s20 = smov 32  }
  0x66   : > { %s8954_s21 = sld [smem:[#allocation108_spill]]  ;;  %s7415_s30 = smov [#allocation8]  }
  0x67   : > { %s466_s24 = sshll.u32 %s7415_s30, 4  ;;  %s467_s24 = int_to_ptr.vmem [resolvable:$true] %s466_s24 }
  0x68   : > { %s7195_s25 = scalar_lea.vmem %s467_s24, 49152  ;;  %p7203_p11 = scmp.lt.s32.totalorder %s467_s24, %s467_s24 }
  0x69   : > { %p7196_p8 = scmp.ne.s32.totalorder %s467_s24, %s7195_s25  ;;  %p7204_p12 = scmp.lt.s32.totalorder %s7195_s25, %s7195_s25 }
  0x6b   : > { %p7198_p9 = pnand %p7196_p8, %p7548_p6  ;;  %p7205_p2 = por %p7204_p12, %p7203_p11 }
  0x6c   : > { %6892 = dma.hbm_to_vmem [thread:$0]  (!%p7538_p5), %s8954_s21, 81920, %s443_s16, [#allocation5], %s7413_s27, %s7413_s27, %s7414_s20  }
  0x6d   : > { %p7199_p10 = pneg %p7198_p9 }
  0x6f   : > { %p7206_p13 = pnand %p7205_p2, %p7199_p10 }
  0x71   : > { %7209 = shalt.err (!%p7206_p13)
}
  0x72   : > { %s7416_s19 = smov 256   ;;  %s7417_s0 = smov 16  }
  0x73   : > { %6898 = dma.hbm_to_vmem [thread:$0]  (!%p7538_p5), %s8852_s3, 49152, %s467_s24, [#allocation7], %s7416_s19, %s7416_s19, %s7417_s0  }
  0x74   : > { %s7418_s20 = smov [#allocation11]   ;;  %s7419_s18 = smov [#allocation14]  }
  0x75   : > { %s491_s23 = sshll.u32 %s7418_s20, 4  ;;  %s512_s21 = sshll.u32 %s7419_s18, 4  ;;  %s492_s23 = int_to_ptr.vmem [resolvable:$true] %s491_s23  ;;  %s513_s21 = int_to_ptr.vmem [resolvable:$true] %s512_s21 }
  0x76   : > { %s7221_s30 = scalar_lea.vmem %s492_s23, 32  ;;  %p7229_p4 = scmp.lt.s32.totalorder %s492_s23, %s492_s23 }
  0x77   : > { %p7222_p3 = scmp.ne.s32.totalorder %s492_s23, %s7221_s30  ;;  %p7230_p7 = scmp.lt.s32.totalorder %s7221_s30, %s7221_s30 }
  0x79   : > { %p7224_p0 = pnand %p7222_p3, %p7548_p6  ;;  %p7231_p8 = por %p7230_p7, %p7229_p4 }
  0x7b   : > { %p7225_p1 = pneg %p7224_p0 }
  0x7d   : > { %p7232_p9 = pnand %p7231_p8, %p7225_p1 }
  0x7f   : > { %7235 = shalt.err (!%p7232_p9)
}
  0x80   : > { %6904 = dma.hbm_to_vmem [thread:$0]  (!%p7538_p5), %s8854_s5, 32, %s492_s23, [#allocation10]  }
  0x81   : > { %s7247_s24 = scalar_lea.vmem %s513_s21, 24576  ;;  %p7255_p2 = scmp.lt.s32.totalorder %s513_s21, %s513_s21 }
  0x82   : > { %p7248_p10 = scmp.ne.s32.totalorder %s513_s21, %s7247_s24  ;;  %p7256_p13 = scmp.lt.s32.totalorder %s7247_s24, %s7247_s24 }
  0x84   : > { %p7250_p11 = pnand %p7248_p10, %p7548_p6  ;;  %p7257_p3 = por %p7256_p13, %p7255_p2 }
  0x86   : > { %p7251_p12 = pneg %p7250_p11 }
  0x88   : > { %p7258_p0 = pnand %p7257_p3, %p7251_p12 }
  0x8a   : > { %7261 = shalt.err (!%p7258_p0)
}
  0x8b   : > { %6910 = dma.hbm_to_vmem [thread:$0]  (!%p7538_p5), %s8856_s7, 24576, %s513_s21, [#allocation13], %s7416_s19, %s7416_s19, %s7417_s0  }
  0x8c   : > { %s7420_s23 = smov [#allocation17]   ;;  %s7421_s30 = smov [#allocation20]  }
  0x8d   : > { %s537_s18 = sshll.u32 %s7420_s23, 4  ;;  %s562_s25 = sshll.u32 %s7421_s30, 4  ;;  %s538_s18 = int_to_ptr.vmem [resolvable:$true] %s537_s18  ;;  %s563_s25 = int_to_ptr.vmem [resolvable:$true] %s562_s25 }
  0x8e   : > { %s7273_s16 = scalar_lea.vmem %s538_s18, 32  ;;  %p7281_p8 = scmp.lt.s32.totalorder %s538_s18, %s538_s18 }
  0x8f   : > { %p7274_p1 = scmp.ne.s32.totalorder %s538_s18, %s7273_s16  ;;  %p7282_p9 = scmp.lt.s32.totalorder %s7273_s16, %s7273_s16 }
  0x91   : > { %p7276_p4 = pnand %p7274_p1, %p7548_p6  ;;  %p7283_p10 = por %p7282_p9, %p7281_p8 }
  0x93   : > { %p7277_p7 = pneg %p7276_p4 }
  0x95   : > { %p7284_p11 = pnand %p7283_p10, %p7277_p7 }
  0x97   : > { %7287 = shalt.err (!%p7284_p11)
}
  0x98   : > { %6916 = dma.hbm_to_vmem [thread:$0]  (!%p7538_p5), %s8858_s9, 32, %s538_s18, [#allocation16]  }
  0x99   : > { %s7299_s19 = scalar_lea.vmem %s563_s25, 16  ;;  %s7306_s0 = scalar_lea.vmem %s563_s25, 32 }
  0x9a   : > { %p7300_p12 = scmp.ne.s32.totalorder %s563_s25, %s7299_s19  ;;  %p7307_p3 = scmp.lt.s32.totalorder %s563_s25, %s563_s25 }
  0x9b   : > { %p7308_p0 = scmp.lt.s32.totalorder %s7306_s0, %s7299_s19 }
  0x9c   : > { %p7302_p2 = pnand %p7300_p12, %p7548_p6 }
  0x9d   : > { %p7309_p1 = por %p7308_p0, %p7307_p3 }
  0x9e   : > { %p7303_p13 = pneg %p7302_p2 }
  0xa0   : > { %p7310_p4 = pnand %p7309_p1, %p7303_p13 }
  0xa2   : > { %7313 = shalt.err (!%p7310_p4)
}
  0xa3   : > { %6922 = dma.hbm_to_vmem [thread:$0]  (!%p7538_p5), %s8861_s12, 16, %s563_s25, [#allocation19]  }
  0xa4   : > { %s7422_s23 = smov [#allocation23]   ;;  %s7423_s30 = smov [#allocation24]  }
  0xa5   : > { %s584_s18 = sshll.u32 %s7422_s23, 4  ;;  %s595_s16 = sshll.u32 %s7423_s30, 4  ;;  %s585_s18 = int_to_ptr.vmem [resolvable:$true] %s584_s18  ;;  %s596_s16 = int_to_ptr.vmem [resolvable:$true] %s595_s16 }
  0xa6   : > { %s7325_s24 = scalar_lea.vmem %s585_s18, 16  ;;  %s7332_s27 = scalar_lea.vmem %s585_s18, 32 }
  0xa7   : > { %p7326_p7 = scmp.ne.s32.totalorder %s585_s18, %s7325_s24  ;;  %p7333_p10 = scmp.lt.s32.totalorder %s585_s18, %s585_s18 }
  0xa8   : > { %p7334_p11 = scmp.lt.s32.totalorder %s7332_s27, %s7325_s24 }
  0xa9   : > { %p7328_p8 = pnand %p7326_p7, %p7548_p6 }
  0xaa   : > { %p7335_p12 = por %p7334_p11, %p7333_p10 }
  0xab   : > { %p7329_p9 = pneg %p7328_p8 }
  0xad   : > { %p7336_p2 = pnand %p7335_p12, %p7329_p9 }
  0xaf   : > { %7339 = shalt.err (!%p7336_p2)
}
  0xb0   : > { %6928 = dma.hbm_to_vmem [thread:$0]  (!%p7538_p5), %s8863_s14, 16, %s585_s18, [#allocation22]  }
  0xb1   : > { %s7351_s0 = scalar_lea.vmem %s596_s16, 16  ;;  %s7358_s21 = scalar_lea.vmem %s596_s16, 32 }
  0xb2   : > { %p7352_p13 = scmp.ne.s32.totalorder %s596_s16, %s7351_s0  ;;  %p7359_p1 = scmp.lt.s32.totalorder %s596_s16, %s596_s16 }
  0xb3   : > { %p7360_p4 = scmp.lt.s32.totalorder %s7358_s21, %s7351_s0 }
  0xb4   : > { %p7354_p3 = pnand %p7352_p13, %p7548_p6 }
  0xb5   : > { %p7361_p7 = por %p7360_p4, %p7359_p1 }
  0xb6   : > { %p7355_p0 = pneg %p7354_p3 }
  0xb8   : > { %p7362_p8 = pnand %p7361_p7, %p7355_p0 }
  0xba   : > { %7365 = shalt.err (!%p7362_p8)
}
  0xbb   : > { %6931 = dma.hbm_to_vmem [thread:$0]  (!%p7538_p5), %s8864_s15, 16, %s596_s16, [#allocation25]  }
  0xbc   : > { %p8955_p9 = scmp.ne.s32.totalorder %s8951_s29, 0 }
  0xbe   : > { %619 = sbr.rel (%p8955_p9) target bundleno = 3320 (0xcf8), region = 88 }
  0xc3   : > { %p8956_p10 = scmp.eq.s32.totalorder %s7525_s28, 0 }
  0xc5   : > { %7371 = dma.done.wait (%p8956_p10), [#allocation5], 81920   ;;  %p8957_p6 = pmov %p8956_p10 }
  0xc7   : > { %7373 = vsyncadd (%p8957_p6), [#allocation5], 4294885376  ;;  %p8958_p11 = pmov %p8957_p6 }
  0xc8   : > { %p8959_p12 = pmov %p8957_p6 }
  0xc9   : > { %7375 = dma.done.wait (%p8958_p11), [#allocation7], 49216  }
  0xca   : > { %7377 = vsyncadd (%p8959_p12), [#allocation7], 4294918080  ;;  %p8960_p2 = pmov %p8957_p6 }
  0xcc   : > { %7379 = dma.done.wait (%p8960_p2), [#allocation10], 64   ;;  %p8961_p5 = pmov %p8960_p2 }
  0xcd   : > { %p8962_p13 = pmov %p8960_p2 }
  0xce   : > { %7381 = vsyncadd (%p8961_p5), [#allocation10], 4294967232 }
  0xcf   : > { %7383 = dma.done.wait (%p8962_p13), [#allocation13], 24608   ;;  %p8963_p3 = pmov %p8960_p2 }
  0xd0   : > { %p8964_p0 = pmov %p8960_p2 }
  0xd1   : > { %7385 = vsyncadd (%p8963_p3), [#allocation13], 4294942688 }
  0xd2   : > { %7387 = dma.done.wait (%p8964_p0), [#allocation16], 64   ;;  %p8965_p1 = pmov %p8964_p0 }
  0xd3   : > { %p8966_p4 = pmov %p8964_p0 }
  0xd4   : > { %7389 = vsyncadd (%p8965_p1), [#allocation16], 4294967232 }
  0xd5   : > { %7391 = dma.done.wait (%p8966_p4), [#allocation19], 48   ;;  %p8967_p7 = pmov %p8964_p0 }
  0xd6   : > { %p8968_p8 = pmov %p8964_p0 }
  0xd7   : > { %7393 = vsyncadd (%p8967_p7), [#allocation19], 4294967248 }
  0xd8   : > { %7395 = dma.done.wait (%p8968_p8), [#allocation22], 32   ;;  %p8969_p9 = pmov %p8964_p0 }
  0xd9   : > { %p8970_p10 = pmov %p8964_p0 }
  0xda   : > { %7397 = vsyncadd (%p8969_p9), [#allocation22], 4294967264 }
  0xdb   : > { %7399 = dma.done.wait (%p8970_p10), [#allocation25], 16   ;;  %p8971_p6 = pmov %p8964_p0 }
  0xdc   : > { %v923_v1 = vld [vmem:[#allocation4 + $0x5e8] sm:$0xff]  ;;  %v925_v2 = vld [vmem:[#allocation4 + $0x5f8] sm:$0xff]  ;;  %v922_v3 = vld [vmem:[#allocation4 + $0x5e0] sm:$0xff]  ;;  %p721_p11 = scmp.lt.s32.totalorder %s7525_s28, 1  ;;  %s8972_s18 = sld [smem:[#allocation107_spill]]  ;;  %vm994_vm0 = vcmask 1046528  }
  0xdd   : > { %7401 = vsyncadd (%p8971_p6), [#allocation25], 4294967280  ;;  %1003 = vmatprep.subr.mxu0 %v923_v1  ;;  %1074 = vmatprep.subr.mxu1 %v925_v2  ;;  %v924_v4 = vld [vmem:[#allocation4 + $0x5f0] sm:$0xff]  ;;  %v919_v5 = vld [vmem:[#allocation4 + $0x5c8] sm:$0xff]  ;;  %vm1416_vm1 = vcmask 1045504   ;;  %vm1700_vm2 = vcmask 1044480  }
  0xde   : > { %v921_v6 = vld [vmem:[#allocation4 + $0x5d8] sm:$0xff]  ;;  %1004 = vmatpush1.msra.mxu0 %v922_v3  ;;  %1075 = vmatpush1.msra.mxu1 %v924_v4  ;;  %v918_v7 = vld [vmem:[#allocation4 + $0x5c0] sm:$0xff]  ;;  %v920_v8 = vld [vmem:[#allocation4 + $0x5d0] sm:$0xff]  ;;  %s9127_s28 = smov (!%p721_p11, %s7525_s28), 1  ;;  %vm1984_vm3 = vcmask 1043456   ;;  %vm6343_vm13 = vcmask 57344  }
  0xdf   : > { %v915_v9 = vld [vmem:[#allocation4 + $0x5a8] sm:$0xff]  ;;  %1005 = vmatprep.subr.mxu0 %v919_v5  ;;  %1076 = vmatprep.subr.mxu1 %v921_v6  ;;  %v917_v10 = vld [vmem:[#allocation4 + $0x5b8] sm:$0xff]  ;;  %v914_v11 = vld [vmem:[#allocation4 + $0x5a0] sm:$0xff]  ;;  %s6692_s29 = sshll.u32 %s9127_s28, 5  ;;  %s728_s21 = scalar_lea.vmem %s8866_s17, %s9127_s28  ;;  %vm6374_vm15 = vcmask 0  }
  0xe0   : > { %v916_v12 = vld [vmem:[#allocation4 + $0x5b0] sm:$0xff]  ;;  %1006 = vmatpush1.msra.mxu0 %v918_v7  ;;  %1077 = vmatpush1.msra.mxu1 %v920_v8  ;;  %v911_v13 = vld [vmem:[#allocation4 + $0x588] sm:$0xff]  ;;  %v913_v14 = vld [vmem:[#allocation4 + $0x598] sm:$0xff] }
  0xe1   : > { %1007 = vmatprep.subr.mxu0 %v915_v9  ;;  %1078 = vmatprep.subr.mxu1 %v917_v10  ;;  %v910_v15 = vld [vmem:[#allocation4 + $0x580] sm:$0xff]  ;;  %v912_v16 = vld [vmem:[#allocation4 + $0x590] sm:$0xff]  ;;  %v907_v17 = vld [vmem:[#allocation4 + $0x568] sm:$0xff] }
  0xe2   : > { %1008 = vmatpush1.msra.mxu0 %v914_v11  ;;  %1079 = vmatpush1.msra.mxu1 %v916_v12  ;;  %v909_v18 = vld [vmem:[#allocation4 + $0x578] sm:$0xff]  ;;  %v906_v19 = vld [vmem:[#allocation4 + $0x560] sm:$0xff]  ;;  %v908_v20 = vld [vmem:[#allocation4 + $0x570] sm:$0xff]  ;;  %s7710_s30 = scalar_lea.vmem %s8972_s18, %s6692_s29 }
  0xe3   : > { %1009 = vmatprep.subr.mxu0 %v911_v13  ;;  %1080 = vmatprep.subr.mxu1 %v913_v14  ;;  %v903_v21 = vld [vmem:[#allocation4 + $0x548] sm:$0xff]  ;;  %v905_v22 = vld [vmem:[#allocation4 + $0x558] sm:$0xff]  ;;  %v902_v23 = vld [vmem:[#allocation4 + $0x540] sm:$0xff] }
  0xe4   : > { %1010 = vmatpush1.msra.mxu0 %v910_v15  ;;  %1081 = vmatpush1.msra.mxu1 %v912_v16  ;;  %v904_v24 = vld [vmem:[#allocation4 + $0x550] sm:$0xff]  ;;  %v899_v25 = vld [vmem:[#allocation4 + $0x528] sm:$0xff]  ;;  %v901_v26 = vld [vmem:[#allocation4 + $0x538] sm:$0xff] }
  0xe5   : > { %1011 = vmatprep.subr.mxu0 %v907_v17  ;;  %1082 = vmatprep.subr.mxu1 %v909_v18  ;;  %v898_v27 = vld [vmem:[#allocation4 + $0x520] sm:$0xff]  ;;  %v900_v28 = vld [vmem:[#allocation4 + $0x530] sm:$0xff]  ;;  %v895_v29 = vld [vmem:[#allocation4 + $0x508] sm:$0xff] }
  0xe6   : > { %1012 = vmatpush1.msra.mxu0 %v906_v19  ;;  %1083 = vmatpush1.msra.mxu1 %v908_v20  ;;  %v897_v30 = vld [vmem:[#allocation4 + $0x518] sm:$0xff]  ;;  %v894_v31 = vld [vmem:[#allocation4 + $0x500] sm:$0xff]  ;;  %v896_v32 = vld [vmem:[#allocation4 + $0x510] sm:$0xff] }
  0xe7   : > { %1013 = vmatprep.subr.mxu0 %v903_v21  ;;  %1084 = vmatprep.subr.mxu1 %v905_v22  ;;  %v891_v33 = vld [vmem:[#allocation4 + $0x4e8] sm:$0xff]  ;;  %v893_v34 = vld [vmem:[#allocation4 + $0x4f8] sm:$0xff]  ;;  %v890_v35 = vld [vmem:[#allocation4 + $0x4e0] sm:$0xff] }
  0xe8   : > { %1014 = vmatpush1.msra.mxu0 %v902_v23  ;;  %1085 = vmatpush1.msra.mxu1 %v904_v24  ;;  %v892_v36 = vld [vmem:[#allocation4 + $0x4f0] sm:$0xff]  ;;  %v887_v37 = vld [vmem:[#allocation4 + $0x4c8] sm:$0xff]  ;;  %v889_v38 = vld [vmem:[#allocation4 + $0x4d8] sm:$0xff] }
  0xe9   : > { %1015 = vmatprep.subr.mxu0 %v899_v25  ;;  %1086 = vmatprep.subr.mxu1 %v901_v26  ;;  %v886_v39 = vld [vmem:[#allocation4 + $0x4c0] sm:$0xff]  ;;  %v888_v40 = vld [vmem:[#allocation4 + $0x4d0] sm:$0xff]  ;;  %v883_v41 = vld [vmem:[#allocation4 + $0x4a8] sm:$0xff] }
  0xea   : > { %1016 = vmatpush1.msra.mxu0 %v898_v27  ;;  %1087 = vmatpush1.msra.mxu1 %v900_v28  ;;  %v885_v42 = vld [vmem:[#allocation4 + $0x4b8] sm:$0xff]  ;;  %v882_v43 = vld [vmem:[#allocation4 + $0x4a0] sm:$0xff]  ;;  %v884_v44 = vld [vmem:[#allocation4 + $0x4b0] sm:$0xff] }
  0xeb   : > { %1017 = vmatprep.subr.mxu0 %v895_v29  ;;  %1088 = vmatprep.subr.mxu1 %v897_v30  ;;  %v879_v45 = vld [vmem:[#allocation4 + $0x488] sm:$0xff]  ;;  %v881_v46 = vld [vmem:[#allocation4 + $0x498] sm:$0xff]  ;;  %v878_v47 = vld [vmem:[#allocation4 + $0x480] sm:$0xff] }
  0xec   : > { %1018 = vmatpush1.msra.mxu0 %v894_v31  ;;  %1089 = vmatpush1.msra.mxu1 %v896_v32  ;;  %v880_v48 = vld [vmem:[#allocation4 + $0x490] sm:$0xff]  ;;  %v875_v49 = vld [vmem:[#allocation4 + $0x468] sm:$0xff]  ;;  %v877_v50 = vld [vmem:[#allocation4 + $0x478] sm:$0xff] }
  0xed   : > { %1019 = vmatprep.subr.mxu0 %v891_v33  ;;  %1090 = vmatprep.subr.mxu1 %v893_v34  ;;  %v874_v51 = vld [vmem:[#allocation4 + $0x460] sm:$0xff]  ;;  %v876_v52 = vld [vmem:[#allocation4 + $0x470] sm:$0xff]  ;;  %v871_v53 = vld [vmem:[#allocation4 + $0x448] sm:$0xff] }
  0xee   : > { %1020 = vmatpush1.msra.mxu0 %v890_v35  ;;  %1091 = vmatpush1.msra.mxu1 %v892_v36  ;;  %v873_v54 = vld [vmem:[#allocation4 + $0x458] sm:$0xff]  ;;  %v870_v55 = vld [vmem:[#allocation4 + $0x440] sm:$0xff]  ;;  %v872_v56 = vld [vmem:[#allocation4 + $0x450] sm:$0xff] }
  0xef   : > { %1021 = vmatprep.subr.mxu0 %v887_v37  ;;  %1092 = vmatprep.subr.mxu1 %v889_v38  ;;  %v867_v57 = vld [vmem:[#allocation4 + $0x428] sm:$0xff]  ;;  %v869_v58 = vld [vmem:[#allocation4 + $0x438] sm:$0xff]  ;;  %v866_v59 = vld [vmem:[#allocation4 + $0x420] sm:$0xff] }
  0xf0   : > { %1022 = vmatpush1.msra.mxu0 %v886_v39  ;;  %1093 = vmatpush1.msra.mxu1 %v888_v40  ;;  %v868_v60 = vld [vmem:[#allocation4 + $0x430] sm:$0xff]  ;;  %v863_v61 = vld [vmem:[#allocation4 + $0x408] sm:$0xff]  ;;  %v865_v62 = vld [vmem:[#allocation4 + $0x418] sm:$0xff] }
  0xf1   : > { %1023 = vmatprep.subr.mxu0 %v883_v41  ;;  %1094 = vmatprep.subr.mxu1 %v885_v42  ;;  %v862_v63 = vld [vmem:[#allocation4 + $0x400] sm:$0xff]  ;;  %v864_v0 = vld [vmem:[#allocation4 + $0x410] sm:$0xff]  ;;  %v987_v1 = vld [vmem:[#allocation4 + $0x7e8] sm:$0xff] }
  0xf2   : > { %1024 = vmatpush1.msra.mxu0 %v882_v43  ;;  %1095 = vmatpush1.msra.mxu1 %v884_v44  ;;  %v989_v2 = vld [vmem:[#allocation4 + $0x7f8] sm:$0xff]  ;;  %v986_v3 = vld [vmem:[#allocation4 + $0x7e0] sm:$0xff]  ;;  %v988_v4 = vld [vmem:[#allocation4 + $0x7f0] sm:$0xff] }
  0xf3   : > { %1025 = vmatprep.subr.mxu0 %v879_v45  ;;  %1096 = vmatprep.subr.mxu1 %v881_v46  ;;  %v983_v5 = vld [vmem:[#allocation4 + $0x7c8] sm:$0xff]  ;;  %v985_v6 = vld [vmem:[#allocation4 + $0x7d8] sm:$0xff]  ;;  %v982_v7 = vld [vmem:[#allocation4 + $0x7c0] sm:$0xff] }
  0xf4   : > { %1026 = vmatpush1.msra.mxu0 %v878_v47  ;;  %1097 = vmatpush1.msra.mxu1 %v880_v48  ;;  %v984_v8 = vld [vmem:[#allocation4 + $0x7d0] sm:$0xff]  ;;  %v979_v9 = vld [vmem:[#allocation4 + $0x7a8] sm:$0xff]  ;;  %v981_v10 = vld [vmem:[#allocation4 + $0x7b8] sm:$0xff] }
  0xf5   : > { %1027 = vmatprep.subr.mxu0 %v875_v49  ;;  %1098 = vmatprep.subr.mxu1 %v877_v50  ;;  %v978_v11 = vld [vmem:[#allocation4 + $0x7a0] sm:$0xff]  ;;  %v980_v12 = vld [vmem:[#allocation4 + $0x7b0] sm:$0xff]  ;;  %v975_v13 = vld [vmem:[#allocation4 + $0x788] sm:$0xff] }
  0xf6   : > { %1028 = vmatpush1.msra.mxu0 %v874_v51  ;;  %1099 = vmatpush1.msra.mxu1 %v876_v52  ;;  %v977_v14 = vld [vmem:[#allocation4 + $0x798] sm:$0xff]  ;;  %v974_v15 = vld [vmem:[#allocation4 + $0x780] sm:$0xff]  ;;  %v976_v16 = vld [vmem:[#allocation4 + $0x790] sm:$0xff] }
  0xf7   : > { %1029 = vmatprep.subr.mxu0 %v871_v53  ;;  %1100 = vmatprep.subr.mxu1 %v873_v54  ;;  %v971_v17 = vld [vmem:[#allocation4 + $0x768] sm:$0xff]  ;;  %v973_v18 = vld [vmem:[#allocation4 + $0x778] sm:$0xff]  ;;  %v970_v19 = vld [vmem:[#allocation4 + $0x760] sm:$0xff] }
  0xf8   : > { %1030 = vmatpush1.msra.mxu0 %v870_v55  ;;  %1101 = vmatpush1.msra.mxu1 %v872_v56  ;;  %v972_v20 = vld [vmem:[#allocation4 + $0x770] sm:$0xff]  ;;  %v967_v21 = vld [vmem:[#allocation4 + $0x748] sm:$0xff]  ;;  %v969_v22 = vld [vmem:[#allocation4 + $0x758] sm:$0xff] }
  0xf9   : > { %1031 = vmatprep.subr.mxu0 %v867_v57  ;;  %1102 = vmatprep.subr.mxu1 %v869_v58  ;;  %v966_v23 = vld [vmem:[#allocation4 + $0x740] sm:$0xff]  ;;  %v968_v24 = vld [vmem:[#allocation4 + $0x750] sm:$0xff]  ;;  %v963_v25 = vld [vmem:[#allocation4 + $0x728] sm:$0xff] }
  0xfa   : > { %1032 = vmatpush1.msra.mxu0 %v866_v59  ;;  %1103 = vmatpush1.msra.mxu1 %v868_v60  ;;  %v965_v26 = vld [vmem:[#allocation4 + $0x738] sm:$0xff]  ;;  %v962_v27 = vld [vmem:[#allocation4 + $0x720] sm:$0xff]  ;;  %v964_v28 = vld [vmem:[#allocation4 + $0x730] sm:$0xff] }
  0xfb   : > { %1033 = vmatprep.subr.mxu0 %v863_v61  ;;  %1104 = vmatprep.subr.mxu1 %v865_v62  ;;  %v959_v29 = vld [vmem:[#allocation4 + $0x708] sm:$0xff]  ;;  %v961_v30 = vld [vmem:[#allocation4 + $0x718] sm:$0xff]  ;;  %v958_v31 = vld [vmem:[#allocation4 + $0x700] sm:$0xff] }
  0xfc   : > { %1034 = vmatpush1.msra.mxu0 %v862_v63  ;;  %1105 = vmatpush1.msra.mxu1 %v864_v0  ;;  %v960_v32 = vld [vmem:[#allocation4 + $0x710] sm:$0xff]  ;;  %v955_v33 = vld [vmem:[#allocation4 + $0x6e8] sm:$0xff]  ;;  %v957_v34 = vld [vmem:[#allocation4 + $0x6f8] sm:$0xff] }
  0xfd   : > { %1035 = vmatprep.subr.mxu0 %v987_v1  ;;  %1106 = vmatprep.subr.mxu1 %v989_v2  ;;  %v954_v35 = vld [vmem:[#allocation4 + $0x6e0] sm:$0xff]  ;;  %v956_v36 = vld [vmem:[#allocation4 + $0x6f0] sm:$0xff]  ;;  %v951_v37 = vld [vmem:[#allocation4 + $0x6c8] sm:$0xff] }
  0xfe   : > { %1036 = vmatpush2.msra.mxu0 %v986_v3  ;;  %1107 = vmatpush2.msra.mxu1 %v988_v4  ;;  %v953_v38 = vld [vmem:[#allocation4 + $0x6d8] sm:$0xff]  ;;  %v950_v39 = vld [vmem:[#allocation4 + $0x6c0] sm:$0xff]  ;;  %v952_v40 = vld [vmem:[#allocation4 + $0x6d0] sm:$0xff] }
  0xff   : > { %1037 = vmatprep.subr.mxu0 %v983_v5  ;;  %1108 = vmatprep.subr.mxu1 %v985_v6  ;;  %v947_v41 = vld [vmem:[#allocation4 + $0x6a8] sm:$0xff]  ;;  %v949_v42 = vld [vmem:[#allocation4 + $0x6b8] sm:$0xff]  ;;  %v946_v43 = vld [vmem:[#allocation4 + $0x6a0] sm:$0xff] }
 0x100   : > { %1038 = vmatpush2.msra.mxu0 %v982_v7  ;;  %1109 = vmatpush2.msra.mxu1 %v984_v8  ;;  %v948_v44 = vld [vmem:[#allocation4 + $0x6b0] sm:$0xff]  ;;  %v943_v45 = vld [vmem:[#allocation4 + $0x688] sm:$0xff]  ;;  %v945_v46 = vld [vmem:[#allocation4 + $0x698] sm:$0xff] }
 0x101   : > { %1039 = vmatprep.subr.mxu0 %v979_v9  ;;  %1110 = vmatprep.subr.mxu1 %v981_v10  ;;  %v942_v47 = vld [vmem:[#allocation4 + $0x680] sm:$0xff]  ;;  %v944_v48 = vld [vmem:[#allocation4 + $0x690] sm:$0xff]  ;;  %v939_v49 = vld [vmem:[#allocation4 + $0x668] sm:$0xff] }
 0x102   : > { %1040 = vmatpush2.msra.mxu0 %v978_v11  ;;  %1111 = vmatpush2.msra.mxu1 %v980_v12  ;;  %v941_v50 = vld [vmem:[#allocation4 + $0x678] sm:$0xff]  ;;  %v732_v52 = vld [vmem:[%s7710_s30 + $0x18] sm:$0xf]  ;;  %v940_v54 = vld [vmem:[#allocation4 + $0x670] sm:$0xff] }
 0x103   : > { %1041 = vmatprep.subr.mxu0 %v975_v13  ;;  %1112 = vmatprep.subr.mxu1 %v977_v14  ;;  %v7713_v51 = vld [vmem:[%s7710_s30 + $0x8] sm:$0xff]  ;;  %v938_v53 = vld [vmem:[#allocation4 + $0x660] sm:$0xff]  ;;  %v935_v55 = vld [vmem:[#allocation4 + $0x648] sm:$0xff]  ;;  %v999_v62 = vrot.slane %v732_v52, 1 }
 0x104   : > { %1042 = vmatpush2.msra.mxu0 %v974_v15  ;;  %1113 = vmatpush2.msra.mxu1 %v976_v16  ;;  %v937_v56 = vld [vmem:[#allocation4 + $0x658] sm:$0xff]  ;;  %v7717_v57 = vld [vmem:[%s7710_s30] sm:$0xff]  ;;  %v934_v59 = vld [vmem:[#allocation4 + $0x640] sm:$0xff]  ;;  %v998_v61 = vrot.slane %v7713_v51, 1 }
 0x105   : > { %1043 = vmatprep.subr.mxu0 %v971_v17  ;;  %1114 = vmatprep.subr.mxu1 %v973_v18  ;;  %v731_v58 = vld [vmem:[%s7710_s30 + $0x10] sm:$0xf]  ;;  %v936_v60 = vld [vmem:[#allocation4 + $0x650] sm:$0xff]  ;;  %v931_v63 = vld [vmem:[#allocation4 + $0x628] sm:$0xff]  ;;  %v995_v3 = vrot.slane %v7717_v57, 1 }
 0x106   : > { %1044 = vmatpush2.msra.mxu0 %v970_v19  ;;  %1115 = vmatpush2.msra.mxu1 %v972_v20  ;;  %v933_v0 = vld [vmem:[#allocation4 + $0x638] sm:$0xff]  ;;  %v930_v1 = vld [vmem:[#allocation4 + $0x620] sm:$0xff]  ;;  %v932_v2 = vld [vmem:[#allocation4 + $0x630] sm:$0xff]  ;;  %v996_v4 = vrot.slane %v731_v58, 1  ;;  %v1000_v8 = vsel %vm994_vm0, %v998_v61, %v999_v62 }
 0x107   : > { %1045 = vmatprep.subr.mxu0 %v967_v21  ;;  %1116 = vmatprep.subr.mxu1 %v969_v22  ;;  %v927_v5 = vld [vmem:[#allocation4 + $0x608] sm:$0xff]  ;;  %v929_v6 = vld [vmem:[#allocation4 + $0x618] sm:$0xff]  ;;  %v926_v7 = vld [vmem:[#allocation4 + $0x600] sm:$0xff] }
 0x108   : > { %1046 = vmatpush2.msra.mxu0 %v966_v23  ;;  %1117 = vmatpush2.msra.mxu1 %v968_v24  ;;  %v928_v9 = vld [vmem:[#allocation4 + $0x610] sm:$0xff]  ;;  %v997_v10 = vsel %vm994_vm0, %v995_v3, %v996_v4  ;;  %v794_v11 = vld [vmem:[#allocation4 + $0x1e8] sm:$0xff]  ;;  %v796_v12 = vld [vmem:[#allocation4 + $0x1f8] sm:$0xff] }
 0x109   : > { %1047 = vmatprep.subr.mxu0 %v963_v25  ;;  %1118 = vmatprep.subr.mxu1 %v965_v26  ;;  %v793_v13 = vld [vmem:[#allocation4 + $0x1e0] sm:$0xff]  ;;  %v795_v14 = vld [vmem:[#allocation4 + $0x1f0] sm:$0xff]  ;;  %v790_v15 = vld [vmem:[#allocation4 + $0x1c8] sm:$0xff] }
 0x10a   : > { %1048 = vmatpush2.msra.mxu0 %v962_v27  ;;  %1119 = vmatpush2.msra.mxu1 %v964_v28  ;;  %v792_v16 = vld [vmem:[#allocation4 + $0x1d8] sm:$0xff]  ;;  %v789_v17 = vld [vmem:[#allocation4 + $0x1c0] sm:$0xff]  ;;  %v791_v18 = vld [vmem:[#allocation4 + $0x1d0] sm:$0xff] }
 0x10b   : > { %1049 = vmatprep.subr.mxu0 %v959_v29  ;;  %1120 = vmatprep.subr.mxu1 %v961_v30  ;;  %v786_v19 = vld [vmem:[#allocation4 + $0x1a8] sm:$0xff]  ;;  %v788_v20 = vld [vmem:[#allocation4 + $0x1b8] sm:$0xff]  ;;  %v785_v21 = vld [vmem:[#allocation4 + $0x1a0] sm:$0xff] }
 0x10c   : > { %1050 = vmatpush2.msra.mxu0 %v958_v31  ;;  %1121 = vmatpush2.msra.mxu1 %v960_v32  ;;  %v787_v22 = vld [vmem:[#allocation4 + $0x1b0] sm:$0xff]  ;;  %v782_v23 = vld [vmem:[#allocation4 + $0x188] sm:$0xff]  ;;  %v784_v24 = vld [vmem:[#allocation4 + $0x198] sm:$0xff] }
 0x10d   : > { %1051 = vmatprep.subr.mxu0 %v955_v33  ;;  %1122 = vmatprep.subr.mxu1 %v957_v34  ;;  %v781_v25 = vld [vmem:[#allocation4 + $0x180] sm:$0xff]  ;;  %v783_v26 = vld [vmem:[#allocation4 + $0x190] sm:$0xff]  ;;  %v778_v27 = vld [vmem:[#allocation4 + $0x168] sm:$0xff] }
 0x10e   : > { %1052 = vmatpush2.msra.mxu0 %v954_v35  ;;  %1123 = vmatpush2.msra.mxu1 %v956_v36  ;;  %v780_v28 = vld [vmem:[#allocation4 + $0x178] sm:$0xff]  ;;  %v777_v29 = vld [vmem:[#allocation4 + $0x160] sm:$0xff]  ;;  %v779_v30 = vld [vmem:[#allocation4 + $0x170] sm:$0xff] }
 0x10f   : > { %1053 = vmatprep.subr.mxu0 %v951_v37  ;;  %1124 = vmatprep.subr.mxu1 %v953_v38  ;;  %v774_v31 = vld [vmem:[#allocation4 + $0x148] sm:$0xff]  ;;  %v776_v32 = vld [vmem:[#allocation4 + $0x158] sm:$0xff]  ;;  %v773_v33 = vld [vmem:[#allocation4 + $0x140] sm:$0xff] }
 0x110   : > { %1054 = vmatpush2.msra.mxu0 %v950_v39  ;;  %1125 = vmatpush2.msra.mxu1 %v952_v40  ;;  %v775_v34 = vld [vmem:[#allocation4 + $0x150] sm:$0xff]  ;;  %v770_v35 = vld [vmem:[#allocation4 + $0x128] sm:$0xff]  ;;  %v772_v36 = vld [vmem:[#allocation4 + $0x138] sm:$0xff] }
 0x111   : > { %1055 = vmatprep.subr.mxu0 %v947_v41  ;;  %1126 = vmatprep.subr.mxu1 %v949_v42  ;;  %v769_v37 = vld [vmem:[#allocation4 + $0x120] sm:$0xff]  ;;  %v771_v38 = vld [vmem:[#allocation4 + $0x130] sm:$0xff]  ;;  %v766_v39 = vld [vmem:[#allocation4 + $0x108] sm:$0xff] }
 0x112   : > { %1056 = vmatpush2.msra.mxu0 %v946_v43  ;;  %1127 = vmatpush2.msra.mxu1 %v948_v44  ;;  %v768_v40 = vld [vmem:[#allocation4 + $0x118] sm:$0xff]  ;;  %v765_v41 = vld [vmem:[#allocation4 + $0x100] sm:$0xff]  ;;  %v767_v42 = vld [vmem:[#allocation4 + $0x110] sm:$0xff] }
 0x113   : > { %1057 = vmatprep.subr.mxu0 %v943_v45  ;;  %1128 = vmatprep.subr.mxu1 %v945_v46  ;;  %v762_v43 = vld [vmem:[#allocation4 + $0xe8] sm:$0xff]  ;;  %v764_v44 = vld [vmem:[#allocation4 + $0xf8] sm:$0xff]  ;;  %v761_v45 = vld [vmem:[#allocation4 + $0xe0] sm:$0xff] }
 0x114   : > { %1058 = vmatpush2.msra.mxu0 %v942_v47  ;;  %1129 = vmatpush2.msra.mxu1 %v944_v48  ;;  %v763_v46 = vld [vmem:[#allocation4 + $0xf0] sm:$0xff]  ;;  %v758_v47 = vld [vmem:[#allocation4 + $0xc8] sm:$0xff]  ;;  %v760_v48 = vld [vmem:[#allocation4 + $0xd8] sm:$0xff] }
 0x115   : > { %1059 = vmatprep.subr.mxu0 %v939_v49  ;;  %1130 = vmatprep.subr.mxu1 %v941_v50  ;;  %v757_v49 = vld [vmem:[#allocation4 + $0xc0] sm:$0xff]  ;;  %v759_v50 = vld [vmem:[#allocation4 + $0xd0] sm:$0xff]  ;;  %v754_v52 = vld [vmem:[#allocation4 + $0xa8] sm:$0xff] }
 0x116   : > { %1060 = vmatpush2.msra.mxu0 %v938_v53  ;;  %1131 = vmatpush2.msra.mxu1 %v940_v54  ;;  %v756_v53 = vld [vmem:[#allocation4 + $0xb8] sm:$0xff]  ;;  %v753_v54 = vld [vmem:[#allocation4 + $0xa0] sm:$0xff]  ;;  %v746_v61 = vld [vmem:[#allocation4 + $0x68] sm:$0xff] }
 0x117   : > { %1061 = vmatprep.subr.mxu0 %v935_v55  ;;  %1132 = vmatprep.subr.mxu1 %v937_v56  ;;  %v755_v55 = vld [vmem:[#allocation4 + $0xb0] sm:$0xff]  ;;  %v750_v56 = vld [vmem:[#allocation4 + $0x88] sm:$0xff]  ;;  %v752_v58 = vld [vmem:[#allocation4 + $0x98] sm:$0xff] }
 0x118   : > { %1062 = vmatpush2.msra.mxu0 %v934_v59  ;;  %1133 = vmatpush2.msra.mxu1 %v936_v60  ;;  %v749_v59 = vld [vmem:[#allocation4 + $0x80] sm:$0xff]  ;;  %v751_v60 = vld [vmem:[#allocation4 + $0x90] sm:$0xff]  ;;  %v748_v62 = vld [vmem:[#allocation4 + $0x78] sm:$0xff] }
 0x119   : > { %1063 = vmatprep.subr.mxu0 %v931_v63  ;;  %1134 = vmatprep.subr.mxu1 %v933_v0  ;;  %v745_v63 = vld [vmem:[#allocation4 + $0x60] sm:$0xff]  ;;  %v747_v0 = vld [vmem:[#allocation4 + $0x70] sm:$0xff] }
 0x11a   : > { %1064 = vmatpush2.msra.mxu0 %v930_v1  ;;  %1135 = vmatpush2.msra.mxu1 %v932_v2  ;;  %v742_v1 = vld [vmem:[#allocation4 + $0x48] sm:$0xff]  ;;  %v744_v2 = vld [vmem:[#allocation4 + $0x58] sm:$0xff]  ;;  %v741_v3 = vld [vmem:[#allocation4 + $0x40] sm:$0xff] }
 0x11b   : > { %1065 = vmatprep.subr.mxu0 %v927_v5  ;;  %1136 = vmatprep.subr.mxu1 %v929_v6  ;;  %v743_v4 = vld [vmem:[#allocation4 + $0x50] sm:$0xff]  ;;  %v738_v5 = vld [vmem:[#allocation4 + $0x28] sm:$0xff]  ;;  %v740_v6 = vld [vmem:[#allocation4 + $0x38] sm:$0xff] }
 0x11c   : > { %1066 = vmatpush2.msra.mxu0 %v926_v7  ;;  %1067 = vmatprep.mubr.f32.mxu0 %v1000_v8  ;;  %v737_v7 = vld [vmem:[#allocation4 + $0x20] sm:$0xff] }
 0x11d   : > { %1137 = vmatpush2.msra.mxu1 %v928_v9  ;;  %1138 = vmatprep.mubr.f32.mxu1 %v1000_v8  ;;  %v739_v8 = vld [vmem:[#allocation4 + $0x30] sm:$0xff]  ;;  %v734_v9 = vld [vmem:[#allocation4 + $0x8] sm:$0xff] }
 0x11e   : > { %1068 = vmatmul.mubr.f32.vlgmr.msra.gmra.mxu0 %v997_v10  ;;  %1139 = vmatmul.mubr.f32.vlgmr.msra.gmra.mxu1 %v997_v10  ;;  %v736_v10 = vld [vmem:[#allocation4 + $0x18] sm:$0xff] }
 0x11f   : > { %1145 = vmatprep.subr.mxu0 %v794_v11  ;;  %1216 = vmatprep.subr.mxu1 %v796_v12  ;;  %v733_v11 = vld [vmem:[#allocation4] sm:$0xff]  ;;  %v735_v12 = vld [vmem:[#allocation4 + $0x10] sm:$0xff] }
 0x120   : > { %1146 = vmatpush1.msra.mxu0 %v793_v13  ;;  %1217 = vmatpush1.msra.mxu1 %v795_v14  ;;  %v858_v13 = vld [vmem:[#allocation4 + $0x3e8] sm:$0xff]  ;;  %v860_v14 = vld [vmem:[#allocation4 + $0x3f8] sm:$0xff] }
 0x121   : > { %1147 = vmatprep.subr.mxu0 %v790_v15  ;;  %1218 = vmatprep.subr.mxu1 %v792_v16  ;;  %v857_v15 = vld [vmem:[#allocation4 + $0x3e0] sm:$0xff]  ;;  %v859_v16 = vld [vmem:[#allocation4 + $0x3f0] sm:$0xff] }
 0x122   : > { %1148 = vmatpush1.msra.mxu0 %v789_v17  ;;  %1219 = vmatpush1.msra.mxu1 %v791_v18  ;;  %v854_v17 = vld [vmem:[#allocation4 + $0x3c8] sm:$0xff]  ;;  %v856_v18 = vld [vmem:[#allocation4 + $0x3d8] sm:$0xff] }
 0x123   : > { %1149 = vmatprep.subr.mxu0 %v786_v19  ;;  %1220 = vmatprep.subr.mxu1 %v788_v20  ;;  %v853_v19 = vld [vmem:[#allocation4 + $0x3c0] sm:$0xff]  ;;  %v855_v20 = vld [vmem:[#allocation4 + $0x3d0] sm:$0xff] }
 0x124   : > { %1150 = vmatpush1.msra.mxu0 %v785_v21  ;;  %1221 = vmatpush1.msra.mxu1 %v787_v22  ;;  %v850_v21 = vld [vmem:[#allocation4 + $0x3a8] sm:$0xff]  ;;  %v852_v22 = vld [vmem:[#allocation4 + $0x3b8] sm:$0xff] }
 0x125   : > { %1151 = vmatprep.subr.mxu0 %v782_v23  ;;  %1222 = vmatprep.subr.mxu1 %v784_v24  ;;  %v849_v23 = vld [vmem:[#allocation4 + $0x3a0] sm:$0xff]  ;;  %v851_v24 = vld [vmem:[#allocation4 + $0x3b0] sm:$0xff] }
 0x126   : > { %1152 = vmatpush1.msra.mxu0 %v781_v25  ;;  %1223 = vmatpush1.msra.mxu1 %v783_v26  ;;  %v846_v25 = vld [vmem:[#allocation4 + $0x388] sm:$0xff]  ;;  %v848_v26 = vld [vmem:[#allocation4 + $0x398] sm:$0xff] }
 0x127   : > { %1153 = vmatprep.subr.mxu0 %v778_v27  ;;  %1224 = vmatprep.subr.mxu1 %v780_v28  ;;  %v845_v27 = vld [vmem:[#allocation4 + $0x380] sm:$0xff]  ;;  %v847_v28 = vld [vmem:[#allocation4 + $0x390] sm:$0xff] }
 0x128   : > { %1154 = vmatpush1.msra.mxu0 %v777_v29  ;;  %1225 = vmatpush1.msra.mxu1 %v779_v30  ;;  %v842_v29 = vld [vmem:[#allocation4 + $0x368] sm:$0xff]  ;;  %v844_v30 = vld [vmem:[#allocation4 + $0x378] sm:$0xff] }
 0x129   : > { %1155 = vmatprep.subr.mxu0 %v774_v31  ;;  %1226 = vmatprep.subr.mxu1 %v776_v32  ;;  %v841_v31 = vld [vmem:[#allocation4 + $0x360] sm:$0xff]  ;;  %v843_v32 = vld [vmem:[#allocation4 + $0x370] sm:$0xff] }
 0x12a   : > { %1156 = vmatpush1.msra.mxu0 %v773_v33  ;;  %1227 = vmatpush1.msra.mxu1 %v775_v34  ;;  %v838_v33 = vld [vmem:[#allocation4 + $0x348] sm:$0xff]  ;;  %v840_v34 = vld [vmem:[#allocation4 + $0x358] sm:$0xff] }
 0x12b   : > { %1157 = vmatprep.subr.mxu0 %v770_v35  ;;  %1228 = vmatprep.subr.mxu1 %v772_v36  ;;  %v837_v35 = vld [vmem:[#allocation4 + $0x340] sm:$0xff]  ;;  %v839_v36 = vld [vmem:[#allocation4 + $0x350] sm:$0xff] }
 0x12c   : > { %1158 = vmatpush1.msra.mxu0 %v769_v37  ;;  %1229 = vmatpush1.msra.mxu1 %v771_v38  ;;  %v834_v37 = vld [vmem:[#allocation4 + $0x328] sm:$0xff]  ;;  %v836_v38 = vld [vmem:[#allocation4 + $0x338] sm:$0xff] }
 0x12d   : > { %1159 = vmatprep.subr.mxu0 %v766_v39  ;;  %1230 = vmatprep.subr.mxu1 %v768_v40  ;;  %v833_v39 = vld [vmem:[#allocation4 + $0x320] sm:$0xff]  ;;  %v835_v40 = vld [vmem:[#allocation4 + $0x330] sm:$0xff] }
 0x12e   : > { %1160 = vmatpush1.msra.mxu0 %v765_v41  ;;  %1231 = vmatpush1.msra.mxu1 %v767_v42  ;;  %v830_v41 = vld [vmem:[#allocation4 + $0x308] sm:$0xff]  ;;  %v832_v42 = vld [vmem:[#allocation4 + $0x318] sm:$0xff] }
 0x12f   : > { %1161 = vmatprep.subr.mxu0 %v762_v43  ;;  %1232 = vmatprep.subr.mxu1 %v764_v44  ;;  %v829_v43 = vld [vmem:[#allocation4 + $0x300] sm:$0xff]  ;;  %v831_v44 = vld [vmem:[#allocation4 + $0x310] sm:$0xff] }
 0x130   : > { %1162 = vmatpush1.msra.mxu0 %v761_v45  ;;  %1233 = vmatpush1.msra.mxu1 %v763_v46  ;;  %v826_v45 = vld [vmem:[#allocation4 + $0x2e8] sm:$0xff]  ;;  %v828_v46 = vld [vmem:[#allocation4 + $0x2f8] sm:$0xff] }
 0x131   : > { %1163 = vmatprep.subr.mxu0 %v758_v47  ;;  %1234 = vmatprep.subr.mxu1 %v760_v48  ;;  %v825_v47 = vld [vmem:[#allocation4 + $0x2e0] sm:$0xff]  ;;  %v827_v48 = vld [vmem:[#allocation4 + $0x2f0] sm:$0xff] }
 0x132   : > { %1164 = vmatpush1.msra.mxu0 %v757_v49  ;;  %1235 = vmatpush1.msra.mxu1 %v759_v50  ;;  %v822_v49 = vld [vmem:[#allocation4 + $0x2c8] sm:$0xff]  ;;  %v824_v50 = vld [vmem:[#allocation4 + $0x2d8] sm:$0xff] }
 0x133   : > { %1165 = vmatprep.subr.mxu0 %v754_v52  ;;  %1236 = vmatprep.subr.mxu1 %v756_v53  ;;  %v821_v52 = vld [vmem:[#allocation4 + $0x2c0] sm:$0xff]  ;;  %v823_v53 = vld [vmem:[#allocation4 + $0x2d0] sm:$0xff] }
 0x134   : > { %1166 = vmatpush1.msra.mxu0 %v753_v54  ;;  %1237 = vmatpush1.msra.mxu1 %v755_v55  ;;  %v818_v54 = vld [vmem:[#allocation4 + $0x2a8] sm:$0xff]  ;;  %v820_v55 = vld [vmem:[#allocation4 + $0x2b8] sm:$0xff] }
 0x135   : > { %1167 = vmatprep.subr.mxu0 %v750_v56  ;;  %1238 = vmatprep.subr.mxu1 %v752_v58  ;;  %v817_v56 = vld [vmem:[#allocation4 + $0x2a0] sm:$0xff]  ;;  %v819_v58 = vld [vmem:[#allocation4 + $0x2b0] sm:$0xff] }
 0x136   : > { %1168 = vmatpush1.msra.mxu0 %v749_v59  ;;  %1239 = vmatpush1.msra.mxu1 %v751_v60  ;;  %v814_v59 = vld [vmem:[#allocation4 + $0x288] sm:$0xff]  ;;  %v816_v60 = vld [vmem:[#allocation4 + $0x298] sm:$0xff] }
 0x137   : > { %1169 = vmatprep.subr.mxu0 %v746_v61  ;;  %1240 = vmatprep.subr.mxu1 %v748_v62  ;;  %v813_v61 = vld [vmem:[#allocation4 + $0x280] sm:$0xff]  ;;  %v815_v62 = vld [vmem:[#allocation4 + $0x290] sm:$0xff] }
 0x138   : > { %1170 = vmatpush1.msra.mxu0 %v745_v63  ;;  %1241 = vmatpush1.msra.mxu1 %v747_v0  ;;  %v810_v63 = vld [vmem:[#allocation4 + $0x268] sm:$0xff]  ;;  %v812_v0 = vld [vmem:[#allocation4 + $0x278] sm:$0xff] }
 0x139   : > { %1171 = vmatprep.subr.mxu0 %v742_v1  ;;  %1242 = vmatprep.subr.mxu1 %v744_v2  ;;  %v809_v1 = vld [vmem:[#allocation4 + $0x260] sm:$0xff]  ;;  %v811_v2 = vld [vmem:[#allocation4 + $0x270] sm:$0xff] }
 0x13a   : > { %1172 = vmatpush1.msra.mxu0 %v741_v3  ;;  %1243 = vmatpush1.msra.mxu1 %v743_v4  ;;  %v806_v3 = vld [vmem:[#allocation4 + $0x248] sm:$0xff]  ;;  %v808_v4 = vld [vmem:[#allocation4 + $0x258] sm:$0xff] }
 0x13b   : > { %1173 = vmatprep.subr.mxu0 %v738_v5  ;;  %1244 = vmatprep.subr.mxu1 %v740_v6  ;;  %v805_v5 = vld [vmem:[#allocation4 + $0x240] sm:$0xff]  ;;  %v807_v6 = vld [vmem:[#allocation4 + $0x250] sm:$0xff] }
 0x13c   : > { %1174 = vmatpush1.msra.mxu0 %v737_v7  ;;  %1245 = vmatpush1.msra.mxu1 %v739_v8  ;;  %v802_v7 = vld [vmem:[#allocation4 + $0x228] sm:$0xff]  ;;  %v804_v8 = vld [vmem:[#allocation4 + $0x238] sm:$0xff] }
 0x13d   : > { %1175 = vmatprep.subr.mxu0 %v734_v9  ;;  %1246 = vmatprep.subr.mxu1 %v736_v10  ;;  %v801_v9 = vld [vmem:[#allocation4 + $0x220] sm:$0xff]  ;;  %v803_v10 = vld [vmem:[#allocation4 + $0x230] sm:$0xff] }
 0x13e   : > { %1176 = vmatpush1.msra.mxu0 %v733_v11  ;;  %1247 = vmatpush1.msra.mxu1 %v735_v12  ;;  %v798_v11 = vld [vmem:[#allocation4 + $0x208] sm:$0xff]  ;;  %v800_v12 = vld [vmem:[#allocation4 + $0x218] sm:$0xff] }
 0x13f   : > { %1177 = vmatprep.subr.mxu0 %v858_v13  ;;  %1248 = vmatprep.subr.mxu1 %v860_v14  ;;  %v797_v13 = vld [vmem:[#allocation4 + $0x200] sm:$0xff]  ;;  %v799_v14 = vld [vmem:[#allocation4 + $0x210] sm:$0xff] }
 0x140   : > { %1178 = vmatpush2.msra.mxu0 %v857_v15  ;;  %1249 = vmatpush2.msra.mxu1 %v859_v16  ;;  %v1349_v15 = vld [vmem:[#allocation4 + $0x9e8] sm:$0xff]  ;;  %v1351_v16 = vld [vmem:[#allocation4 + $0x9f8] sm:$0xff] }
 0x141   : > { %1179 = vmatprep.subr.mxu0 %v854_v17  ;;  %1250 = vmatprep.subr.mxu1 %v856_v18  ;;  %v1348_v17 = vld [vmem:[#allocation4 + $0x9e0] sm:$0xff]  ;;  %v1350_v18 = vld [vmem:[#allocation4 + $0x9f0] sm:$0xff] }
 0x142   : > { %1180 = vmatpush2.msra.mxu0 %v853_v19  ;;  %1251 = vmatpush2.msra.mxu1 %v855_v20  ;;  %v1345_v19 = vld [vmem:[#allocation4 + $0x9c8] sm:$0xff]  ;;  %v1347_v20 = vld [vmem:[#allocation4 + $0x9d8] sm:$0xff] }
 0x143   : > { %1181 = vmatprep.subr.mxu0 %v850_v21  ;;  %1252 = vmatprep.subr.mxu1 %v852_v22  ;;  %v1344_v21 = vld [vmem:[#allocation4 + $0x9c0] sm:$0xff]  ;;  %v1346_v22 = vld [vmem:[#allocation4 + $0x9d0] sm:$0xff] }
 0x144   : > { %1182 = vmatpush2.msra.mxu0 %v849_v23  ;;  %1253 = vmatpush2.msra.mxu1 %v851_v24  ;;  %v1341_v23 = vld [vmem:[#allocation4 + $0x9a8] sm:$0xff]  ;;  %v1343_v24 = vld [vmem:[#allocation4 + $0x9b8] sm:$0xff] }
 0x145   : > { %1183 = vmatprep.subr.mxu0 %v846_v25  ;;  %1254 = vmatprep.subr.mxu1 %v848_v26  ;;  %v1340_v25 = vld [vmem:[#allocation4 + $0x9a0] sm:$0xff]  ;;  %v1337_v26 = vld [vmem:[#allocation4 + $0x988] sm:$0xff] }
 0x146   : > { %1184 = vmatpush2.msra.mxu0 %v845_v27  ;;  %1255 = vmatpush2.msra.mxu1 %v847_v28  ;;  %v1339_v27 = vld [vmem:[#allocation4 + $0x998] sm:$0xff]  ;;  %v1338_v28 = vld [vmem:[#allocation4 + $0x990] sm:$0xff] }
 0x147   : > { %1185 = vmatprep.subr.mxu0 %v842_v29  ;;  %1256 = vmatprep.subr.mxu1 %v844_v30  ;;  %v1333_v29 = vld [vmem:[#allocation4 + $0x968] sm:$0xff]  ;;  %v1335_v30 = vld [vmem:[#allocation4 + $0x978] sm:$0xff] }
 0x148   : > { %1186 = vmatpush2.msra.mxu0 %v841_v31  ;;  %1257 = vmatpush2.msra.mxu1 %v843_v32  ;;  %v1332_v31 = vld [vmem:[#allocation4 + $0x960] sm:$0xff]  ;;  %v1334_v32 = vld [vmem:[#allocation4 + $0x970] sm:$0xff] }
 0x149   : > { %1187 = vmatprep.subr.mxu0 %v838_v33  ;;  %1258 = vmatprep.subr.mxu1 %v840_v34  ;;  %v1329_v33 = vld [vmem:[#allocation4 + $0x948] sm:$0xff]  ;;  %v1331_v34 = vld [vmem:[#allocation4 + $0x958] sm:$0xff] }
 0x14a   : > { %1188 = vmatpush2.msra.mxu0 %v837_v35  ;;  %1259 = vmatpush2.msra.mxu1 %v839_v36  ;;  %v1328_v35 = vld [vmem:[#allocation4 + $0x940] sm:$0xff]  ;;  %v1330_v36 = vld [vmem:[#allocation4 + $0x950] sm:$0xff] }
 0x14b   : > { %1189 = vmatprep.subr.mxu0 %v834_v37  ;;  %1260 = vmatprep.subr.mxu1 %v836_v38  ;;  %v1325_v37 = vld [vmem:[#allocation4 + $0x928] sm:$0xff]  ;;  %v1327_v38 = vld [vmem:[#allocation4 + $0x938] sm:$0xff] }
 0x14c   : > { %1190 = vmatpush2.msra.mxu0 %v833_v39  ;;  %1261 = vmatpush2.msra.mxu1 %v835_v40  ;;  %v1324_v39 = vld [vmem:[#allocation4 + $0x920] sm:$0xff]  ;;  %v1326_v40 = vld [vmem:[#allocation4 + $0x930] sm:$0xff] }
 0x14d   : > { %1191 = vmatprep.subr.mxu0 %v830_v41  ;;  %1262 = vmatprep.subr.mxu1 %v832_v42  ;;  %v1321_v41 = vld [vmem:[#allocation4 + $0x908] sm:$0xff]  ;;  %v1323_v42 = vld [vmem:[#allocation4 + $0x918] sm:$0xff] }
 0x14e   : > { %1192 = vmatpush2.msra.mxu0 %v829_v43  ;;  %1263 = vmatpush2.msra.mxu1 %v831_v44  ;;  %v1320_v43 = vld [vmem:[#allocation4 + $0x900] sm:$0xff]  ;;  %v1322_v44 = vld [vmem:[#allocation4 + $0x910] sm:$0xff] }
 0x14f   : > { %1193 = vmatprep.subr.mxu0 %v826_v45  ;;  %1264 = vmatprep.subr.mxu1 %v828_v46  ;;  %v1317_v45 = vld [vmem:[#allocation4 + $0x8e8] sm:$0xff]  ;;  %v1319_v46 = vld [vmem:[#allocation4 + $0x8f8] sm:$0xff] }
 0x150   : > { %1194 = vmatpush2.msra.mxu0 %v825_v47  ;;  %1265 = vmatpush2.msra.mxu1 %v827_v48  ;;  %v1316_v47 = vld [vmem:[#allocation4 + $0x8e0] sm:$0xff]  ;;  %v1318_v48 = vld [vmem:[#allocation4 + $0x8f0] sm:$0xff] }
 0x151   : > { %1195 = vmatprep.subr.mxu0 %v822_v49  ;;  %1266 = vmatprep.subr.mxu1 %v824_v50  ;;  %v1313_v49 = vld [vmem:[#allocation4 + $0x8c8] sm:$0xff]  ;;  %v1315_v50 = vld [vmem:[#allocation4 + $0x8d8] sm:$0xff] }
 0x152   : > { %1196 = vmatpush2.msra.mxu0 %v821_v52  ;;  %1267 = vmatpush2.msra.mxu1 %v823_v53  ;;  %v1312_v52 = vld [vmem:[#allocation4 + $0x8c0] sm:$0xff]  ;;  %v1314_v53 = vld [vmem:[#allocation4 + $0x8d0] sm:$0xff] }
 0x153   : > { %1197 = vmatprep.subr.mxu0 %v818_v54  ;;  %1268 = vmatprep.subr.mxu1 %v820_v55  ;;  %v1309_v54 = vld [vmem:[#allocation4 + $0x8a8] sm:$0xff]  ;;  %v1311_v55 = vld [vmem:[#allocation4 + $0x8b8] sm:$0xff] }
 0x154   : > { %1198 = vmatpush2.msra.mxu0 %v817_v56  ;;  %1269 = vmatpush2.msra.mxu1 %v819_v58  ;;  %v1308_v56 = vld [vmem:[#allocation4 + $0x8a0] sm:$0xff]  ;;  %v1310_v58 = vld [vmem:[#allocation4 + $0x8b0] sm:$0xff] }
 0x155   : > { %1199 = vmatprep.subr.mxu0 %v814_v59  ;;  %1270 = vmatprep.subr.mxu1 %v816_v60  ;;  %v1305_v59 = vld [vmem:[#allocation4 + $0x888] sm:$0xff]  ;;  %v1307_v60 = vld [vmem:[#allocation4 + $0x898] sm:$0xff] }
 0x156   : > { %1200 = vmatpush2.msra.mxu0 %v813_v61  ;;  %1271 = vmatpush2.msra.mxu1 %v815_v62  ;;  %v1304_v61 = vld [vmem:[#allocation4 + $0x880] sm:$0xff]  ;;  %v1306_v62 = vld [vmem:[#allocation4 + $0x890] sm:$0xff] }
 0x157   : > { %1201 = vmatprep.subr.mxu0 %v810_v63  ;;  %1272 = vmatprep.subr.mxu1 %v812_v0  ;;  %v1301_v63 = vld [vmem:[#allocation4 + $0x868] sm:$0xff]  ;;  %v1303_v0 = vld [vmem:[#allocation4 + $0x878] sm:$0xff] }
 0x158   : > { %1202 = vmatpush2.msra.mxu0 %v809_v1  ;;  %1273 = vmatpush2.msra.mxu1 %v811_v2  ;;  %v1300_v1 = vld [vmem:[#allocation4 + $0x860] sm:$0xff]  ;;  %v1302_v2 = vld [vmem:[#allocation4 + $0x870] sm:$0xff] }
 0x159   : > { %1203 = vmatprep.subr.mxu0 %v806_v3  ;;  %1274 = vmatprep.subr.mxu1 %v808_v4  ;;  %v1297_v3 = vld [vmem:[#allocation4 + $0x848] sm:$0xff]  ;;  %v1299_v4 = vld [vmem:[#allocation4 + $0x858] sm:$0xff] }
 0x15a   : > { %1204 = vmatpush2.msra.mxu0 %v805_v5  ;;  %1275 = vmatpush2.msra.mxu1 %v807_v6  ;;  %v1296_v5 = vld [vmem:[#allocation4 + $0x840] sm:$0xff]  ;;  %v1298_v6 = vld [vmem:[#allocation4 + $0x850] sm:$0xff] }
 0x15b   : > { %1205 = vmatprep.subr.mxu0 %v802_v7  ;;  %1276 = vmatprep.subr.mxu1 %v804_v8  ;;  %v1293_v7 = vld [vmem:[#allocation4 + $0x828] sm:$0xff]  ;;  %v1295_v8 = vld [vmem:[#allocation4 + $0x838] sm:$0xff] }
 0x15c   : > { %1206 = vmatpush2.msra.mxu0 %v801_v9  ;;  %1277 = vmatpush2.msra.mxu1 %v803_v10  ;;  %v1292_v9 = vld [vmem:[#allocation4 + $0x820] sm:$0xff]  ;;  %v1294_v10 = vld [vmem:[#allocation4 + $0x830] sm:$0xff] }
 0x15d   : > { %1207 = vmatprep.subr.mxu0 %v798_v11  ;;  %1278 = vmatprep.subr.mxu1 %v800_v12  ;;  %v1289_v11 = vld [vmem:[#allocation4 + $0x808] sm:$0xff]  ;;  %v1291_v12 = vld [vmem:[#allocation4 + $0x818] sm:$0xff] }
 0x15e   : > { %1208 = vmatpush2.msra.mxu0 %v797_v13  ;;  %1209 = vmatprep.mubr.f32.mxu0 %v7713_v51  ;;  %v1288_v13 = vld [vmem:[#allocation4 + $0x800] sm:$0xff] }
 0x15f   : > { %1279 = vmatpush2.msra.mxu1 %v799_v14  ;;  %1280 = vmatprep.mubr.f32.mxu1 %v7713_v51  ;;  %v1342_v51 = vld [vmem:[#allocation4 + $0x9b0] sm:$0xff] }
 0x160   : > { %1210 = vmatmul.mubr.f32.vlgmr.msra.gmra.mxu0 %v7717_v57  ;;  %1281 = vmatmul.mubr.f32.vlgmr.msra.gmra.mxu1 %v7717_v57  ;;  %v1336_v57 = vld [vmem:[#allocation4 + $0x980] sm:$0xff]  ;;  %v1290_v14 = vld [vmem:[#allocation4 + $0x810] sm:$0xff] }
 0x161   : > { %1425 = vmatprep.subr.mxu0 %v1349_v15  ;;  %1496 = vmatprep.subr.mxu1 %v1351_v16  ;;  %v1413_v15 = vld [vmem:[#allocation4 + $0xbe8] sm:$0xff]  ;;  %v1415_v16 = vld [vmem:[#allocation4 + $0xbf8] sm:$0xff] }
 0x162   : > { %1426 = vmatpush1.msra.mxu0 %v1348_v17  ;;  %1497 = vmatpush1.msra.mxu1 %v1350_v18  ;;  %v1412_v17 = vld [vmem:[#allocation4 + $0xbe0] sm:$0xff]  ;;  %v1414_v18 = vld [vmem:[#allocation4 + $0xbf0] sm:$0xff] }
 0x163   : > { %1427 = vmatprep.subr.mxu0 %v1345_v19  ;;  %1498 = vmatprep.subr.mxu1 %v1347_v20  ;;  %v1409_v19 = vld [vmem:[#allocation4 + $0xbc8] sm:$0xff]  ;;  %v1411_v20 = vld [vmem:[#allocation4 + $0xbd8] sm:$0xff] }
 0x164   : > { %1428 = vmatpush1.msra.mxu0 %v1344_v21  ;;  %1499 = vmatpush1.msra.mxu1 %v1346_v22  ;;  %v1408_v21 = vld [vmem:[#allocation4 + $0xbc0] sm:$0xff]  ;;  %v1410_v22 = vld [vmem:[#allocation4 + $0xbd0] sm:$0xff] }
 0x165   : > { %1429 = vmatprep.subr.mxu0 %v1341_v23  ;;  %1500 = vmatprep.subr.mxu1 %v1343_v24  ;;  %v1405_v23 = vld [vmem:[#allocation4 + $0xba8] sm:$0xff]  ;;  %v1407_v24 = vld [vmem:[#allocation4 + $0xbb8] sm:$0xff] }
 0x166   : > { %1430 = vmatpush1.msra.mxu0 %v1340_v25  ;;  %1501 = vmatpush1.msra.mxu1 %v1342_v51  ;;  %v1404_v25 = vld [vmem:[#allocation4 + $0xba0] sm:$0xff]  ;;  %v1406_v51 = vld [vmem:[#allocation4 + $0xbb0] sm:$0xff] }
 0x167   : > { %1431 = vmatprep.subr.mxu0 %v1337_v26  ;;  %1502 = vmatprep.subr.mxu1 %v1339_v27  ;;  %v1401_v26 = vld [vmem:[#allocation4 + $0xb88] sm:$0xff]  ;;  %v1403_v27 = vld [vmem:[#allocation4 + $0xb98] sm:$0xff] }
 0x168   : > { %1432 = vmatpush1.msra.mxu0 %v1336_v57  ;;  %1503 = vmatpush1.msra.mxu1 %v1338_v28  ;;  %v1400_v57 = vld [vmem:[#allocation4 + $0xb80] sm:$0xff]  ;;  %v1402_v28 = vld [vmem:[#allocation4 + $0xb90] sm:$0xff] }
 0x169   : > { %1433 = vmatprep.subr.mxu0 %v1333_v29  ;;  %1504 = vmatprep.subr.mxu1 %v1335_v30  ;;  %v1397_v29 = vld [vmem:[#allocation4 + $0xb68] sm:$0xff]  ;;  %v1399_v30 = vld [vmem:[#allocation4 + $0xb78] sm:$0xff] }
 0x16a   : > { %1434 = vmatpush1.msra.mxu0 %v1332_v31  ;;  %1505 = vmatpush1.msra.mxu1 %v1334_v32  ;;  %v1396_v31 = vld [vmem:[#allocation4 + $0xb60] sm:$0xff]  ;;  %v1398_v32 = vld [vmem:[#allocation4 + $0xb70] sm:$0xff] }
 0x16b   : > { %1435 = vmatprep.subr.mxu0 %v1329_v33  ;;  %1506 = vmatprep.subr.mxu1 %v1331_v34  ;;  %v1393_v33 = vld [vmem:[#allocation4 + $0xb48] sm:$0xff]  ;;  %v1395_v34 = vld [vmem:[#allocation4 + $0xb58] sm:$0xff] }
 0x16c   : > { %1436 = vmatpush1.msra.mxu0 %v1328_v35  ;;  %1507 = vmatpush1.msra.mxu1 %v1330_v36  ;;  %v1392_v35 = vld [vmem:[#allocation4 + $0xb40] sm:$0xff]  ;;  %v1394_v36 = vld [vmem:[#allocation4 + $0xb50] sm:$0xff] }
 0x16d   : > { %1437 = vmatprep.subr.mxu0 %v1325_v37  ;;  %1508 = vmatprep.subr.mxu1 %v1327_v38  ;;  %v1389_v37 = vld [vmem:[#allocation4 + $0xb28] sm:$0xff]  ;;  %v1391_v38 = vld [vmem:[#allocation4 + $0xb38] sm:$0xff] }
 0x16e   : > { %1438 = vmatpush1.msra.mxu0 %v1324_v39  ;;  %1509 = vmatpush1.msra.mxu1 %v1326_v40  ;;  %v1388_v39 = vld [vmem:[#allocation4 + $0xb20] sm:$0xff]  ;;  %v1390_v40 = vld [vmem:[#allocation4 + $0xb30] sm:$0xff] }
 0x16f   : > { %1439 = vmatprep.subr.mxu0 %v1321_v41  ;;  %1510 = vmatprep.subr.mxu1 %v1323_v42  ;;  %v1385_v41 = vld [vmem:[#allocation4 + $0xb08] sm:$0xff]  ;;  %v1387_v42 = vld [vmem:[#allocation4 + $0xb18] sm:$0xff] }
 0x170   : > { %1440 = vmatpush1.msra.mxu0 %v1320_v43  ;;  %1511 = vmatpush1.msra.mxu1 %v1322_v44  ;;  %v1384_v43 = vld [vmem:[#allocation4 + $0xb00] sm:$0xff]  ;;  %v1386_v44 = vld [vmem:[#allocation4 + $0xb10] sm:$0xff] }
 0x171   : > { %1441 = vmatprep.subr.mxu0 %v1317_v45  ;;  %1512 = vmatprep.subr.mxu1 %v1319_v46  ;;  %v1381_v45 = vld [vmem:[#allocation4 + $0xae8] sm:$0xff]  ;;  %v1383_v46 = vld [vmem:[#allocation4 + $0xaf8] sm:$0xff] }
 0x172   : > { %1442 = vmatpush1.msra.mxu0 %v1316_v47  ;;  %1513 = vmatpush1.msra.mxu1 %v1318_v48  ;;  %v1380_v47 = vld [vmem:[#allocation4 + $0xae0] sm:$0xff]  ;;  %v1382_v48 = vld [vmem:[#allocation4 + $0xaf0] sm:$0xff] }
 0x173   : > { %1443 = vmatprep.subr.mxu0 %v1313_v49  ;;  %1514 = vmatprep.subr.mxu1 %v1315_v50  ;;  %v1377_v49 = vld [vmem:[#allocation4 + $0xac8] sm:$0xff]  ;;  %v1379_v50 = vld [vmem:[#allocation4 + $0xad8] sm:$0xff] }
 0x174   : > { %1444 = vmatpush1.msra.mxu0 %v1312_v52  ;;  %1515 = vmatpush1.msra.mxu1 %v1314_v53  ;;  %v1376_v52 = vld [vmem:[#allocation4 + $0xac0] sm:$0xff]  ;;  %v1378_v53 = vld [vmem:[#allocation4 + $0xad0] sm:$0xff] }
 0x175   : > { %1445 = vmatprep.subr.mxu0 %v1309_v54  ;;  %1516 = vmatprep.subr.mxu1 %v1311_v55  ;;  %v1373_v54 = vld [vmem:[#allocation4 + $0xaa8] sm:$0xff]  ;;  %v1375_v55 = vld [vmem:[#allocation4 + $0xab8] sm:$0xff] }
 0x176   : > { %1446 = vmatpush1.msra.mxu0 %v1308_v56  ;;  %1517 = vmatpush1.msra.mxu1 %v1310_v58  ;;  %v1372_v56 = vld [vmem:[#allocation4 + $0xaa0] sm:$0xff]  ;;  %v1374_v58 = vld [vmem:[#allocation4 + $0xab0] sm:$0xff] }
 0x177   : > { %1447 = vmatprep.subr.mxu0 %v1305_v59  ;;  %1518 = vmatprep.subr.mxu1 %v1307_v60  ;;  %v1369_v59 = vld [vmem:[#allocation4 + $0xa88] sm:$0xff]  ;;  %v1371_v60 = vld [vmem:[#allocation4 + $0xa98] sm:$0xff] }
 0x178   : > { %1448 = vmatpush1.msra.mxu0 %v1304_v61  ;;  %1519 = vmatpush1.msra.mxu1 %v1306_v62  ;;  %v1368_v61 = vld [vmem:[#allocation4 + $0xa80] sm:$0xff]  ;;  %v1370_v62 = vld [vmem:[#allocation4 + $0xa90] sm:$0xff] }
 0x179   : > { %1449 = vmatprep.subr.mxu0 %v1301_v63  ;;  %1520 = vmatprep.subr.mxu1 %v1303_v0  ;;  %v1365_v63 = vld [vmem:[#allocation4 + $0xa68] sm:$0xff]  ;;  %v1367_v0 = vld [vmem:[#allocation4 + $0xa78] sm:$0xff] }
 0x17a   : > { %1450 = vmatpush1.msra.mxu0 %v1300_v1  ;;  %1521 = vmatpush1.msra.mxu1 %v1302_v2  ;;  %v1364_v1 = vld [vmem:[#allocation4 + $0xa60] sm:$0xff]  ;;  %v1366_v2 = vld [vmem:[#allocation4 + $0xa70] sm:$0xff] }
 0x17b   : > { %1451 = vmatprep.subr.mxu0 %v1297_v3  ;;  %1522 = vmatprep.subr.mxu1 %v1299_v4  ;;  %v1361_v3 = vld [vmem:[#allocation4 + $0xa48] sm:$0xff]  ;;  %v1363_v4 = vld [vmem:[#allocation4 + $0xa58] sm:$0xff] }
 0x17c   : > { %1452 = vmatpush1.msra.mxu0 %v1296_v5  ;;  %1523 = vmatpush1.msra.mxu1 %v1298_v6  ;;  %v1360_v5 = vld [vmem:[#allocation4 + $0xa40] sm:$0xff]  ;;  %v1362_v6 = vld [vmem:[#allocation4 + $0xa50] sm:$0xff] }
 0x17d   : > { %1453 = vmatprep.subr.mxu0 %v1293_v7  ;;  %1524 = vmatprep.subr.mxu1 %v1295_v8  ;;  %v7729_v7 = vld [vmem:[%s7710_s30 + $0x8] sm:$0xff] }
 0x17e   : > { %1454 = vmatpush1.msra.mxu0 %v1292_v9  ;;  %1525 = vmatpush1.msra.mxu1 %v1294_v10  ;;  %v1420_v8 = vrot.slane %v7729_v7, 2  ;;  %v7733_v9 = vld [vmem:[%s7710_s30 + $0x18] sm:$0xf] }
 0x17f   : > { %1455 = vmatprep.subr.mxu0 %v1289_v11  ;;  %1526 = vmatprep.subr.mxu1 %v1291_v12  ;;  %v1421_v10 = vrot.slane %v7733_v9, 2  ;;  %v1357_v11 = vld [vmem:[#allocation4 + $0xa28] sm:$0xff]  ;;  %v1359_v12 = vld [vmem:[#allocation4 + $0xa38] sm:$0xff] }
 0x180   : > { %1456 = vmatpush1.msra.mxu0 %v1288_v13  ;;  %1527 = vmatpush1.msra.mxu1 %v1290_v14  ;;  %v1356_v13 = vld [vmem:[#allocation4 + $0xa20] sm:$0xff]  ;;  %v1358_v14 = vld [vmem:[#allocation4 + $0xa30] sm:$0xff] }
 0x181   : > { %1457 = vmatprep.subr.mxu0 %v1413_v15  ;;  %1528 = vmatprep.subr.mxu1 %v1415_v16  ;;  %v7737_v15 = vld [vmem:[%s7710_s30] sm:$0xff] }
 0x182   : > { %1458 = vmatpush2.msra.mxu0 %v1412_v17  ;;  %1529 = vmatpush2.msra.mxu1 %v1414_v18  ;;  %v1417_v16 = vrot.slane %v7737_v15, 2  ;;  %v7741_v17 = vld [vmem:[%s7710_s30 + $0x10] sm:$0xf] }
 0x183   : > { %1459 = vmatprep.subr.mxu0 %v1409_v19  ;;  %1530 = vmatprep.subr.mxu1 %v1411_v20  ;;  %v1418_v18 = vrot.slane %v7741_v17, 2  ;;  %v1353_v19 = vld [vmem:[#allocation4 + $0xa08] sm:$0xff]  ;;  %v1355_v20 = vld [vmem:[#allocation4 + $0xa18] sm:$0xff] }
 0x184   : > { %1460 = vmatpush2.msra.mxu0 %v1408_v21  ;;  %1531 = vmatpush2.msra.mxu1 %v1410_v22  ;;  %v1352_v21 = vld [vmem:[#allocation4 + $0xa00] sm:$0xff]  ;;  %v1422_v22 = vsel %vm1416_vm1, %v1420_v8, %v1421_v10  ;;  %v1590_v10 = vld [vmem:[#allocation4 + $0xc90] sm:$0xff] }
 0x185   : > { %1461 = vmatprep.subr.mxu0 %v1405_v23  ;;  %1532 = vmatprep.subr.mxu1 %v1407_v24  ;;  %v1354_v23 = vld [vmem:[#allocation4 + $0xa10] sm:$0xff]  ;;  %v1419_v24 = vsel %vm1416_vm1, %v1417_v16, %v1418_v18  ;;  %v1588_v8 = vld [vmem:[#allocation4 + $0xc80] sm:$0xff]  ;;  %v1581_v16 = vld [vmem:[#allocation4 + $0xc48] sm:$0xff] }
 0x186   : > { %1462 = vmatpush2.msra.mxu0 %v1404_v25  ;;  %1533 = vmatpush2.msra.mxu1 %v1406_v51  ;;  %v1633_v25 = vld [vmem:[#allocation4 + $0xde8] sm:$0xff]  ;;  %v1635_v51 = vld [vmem:[#allocation4 + $0xdf8] sm:$0xff] }
 0x187   : > { %1463 = vmatprep.subr.mxu0 %v1401_v26  ;;  %1534 = vmatprep.subr.mxu1 %v1403_v27  ;;  %v1632_v26 = vld [vmem:[#allocation4 + $0xde0] sm:$0xff]  ;;  %v1634_v27 = vld [vmem:[#allocation4 + $0xdf0] sm:$0xff]  ;;  %v1583_v18 = vld [vmem:[#allocation4 + $0xc58] sm:$0xff] }
 0x188   : > { %1464 = vmatpush2.msra.mxu0 %v1400_v57  ;;  %1535 = vmatpush2.msra.mxu1 %v1402_v28  ;;  %v1629_v57 = vld [vmem:[#allocation4 + $0xdc8] sm:$0xff]  ;;  %v1631_v28 = vld [vmem:[#allocation4 + $0xdd8] sm:$0xff] }
 0x189   : > { %1465 = vmatprep.subr.mxu0 %v1397_v29  ;;  %1536 = vmatprep.subr.mxu1 %v1399_v30  ;;  %v1628_v29 = vld [vmem:[#allocation4 + $0xdc0] sm:$0xff]  ;;  %v1630_v30 = vld [vmem:[#allocation4 + $0xdd0] sm:$0xff] }
 0x18a   : > { %1466 = vmatpush2.msra.mxu0 %v1396_v31  ;;  %1537 = vmatpush2.msra.mxu1 %v1398_v32  ;;  %v1625_v31 = vld [vmem:[#allocation4 + $0xda8] sm:$0xff]  ;;  %v1627_v32 = vld [vmem:[#allocation4 + $0xdb8] sm:$0xff] }
 0x18b   : > { %1467 = vmatprep.subr.mxu0 %v1393_v33  ;;  %1538 = vmatprep.subr.mxu1 %v1395_v34  ;;  %v1624_v33 = vld [vmem:[#allocation4 + $0xda0] sm:$0xff]  ;;  %v1626_v34 = vld [vmem:[#allocation4 + $0xdb0] sm:$0xff] }
 0x18c   : > { %1468 = vmatpush2.msra.mxu0 %v1392_v35  ;;  %1539 = vmatpush2.msra.mxu1 %v1394_v36  ;;  %v1621_v35 = vld [vmem:[#allocation4 + $0xd88] sm:$0xff]  ;;  %v1623_v36 = vld [vmem:[#allocation4 + $0xd98] sm:$0xff] }
 0x18d   : > { %1469 = vmatprep.subr.mxu0 %v1389_v37  ;;  %1540 = vmatprep.subr.mxu1 %v1391_v38  ;;  %v1620_v37 = vld [vmem:[#allocation4 + $0xd80] sm:$0xff]  ;;  %v1622_v38 = vld [vmem:[#allocation4 + $0xd90] sm:$0xff] }
 0x18e   : > { %1470 = vmatpush2.msra.mxu0 %v1388_v39  ;;  %1541 = vmatpush2.msra.mxu1 %v1390_v40  ;;  %v1617_v39 = vld [vmem:[#allocation4 + $0xd68] sm:$0xff]  ;;  %v1619_v40 = vld [vmem:[#allocation4 + $0xd78] sm:$0xff] }
 0x18f   : > { %1471 = vmatprep.subr.mxu0 %v1385_v41  ;;  %1542 = vmatprep.subr.mxu1 %v1387_v42  ;;  %v1616_v41 = vld [vmem:[#allocation4 + $0xd60] sm:$0xff]  ;;  %v1618_v42 = vld [vmem:[#allocation4 + $0xd70] sm:$0xff] }
 0x190   : > { %1472 = vmatpush2.msra.mxu0 %v1384_v43  ;;  %1543 = vmatpush2.msra.mxu1 %v1386_v44  ;;  %v1613_v43 = vld [vmem:[#allocation4 + $0xd48] sm:$0xff]  ;;  %v1615_v44 = vld [vmem:[#allocation4 + $0xd58] sm:$0xff] }
 0x191   : > { %1473 = vmatprep.subr.mxu0 %v1381_v45  ;;  %1544 = vmatprep.subr.mxu1 %v1383_v46  ;;  %v1612_v45 = vld [vmem:[#allocation4 + $0xd40] sm:$0xff]  ;;  %v1614_v46 = vld [vmem:[#allocation4 + $0xd50] sm:$0xff] }
 0x192   : > { %1474 = vmatpush2.msra.mxu0 %v1380_v47  ;;  %1545 = vmatpush2.msra.mxu1 %v1382_v48  ;;  %v1609_v47 = vld [vmem:[#allocation4 + $0xd28] sm:$0xff]  ;;  %v1611_v48 = vld [vmem:[#allocation4 + $0xd38] sm:$0xff] }
 0x193   : > { %1475 = vmatprep.subr.mxu0 %v1377_v49  ;;  %1546 = vmatprep.subr.mxu1 %v1379_v50  ;;  %v1608_v49 = vld [vmem:[#allocation4 + $0xd20] sm:$0xff]  ;;  %v1610_v50 = vld [vmem:[#allocation4 + $0xd30] sm:$0xff] }
 0x194   : > { %1476 = vmatpush2.msra.mxu0 %v1376_v52  ;;  %1547 = vmatpush2.msra.mxu1 %v1378_v53  ;;  %v1605_v52 = vld [vmem:[#allocation4 + $0xd08] sm:$0xff]  ;;  %v1607_v53 = vld [vmem:[#allocation4 + $0xd18] sm:$0xff] }
 0x195   : > { %1477 = vmatprep.subr.mxu0 %v1373_v54  ;;  %1548 = vmatprep.subr.mxu1 %v1375_v55  ;;  %v1604_v54 = vld [vmem:[#allocation4 + $0xd00] sm:$0xff]  ;;  %v1606_v55 = vld [vmem:[#allocation4 + $0xd10] sm:$0xff] }
 0x196   : > { %1478 = vmatpush2.msra.mxu0 %v1372_v56  ;;  %1549 = vmatpush2.msra.mxu1 %v1374_v58  ;;  %v1601_v56 = vld [vmem:[#allocation4 + $0xce8] sm:$0xff]  ;;  %v1603_v58 = vld [vmem:[#allocation4 + $0xcf8] sm:$0xff] }
 0x197   : > { %1479 = vmatprep.subr.mxu0 %v1369_v59  ;;  %1550 = vmatprep.subr.mxu1 %v1371_v60  ;;  %v1600_v59 = vld [vmem:[#allocation4 + $0xce0] sm:$0xff]  ;;  %v1602_v60 = vld [vmem:[#allocation4 + $0xcf0] sm:$0xff] }
 0x198   : > { %1480 = vmatpush2.msra.mxu0 %v1368_v61  ;;  %1551 = vmatpush2.msra.mxu1 %v1370_v62  ;;  %v1597_v61 = vld [vmem:[#allocation4 + $0xcc8] sm:$0xff]  ;;  %v1599_v62 = vld [vmem:[#allocation4 + $0xcd8] sm:$0xff] }
 0x199   : > { %1481 = vmatprep.subr.mxu0 %v1365_v63  ;;  %1552 = vmatprep.subr.mxu1 %v1367_v0  ;;  %v1596_v63 = vld [vmem:[#allocation4 + $0xcc0] sm:$0xff]  ;;  %v1598_v0 = vld [vmem:[#allocation4 + $0xcd0] sm:$0xff] }
 0x19a   : > { %1482 = vmatpush2.msra.mxu0 %v1364_v1  ;;  %1553 = vmatpush2.msra.mxu1 %v1366_v2  ;;  %v1593_v1 = vld [vmem:[#allocation4 + $0xca8] sm:$0xff]  ;;  %v1595_v2 = vld [vmem:[#allocation4 + $0xcb8] sm:$0xff] }
 0x19b   : > { %1483 = vmatprep.subr.mxu0 %v1361_v3  ;;  %1554 = vmatprep.subr.mxu1 %v1363_v4  ;;  %v1592_v3 = vld [vmem:[#allocation4 + $0xca0] sm:$0xff]  ;;  %v1594_v4 = vld [vmem:[#allocation4 + $0xcb0] sm:$0xff] }
 0x19c   : > { %1484 = vmatpush2.msra.mxu0 %v1360_v5  ;;  %1555 = vmatpush2.msra.mxu1 %v1362_v6  ;;  %v1589_v5 = vld [vmem:[#allocation4 + $0xc88] sm:$0xff]  ;;  %v1591_v6 = vld [vmem:[#allocation4 + $0xc98] sm:$0xff] }
 0x19d   : > { %1485 = vmatprep.subr.mxu0 %v1357_v11  ;;  %1556 = vmatprep.subr.mxu1 %v1359_v12  ;;  %v1585_v11 = vld [vmem:[#allocation4 + $0xc68] sm:$0xff]  ;;  %v1587_v12 = vld [vmem:[#allocation4 + $0xc78] sm:$0xff] }
 0x19e   : > { %1486 = vmatpush2.msra.mxu0 %v1356_v13  ;;  %1557 = vmatpush2.msra.mxu1 %v1358_v14  ;;  %v1584_v13 = vld [vmem:[#allocation4 + $0xc60] sm:$0xff]  ;;  %v1586_v14 = vld [vmem:[#allocation4 + $0xc70] sm:$0xff] }
 0x19f   : > { %1487 = vmatprep.subr.mxu0 %v1353_v19  ;;  %1558 = vmatprep.subr.mxu1 %v1355_v20  ;;  %v1580_v19 = vld [vmem:[#allocation4 + $0xc40] sm:$0xff]  ;;  %v1582_v20 = vld [vmem:[#allocation4 + $0xc50] sm:$0xff] }
 0x1a0   : > { %1488 = vmatpush2.msra.mxu0 %v1352_v21  ;;  %1489 = vmatprep.mubr.f32.mxu0 %v1422_v22  ;;  %v1577_v21 = vld [vmem:[#allocation4 + $0xc28] sm:$0xff] }
 0x1a1   : > { %1559 = vmatpush2.msra.mxu1 %v1354_v23  ;;  %1560 = vmatprep.mubr.f32.mxu1 %v1422_v22  ;;  %v1579_v22 = vld [vmem:[#allocation4 + $0xc38] sm:$0xff]  ;;  %v1576_v23 = vld [vmem:[#allocation4 + $0xc20] sm:$0xff] }
 0x1a2   : > { %1490 = vmatmul.mubr.f32.vlgmr.msra.gmra.mxu0 %v1419_v24  ;;  %1561 = vmatmul.mubr.f32.vlgmr.msra.gmra.mxu1 %v1419_v24  ;;  %v1578_v24 = vld [vmem:[#allocation4 + $0xc30] sm:$0xff] }
 0x1a3   : > { %1709 = vmatprep.subr.mxu0 %v1633_v25  ;;  %1780 = vmatprep.subr.mxu1 %v1635_v51  ;;  %v1573_v25 = vld [vmem:[#allocation4 + $0xc08] sm:$0xff]  ;;  %v1575_v51 = vld [vmem:[#allocation4 + $0xc18] sm:$0xff] }
 0x1a4   : > { %1710 = vmatpush1.msra.mxu0 %v1632_v26  ;;  %1781 = vmatpush1.msra.mxu1 %v1634_v27  ;;  %v1572_v26 = vld [vmem:[#allocation4 + $0xc00] sm:$0xff]  ;;  %v1574_v27 = vld [vmem:[#allocation4 + $0xc10] sm:$0xff] }
 0x1a5   : > { %1711 = vmatprep.subr.mxu0 %v1629_v57  ;;  %1782 = vmatprep.subr.mxu1 %v1631_v28  ;;  %v1697_v57 = vld [vmem:[#allocation4 + $0xfe8] sm:$0xff]  ;;  %v1699_v28 = vld [vmem:[#allocation4 + $0xff8] sm:$0xff] }
 0x1a6   : > { %1712 = vmatpush1.msra.mxu0 %v1628_v29  ;;  %1783 = vmatpush1.msra.mxu1 %v1630_v30  ;;  %v1696_v29 = vld [vmem:[#allocation4 + $0xfe0] sm:$0xff]  ;;  %v1698_v30 = vld [vmem:[#allocation4 + $0xff0] sm:$0xff] }
 0x1a7   : > { %1713 = vmatprep.subr.mxu0 %v1625_v31  ;;  %1784 = vmatprep.subr.mxu1 %v1627_v32  ;;  %v1693_v31 = vld [vmem:[#allocation4 + $0xfc8] sm:$0xff]  ;;  %v1695_v32 = vld [vmem:[#allocation4 + $0xfd8] sm:$0xff] }
 0x1a8   : > { %1714 = vmatpush1.msra.mxu0 %v1624_v33  ;;  %1785 = vmatpush1.msra.mxu1 %v1626_v34  ;;  %v1692_v33 = vld [vmem:[#allocation4 + $0xfc0] sm:$0xff]  ;;  %v1694_v34 = vld [vmem:[#allocation4 + $0xfd0] sm:$0xff] }
 0x1a9   : > { %1715 = vmatprep.subr.mxu0 %v1621_v35  ;;  %1786 = vmatprep.subr.mxu1 %v1623_v36  ;;  %v1689_v35 = vld [vmem:[#allocation4 + $0xfa8] sm:$0xff]  ;;  %v1691_v36 = vld [vmem:[#allocation4 + $0xfb8] sm:$0xff] }
 0x1aa   : > { %1716 = vmatpush1.msra.mxu0 %v1620_v37  ;;  %1787 = vmatpush1.msra.mxu1 %v1622_v38  ;;  %v1688_v37 = vld [vmem:[#allocation4 + $0xfa0] sm:$0xff]  ;;  %v1690_v38 = vld [vmem:[#allocation4 + $0xfb0] sm:$0xff] }
 0x1ab   : > { %1717 = vmatprep.subr.mxu0 %v1617_v39  ;;  %1788 = vmatprep.subr.mxu1 %v1619_v40  ;;  %v1685_v39 = vld [vmem:[#allocation4 + $0xf88] sm:$0xff]  ;;  %v1687_v40 = vld [vmem:[#allocation4 + $0xf98] sm:$0xff] }
 0x1ac   : > { %1718 = vmatpush1.msra.mxu0 %v1616_v41  ;;  %1789 = vmatpush1.msra.mxu1 %v1618_v42  ;;  %v1684_v41 = vld [vmem:[#allocation4 + $0xf80] sm:$0xff]  ;;  %v1686_v42 = vld [vmem:[#allocation4 + $0xf90] sm:$0xff] }
 0x1ad   : > { %1719 = vmatprep.subr.mxu0 %v1613_v43  ;;  %1790 = vmatprep.subr.mxu1 %v1615_v44  ;;  %v1681_v43 = vld [vmem:[#allocation4 + $0xf68] sm:$0xff]  ;;  %v1683_v44 = vld [vmem:[#allocation4 + $0xf78] sm:$0xff] }
 0x1ae   : > { %1720 = vmatpush1.msra.mxu0 %v1612_v45  ;;  %1791 = vmatpush1.msra.mxu1 %v1614_v46  ;;  %v1680_v45 = vld [vmem:[#allocation4 + $0xf60] sm:$0xff]  ;;  %v1682_v46 = vld [vmem:[#allocation4 + $0xf70] sm:$0xff] }
 0x1af   : > { %1721 = vmatprep.subr.mxu0 %v1609_v47  ;;  %1792 = vmatprep.subr.mxu1 %v1611_v48  ;;  %v1677_v47 = vld [vmem:[#allocation4 + $0xf48] sm:$0xff]  ;;  %v1679_v48 = vld [vmem:[#allocation4 + $0xf58] sm:$0xff] }
 0x1b0   : > { %1722 = vmatpush1.msra.mxu0 %v1608_v49  ;;  %1793 = vmatpush1.msra.mxu1 %v1610_v50  ;;  %v1676_v49 = vld [vmem:[#allocation4 + $0xf40] sm:$0xff]  ;;  %v1678_v50 = vld [vmem:[#allocation4 + $0xf50] sm:$0xff] }
 0x1b1   : > { %1723 = vmatprep.subr.mxu0 %v1605_v52  ;;  %1794 = vmatprep.subr.mxu1 %v1607_v53  ;;  %v1673_v52 = vld [vmem:[#allocation4 + $0xf28] sm:$0xff]  ;;  %v1675_v53 = vld [vmem:[#allocation4 + $0xf38] sm:$0xff] }
 0x1b2   : > { %1724 = vmatpush1.msra.mxu0 %v1604_v54  ;;  %1795 = vmatpush1.msra.mxu1 %v1606_v55  ;;  %v1672_v54 = vld [vmem:[#allocation4 + $0xf20] sm:$0xff]  ;;  %v1674_v55 = vld [vmem:[#allocation4 + $0xf30] sm:$0xff] }
 0x1b3   : > { %1725 = vmatprep.subr.mxu0 %v1601_v56  ;;  %1796 = vmatprep.subr.mxu1 %v1603_v58  ;;  %v1669_v56 = vld [vmem:[#allocation4 + $0xf08] sm:$0xff]  ;;  %v1671_v58 = vld [vmem:[#allocation4 + $0xf18] sm:$0xff] }
 0x1b4   : > { %1726 = vmatpush1.msra.mxu0 %v1600_v59  ;;  %1797 = vmatpush1.msra.mxu1 %v1602_v60  ;;  %v1668_v59 = vld [vmem:[#allocation4 + $0xf00] sm:$0xff]  ;;  %v1670_v60 = vld [vmem:[#allocation4 + $0xf10] sm:$0xff] }
 0x1b5   : > { %1727 = vmatprep.subr.mxu0 %v1597_v61  ;;  %1798 = vmatprep.subr.mxu1 %v1599_v62  ;;  %v1665_v61 = vld [vmem:[#allocation4 + $0xee8] sm:$0xff]  ;;  %v1667_v62 = vld [vmem:[#allocation4 + $0xef8] sm:$0xff] }
 0x1b6   : > { %1728 = vmatpush1.msra.mxu0 %v1596_v63  ;;  %1799 = vmatpush1.msra.mxu1 %v1598_v0  ;;  %v1664_v63 = vld [vmem:[#allocation4 + $0xee0] sm:$0xff]  ;;  %v1666_v0 = vld [vmem:[#allocation4 + $0xef0] sm:$0xff] }
 0x1b7   : > { %1729 = vmatprep.subr.mxu0 %v1593_v1  ;;  %1800 = vmatprep.subr.mxu1 %v1595_v2  ;;  %v1661_v1 = vld [vmem:[#allocation4 + $0xec8] sm:$0xff]  ;;  %v1663_v2 = vld [vmem:[#allocation4 + $0xed8] sm:$0xff] }
 0x1b8   : > { %1730 = vmatpush1.msra.mxu0 %v1592_v3  ;;  %1801 = vmatpush1.msra.mxu1 %v1594_v4  ;;  %v1660_v3 = vld [vmem:[#allocation4 + $0xec0] sm:$0xff]  ;;  %v1662_v4 = vld [vmem:[#allocation4 + $0xed0] sm:$0xff] }
 0x1b9   : > { %1731 = vmatprep.subr.mxu0 %v1589_v5  ;;  %1802 = vmatprep.subr.mxu1 %v1591_v6  ;;  %v1657_v5 = vld [vmem:[#allocation4 + $0xea8] sm:$0xff]  ;;  %v1659_v6 = vld [vmem:[#allocation4 + $0xeb8] sm:$0xff] }
 0x1ba   : > { %1732 = vmatpush1.msra.mxu0 %v1588_v8  ;;  %1803 = vmatpush1.msra.mxu1 %v1590_v10  ;;  %v1656_v8 = vld [vmem:[#allocation4 + $0xea0] sm:$0xff]  ;;  %v1658_v10 = vld [vmem:[#allocation4 + $0xeb0] sm:$0xff] }
 0x1bb   : > { %1733 = vmatprep.subr.mxu0 %v1585_v11  ;;  %1804 = vmatprep.subr.mxu1 %v1587_v12  ;;  %v1653_v11 = vld [vmem:[#allocation4 + $0xe88] sm:$0xff]  ;;  %v1655_v12 = vld [vmem:[#allocation4 + $0xe98] sm:$0xff] }
 0x1bc   : > { %1734 = vmatpush1.msra.mxu0 %v1584_v13  ;;  %1805 = vmatpush1.msra.mxu1 %v1586_v14  ;;  %v1652_v13 = vld [vmem:[#allocation4 + $0xe80] sm:$0xff]  ;;  %v1654_v14 = vld [vmem:[#allocation4 + $0xe90] sm:$0xff] }
 0x1bd   : > { %1735 = vmatprep.subr.mxu0 %v1581_v16  ;;  %1806 = vmatprep.subr.mxu1 %v1583_v18  ;;  %v1649_v16 = vld [vmem:[#allocation4 + $0xe68] sm:$0xff]  ;;  %v1651_v18 = vld [vmem:[#allocation4 + $0xe78] sm:$0xff] }
 0x1be   : > { %1736 = vmatpush1.msra.mxu0 %v1580_v19  ;;  %1807 = vmatpush1.msra.mxu1 %v1582_v20  ;;  %v1648_v19 = vld [vmem:[#allocation4 + $0xe60] sm:$0xff]  ;;  %v1650_v20 = vld [vmem:[#allocation4 + $0xe70] sm:$0xff] }
 0x1bf   : > { %1737 = vmatprep.subr.mxu0 %v1577_v21  ;;  %1808 = vmatprep.subr.mxu1 %v1579_v22  ;;  %v1645_v21 = vld [vmem:[#allocation4 + $0xe48] sm:$0xff]  ;;  %v1647_v22 = vld [vmem:[#allocation4 + $0xe58] sm:$0xff] }
 0x1c0   : > { %1738 = vmatpush1.msra.mxu0 %v1576_v23  ;;  %1809 = vmatpush1.msra.mxu1 %v1578_v24  ;;  %v1644_v23 = vld [vmem:[#allocation4 + $0xe40] sm:$0xff]  ;;  %v1646_v24 = vld [vmem:[#allocation4 + $0xe50] sm:$0xff] }
 0x1c1   : > { %1739 = vmatprep.subr.mxu0 %v1573_v25  ;;  %1810 = vmatprep.subr.mxu1 %v1575_v51  ;;  %v1704_v25 = vrot.slane %v7729_v7, 3  ;;  %v1705_v51 = vrot.slane %v7733_v9, 3  ;;  %v1636_v7 = vld [vmem:[#allocation4 + $0xe00] sm:$0xff] }
 0x1c2   : > { %1740 = vmatpush1.msra.mxu0 %v1572_v26  ;;  %1811 = vmatpush1.msra.mxu1 %v1574_v27  ;;  %v1641_v26 = vld [vmem:[#allocation4 + $0xe28] sm:$0xff]  ;;  %v1643_v27 = vld [vmem:[#allocation4 + $0xe38] sm:$0xff] }
 0x1c3   : > { %1741 = vmatprep.subr.mxu0 %v1697_v57  ;;  %1812 = vmatprep.subr.mxu1 %v1699_v28  ;;  %v1640_v57 = vld [vmem:[#allocation4 + $0xe20] sm:$0xff]  ;;  %v1642_v28 = vld [vmem:[#allocation4 + $0xe30] sm:$0xff]  ;;  %v1706_v9 = vsel %vm1700_vm2, %v1704_v25, %v1705_v51 }
 0x1c4   : > { %1742 = vmatpush2.msra.mxu0 %v1696_v29  ;;  %1813 = vmatpush2.msra.mxu1 %v1698_v30  ;;  %v1701_v29 = vrot.slane %v7737_v15, 3  ;;  %v1702_v30 = vrot.slane %v7741_v17, 3  ;;  %v1917_v15 = vld [vmem:[#allocation4 + $0x11e8] sm:$0xff]  ;;  %v1919_v17 = vld [vmem:[#allocation4 + $0x11f8] sm:$0xff]  ;;  %v1868_v25 = vld [vmem:[#allocation4 + $0x1060] sm:$0xff] }
 0x1c5   : > { %1743 = vmatprep.subr.mxu0 %v1693_v31  ;;  %1814 = vmatprep.subr.mxu1 %v1695_v32  ;;  %v1637_v31 = vld [vmem:[#allocation4 + $0xe08] sm:$0xff]  ;;  %v1639_v32 = vld [vmem:[#allocation4 + $0xe18] sm:$0xff]  ;;  %v1870_v51 = vld [vmem:[#allocation4 + $0x1070] sm:$0xff] }
 0x1c6   : > { %1744 = vmatpush2.msra.mxu0 %v1692_v33  ;;  %1815 = vmatpush2.msra.mxu1 %v1694_v34  ;;  %v1638_v33 = vld [vmem:[#allocation4 + $0xe10] sm:$0xff]  ;;  %v1703_v34 = vsel %vm1700_vm2, %v1701_v29, %v1702_v30  ;;  %v1861_v29 = vld [vmem:[#allocation4 + $0x1028] sm:$0xff]  ;;  %v1863_v30 = vld [vmem:[#allocation4 + $0x1038] sm:$0xff] }
 0x1c7   : > { %1745 = vmatprep.subr.mxu0 %v1689_v35  ;;  %1816 = vmatprep.subr.mxu1 %v1691_v36  ;;  %v1916_v35 = vld [vmem:[#allocation4 + $0x11e0] sm:$0xff]  ;;  %v1918_v36 = vld [vmem:[#allocation4 + $0x11f0] sm:$0xff] }
 0x1c8   : > { %1746 = vmatpush2.msra.mxu0 %v1688_v37  ;;  %1817 = vmatpush2.msra.mxu1 %v1690_v38  ;;  %v1913_v37 = vld [vmem:[#allocation4 + $0x11c8] sm:$0xff]  ;;  %v1915_v38 = vld [vmem:[#allocation4 + $0x11d8] sm:$0xff] }
 0x1c9   : > { %1747 = vmatprep.subr.mxu0 %v1685_v39  ;;  %1818 = vmatprep.subr.mxu1 %v1687_v40  ;;  %v1912_v39 = vld [vmem:[#allocation4 + $0x11c0] sm:$0xff]  ;;  %v1914_v40 = vld [vmem:[#allocation4 + $0x11d0] sm:$0xff] }
 0x1ca   : > { %1748 = vmatpush2.msra.mxu0 %v1684_v41  ;;  %1819 = vmatpush2.msra.mxu1 %v1686_v42  ;;  %v1909_v41 = vld [vmem:[#allocation4 + $0x11a8] sm:$0xff]  ;;  %v1911_v42 = vld [vmem:[#allocation4 + $0x11b8] sm:$0xff] }
 0x1cb   : > { %1749 = vmatprep.subr.mxu0 %v1681_v43  ;;  %1820 = vmatprep.subr.mxu1 %v1683_v44  ;;  %v1908_v43 = vld [vmem:[#allocation4 + $0x11a0] sm:$0xff]  ;;  %v1910_v44 = vld [vmem:[#allocation4 + $0x11b0] sm:$0xff] }
 0x1cc   : > { %1750 = vmatpush2.msra.mxu0 %v1680_v45  ;;  %1821 = vmatpush2.msra.mxu1 %v1682_v46  ;;  %v1905_v45 = vld [vmem:[#allocation4 + $0x1188] sm:$0xff]  ;;  %v1907_v46 = vld [vmem:[#allocation4 + $0x1198] sm:$0xff] }
 0x1cd   : > { %1751 = vmatprep.subr.mxu0 %v1677_v47  ;;  %1822 = vmatprep.subr.mxu1 %v1679_v48  ;;  %v1904_v47 = vld [vmem:[#allocation4 + $0x1180] sm:$0xff]  ;;  %v1906_v48 = vld [vmem:[#allocation4 + $0x1190] sm:$0xff] }
 0x1ce   : > { %1752 = vmatpush2.msra.mxu0 %v1676_v49  ;;  %1823 = vmatpush2.msra.mxu1 %v1678_v50  ;;  %v1901_v49 = vld [vmem:[#allocation4 + $0x1168] sm:$0xff]  ;;  %v1903_v50 = vld [vmem:[#allocation4 + $0x1178] sm:$0xff] }
 0x1cf   : > { %1753 = vmatprep.subr.mxu0 %v1673_v52  ;;  %1824 = vmatprep.subr.mxu1 %v1675_v53  ;;  %v1900_v52 = vld [vmem:[#allocation4 + $0x1160] sm:$0xff]  ;;  %v1902_v53 = vld [vmem:[#allocation4 + $0x1170] sm:$0xff] }
 0x1d0   : > { %1754 = vmatpush2.msra.mxu0 %v1672_v54  ;;  %1825 = vmatpush2.msra.mxu1 %v1674_v55  ;;  %v1897_v54 = vld [vmem:[#allocation4 + $0x1148] sm:$0xff]  ;;  %v1899_v55 = vld [vmem:[#allocation4 + $0x1158] sm:$0xff] }
 0x1d1   : > { %1755 = vmatprep.subr.mxu0 %v1669_v56  ;;  %1826 = vmatprep.subr.mxu1 %v1671_v58  ;;  %v1896_v56 = vld [vmem:[#allocation4 + $0x1140] sm:$0xff]  ;;  %v1898_v58 = vld [vmem:[#allocation4 + $0x1150] sm:$0xff] }
 0x1d2   : > { %1756 = vmatpush2.msra.mxu0 %v1668_v59  ;;  %1827 = vmatpush2.msra.mxu1 %v1670_v60  ;;  %v1893_v59 = vld [vmem:[#allocation4 + $0x1128] sm:$0xff]  ;;  %v1895_v60 = vld [vmem:[#allocation4 + $0x1138] sm:$0xff] }
 0x1d3   : > { %1757 = vmatprep.subr.mxu0 %v1665_v61  ;;  %1828 = vmatprep.subr.mxu1 %v1667_v62  ;;  %v1892_v61 = vld [vmem:[#allocation4 + $0x1120] sm:$0xff]  ;;  %v1894_v62 = vld [vmem:[#allocation4 + $0x1130] sm:$0xff] }
 0x1d4   : > { %1758 = vmatpush2.msra.mxu0 %v1664_v63  ;;  %1829 = vmatpush2.msra.mxu1 %v1666_v0  ;;  %v1889_v63 = vld [vmem:[#allocation4 + $0x1108] sm:$0xff]  ;;  %v1891_v0 = vld [vmem:[#allocation4 + $0x1118] sm:$0xff] }
 0x1d5   : > { %1759 = vmatprep.subr.mxu0 %v1661_v1  ;;  %1830 = vmatprep.subr.mxu1 %v1663_v2  ;;  %v1888_v1 = vld [vmem:[#allocation4 + $0x1100] sm:$0xff]  ;;  %v1890_v2 = vld [vmem:[#allocation4 + $0x1110] sm:$0xff] }
 0x1d6   : > { %1760 = vmatpush2.msra.mxu0 %v1660_v3  ;;  %1831 = vmatpush2.msra.mxu1 %v1662_v4  ;;  %v1885_v3 = vld [vmem:[#allocation4 + $0x10e8] sm:$0xff]  ;;  %v1887_v4 = vld [vmem:[#allocation4 + $0x10f8] sm:$0xff] }
 0x1d7   : > { %1761 = vmatprep.subr.mxu0 %v1657_v5  ;;  %1832 = vmatprep.subr.mxu1 %v1659_v6  ;;  %v1884_v5 = vld [vmem:[#allocation4 + $0x10e0] sm:$0xff]  ;;  %v1886_v6 = vld [vmem:[#allocation4 + $0x10f0] sm:$0xff] }
 0x1d8   : > { %1762 = vmatpush2.msra.mxu0 %v1656_v8  ;;  %1833 = vmatpush2.msra.mxu1 %v1658_v10  ;;  %v1881_v8 = vld [vmem:[#allocation4 + $0x10c8] sm:$0xff]  ;;  %v1883_v10 = vld [vmem:[#allocation4 + $0x10d8] sm:$0xff] }
 0x1d9   : > { %1763 = vmatprep.subr.mxu0 %v1653_v11  ;;  %1834 = vmatprep.subr.mxu1 %v1655_v12  ;;  %v1880_v11 = vld [vmem:[#allocation4 + $0x10c0] sm:$0xff]  ;;  %v1882_v12 = vld [vmem:[#allocation4 + $0x10d0] sm:$0xff] }
 0x1da   : > { %1764 = vmatpush2.msra.mxu0 %v1652_v13  ;;  %1835 = vmatpush2.msra.mxu1 %v1654_v14  ;;  %v1877_v13 = vld [vmem:[#allocation4 + $0x10a8] sm:$0xff]  ;;  %v1879_v14 = vld [vmem:[#allocation4 + $0x10b8] sm:$0xff] }
 0x1db   : > { %1765 = vmatprep.subr.mxu0 %v1649_v16  ;;  %1836 = vmatprep.subr.mxu1 %v1651_v18  ;;  %v1876_v16 = vld [vmem:[#allocation4 + $0x10a0] sm:$0xff]  ;;  %v1878_v18 = vld [vmem:[#allocation4 + $0x10b0] sm:$0xff] }
 0x1dc   : > { %1766 = vmatpush2.msra.mxu0 %v1648_v19  ;;  %1837 = vmatpush2.msra.mxu1 %v1650_v20  ;;  %v1873_v19 = vld [vmem:[#allocation4 + $0x1088] sm:$0xff]  ;;  %v1875_v20 = vld [vmem:[#allocation4 + $0x1098] sm:$0xff] }
 0x1dd   : > { %1767 = vmatprep.subr.mxu0 %v1645_v21  ;;  %1838 = vmatprep.subr.mxu1 %v1647_v22  ;;  %v1872_v21 = vld [vmem:[#allocation4 + $0x1080] sm:$0xff]  ;;  %v1874_v22 = vld [vmem:[#allocation4 + $0x1090] sm:$0xff] }
 0x1de   : > { %1768 = vmatpush2.msra.mxu0 %v1644_v23  ;;  %1839 = vmatpush2.msra.mxu1 %v1646_v24  ;;  %v1869_v23 = vld [vmem:[#allocation4 + $0x1068] sm:$0xff]  ;;  %v1871_v24 = vld [vmem:[#allocation4 + $0x1078] sm:$0xff] }
 0x1df   : > { %1769 = vmatprep.subr.mxu0 %v1641_v26  ;;  %1840 = vmatprep.subr.mxu1 %v1643_v27  ;;  %v1865_v26 = vld [vmem:[#allocation4 + $0x1048] sm:$0xff]  ;;  %v1867_v27 = vld [vmem:[#allocation4 + $0x1058] sm:$0xff] }
 0x1e0   : > { %1770 = vmatpush2.msra.mxu0 %v1640_v57  ;;  %1841 = vmatpush2.msra.mxu1 %v1642_v28  ;;  %v1864_v57 = vld [vmem:[#allocation4 + $0x1040] sm:$0xff]  ;;  %v1866_v28 = vld [vmem:[#allocation4 + $0x1050] sm:$0xff] }
 0x1e1   : > { %1771 = vmatprep.subr.mxu0 %v1637_v31  ;;  %1842 = vmatprep.subr.mxu1 %v1639_v32  ;;  %v1860_v31 = vld [vmem:[#allocation4 + $0x1020] sm:$0xff]  ;;  %v1862_v32 = vld [vmem:[#allocation4 + $0x1030] sm:$0xff] }
 0x1e2   : > { %1772 = vmatpush2.msra.mxu0 %v1636_v7  ;;  %1773 = vmatprep.mubr.f32.mxu0 %v1706_v9  ;;  %v1857_v7 = vld [vmem:[#allocation4 + $0x1008] sm:$0xff] }
 0x1e3   : > { %1843 = vmatpush2.msra.mxu1 %v1638_v33  ;;  %1844 = vmatprep.mubr.f32.mxu1 %v1706_v9  ;;  %v1859_v9 = vld [vmem:[#allocation4 + $0x1018] sm:$0xff]  ;;  %v1856_v33 = vld [vmem:[#allocation4 + $0x1000] sm:$0xff] }
 0x1e4   : > { %1774 = vmatmul.mubr.f32.vlgmr.msra.gmra.mxu0 %v1703_v34  ;;  %1845 = vmatmul.mubr.f32.vlgmr.msra.gmra.mxu1 %v1703_v34  ;;  %v1858_v34 = vld [vmem:[#allocation4 + $0x1010] sm:$0xff] }
 0x1e5   : > { %1993 = vmatprep.subr.mxu0 %v1917_v15  ;;  %2064 = vmatprep.subr.mxu1 %v1919_v17  ;;  %v1981_v15 = vld [vmem:[#allocation4 + $0x13e8] sm:$0xff]  ;;  %v1983_v17 = vld [vmem:[#allocation4 + $0x13f8] sm:$0xff] }
 0x1e6   : > { %1994 = vmatpush1.msra.mxu0 %v1916_v35  ;;  %2065 = vmatpush1.msra.mxu1 %v1918_v36  ;;  %v1980_v35 = vld [vmem:[#allocation4 + $0x13e0] sm:$0xff]  ;;  %v1982_v36 = vld [vmem:[#allocation4 + $0x13f0] sm:$0xff] }
 0x1e7   : > { %1995 = vmatprep.subr.mxu0 %v1913_v37  ;;  %2066 = vmatprep.subr.mxu1 %v1915_v38  ;;  %v1977_v37 = vld [vmem:[#allocation4 + $0x13c8] sm:$0xff]  ;;  %v1979_v38 = vld [vmem:[#allocation4 + $0x13d8] sm:$0xff] }
 0x1e8   : > { %1996 = vmatpush1.msra.mxu0 %v1912_v39  ;;  %2067 = vmatpush1.msra.mxu1 %v1914_v40  ;;  %v1976_v39 = vld [vmem:[#allocation4 + $0x13c0] sm:$0xff]  ;;  %v1978_v40 = vld [vmem:[#allocation4 + $0x13d0] sm:$0xff] }
 0x1e9   : > { %1997 = vmatprep.subr.mxu0 %v1909_v41  ;;  %2068 = vmatprep.subr.mxu1 %v1911_v42  ;;  %v1973_v41 = vld [vmem:[#allocation4 + $0x13a8] sm:$0xff]  ;;  %v1975_v42 = vld [vmem:[#allocation4 + $0x13b8] sm:$0xff] }
 0x1ea   : > { %1998 = vmatpush1.msra.mxu0 %v1908_v43  ;;  %2069 = vmatpush1.msra.mxu1 %v1910_v44  ;;  %v1972_v43 = vld [vmem:[#allocation4 + $0x13a0] sm:$0xff]  ;;  %v1974_v44 = vld [vmem:[#allocation4 + $0x13b0] sm:$0xff] }
 0x1eb   : > { %1999 = vmatprep.subr.mxu0 %v1905_v45  ;;  %2070 = vmatprep.subr.mxu1 %v1907_v46  ;;  %v1969_v45 = vld [vmem:[#allocation4 + $0x1388] sm:$0xff]  ;;  %v1971_v46 = vld [vmem:[#allocation4 + $0x1398] sm:$0xff] }
 0x1ec   : > { %2000 = vmatpush1.msra.mxu0 %v1904_v47  ;;  %2071 = vmatpush1.msra.mxu1 %v1906_v48  ;;  %v1968_v47 = vld [vmem:[#allocation4 + $0x1380] sm:$0xff]  ;;  %v1970_v48 = vld [vmem:[#allocation4 + $0x1390] sm:$0xff] }
 0x1ed   : > { %2001 = vmatprep.subr.mxu0 %v1901_v49  ;;  %2072 = vmatprep.subr.mxu1 %v1903_v50  ;;  %v1965_v49 = vld [vmem:[#allocation4 + $0x1368] sm:$0xff]  ;;  %v1967_v50 = vld [vmem:[#allocation4 + $0x1378] sm:$0xff] }
 0x1ee   : > { %2002 = vmatpush1.msra.mxu0 %v1900_v52  ;;  %2073 = vmatpush1.msra.mxu1 %v1902_v53  ;;  %v1964_v52 = vld [vmem:[#allocation4 + $0x1360] sm:$0xff]  ;;  %v1966_v53 = vld [vmem:[#allocation4 + $0x1370] sm:$0xff] }
 0x1ef   : > { %2003 = vmatprep.subr.mxu0 %v1897_v54  ;;  %2074 = vmatprep.subr.mxu1 %v1899_v55  ;;  %v1961_v54 = vld [vmem:[#allocation4 + $0x1348] sm:$0xff]  ;;  %v1963_v55 = vld [vmem:[#allocation4 + $0x1358] sm:$0xff] }
 0x1f0   : > { %2004 = vmatpush1.msra.mxu0 %v1896_v56  ;;  %2075 = vmatpush1.msra.mxu1 %v1898_v58  ;;  %v1960_v56 = vld [vmem:[#allocation4 + $0x1340] sm:$0xff]  ;;  %v1962_v58 = vld [vmem:[#allocation4 + $0x1350] sm:$0xff] }
 0x1f1   : > { %2005 = vmatprep.subr.mxu0 %v1893_v59  ;;  %2076 = vmatprep.subr.mxu1 %v1895_v60  ;;  %v1957_v59 = vld [vmem:[#allocation4 + $0x1328] sm:$0xff]  ;;  %v1959_v60 = vld [vmem:[#allocation4 + $0x1338] sm:$0xff] }
 0x1f2   : > { %2006 = vmatpush1.msra.mxu0 %v1892_v61  ;;  %2077 = vmatpush1.msra.mxu1 %v1894_v62  ;;  %v1956_v61 = vld [vmem:[#allocation4 + $0x1320] sm:$0xff]  ;;  %v1958_v62 = vld [vmem:[#allocation4 + $0x1330] sm:$0xff] }
 0x1f3   : > { %2007 = vmatprep.subr.mxu0 %v1889_v63  ;;  %2078 = vmatprep.subr.mxu1 %v1891_v0  ;;  %v1953_v63 = vld [vmem:[#allocation4 + $0x1308] sm:$0xff]  ;;  %v1955_v0 = vld [vmem:[#allocation4 + $0x1318] sm:$0xff] }
 0x1f4   : > { %2008 = vmatpush1.msra.mxu0 %v1888_v1  ;;  %2079 = vmatpush1.msra.mxu1 %v1890_v2  ;;  %v1952_v1 = vld [vmem:[#allocation4 + $0x1300] sm:$0xff]  ;;  %v1954_v2 = vld [vmem:[#allocation4 + $0x1310] sm:$0xff] }
 0x1f5   : > { %2009 = vmatprep.subr.mxu0 %v1885_v3  ;;  %2080 = vmatprep.subr.mxu1 %v1887_v4  ;;  %v1949_v3 = vld [vmem:[#allocation4 + $0x12e8] sm:$0xff]  ;;  %v1951_v4 = vld [vmem:[#allocation4 + $0x12f8] sm:$0xff] }
 0x1f6   : > { %2010 = vmatpush1.msra.mxu0 %v1884_v5  ;;  %2081 = vmatpush1.msra.mxu1 %v1886_v6  ;;  %v1948_v5 = vld [vmem:[#allocation4 + $0x12e0] sm:$0xff]  ;;  %v1950_v6 = vld [vmem:[#allocation4 + $0x12f0] sm:$0xff] }
 0x1f7   : > { %2011 = vmatprep.subr.mxu0 %v1881_v8  ;;  %2082 = vmatprep.subr.mxu1 %v1883_v10  ;;  %v1945_v8 = vld [vmem:[#allocation4 + $0x12c8] sm:$0xff]  ;;  %v1947_v10 = vld [vmem:[#allocation4 + $0x12d8] sm:$0xff] }
 0x1f8   : > { %2012 = vmatpush1.msra.mxu0 %v1880_v11  ;;  %2083 = vmatpush1.msra.mxu1 %v1882_v12  ;;  %v1944_v11 = vld [vmem:[#allocation4 + $0x12c0] sm:$0xff]  ;;  %v1946_v12 = vld [vmem:[#allocation4 + $0x12d0] sm:$0xff] }
 0x1f9   : > { %2013 = vmatprep.subr.mxu0 %v1877_v13  ;;  %2084 = vmatprep.subr.mxu1 %v1879_v14  ;;  %v1941_v13 = vld [vmem:[#allocation4 + $0x12a8] sm:$0xff]  ;;  %v1943_v14 = vld [vmem:[#allocation4 + $0x12b8] sm:$0xff] }
 0x1fa   : > { %2014 = vmatpush1.msra.mxu0 %v1876_v16  ;;  %2085 = vmatpush1.msra.mxu1 %v1878_v18  ;;  %v1940_v16 = vld [vmem:[#allocation4 + $0x12a0] sm:$0xff]  ;;  %v1942_v18 = vld [vmem:[#allocation4 + $0x12b0] sm:$0xff] }
 0x1fb   : > { %2015 = vmatprep.subr.mxu0 %v1873_v19  ;;  %2086 = vmatprep.subr.mxu1 %v1875_v20  ;;  %v1937_v19 = vld [vmem:[#allocation4 + $0x1288] sm:$0xff]  ;;  %v1939_v20 = vld [vmem:[#allocation4 + $0x1298] sm:$0xff] }
 0x1fc   : > { %2016 = vmatpush1.msra.mxu0 %v1872_v21  ;;  %2087 = vmatpush1.msra.mxu1 %v1874_v22  ;;  %v1936_v21 = vld [vmem:[#allocation4 + $0x1280] sm:$0xff]  ;;  %v1938_v22 = vld [vmem:[#allocation4 + $0x1290] sm:$0xff] }
 0x1fd   : > { %2017 = vmatprep.subr.mxu0 %v1869_v23  ;;  %2088 = vmatprep.subr.mxu1 %v1871_v24  ;;  %v1933_v23 = vld [vmem:[#allocation4 + $0x1268] sm:$0xff]  ;;  %v1935_v24 = vld [vmem:[#allocation4 + $0x1278] sm:$0xff] }
 0x1fe   : > { %2018 = vmatpush1.msra.mxu0 %v1868_v25  ;;  %2089 = vmatpush1.msra.mxu1 %v1870_v51  ;;  %v1932_v25 = vld [vmem:[#allocation4 + $0x1260] sm:$0xff]  ;;  %v1934_v51 = vld [vmem:[#allocation4 + $0x1270] sm:$0xff] }
 0x1ff   : > { %2019 = vmatprep.subr.mxu0 %v1865_v26  ;;  %2090 = vmatprep.subr.mxu1 %v1867_v27  ;;  %v1929_v26 = vld [vmem:[#allocation4 + $0x1248] sm:$0xff]  ;;  %v1931_v27 = vld [vmem:[#allocation4 + $0x1258] sm:$0xff] }
 0x200   : > { %2020 = vmatpush1.msra.mxu0 %v1864_v57  ;;  %2091 = vmatpush1.msra.mxu1 %v1866_v28  ;;  %v1928_v57 = vld [vmem:[#allocation4 + $0x1240] sm:$0xff]  ;;  %v1930_v28 = vld [vmem:[#allocation4 + $0x1250] sm:$0xff] }
 0x201   : > { %2021 = vmatprep.subr.mxu0 %v1861_v29  ;;  %2092 = vmatprep.subr.mxu1 %v1863_v30  ;;  %v6998_v29 = vld [vmem:[%s7710_s30 + $0x8] sm:$0xff] }
 0x202   : > { %2022 = vmatpush1.msra.mxu0 %v1860_v31  ;;  %2093 = vmatpush1.msra.mxu1 %v1862_v32  ;;  %v1988_v30 = vrot.slane %v6998_v29, 4  ;;  %v6999_v31 = vld [vmem:[%s7710_s30 + $0x18] sm:$0xf] }
 0x203   : > { %2023 = vmatprep.subr.mxu0 %v1857_v7  ;;  %2094 = vmatprep.subr.mxu1 %v1859_v9  ;;  %v1989_v32 = vrot.slane %v6999_v31, 4  ;;  %v1925_v7 = vld [vmem:[#allocation4 + $0x1228] sm:$0xff]  ;;  %v1927_v9 = vld [vmem:[#allocation4 + $0x1238] sm:$0xff] }
 0x204   : > { %2024 = vmatpush1.msra.mxu0 %v1856_v33  ;;  %2095 = vmatpush1.msra.mxu1 %v1858_v34  ;;  %v1924_v33 = vld [vmem:[#allocation4 + $0x1220] sm:$0xff]  ;;  %v1926_v34 = vld [vmem:[#allocation4 + $0x1230] sm:$0xff] }
 0x205   : > { %2025 = vmatprep.subr.mxu0 %v1981_v15  ;;  %2096 = vmatprep.subr.mxu1 %v1983_v17  ;;  %v7000_v15 = vld [vmem:[%s7710_s30] sm:$0xff]  ;;  %v2315_v29 = vld [vmem:[#allocation8 + $0x840] sm:$0xff]  ;;  %v2314_v31 = vld [vmem:[#allocation8 + $0x838] sm:$0xff] }
 0x206   : > { %2026 = vmatpush2.msra.mxu0 %v1980_v35  ;;  %2097 = vmatpush2.msra.mxu1 %v1982_v36  ;;  %v1985_v17 = vrot.slane %v7000_v15, 4  ;;  %v7001_v35 = vld [vmem:[%s7710_s30 + $0x10] sm:$0xf]  ;;  %v2311_v15 = vld [vmem:[#allocation8 + $0x820] sm:$0xff] }
 0x207   : > { %2027 = vmatprep.subr.mxu0 %v1977_v37  ;;  %2098 = vmatprep.subr.mxu1 %v1979_v38  ;;  %v1986_v36 = vrot.slane %v7001_v35, 4  ;;  %v1921_v37 = vld [vmem:[#allocation4 + $0x1208] sm:$0xff]  ;;  %v1923_v38 = vld [vmem:[#allocation4 + $0x1218] sm:$0xff] }
 0x208   : > { %2028 = vmatpush2.msra.mxu0 %v1976_v39  ;;  %2099 = vmatpush2.msra.mxu1 %v1978_v40  ;;  %v1920_v39 = vld [vmem:[#allocation4 + $0x1200] sm:$0xff]  ;;  %v1990_v40 = vsel %vm1984_vm3, %v1988_v30, %v1989_v32 }
 0x209   : > { %2029 = vmatprep.subr.mxu0 %v1973_v41  ;;  %2100 = vmatprep.subr.mxu1 %v1975_v42  ;;  %v1922_v41 = vld [vmem:[#allocation4 + $0x1210] sm:$0xff]  ;;  %v1987_v42 = vsel %vm1984_vm3, %v1985_v17, %v1986_v36  ;;  %v2379_v30 = vld [vmem:[#allocation8 + $0xa40] sm:$0xff]  ;;  %v2378_v32 = vld [vmem:[#allocation8 + $0xa38] sm:$0xff] }
 0x20a   : > { %2030 = vmatpush2.msra.mxu0 %v1972_v43  ;;  %2101 = vmatpush2.msra.mxu1 %v1974_v44  ;;  %v2338_v43 = vld [vmem:[#allocation8 + $0x8f8] sm:$0xff]  ;;  %v2375_v17 = vld [vmem:[#allocation8 + $0xa20] sm:$0xff] }
 0x20b   : > { %2031 = vmatprep.subr.mxu0 %v1969_v45  ;;  %2102 = vmatprep.subr.mxu1 %v1971_v46  ;;  %v2402_v44 = vld [vmem:[#allocation8 + $0xaf8] sm:$0xff]  ;;  %v2337_v45 = vld [vmem:[#allocation8 + $0x8f0] sm:$0xff] }
 0x20c   : > { %2032 = vmatpush2.msra.mxu0 %v1968_v47  ;;  %2103 = vmatpush2.msra.mxu1 %v1970_v48  ;;  %v2401_v46 = vld [vmem:[#allocation8 + $0xaf0] sm:$0xff]  ;;  %v2336_v47 = vld [vmem:[#allocation8 + $0x8e8] sm:$0xff]  ;;  %v2310_v35 = vld [vmem:[#allocation8 + $0x818] sm:$0xff] }
 0x20d   : > { %2033 = vmatprep.subr.mxu0 %v1965_v49  ;;  %2104 = vmatprep.subr.mxu1 %v1967_v50  ;;  %v2400_v48 = vld [vmem:[#allocation8 + $0xae8] sm:$0xff]  ;;  %v2335_v49 = vld [vmem:[#allocation8 + $0x8e0] sm:$0xff]  ;;  %v2374_v36 = vld [vmem:[#allocation8 + $0xa18] sm:$0xff] }
 0x20e   : > { %2034 = vmatpush2.msra.mxu0 %v1964_v52  ;;  %2105 = vmatpush2.msra.mxu1 %v1966_v53  ;;  %v2399_v50 = vld [vmem:[#allocation8 + $0xae0] sm:$0xff]  ;;  %v2334_v52 = vld [vmem:[#allocation8 + $0x8d8] sm:$0xff] }
 0x20f   : > { %2035 = vmatprep.subr.mxu0 %v1961_v54  ;;  %2106 = vmatprep.subr.mxu1 %v1963_v55  ;;  %v2398_v53 = vld [vmem:[#allocation8 + $0xad8] sm:$0xff]  ;;  %v2333_v54 = vld [vmem:[#allocation8 + $0x8d0] sm:$0xff] }
 0x210   : > { %2036 = vmatpush2.msra.mxu0 %v1960_v56  ;;  %2107 = vmatpush2.msra.mxu1 %v1962_v58  ;;  %v2397_v55 = vld [vmem:[#allocation8 + $0xad0] sm:$0xff]  ;;  %v2332_v56 = vld [vmem:[#allocation8 + $0x8c8] sm:$0xff] }
 0x211   : > { %2037 = vmatprep.subr.mxu0 %v1957_v59  ;;  %2108 = vmatprep.subr.mxu1 %v1959_v60  ;;  %v2396_v58 = vld [vmem:[#allocation8 + $0xac8] sm:$0xff]  ;;  %v2331_v59 = vld [vmem:[#allocation8 + $0x8c0] sm:$0xff] }
 0x212   : > { %2038 = vmatpush2.msra.mxu0 %v1956_v61  ;;  %2109 = vmatpush2.msra.mxu1 %v1958_v62  ;;  %v2395_v60 = vld [vmem:[#allocation8 + $0xac0] sm:$0xff]  ;;  %v2330_v61 = vld [vmem:[#allocation8 + $0x8b8] sm:$0xff] }
 0x213   : > { %2039 = vmatprep.subr.mxu0 %v1953_v63  ;;  %2110 = vmatprep.subr.mxu1 %v1955_v0  ;;  %v2394_v62 = vld [vmem:[#allocation8 + $0xab8] sm:$0xff]  ;;  %v2329_v63 = vld [vmem:[#allocation8 + $0x8b0] sm:$0xff] }
 0x214   : > { %2040 = vmatpush2.msra.mxu0 %v1952_v1  ;;  %2111 = vmatpush2.msra.mxu1 %v1954_v2  ;;  %v2393_v0 = vld [vmem:[#allocation8 + $0xab0] sm:$0xff]  ;;  %v2328_v1 = vld [vmem:[#allocation8 + $0x8a8] sm:$0xff] }
 0x215   : > { %2041 = vmatprep.subr.mxu0 %v1949_v3  ;;  %2112 = vmatprep.subr.mxu1 %v1951_v4  ;;  %v2392_v2 = vld [vmem:[#allocation8 + $0xaa8] sm:$0xff]  ;;  %v2327_v3 = vld [vmem:[#allocation8 + $0x8a0] sm:$0xff] }
 0x216   : > { %2042 = vmatpush2.msra.mxu0 %v1948_v5  ;;  %2113 = vmatpush2.msra.mxu1 %v1950_v6  ;;  %v2391_v4 = vld [vmem:[#allocation8 + $0xaa0] sm:$0xff]  ;;  %v2326_v5 = vld [vmem:[#allocation8 + $0x898] sm:$0xff] }
 0x217   : > { %2043 = vmatprep.subr.mxu0 %v1945_v8  ;;  %2114 = vmatprep.subr.mxu1 %v1947_v10  ;;  %v2390_v6 = vld [vmem:[#allocation8 + $0xa98] sm:$0xff]  ;;  %v2325_v8 = vld [vmem:[#allocation8 + $0x890] sm:$0xff] }
 0x218   : > { %2044 = vmatpush2.msra.mxu0 %v1944_v11  ;;  %2115 = vmatpush2.msra.mxu1 %v1946_v12  ;;  %v2389_v10 = vld [vmem:[#allocation8 + $0xa90] sm:$0xff]  ;;  %v2324_v11 = vld [vmem:[#allocation8 + $0x888] sm:$0xff] }
 0x219   : > { %2045 = vmatprep.subr.mxu0 %v1941_v13  ;;  %2116 = vmatprep.subr.mxu1 %v1943_v14  ;;  %v2388_v12 = vld [vmem:[#allocation8 + $0xa88] sm:$0xff]  ;;  %v2323_v13 = vld [vmem:[#allocation8 + $0x880] sm:$0xff] }
 0x21a   : > { %2046 = vmatpush2.msra.mxu0 %v1940_v16  ;;  %2117 = vmatpush2.msra.mxu1 %v1942_v18  ;;  %v2387_v14 = vld [vmem:[#allocation8 + $0xa80] sm:$0xff]  ;;  %v2322_v16 = vld [vmem:[#allocation8 + $0x878] sm:$0xff] }
 0x21b   : > { %2047 = vmatprep.subr.mxu0 %v1937_v19  ;;  %2118 = vmatprep.subr.mxu1 %v1939_v20  ;;  %v2386_v18 = vld [vmem:[#allocation8 + $0xa78] sm:$0xff]  ;;  %v2321_v19 = vld [vmem:[#allocation8 + $0x870] sm:$0xff] }
 0x21c   : > { %2048 = vmatpush2.msra.mxu0 %v1936_v21  ;;  %2119 = vmatpush2.msra.mxu1 %v1938_v22  ;;  %v2385_v20 = vld [vmem:[#allocation8 + $0xa70] sm:$0xff]  ;;  %v2320_v21 = vld [vmem:[#allocation8 + $0x868] sm:$0xff] }
 0x21d   : > { %2049 = vmatprep.subr.mxu0 %v1933_v23  ;;  %2120 = vmatprep.subr.mxu1 %v1935_v24  ;;  %v2384_v22 = vld [vmem:[#allocation8 + $0xa68] sm:$0xff]  ;;  %v2319_v23 = vld [vmem:[#allocation8 + $0x860] sm:$0xff] }
 0x21e   : > { %2050 = vmatpush2.msra.mxu0 %v1932_v25  ;;  %2121 = vmatpush2.msra.mxu1 %v1934_v51  ;;  %v2383_v24 = vld [vmem:[#allocation8 + $0xa60] sm:$0xff]  ;;  %v2318_v25 = vld [vmem:[#allocation8 + $0x858] sm:$0xff] }
 0x21f   : > { %2051 = vmatprep.subr.mxu0 %v1929_v26  ;;  %2122 = vmatprep.subr.mxu1 %v1931_v27  ;;  %v2382_v51 = vld [vmem:[#allocation8 + $0xa58] sm:$0xff]  ;;  %v2317_v26 = vld [vmem:[#allocation8 + $0x850] sm:$0xff] }
 0x220   : > { %2052 = vmatpush2.msra.mxu0 %v1928_v57  ;;  %2123 = vmatpush2.msra.mxu1 %v1930_v28  ;;  %v2381_v27 = vld [vmem:[#allocation8 + $0xa50] sm:$0xff]  ;;  %v2316_v57 = vld [vmem:[#allocation8 + $0x848] sm:$0xff] }
 0x221   : > { %2053 = vmatprep.subr.mxu0 %v1925_v7  ;;  %2124 = vmatprep.subr.mxu1 %v1927_v9  ;;  %v2380_v28 = vld [vmem:[#allocation8 + $0xa48] sm:$0xff]  ;;  %v2313_v7 = vld [vmem:[#allocation8 + $0x830] sm:$0xff] }
 0x222   : > { %2054 = vmatpush2.msra.mxu0 %v1924_v33  ;;  %2125 = vmatpush2.msra.mxu1 %v1926_v34  ;;  %v2377_v9 = vld [vmem:[#allocation8 + $0xa30] sm:$0xff]  ;;  %v2312_v33 = vld [vmem:[#allocation8 + $0x828] sm:$0xff] }
 0x223   : > { %2055 = vmatprep.subr.mxu0 %v1921_v37  ;;  %2126 = vmatprep.subr.mxu1 %v1923_v38  ;;  %v2376_v34 = vld [vmem:[#allocation8 + $0xa28] sm:$0xff]  ;;  %v2309_v37 = vld [vmem:[#allocation8 + $0x810] sm:$0xff] }
 0x224   : > { %2056 = vmatpush2.msra.mxu0 %v1920_v39  ;;  %2057 = vmatprep.mubr.f32.mxu0 %v1990_v40  ;;  %v2373_v38 = vld [vmem:[#allocation8 + $0xa10] sm:$0xff]  ;;  %v2308_v39 = vld [vmem:[#allocation8 + $0x808] sm:$0xff] }
 0x225   : > { %2127 = vmatpush2.msra.mxu1 %v1922_v41  ;;  %2128 = vmatprep.mubr.f32.mxu1 %v1990_v40  ;;  %v2372_v40 = vld [vmem:[#allocation8 + $0xa08] sm:$0xff]  ;;  %v2307_v41 = vld [vmem:[#allocation8 + $0x800] sm:$0xff] }
 0x226   : > { %2058 = vmatmul.mubr.f32.vlgmr.msra.gmra.mxu0 %v1987_v42  ;;  %2129 = vmatmul.mubr.f32.vlgmr.msra.gmra.mxu1 %v1987_v42  ;;  %v2371_v42 = vld [vmem:[#allocation8 + $0xa00] sm:$0xff] }
 0x227   : > { %2447 = vmatprep.subr.mxu0 %v2338_v43  ;;  %2518 = vmatprep.subr.mxu1 %v2402_v44  ;;  %v2370_v43 = vld [vmem:[#allocation8 + $0x9f8] sm:$0xff] }
 0x228   : > { %2448 = vmatpush1.msra.mxu0 %v2337_v45  ;;  %2519 = vmatpush1.msra.mxu1 %v2401_v46  ;;  %v2434_v44 = vld [vmem:[#allocation8 + $0xbf8] sm:$0xff]  ;;  %v2369_v45 = vld [vmem:[#allocation8 + $0x9f0] sm:$0xff] }
 0x229   : > { %2449 = vmatprep.subr.mxu0 %v2336_v47  ;;  %2520 = vmatprep.subr.mxu1 %v2400_v48  ;;  %v2433_v46 = vld [vmem:[#allocation8 + $0xbf0] sm:$0xff]  ;;  %v2368_v47 = vld [vmem:[#allocation8 + $0x9e8] sm:$0xff] }
 0x22a   : > { %2450 = vmatpush1.msra.mxu0 %v2335_v49  ;;  %2521 = vmatpush1.msra.mxu1 %v2399_v50  ;;  %v2432_v48 = vld [vmem:[#allocation8 + $0xbe8] sm:$0xff]  ;;  %v2367_v49 = vld [vmem:[#allocation8 + $0x9e0] sm:$0xff] }
 0x22b   : > { %2451 = vmatprep.subr.mxu0 %v2334_v52  ;;  %2522 = vmatprep.subr.mxu1 %v2398_v53  ;;  %v2431_v50 = vld [vmem:[#allocation8 + $0xbe0] sm:$0xff]  ;;  %v2366_v52 = vld [vmem:[#allocation8 + $0x9d8] sm:$0xff] }
 0x22c   : > { %2452 = vmatpush1.msra.mxu0 %v2333_v54  ;;  %2523 = vmatpush1.msra.mxu1 %v2397_v55  ;;  %v2430_v53 = vld [vmem:[#allocation8 + $0xbd8] sm:$0xff]  ;;  %v2365_v54 = vld [vmem:[#allocation8 + $0x9d0] sm:$0xff] }
 0x22d   : > { %2453 = vmatprep.subr.mxu0 %v2332_v56  ;;  %2524 = vmatprep.subr.mxu1 %v2396_v58  ;;  %v2429_v55 = vld [vmem:[#allocation8 + $0xbd0] sm:$0xff]  ;;  %v2364_v56 = vld [vmem:[#allocation8 + $0x9c8] sm:$0xff] }
 0x22e   : > { %2454 = vmatpush1.msra.mxu0 %v2331_v59  ;;  %2525 = vmatpush1.msra.mxu1 %v2395_v60  ;;  %v2428_v58 = vld [vmem:[#allocation8 + $0xbc8] sm:$0xff]  ;;  %v2363_v59 = vld [vmem:[#allocation8 + $0x9c0] sm:$0xff] }
 0x22f   : > { %2455 = vmatprep.subr.mxu0 %v2330_v61  ;;  %2526 = vmatprep.subr.mxu1 %v2394_v62  ;;  %v2427_v60 = vld [vmem:[#allocation8 + $0xbc0] sm:$0xff]  ;;  %v2362_v61 = vld [vmem:[#allocation8 + $0x9b8] sm:$0xff] }
 0x230   : > { %2456 = vmatpush1.msra.mxu0 %v2329_v63  ;;  %2527 = vmatpush1.msra.mxu1 %v2393_v0  ;;  %v2426_v62 = vld [vmem:[#allocation8 + $0xbb8] sm:$0xff]  ;;  %v2361_v63 = vld [vmem:[#allocation8 + $0x9b0] sm:$0xff] }
 0x231   : > { %2457 = vmatprep.subr.mxu0 %v2328_v1  ;;  %2528 = vmatprep.subr.mxu1 %v2392_v2  ;;  %v2425_v0 = vld [vmem:[#allocation8 + $0xbb0] sm:$0xff]  ;;  %v2360_v1 = vld [vmem:[#allocation8 + $0x9a8] sm:$0xff] }
 0x232   : > { %2458 = vmatpush1.msra.mxu0 %v2327_v3  ;;  %2529 = vmatpush1.msra.mxu1 %v2391_v4  ;;  %v2424_v2 = vld [vmem:[#allocation8 + $0xba8] sm:$0xff]  ;;  %v2359_v3 = vld [vmem:[#allocation8 + $0x9a0] sm:$0xff] }
 0x233   : > { %2459 = vmatprep.subr.mxu0 %v2326_v5  ;;  %2530 = vmatprep.subr.mxu1 %v2390_v6  ;;  %v2423_v4 = vld [vmem:[#allocation8 + $0xba0] sm:$0xff]  ;;  %v2358_v5 = vld [vmem:[#allocation8 + $0x998] sm:$0xff] }
 0x234   : > { %2460 = vmatpush1.msra.mxu0 %v2325_v8  ;;  %2531 = vmatpush1.msra.mxu1 %v2389_v10  ;;  %v2422_v6 = vld [vmem:[#allocation8 + $0xb98] sm:$0xff]  ;;  %v2357_v8 = vld [vmem:[#allocation8 + $0x990] sm:$0xff] }
 0x235   : > { %2461 = vmatprep.subr.mxu0 %v2324_v11  ;;  %2532 = vmatprep.subr.mxu1 %v2388_v12  ;;  %v2421_v10 = vld [vmem:[#allocation8 + $0xb90] sm:$0xff]  ;;  %v2356_v11 = vld [vmem:[#allocation8 + $0x988] sm:$0xff] }
 0x236   : > { %2462 = vmatpush1.msra.mxu0 %v2323_v13  ;;  %2533 = vmatpush1.msra.mxu1 %v2387_v14  ;;  %v2420_v12 = vld [vmem:[#allocation8 + $0xb88] sm:$0xff]  ;;  %v2355_v13 = vld [vmem:[#allocation8 + $0x980] sm:$0xff] }
 0x237   : > { %2463 = vmatprep.subr.mxu0 %v2322_v16  ;;  %2534 = vmatprep.subr.mxu1 %v2386_v18  ;;  %v2419_v14 = vld [vmem:[#allocation8 + $0xb80] sm:$0xff]  ;;  %v2354_v16 = vld [vmem:[#allocation8 + $0x978] sm:$0xff] }
 0x238   : > { %2464 = vmatpush1.msra.mxu0 %v2321_v19  ;;  %2535 = vmatpush1.msra.mxu1 %v2385_v20  ;;  %v2418_v18 = vld [vmem:[#allocation8 + $0xb78] sm:$0xff]  ;;  %v2353_v19 = vld [vmem:[#allocation8 + $0x970] sm:$0xff] }
 0x239   : > { %2465 = vmatprep.subr.mxu0 %v2320_v21  ;;  %2536 = vmatprep.subr.mxu1 %v2384_v22  ;;  %v2417_v20 = vld [vmem:[#allocation8 + $0xb70] sm:$0xff]  ;;  %v2352_v21 = vld [vmem:[#allocation8 + $0x968] sm:$0xff] }
 0x23a   : > { %2466 = vmatpush1.msra.mxu0 %v2319_v23  ;;  %2537 = vmatpush1.msra.mxu1 %v2383_v24  ;;  %v2416_v22 = vld [vmem:[#allocation8 + $0xb68] sm:$0xff]  ;;  %v2351_v23 = vld [vmem:[#allocation8 + $0x960] sm:$0xff] }
 0x23b   : > { %2467 = vmatprep.subr.mxu0 %v2318_v25  ;;  %2538 = vmatprep.subr.mxu1 %v2382_v51  ;;  %v2415_v24 = vld [vmem:[#allocation8 + $0xb60] sm:$0xff]  ;;  %v2350_v25 = vld [vmem:[#allocation8 + $0x958] sm:$0xff] }
 0x23c   : > { %2468 = vmatpush1.msra.mxu0 %v2317_v26  ;;  %2539 = vmatpush1.msra.mxu1 %v2381_v27  ;;  %v2414_v51 = vld [vmem:[#allocation8 + $0xb58] sm:$0xff]  ;;  %v2349_v26 = vld [vmem:[#allocation8 + $0x950] sm:$0xff] }
 0x23d   : > { %2469 = vmatprep.subr.mxu0 %v2316_v57  ;;  %2540 = vmatprep.subr.mxu1 %v2380_v28  ;;  %v2413_v27 = vld [vmem:[#allocation8 + $0xb50] sm:$0xff]  ;;  %v2348_v57 = vld [vmem:[#allocation8 + $0x948] sm:$0xff] }
 0x23e   : > { %2470 = vmatpush1.msra.mxu0 %v2315_v29  ;;  %2541 = vmatpush1.msra.mxu1 %v2379_v30  ;;  %v2412_v28 = vld [vmem:[#allocation8 + $0xb48] sm:$0xff]  ;;  %v2347_v29 = vld [vmem:[#allocation8 + $0x940] sm:$0xff] }
 0x23f   : > { %2471 = vmatprep.subr.mxu0 %v2314_v31  ;;  %2542 = vmatprep.subr.mxu1 %v2378_v32  ;;  %v2411_v30 = vld [vmem:[#allocation8 + $0xb40] sm:$0xff]  ;;  %v2346_v31 = vld [vmem:[#allocation8 + $0x938] sm:$0xff] }
 0x240   : > { %2472 = vmatpush1.msra.mxu0 %v2313_v7  ;;  %2543 = vmatpush1.msra.mxu1 %v2377_v9  ;;  %v2410_v32 = vld [vmem:[#allocation8 + $0xb38] sm:$0xff]  ;;  %v2345_v7 = vld [vmem:[#allocation8 + $0x930] sm:$0xff] }
 0x241   : > { %2473 = vmatprep.subr.mxu0 %v2312_v33  ;;  %2544 = vmatprep.subr.mxu1 %v2376_v34  ;;  %v2409_v9 = vld [vmem:[#allocation8 + $0xb30] sm:$0xff]  ;;  %v2344_v33 = vld [vmem:[#allocation8 + $0x928] sm:$0xff] }
 0x242   : > { %2474 = vmatpush1.msra.mxu0 %v2311_v15  ;;  %2545 = vmatpush1.msra.mxu1 %v2375_v17  ;;  %v2408_v34 = vld [vmem:[#allocation8 + $0xb28] sm:$0xff]  ;;  %v2343_v15 = vld [vmem:[#allocation8 + $0x920] sm:$0xff] }
 0x243   : > { %2475 = vmatprep.subr.mxu0 %v2310_v35  ;;  %2546 = vmatprep.subr.mxu1 %v2374_v36  ;;  %v2407_v17 = vld [vmem:[#allocation8 + $0xb20] sm:$0xff]  ;;  %v2342_v35 = vld [vmem:[#allocation8 + $0x918] sm:$0xff] }
 0x244   : > { %2476 = vmatpush1.msra.mxu0 %v2309_v37  ;;  %2547 = vmatpush1.msra.mxu1 %v2373_v38  ;;  %v2406_v36 = vld [vmem:[#allocation8 + $0xb18] sm:$0xff]  ;;  %v2341_v37 = vld [vmem:[#allocation8 + $0x910] sm:$0xff] }
 0x245   : > { %2477 = vmatprep.subr.mxu0 %v2308_v39  ;;  %2548 = vmatprep.subr.mxu1 %v2372_v40  ;;  %v2405_v38 = vld [vmem:[#allocation8 + $0xb10] sm:$0xff]  ;;  %v2340_v39 = vld [vmem:[#allocation8 + $0x908] sm:$0xff] }
 0x246   : > { %2478 = vmatpush1.msra.mxu0 %v2307_v41  ;;  %2549 = vmatpush1.msra.mxu1 %v2371_v42  ;;  %v2404_v40 = vld [vmem:[#allocation8 + $0xb08] sm:$0xff]  ;;  %v2339_v41 = vld [vmem:[#allocation8 + $0x900] sm:$0xff] }
 0x247   : > { %2479 = vmatprep.subr.mxu0 %v2370_v43  ;;  %2550 = vmatprep.subr.mxu1 %v2434_v44  ;;  %v2403_v42 = vld [vmem:[#allocation8 + $0xb00] sm:$0xff]  ;;  %v7758_v43 = vld [vmem:[#allocation8 + $0x4f8] sm:$0xff] }
 0x248   : > { %2480 = vmatpush2.msra.mxu0 %v2369_v45  ;;  %2551 = vmatpush2.msra.mxu1 %v2433_v46  ;;  %v7760_v44 = vld [vmem:[#allocation8 + $0x6f8] sm:$0xff]  ;;  %v1069_v45 = vpop.f32.mrf.mxu0  ;;  %v1140_v46 = vpop.f32.mrf.mxu1 }
 0x249   : > { %2481 = vmatprep.subr.mxu0 %v2368_v47  ;;  %2552 = vmatprep.subr.mxu1 %v2432_v48 }
 0x24a   : > { %2482 = vmatpush2.msra.mxu0 %v2367_v49  ;;  %2553 = vmatpush2.msra.mxu1 %v2431_v50  ;;  %v1071_v47 = vpop.f32.mrf.mxu0  ;;  %v1142_v48 = vpop.f32.mrf.mxu1 }
 0x24b   : > { %2483 = vmatprep.subr.mxu0 %v2366_v52  ;;  %2554 = vmatprep.subr.mxu1 %v2430_v53 }
 0x24c   : > { %2484 = vmatpush2.msra.mxu0 %v2365_v54  ;;  %2555 = vmatpush2.msra.mxu1 %v2429_v55  ;;  %v1211_v49 = vpop.f32.mrf.mxu0  ;;  %v1282_v50 = vpop.f32.mrf.mxu1  ;;  %v8869_v54 = vlaneseq }
 0x24d   : > { %2485 = vmatprep.subr.mxu0 %v2364_v56  ;;  %2556 = vmatprep.subr.mxu1 %v2428_v58 }
 0x24e   : > { %2486 = vmatpush2.msra.mxu0 %v2363_v59  ;;  %2557 = vmatpush2.msra.mxu1 %v2427_v60  ;;  %v1213_v52 = vpop.f32.mrf.mxu0  ;;  %v1284_v53 = vpop.f32.mrf.mxu1  ;;  %v7765_v58 = vshrl.u32 %v8869_v54, 7  ;;  %v7945_v54 = vld [vmem:[#allocation8 + $0x428] sm:$0xff] }
 0x24f   : > { %2487 = vmatprep.subr.mxu0 %v2362_v61  ;;  %2558 = vmatprep.subr.mxu1 %v2426_v62  ;;  %8979 = vst [vmem:[#allocation40_spill] sm:$0xff] %v7945_v54 }
 0x250   : > { %2488 = vmatpush2.msra.mxu0 %v2361_v63  ;;  %2559 = vmatpush2.msra.mxu1 %v2425_v0  ;;  %8973 = vst [vmem:[#allocation34_spill] sm:$0xff] %v7765_v58  ;;  %v1212_v63 = vadd.f32 %v1211_v49, %v1069_v45  ;;  %v1283_v0 = vadd.f32 %v1282_v50, %v1140_v46  ;;  %v7789_v46 = vld [vmem:[#allocation8 + $0x4f0] sm:$0xff]  ;;  %v7803_v49 = vld [vmem:[#allocation8 + $0x6e8] sm:$0xff]  ;;  %v7807_v50 = vld [vmem:[#allocation8 + $0x4e0] sm:$0xff] }
 0x251   : > { %2489 = vmatprep.subr.mxu0 %v2360_v1  ;;  %2560 = vmatprep.subr.mxu1 %v2424_v2  ;;  %v7768_v1 = vsub.s32 0, %v7765_v58  ;;  %v2151_v2 = vsub.s32 2, %v7765_v58 }
 0x252   : > { %2490 = vmatpush2.msra.mxu0 %v2359_v3  ;;  %2561 = vmatpush2.msra.mxu1 %v2423_v4  ;;  %v1214_v3 = vadd.f32 %v1213_v52, %v1071_v47  ;;  %v1285_v4 = vadd.f32 %v1284_v53, %v1142_v48  ;;  %v7791_v47 = vld [vmem:[#allocation8 + $0x6f0] sm:$0xff]  ;;  %v7797_v48 = vld [vmem:[#allocation8 + $0x4e8] sm:$0xff]  ;;  %v7809_v52 = vld [vmem:[#allocation8 + $0x6e0] sm:$0xff] }
 0x253   : > { %2491 = vmatprep.subr.mxu0 %v2358_v5  ;;  %2562 = vmatprep.subr.mxu1 %v2422_v6  ;;  %8974 = vst [vmem:[#allocation35_spill] sm:$0xff] %v7768_v1  ;;  %v2139_v5 = vld [vmem:[#allocation6] sm:$0xf] }
 0x254   : > { %2492 = vmatpush2.msra.mxu0 %v2357_v8  ;;  %2563 = vmatpush2.msra.mxu1 %v2421_v10  ;;  %v7813_v53 = vld [vmem:[#allocation8 + $0x4d8] sm:$0xff] }
 0x255   : > { %2493 = vmatprep.subr.mxu0 %v2356_v11  ;;  %2564 = vmatprep.subr.mxu1 %v2420_v12 }
 0x256   : > { %2494 = vmatpush2.msra.mxu0 %v2355_v13  ;;  %2565 = vmatpush2.msra.mxu1 %v2419_v14  ;;  %v7772_v14 = vsub.s32 1, %v7765_v58 }
 0x257   : > { %2495 = vmatprep.subr.mxu0 %v2354_v16  ;;  %2566 = vmatprep.subr.mxu1 %v2418_v18  ;;  %v2155_v16 = vsub.s32 3, %v7765_v58  ;;  %v7965_v58 = vld [vmem:[#allocation8 + $0x610] sm:$0xff] }
 0x258   : > { %2496 = vmatpush2.msra.mxu0 %v2353_v19  ;;  %2567 = vmatpush2.msra.mxu1 %v2417_v20  ;;  %8975 = vst [vmem:[#allocation36_spill] sm:$0xff] %v7772_v14  ;;  %v2144_v20 = vrot.slane %v2139_v5, %v7768_v1  ;;  %v7963_v1 = vld [vmem:[#allocation8 + $0x410] sm:$0xff]  ;;  %8986 = vst [vmem:[#allocation47_spill] sm:$0xff] %v7965_v58 }
 0x259   : > { %2497 = vmatprep.subr.mxu0 %v2352_v21  ;;  %2568 = vmatprep.subr.mxu1 %v2416_v22  ;;  %v2152_v21 = vrot.slane %v2139_v5, %v2151_v2  ;;  %v7839_v2 = vld [vmem:[#allocation8 + $0x6b8] sm:$0xff]  ;;  %8985 = vst [vmem:[#allocation46_spill] sm:$0xff] %v7963_v1 }
 0x25a   : > { %2498 = vmatpush2.msra.mxu0 %v2351_v23  ;;  %2569 = vmatpush2.msra.mxu1 %v2415_v24 }
 0x25b   : > { %2499 = vmatprep.subr.mxu0 %v2350_v25  ;;  %2570 = vmatprep.subr.mxu1 %v2414_v51 }
 0x25c   : > { %2500 = vmatpush2.msra.mxu0 %v2349_v26  ;;  %2571 = vmatpush2.msra.mxu1 %v2413_v27 }
 0x25d   : > { %2501 = vmatprep.subr.mxu0 %v2348_v57  ;;  %2572 = vmatprep.subr.mxu1 %v2412_v28  ;;  %v2148_v57 = vrot.slane %v2139_v5, %v7772_v14  ;;  %v7959_v14 = vld [vmem:[#allocation8 + $0x618] sm:$0xff] }
 0x25e   : > { %2502 = vmatpush2.msra.mxu0 %v2347_v29  ;;  %2573 = vmatpush2.msra.mxu1 %v2411_v30  ;;  %v2156_v29 = vrot.slane %v2139_v5, %v2155_v16  ;;  %v7849_v5 = vld [vmem:[#allocation8 + $0x4a8] sm:$0xff]  ;;  %v7869_v16 = vld [vmem:[#allocation8 + $0x690] sm:$0xff]  ;;  %8984 = vst [vmem:[#allocation45_spill] sm:$0xff] %v7959_v14 }
 0x25f   : > { %2503 = vmatprep.subr.mxu0 %v2346_v31  ;;  %2574 = vmatprep.subr.mxu1 %v2410_v32 }
 0x260   : > { %2504 = vmatpush2.msra.mxu0 %v2345_v7  ;;  %2575 = vmatpush2.msra.mxu1 %v2409_v9 }
 0x261   : > { %2505 = vmatprep.subr.mxu0 %v2344_v33  ;;  %2576 = vmatprep.subr.mxu1 %v2408_v34 }
 0x262   : > { %2506 = vmatpush2.msra.mxu0 %v2343_v15  ;;  %2577 = vmatpush2.msra.mxu1 %v2407_v17  ;;  %v1491_v55 = vpop.f32.mrf.mxu0  ;;  %v1562_v56 = vpop.f32.mrf.mxu1 }
 0x263   : > { %2507 = vmatprep.subr.mxu0 %v2342_v35  ;;  %2578 = vmatprep.subr.mxu1 %v2406_v36  ;;  %v1567_v6 = vadd.f32 %v1491_v55, %v1212_v63  ;;  %v1569_v8 = vadd.f32 %v1562_v56, %v1283_v0  ;;  %v7815_v55 = vld [vmem:[#allocation8 + $0x6d8] sm:$0xff]  ;;  %v7819_v56 = vld [vmem:[#allocation8 + $0x4d0] sm:$0xff]  ;;  %v7833_v63 = vld [vmem:[#allocation8 + $0x6c0] sm:$0xff] }
 0x264   : > { %2508 = vmatpush2.msra.mxu0 %v2341_v37  ;;  %2579 = vmatpush2.msra.mxu1 %v2405_v38  ;;  %v1493_v59 = vpop.f32.mrf.mxu0  ;;  %v1564_v60 = vpop.f32.mrf.mxu1  ;;  %v7837_v0 = vld [vmem:[#allocation8 + $0x4b8] sm:$0xff] }
 0x265   : > { %2509 = vmatprep.subr.mxu0 %v2340_v39  ;;  %2580 = vmatprep.subr.mxu1 %v2404_v40  ;;  %v1568_v10 = vadd.f32 %v1493_v59, %v1214_v3  ;;  %v1570_v11 = vadd.f32 %v1564_v60, %v1285_v4  ;;  %v7821_v59 = vld [vmem:[#allocation8 + $0x6d0] sm:$0xff]  ;;  %v7825_v60 = vld [vmem:[#allocation8 + $0x4c8] sm:$0xff] }
 0x266   : > { %2510 = vmatpush2.msra.mxu0 %v2339_v41  ;;  %2581 = vmatpush2.msra.mxu1 %v2403_v42  ;;  %v7843_v3 = vld [vmem:[#allocation8 + $0x4b0] sm:$0xff] }
 0x267   : > { %2589 = vmatprep.subr.mxu0 %v7758_v43  ;;  %2660 = vmatprep.subr.mxu1 %v7760_v44  ;;  %v7845_v4 = vld [vmem:[#allocation8 + $0x6b0] sm:$0xff] }
 0x2a4   : > { %v1775_v61 = vpop.f32.mrf.mxu0  ;;  %v1846_v62 = vpop.f32.mrf.mxu1 }
 0x2a5   : > { %v1851_v18 = vadd.f32 %v1775_v61, %v1567_v6  ;;  %v1853_v19 = vadd.f32 %v1846_v62, %v1569_v8  ;;  %v7827_v61 = vld [vmem:[#allocation8 + $0x6c8] sm:$0xff]  ;;  %v7831_v62 = vld [vmem:[#allocation8 + $0x4c0] sm:$0xff] }
 0x2a6   : > { %v1777_v12 = vpop.f32.mrf.mxu0  ;;  %v1848_v13 = vpop.f32.mrf.mxu1  ;;  %v7851_v6 = vld [vmem:[#allocation8 + $0x6a8] sm:$0xff]  ;;  %v7855_v8 = vld [vmem:[#allocation8 + $0x4a0] sm:$0xff] }
 0x2a7   : > { %v1852_v24 = vadd.f32 %v1777_v12, %v1568_v10  ;;  %v1854_v25 = vadd.f32 %v1848_v13, %v1570_v11  ;;  %v7857_v10 = vld [vmem:[#allocation8 + $0x6a0] sm:$0xff]  ;;  %v7861_v11 = vld [vmem:[#allocation8 + $0x498] sm:$0xff]  ;;  %v7867_v13 = vld [vmem:[#allocation8 + $0x490] sm:$0xff] }
 0x2a8   : > { %v7863_v12 = vld [vmem:[#allocation8 + $0x698] sm:$0xff] }
 0x2e6   : > { %v2059_v22 = vpop.f32.mrf.mxu0  ;;  %v2130_v23 = vpop.f32.mrf.mxu1 }
 0x2e7   : > { %v2135_v51 = vadd.f32 %v2059_v22, %v1851_v18  ;;  %v2137_v26 = vadd.f32 %v2130_v23, %v1853_v19  ;;  %v7873_v18 = vld [vmem:[#allocation8 + $0x488] sm:$0xff]  ;;  %v7885_v22 = vld [vmem:[#allocation8 + $0x478] sm:$0xff] }
 0x2e8   : > { %v2061_v27 = vpop.f32.mrf.mxu0  ;;  %v2132_v28 = vpop.f32.mrf.mxu1  ;;  %v7875_v19 = vld [vmem:[#allocation8 + $0x688] sm:$0xff]  ;;  %v7887_v23 = vld [vmem:[#allocation8 + $0x678] sm:$0xff] }
 0x2e9   : > { %v2161_v30 = vadd.f32 %v2144_v20, %v2135_v51  ;;  %v2163_v31 = vadd.f32 %v2152_v21, %v2137_v26  ;;  %v2136_v32 = vadd.f32 %v2061_v27, %v1852_v24  ;;  %v2138_v7 = vadd.f32 %v2132_v28, %v1854_v25  ;;  %v7879_v20 = vld [vmem:[#allocation8 + $0x480] sm:$0xff]  ;;  %v7891_v24 = vld [vmem:[#allocation8 + $0x470] sm:$0xff]  ;;  %v7897_v51 = vld [vmem:[#allocation8 + $0x468] sm:$0xff] }
 0x2ea   : > { %v7881_v21 = vld [vmem:[#allocation8 + $0x680] sm:$0xff]  ;;  %v7893_v25 = vld [vmem:[#allocation8 + $0x670] sm:$0xff]  ;;  %v7899_v26 = vld [vmem:[#allocation8 + $0x668] sm:$0xff] }
 0x2eb   : > { %v2169_v9 = vmul.f32 0.01, %v2161_v30  ;;  %v2171_v33 = vmul.f32 0.01, %v2163_v31  ;;  %vm2165_vm4 = vcmp.ge.f32.partialorder %v2161_v30, 0.0  ;;  %vm2167_vm5 = vcmp.ge.f32.partialorder %v2163_v31, 0.0 }
 0x2ec   : > { %v2162_v34 = vadd.f32 %v2148_v57, %v2136_v32  ;;  %v2164_v15 = vadd.f32 %v2156_v29, %v2138_v7  ;;  %v7903_v27 = vld [vmem:[#allocation8 + $0x460] sm:$0xff]  ;;  %v7909_v28 = vld [vmem:[#allocation8 + $0x458] sm:$0xff]  ;;  %v7921_v32 = vld [vmem:[#allocation8 + $0x448] sm:$0xff] }
 0x2ed   : > { %v7777_v36 = vsel %vm2165_vm4, %v2161_v30, %v2169_v9  ;;  %v7779_v37 = vsel %vm2167_vm5, %v2163_v31, %v2171_v33  ;;  %v7905_v57 = vld [vmem:[#allocation8 + $0x660] sm:$0xff]  ;;  %v7911_v29 = vld [vmem:[#allocation8 + $0x658] sm:$0xff]  ;;  %v7915_v30 = vld [vmem:[#allocation8 + $0x450] sm:$0xff] }
 0x2ee   : > { %vm2166_vm6 = vcmp.ge.f32.partialorder %v2162_v34, 0.0  ;;  %v2170_v17 = vmul.f32 0.01, %v2162_v34  ;;  %vm2168_vm7 = vcmp.ge.f32.partialorder %v2164_v15, 0.0  ;;  %v2172_v35 = vmul.f32 0.01, %v2164_v15 }
 0x2ef   : > { %v8871_v42 = vrot.slane %v7777_v36, 1  ;;  %v8870_v45 = vrot.slane %v7779_v37, 1  ;;  %v7917_v31 = vld [vmem:[#allocation8 + $0x650] sm:$0xff]  ;;  %v7923_v7 = vld [vmem:[#allocation8 + $0x648] sm:$0xff]  ;;  %v7927_v9 = vld [vmem:[#allocation8 + $0x440] sm:$0xff] }
 0x2f0   : > { %v7781_v38 = vsel %vm2166_vm6, %v2162_v34, %v2170_v17  ;;  %v7783_v39 = vsel %vm2168_vm7, %v2164_v15, %v2172_v35  ;;  %v7929_v33 = vld [vmem:[#allocation8 + $0x640] sm:$0xff]  ;;  %v7933_v34 = vld [vmem:[#allocation8 + $0x438] sm:$0xff]  ;;  %v7939_v17 = vld [vmem:[#allocation8 + $0x430] sm:$0xff] }
 0x2f1   : > { %v8873_v40 = vrot.slane %v7781_v38, 1  ;;  %v8872_v41 = vrot.slane %v7783_v39, 1  ;;  %v7935_v15 = vld [vmem:[#allocation8 + $0x638] sm:$0xff]  ;;  %8977 = vst [vmem:[#allocation38_spill] sm:$0xff] %v7939_v17  ;;  %v7941_v35 = vld [vmem:[#allocation8 + $0x630] sm:$0xff] }
 0x2f2   : > { %8976 = vst [vmem:[#allocation37_spill] sm:$0xff] %v7935_v15  ;;  %8978 = vst [vmem:[#allocation39_spill] sm:$0xff] %v7941_v35 }
 0x2f3   : > { %2511 = vmatprep.mubr.f32.mxu0 %v8873_v40  ;;  %2582 = vmatprep.mubr.f32.mxu1 %v8872_v41  ;;  %v7953_v41 = vld [vmem:[#allocation8 + $0x620] sm:$0xff]  ;;  %v7957_v40 = vld [vmem:[#allocation8 + $0x418] sm:$0xff] }
 0x2f4   : > { %2512 = vmatmul.mubr.f32.vlgmr.msra.gmra.mxu0 %v8871_v42  ;;  %2583 = vmatmul.mubr.f32.vlgmr.msra.gmra.mxu1 %v8870_v45  ;;  %v7947_v45 = vld [vmem:[#allocation8 + $0x628] sm:$0xff]  ;;  %v7951_v42 = vld [vmem:[#allocation8 + $0x420] sm:$0xff]  ;;  %8982 = vst [vmem:[#allocation43_spill] sm:$0xff] %v7953_v41  ;;  %8983 = vst [vmem:[#allocation44_spill] sm:$0xff] %v7957_v40 }
 0x2f5   : > { %2590 = vmatpush1.msra.mxu0 %v7789_v46  ;;  %2661 = vmatpush1.msra.mxu1 %v7791_v47  ;;  %8980 = vst [vmem:[#allocation41_spill] sm:$0xff] %v7947_v45  ;;  %8981 = vst [vmem:[#allocation42_spill] sm:$0xff] %v7951_v42 }
 0x2f6   : > { %2591 = vmatprep.subr.mxu0 %v7797_v48  ;;  %2653 = vmatprep.mubr.f32.mxu0 %v7781_v38 }
 0x2f7   : > { %2662 = vmatprep.subr.mxu1 %v7803_v49  ;;  %2724 = vmatprep.mubr.f32.mxu1 %v7783_v39 }
 0x2f8   : > { %2592 = vmatpush1.msra.mxu0 %v7807_v50  ;;  %2663 = vmatpush1.msra.mxu1 %v7809_v52 }
 0x2f9   : > { %2593 = vmatprep.subr.mxu0 %v7813_v53  ;;  %2664 = vmatprep.subr.mxu1 %v7815_v55 }
 0x2fa   : > { %2594 = vmatpush1.msra.mxu0 %v7819_v56  ;;  %2665 = vmatpush1.msra.mxu1 %v7821_v59 }
 0x2fb   : > { %2595 = vmatprep.subr.mxu0 %v7825_v60  ;;  %2666 = vmatprep.subr.mxu1 %v7827_v61 }
 0x2fc   : > { %2596 = vmatpush1.msra.mxu0 %v7831_v62  ;;  %2667 = vmatpush1.msra.mxu1 %v7833_v63 }
 0x2fd   : > { %2597 = vmatprep.subr.mxu0 %v7837_v0  ;;  %2668 = vmatprep.subr.mxu1 %v7839_v2 }
 0x2fe   : > { %2598 = vmatpush1.msra.mxu0 %v7843_v3  ;;  %2669 = vmatpush1.msra.mxu1 %v7845_v4 }
 0x2ff   : > { %2599 = vmatprep.subr.mxu0 %v7849_v5  ;;  %2670 = vmatprep.subr.mxu1 %v7851_v6 }
 0x300   : > { %2600 = vmatpush1.msra.mxu0 %v7855_v8  ;;  %2671 = vmatpush1.msra.mxu1 %v7857_v10 }
 0x301   : > { %2601 = vmatprep.subr.mxu0 %v7861_v11  ;;  %2672 = vmatprep.subr.mxu1 %v7863_v12 }
 0x302   : > { %2602 = vmatpush1.msra.mxu0 %v7867_v13  ;;  %2673 = vmatpush1.msra.mxu1 %v7869_v16 }
 0x303   : > { %2603 = vmatprep.subr.mxu0 %v7873_v18  ;;  %2674 = vmatprep.subr.mxu1 %v7875_v19 }
 0x304   : > { %2604 = vmatpush1.msra.mxu0 %v7879_v20  ;;  %2675 = vmatpush1.msra.mxu1 %v7881_v21 }
 0x305   : > { %2605 = vmatprep.subr.mxu0 %v7885_v22  ;;  %2676 = vmatprep.subr.mxu1 %v7887_v23 }
 0x306   : > { %2606 = vmatpush1.msra.mxu0 %v7891_v24  ;;  %2677 = vmatpush1.msra.mxu1 %v7893_v25 }
 0x307   : > { %2607 = vmatprep.subr.mxu0 %v7897_v51  ;;  %2678 = vmatprep.subr.mxu1 %v7899_v26 }
 0x308   : > { %2608 = vmatpush1.msra.mxu0 %v7903_v27  ;;  %2679 = vmatpush1.msra.mxu1 %v7905_v57 }
 0x309   : > { %2609 = vmatprep.subr.mxu0 %v7909_v28  ;;  %2680 = vmatprep.subr.mxu1 %v7911_v29 }
 0x30a   : > { %2610 = vmatpush1.msra.mxu0 %v7915_v30  ;;  %2681 = vmatpush1.msra.mxu1 %v7917_v31 }
 0x30b   : > { %2611 = vmatprep.subr.mxu0 %v7921_v32  ;;  %2682 = vmatprep.subr.mxu1 %v7923_v7 }
 0x30c   : > { %2612 = vmatpush1.msra.mxu0 %v7927_v9  ;;  %2683 = vmatpush1.msra.mxu1 %v7929_v33 }
 0x30d   : > { %2613 = vmatprep.subr.mxu0 %v7933_v34  ;;  %2684 = vmatprep.subr.mxu1 %v7935_v15  ;;  %v7969_v15 = vld [vmem:[#allocation8 + $0x408] sm:$0xff] }
 0x30e   : > { %2614 = vmatpush1.msra.mxu0 %v7939_v17  ;;  %2685 = vmatpush1.msra.mxu1 %v7941_v35  ;;  %8987 = vst [vmem:[#allocation48_spill] sm:$0xff] %v7969_v15  ;;  %v7971_v17 = vld [vmem:[#allocation8 + $0x608] sm:$0xff]  ;;  %v7975_v35 = vld [vmem:[#allocation8 + $0x400] sm:$0xff] }
 0x30f   : > { %2615 = vmatprep.subr.mxu0 %v7945_v54  ;;  %2686 = vmatprep.subr.mxu1 %v7947_v45  ;;  %8988 = vst [vmem:[#allocation49_spill] sm:$0xff] %v7971_v17  ;;  %8989 = vst [vmem:[#allocation50_spill] sm:$0xff] %v7975_v35  ;;  %v7977_v54 = vld [vmem:[#allocation8 + $0x600] sm:$0xff]  ;;  %v7981_v45 = vld [vmem:[#allocation8 + $0x5f8] sm:$0xff] }
 0x310   : > { %2616 = vmatpush1.msra.mxu0 %v7951_v42  ;;  %2687 = vmatpush1.msra.mxu1 %v7953_v41  ;;  %8990 = vst [vmem:[#allocation51_spill] sm:$0xff] %v7977_v54  ;;  %8991 = vst [vmem:[#allocation52_spill] sm:$0xff] %v7981_v45  ;;  %v7983_v42 = vld [vmem:[#allocation8 + $0x7f8] sm:$0xff]  ;;  %v7987_v41 = vld [vmem:[#allocation8 + $0x5f0] sm:$0xff] }
 0x311   : > { %2617 = vmatprep.subr.mxu0 %v7957_v40  ;;  %2688 = vmatprep.subr.mxu1 %v7959_v14  ;;  %8992 = vst [vmem:[#allocation53_spill] sm:$0xff] %v7983_v42  ;;  %8993 = vst [vmem:[#allocation54_spill] sm:$0xff] %v7987_v41  ;;  %v7989_v40 = vld [vmem:[#allocation8 + $0x7f0] sm:$0xff]  ;;  %v7993_v14 = vld [vmem:[#allocation8 + $0x5e8] sm:$0xff] }
 0x312   : > { %2618 = vmatpush1.msra.mxu0 %v7963_v1  ;;  %2689 = vmatpush1.msra.mxu1 %v7965_v58  ;;  %8994 = vst [vmem:[#allocation55_spill] sm:$0xff] %v7989_v40  ;;  %8995 = vst [vmem:[#allocation56_spill] sm:$0xff] %v7993_v14  ;;  %v7995_v1 = vld [vmem:[#allocation8 + $0x7e8] sm:$0xff]  ;;  %v7999_v58 = vld [vmem:[#allocation8 + $0x5e0] sm:$0xff] }
 0x313   : > { %2619 = vmatprep.subr.mxu0 %v7969_v15  ;;  %2690 = vmatprep.subr.mxu1 %v7971_v17  ;;  %8996 = vst [vmem:[#allocation57_spill] sm:$0xff] %v7995_v1  ;;  %8997 = vst [vmem:[#allocation58_spill] sm:$0xff] %v7999_v58  ;;  %v8001_v15 = vld [vmem:[#allocation8 + $0x7e0] sm:$0xff]  ;;  %v8005_v17 = vld [vmem:[#allocation8 + $0x5d8] sm:$0xff] }
 0x314   : > { %2620 = vmatpush1.msra.mxu0 %v7975_v35  ;;  %2691 = vmatpush1.msra.mxu1 %v7977_v54  ;;  %8998 = vst [vmem:[#allocation59_spill] sm:$0xff] %v8001_v15  ;;  %8999 = vst [vmem:[#allocation60_spill] sm:$0xff] %v8005_v17  ;;  %v8007_v35 = vld [vmem:[#allocation8 + $0x7d8] sm:$0xff]  ;;  %v8011_v54 = vld [vmem:[#allocation8 + $0x5d0] sm:$0xff] }
 0x315   : > { %2621 = vmatprep.subr.mxu0 %v7981_v45  ;;  %2692 = vmatprep.subr.mxu1 %v7983_v42  ;;  %9000 = vst [vmem:[#allocation61_spill] sm:$0xff] %v8007_v35  ;;  %9001 = vst [vmem:[#allocation62_spill] sm:$0xff] %v8011_v54  ;;  %v8013_v45 = vld [vmem:[#allocation8 + $0x7d0] sm:$0xff]  ;;  %v8017_v42 = vld [vmem:[#allocation8 + $0x5c8] sm:$0xff] }
 0x316   : > { %2622 = vmatpush2.msra.mxu0 %v7987_v41  ;;  %2693 = vmatpush2.msra.mxu1 %v7989_v40  ;;  %9002 = vst [vmem:[#allocation63_spill] sm:$0xff] %v8013_v45  ;;  %9003 = vst [vmem:[#allocation64_spill] sm:$0xff] %v8017_v42  ;;  %v8019_v41 = vld [vmem:[#allocation8 + $0x7c8] sm:$0xff]  ;;  %v8023_v40 = vld [vmem:[#allocation8 + $0x5c0] sm:$0xff] }
 0x317   : > { %2623 = vmatprep.subr.mxu0 %v7993_v14  ;;  %2694 = vmatprep.subr.mxu1 %v7995_v1  ;;  %9004 = vst [vmem:[#allocation65_spill] sm:$0xff] %v8019_v41  ;;  %9005 = vst [vmem:[#allocation66_spill] sm:$0xff] %v8023_v40  ;;  %v8025_v14 = vld [vmem:[#allocation8 + $0x7c0] sm:$0xff]  ;;  %v8029_v1 = vld [vmem:[#allocation8 + $0x5b8] sm:$0xff] }
 0x318   : > { %2624 = vmatpush2.msra.mxu0 %v7999_v58  ;;  %2695 = vmatpush2.msra.mxu1 %v8001_v15  ;;  %9006 = vst [vmem:[#allocation67_spill] sm:$0xff] %v8025_v14  ;;  %9007 = vst [vmem:[#allocation68_spill] sm:$0xff] %v8029_v1  ;;  %v8031_v58 = vld [vmem:[#allocation8 + $0x7b8] sm:$0xff]  ;;  %v8035_v15 = vld [vmem:[#allocation8 + $0x5b0] sm:$0xff] }
 0x319   : > { %2625 = vmatprep.subr.mxu0 %v8005_v17  ;;  %2696 = vmatprep.subr.mxu1 %v8007_v35  ;;  %9008 = vst [vmem:[#allocation69_spill] sm:$0xff] %v8031_v58  ;;  %9009 = vst [vmem:[#allocation70_spill] sm:$0xff] %v8035_v15  ;;  %v8037_v17 = vld [vmem:[#allocation8 + $0x7b0] sm:$0xff]  ;;  %v8041_v35 = vld [vmem:[#allocation8 + $0x5a8] sm:$0xff] }
 0x31a   : > { %2626 = vmatpush2.msra.mxu0 %v8011_v54  ;;  %2697 = vmatpush2.msra.mxu1 %v8013_v45  ;;  %9010 = vst [vmem:[#allocation71_spill] sm:$0xff] %v8037_v17  ;;  %9011 = vst [vmem:[#allocation72_spill] sm:$0xff] %v8041_v35  ;;  %v8043_v54 = vld [vmem:[#allocation8 + $0x7a8] sm:$0xff]  ;;  %v8047_v45 = vld [vmem:[#allocation8 + $0x5a0] sm:$0xff] }
 0x31b   : > { %2627 = vmatprep.subr.mxu0 %v8017_v42  ;;  %2698 = vmatprep.subr.mxu1 %v8019_v41  ;;  %9012 = vst [vmem:[#allocation73_spill] sm:$0xff] %v8043_v54  ;;  %9013 = vst [vmem:[#allocation74_spill] sm:$0xff] %v8047_v45  ;;  %v8049_v42 = vld [vmem:[#allocation8 + $0x7a0] sm:$0xff]  ;;  %v8053_v41 = vld [vmem:[#allocation8 + $0x598] sm:$0xff] }
 0x31c   : > { %2628 = vmatpush2.msra.mxu0 %v8023_v40  ;;  %2699 = vmatpush2.msra.mxu1 %v8025_v14  ;;  %9014 = vst [vmem:[#allocation75_spill] sm:$0xff] %v8049_v42  ;;  %9015 = vst [vmem:[#allocation76_spill] sm:$0xff] %v8053_v41  ;;  %v8055_v40 = vld [vmem:[#allocation8 + $0x798] sm:$0xff]  ;;  %v8059_v14 = vld [vmem:[#allocation8 + $0x590] sm:$0xff] }
 0x31d   : > { %2629 = vmatprep.subr.mxu0 %v8029_v1  ;;  %2700 = vmatprep.subr.mxu1 %v8031_v58  ;;  %9016 = vst [vmem:[#allocation77_spill] sm:$0xff] %v8055_v40  ;;  %9017 = vst [vmem:[#allocation78_spill] sm:$0xff] %v8059_v14  ;;  %v8061_v1 = vld [vmem:[#allocation8 + $0x790] sm:$0xff]  ;;  %v8065_v58 = vld [vmem:[#allocation8 + $0x588] sm:$0xff] }
 0x31e   : > { %2630 = vmatpush2.msra.mxu0 %v8035_v15  ;;  %2701 = vmatpush2.msra.mxu1 %v8037_v17  ;;  %9018 = vst [vmem:[#allocation79_spill] sm:$0xff] %v8061_v1  ;;  %9019 = vst [vmem:[#allocation80_spill] sm:$0xff] %v8065_v58  ;;  %v8067_v15 = vld [vmem:[#allocation8 + $0x788] sm:$0xff]  ;;  %v8071_v17 = vld [vmem:[#allocation8 + $0x580] sm:$0xff] }
 0x31f   : > { %2631 = vmatprep.subr.mxu0 %v8041_v35  ;;  %2702 = vmatprep.subr.mxu1 %v8043_v54  ;;  %9020 = vst [vmem:[#allocation81_spill] sm:$0xff] %v8067_v15  ;;  %9021 = vst [vmem:[#allocation82_spill] sm:$0xff] %v8071_v17  ;;  %v8073_v35 = vld [vmem:[#allocation8 + $0x780] sm:$0xff]  ;;  %v8077_v54 = vld [vmem:[#allocation8 + $0x578] sm:$0xff] }
 0x320   : > { %2632 = vmatpush2.msra.mxu0 %v8047_v45  ;;  %2703 = vmatpush2.msra.mxu1 %v8049_v42  ;;  %9022 = vst [vmem:[#allocation83_spill] sm:$0xff] %v8073_v35  ;;  %9023 = vst [vmem:[#allocation84_spill] sm:$0xff] %v8077_v54  ;;  %v8079_v45 = vld [vmem:[#allocation8 + $0x778] sm:$0xff]  ;;  %v8083_v42 = vld [vmem:[#allocation8 + $0x570] sm:$0xff] }
 0x321   : > { %2633 = vmatprep.subr.mxu0 %v8053_v41  ;;  %2704 = vmatprep.subr.mxu1 %v8055_v40  ;;  %9024 = vst [vmem:[#allocation85_spill] sm:$0xff] %v8079_v45  ;;  %9025 = vst [vmem:[#allocation86_spill] sm:$0xff] %v8083_v42  ;;  %v8085_v41 = vld [vmem:[#allocation8 + $0x770] sm:$0xff]  ;;  %v8089_v40 = vld [vmem:[#allocation8 + $0x568] sm:$0xff] }
 0x322   : > { %2634 = vmatpush2.msra.mxu0 %v8059_v14  ;;  %2705 = vmatpush2.msra.mxu1 %v8061_v1  ;;  %9026 = vst [vmem:[#allocation87_spill] sm:$0xff] %v8085_v41  ;;  %9027 = vst [vmem:[#allocation88_spill] sm:$0xff] %v8089_v40  ;;  %v8091_v14 = vld [vmem:[#allocation8 + $0x768] sm:$0xff]  ;;  %v8095_v1 = vld [vmem:[#allocation8 + $0x560] sm:$0xff] }
 0x323   : > { %2635 = vmatprep.subr.mxu0 %v8065_v58  ;;  %2706 = vmatprep.subr.mxu1 %v8067_v15  ;;  %9028 = vst [vmem:[#allocation89_spill] sm:$0xff] %v8091_v14  ;;  %9029 = vst [vmem:[#allocation90_spill] sm:$0xff] %v8095_v1  ;;  %v8097_v58 = vld [vmem:[#allocation8 + $0x760] sm:$0xff]  ;;  %v8101_v15 = vld [vmem:[#allocation8 + $0x558] sm:$0xff] }
 0x324   : > { %2636 = vmatpush2.msra.mxu0 %v8071_v17  ;;  %2707 = vmatpush2.msra.mxu1 %v8073_v35  ;;  %9030 = vst [vmem:[#allocation91_spill] sm:$0xff] %v8097_v58  ;;  %9031 = vst [vmem:[#allocation92_spill] sm:$0xff] %v8101_v15  ;;  %v8103_v17 = vld [vmem:[#allocation8 + $0x758] sm:$0xff]  ;;  %v8107_v35 = vld [vmem:[#allocation8 + $0x550] sm:$0xff] }
 0x325   : > { %2637 = vmatprep.subr.mxu0 %v8077_v54  ;;  %2708 = vmatprep.subr.mxu1 %v8079_v45  ;;  %9032 = vst [vmem:[#allocation93_spill] sm:$0xff] %v8103_v17  ;;  %9033 = vst [vmem:[#allocation94_spill] sm:$0xff] %v8107_v35  ;;  %v8109_v54 = vld [vmem:[#allocation8 + $0x750] sm:$0xff]  ;;  %v8113_v45 = vld [vmem:[#allocation8 + $0x548] sm:$0xff] }
 0x326   : > { %2638 = vmatpush2.msra.mxu0 %v8083_v42  ;;  %2709 = vmatpush2.msra.mxu1 %v8085_v41  ;;  %9034 = vst [vmem:[#allocation95_spill] sm:$0xff] %v8109_v54  ;;  %9035 = vst [vmem:[#allocation96_spill] sm:$0xff] %v8113_v45  ;;  %v8115_v42 = vld [vmem:[#allocation8 + $0x748] sm:$0xff]  ;;  %v8119_v41 = vld [vmem:[#allocation8 + $0x540] sm:$0xff] }
 0x327   : > { %2639 = vmatprep.subr.mxu0 %v8089_v40  ;;  %2710 = vmatprep.subr.mxu1 %v8091_v14  ;;  %9036 = vst [vmem:[#allocation97_spill] sm:$0xff] %v8115_v42  ;;  %9037 = vst [vmem:[#allocation98_spill] sm:$0xff] %v8119_v41  ;;  %v8121_v40 = vld [vmem:[#allocation8 + $0x740] sm:$0xff]  ;;  %v8125_v14 = vld [vmem:[#allocation8 + $0x538] sm:$0xff] }
 0x328   : > { %2640 = vmatpush2.msra.mxu0 %v8095_v1  ;;  %2711 = vmatpush2.msra.mxu1 %v8097_v58  ;;  %9038 = vst [vmem:[#allocation99_spill] sm:$0xff] %v8121_v40  ;;  %9039 = vst [vmem:[#allocation100_spill] sm:$0xff] %v8125_v14  ;;  %v8127_v1 = vld [vmem:[#allocation8 + $0x738] sm:$0xff]  ;;  %v8131_v58 = vld [vmem:[#allocation8 + $0x530] sm:$0xff] }
 0x329   : > { %2641 = vmatprep.subr.mxu0 %v8101_v15  ;;  %2712 = vmatprep.subr.mxu1 %v8103_v17  ;;  %9040 = vst [vmem:[#allocation101_spill] sm:$0xff] %v8127_v1  ;;  %9041 = vst [vmem:[#allocation102_spill] sm:$0xff] %v8131_v58  ;;  %v8133_v15 = vld [vmem:[#allocation8 + $0x730] sm:$0xff]  ;;  %v8137_v17 = vld [vmem:[#allocation8 + $0x528] sm:$0xff] }
 0x32a   : > { %2642 = vmatpush2.msra.mxu0 %v8107_v35  ;;  %2713 = vmatpush2.msra.mxu1 %v8109_v54  ;;  %9042 = vst [vmem:[#allocation103_spill] sm:$0xff] %v8133_v15  ;;  %9043 = vst [vmem:[#allocation104_spill] sm:$0xff] %v8137_v17  ;;  %v8139_v35 = vld [vmem:[#allocation8 + $0x728] sm:$0xff]  ;;  %v8143_v54 = vld [vmem:[#allocation8 + $0x520] sm:$0xff] }
 0x32b   : > { %2643 = vmatprep.subr.mxu0 %v8113_v45  ;;  %2714 = vmatprep.subr.mxu1 %v8115_v42  ;;  %v8145_v45 = vld [vmem:[#allocation8 + $0x720] sm:$0xff]  ;;  %v8149_v42 = vld [vmem:[#allocation8 + $0x518] sm:$0xff] }
 0x32c   : > { %2644 = vmatpush2.msra.mxu0 %v8119_v41  ;;  %2715 = vmatpush2.msra.mxu1 %v8121_v40  ;;  %v8151_v41 = vld [vmem:[#allocation8 + $0x718] sm:$0xff]  ;;  %v8155_v40 = vld [vmem:[#allocation8 + $0x510] sm:$0xff] }
 0x32d   : > { %2645 = vmatprep.subr.mxu0 %v8125_v14  ;;  %2716 = vmatprep.subr.mxu1 %v8127_v1  ;;  %9044 = vst [vmem:[#allocation105_spill] sm:$0xff] %v8151_v41  ;;  %v8157_v14 = vld [vmem:[#allocation8 + $0x710] sm:$0xff]  ;;  %v8161_v1 = vld [vmem:[#allocation8 + $0x508] sm:$0xff] }
 0x32e   : > { %2646 = vmatpush2.msra.mxu0 %v8131_v58  ;;  %2717 = vmatpush2.msra.mxu1 %v8133_v15  ;;  %9045 = vst [vmem:[#allocation106_spill] sm:$0xff] %v8157_v14  ;;  %v8163_v58 = vld [vmem:[#allocation8 + $0x708] sm:$0xff]  ;;  %v8167_v15 = vld [vmem:[#allocation8 + $0x500] sm:$0xff] }
 0x32f   : > { %2647 = vmatprep.subr.mxu0 %v8137_v17  ;;  %2718 = vmatprep.subr.mxu1 %v8139_v35  ;;  %v8169_v17 = vld [vmem:[#allocation8 + $0x700] sm:$0xff] }
 0x330   : > { %2648 = vmatpush2.msra.mxu0 %v8143_v54  ;;  %2719 = vmatpush2.msra.mxu1 %v8145_v45 }
 0x331   : > { %2649 = vmatprep.subr.mxu0 %v8149_v42  ;;  %2720 = vmatprep.subr.mxu1 %v8151_v41  ;;  %v3012_v41 = vrot.slane %v7781_v38, 2 }
 0x332   : > { %2650 = vmatpush2.msra.mxu0 %v8155_v40  ;;  %2721 = vmatpush2.msra.mxu1 %v8157_v14  ;;  %v3014_v14 = vrot.slane %v7783_v39, 2 }
 0x333   : > { %2651 = vmatprep.subr.mxu0 %v8161_v1  ;;  %2722 = vmatprep.subr.mxu1 %v8163_v58 }
 0x334   : > { %2652 = vmatpush2.msra.mxu0 %v8167_v15  ;;  %2723 = vmatpush2.msra.mxu1 %v8169_v17 }
 0x335   : > { %2654 = vmatmul.mubr.f32.vlgmr.msra.gmra.mxu0 %v7777_v36  ;;  %2725 = vmatmul.mubr.f32.vlgmr.msra.gmra.mxu1 %v7779_v37 }
 0x336   : > { %3019 = vmatprep.subr.mxu0 %v7758_v43  ;;  %3090 = vmatprep.subr.mxu1 %v7760_v44  ;;  %v9046_v43 = vld [vmem:[#allocation37_spill] sm:$0xff]  ;;  %v9047_v44 = vld [vmem:[#allocation38_spill] sm:$0xff] }
 0x337   : > { %3020 = vmatpush1.msra.mxu0 %v7789_v46  ;;  %3083 = vmatprep.mubr.f32.mxu0 %v3012_v41  ;;  %v9049_v41 = vld [vmem:[#allocation40_spill] sm:$0xff]  ;;  %v9050_v46 = vld [vmem:[#allocation41_spill] sm:$0xff] }
 0x338   : > { %3091 = vmatpush1.msra.mxu1 %v7791_v47  ;;  %3154 = vmatprep.mubr.f32.mxu1 %v3014_v14  ;;  %v9048_v14 = vld [vmem:[#allocation39_spill] sm:$0xff]  ;;  %v9051_v47 = vld [vmem:[#allocation42_spill] sm:$0xff] }
 0x339   : > { %3021 = vmatprep.subr.mxu0 %v7797_v48  ;;  %3092 = vmatprep.subr.mxu1 %v7803_v49  ;;  %v9052_v48 = vld [vmem:[#allocation43_spill] sm:$0xff]  ;;  %v9053_v49 = vld [vmem:[#allocation44_spill] sm:$0xff] }
 0x33a   : > { %3022 = vmatpush1.msra.mxu0 %v7807_v50  ;;  %3093 = vmatpush1.msra.mxu1 %v7809_v52  ;;  %v9054_v50 = vld [vmem:[#allocation45_spill] sm:$0xff]  ;;  %v9055_v52 = vld [vmem:[#allocation46_spill] sm:$0xff] }
 0x33b   : > { %3023 = vmatprep.subr.mxu0 %v7813_v53  ;;  %3094 = vmatprep.subr.mxu1 %v7815_v55  ;;  %v9056_v53 = vld [vmem:[#allocation47_spill] sm:$0xff]  ;;  %v9057_v55 = vld [vmem:[#allocation48_spill] sm:$0xff] }
 0x33c   : > { %3024 = vmatpush1.msra.mxu0 %v7819_v56  ;;  %3095 = vmatpush1.msra.mxu1 %v7821_v59  ;;  %v9058_v56 = vld [vmem:[#allocation49_spill] sm:$0xff]  ;;  %v9059_v59 = vld [vmem:[#allocation50_spill] sm:$0xff] }
 0x33d   : > { %3025 = vmatprep.subr.mxu0 %v7825_v60  ;;  %3096 = vmatprep.subr.mxu1 %v7827_v61  ;;  %v9060_v60 = vld [vmem:[#allocation51_spill] sm:$0xff]  ;;  %v9061_v61 = vld [vmem:[#allocation52_spill] sm:$0xff] }
 0x33e   : > { %3026 = vmatpush1.msra.mxu0 %v7831_v62  ;;  %3097 = vmatpush1.msra.mxu1 %v7833_v63  ;;  %v9062_v62 = vld [vmem:[#allocation53_spill] sm:$0xff]  ;;  %v9063_v63 = vld [vmem:[#allocation54_spill] sm:$0xff] }
 0x33f   : > { %3027 = vmatprep.subr.mxu0 %v7837_v0  ;;  %3098 = vmatprep.subr.mxu1 %v7839_v2  ;;  %v9064_v0 = vld [vmem:[#allocation55_spill] sm:$0xff]  ;;  %v9065_v2 = vld [vmem:[#allocation56_spill] sm:$0xff] }
 0x340   : > { %3028 = vmatpush1.msra.mxu0 %v7843_v3  ;;  %3099 = vmatpush1.msra.mxu1 %v7845_v4  ;;  %v9066_v3 = vld [vmem:[#allocation57_spill] sm:$0xff]  ;;  %v9067_v4 = vld [vmem:[#allocation58_spill] sm:$0xff] }
 0x341   : > { %3029 = vmatprep.subr.mxu0 %v7849_v5  ;;  %3100 = vmatprep.subr.mxu1 %v7851_v6  ;;  %v9068_v5 = vld [vmem:[#allocation59_spill] sm:$0xff]  ;;  %v9069_v6 = vld [vmem:[#allocation60_spill] sm:$0xff] }
 0x342   : > { %3030 = vmatpush1.msra.mxu0 %v7855_v8  ;;  %3101 = vmatpush1.msra.mxu1 %v7857_v10  ;;  %v9070_v8 = vld [vmem:[#allocation61_spill] sm:$0xff]  ;;  %v9071_v10 = vld [vmem:[#allocation62_spill] sm:$0xff] }
 0x343   : > { %3031 = vmatprep.subr.mxu0 %v7861_v11  ;;  %3102 = vmatprep.subr.mxu1 %v7863_v12  ;;  %v9072_v11 = vld [vmem:[#allocation63_spill] sm:$0xff]  ;;  %v9073_v12 = vld [vmem:[#allocation64_spill] sm:$0xff] }
 0x344   : > { %3032 = vmatpush1.msra.mxu0 %v7867_v13  ;;  %3103 = vmatpush1.msra.mxu1 %v7869_v16  ;;  %v9074_v13 = vld [vmem:[#allocation65_spill] sm:$0xff]  ;;  %v9075_v16 = vld [vmem:[#allocation66_spill] sm:$0xff] }
 0x345   : > { %3033 = vmatprep.subr.mxu0 %v7873_v18  ;;  %3104 = vmatprep.subr.mxu1 %v7875_v19  ;;  %v9076_v18 = vld [vmem:[#allocation67_spill] sm:$0xff]  ;;  %v9077_v19 = vld [vmem:[#allocation68_spill] sm:$0xff] }
 0x346   : > { %3034 = vmatpush1.msra.mxu0 %v7879_v20  ;;  %3105 = vmatpush1.msra.mxu1 %v7881_v21  ;;  %v9078_v20 = vld [vmem:[#allocation69_spill] sm:$0xff]  ;;  %v9079_v21 = vld [vmem:[#allocation70_spill] sm:$0xff] }
 0x347   : > { %3035 = vmatprep.subr.mxu0 %v7885_v22  ;;  %3106 = vmatprep.subr.mxu1 %v7887_v23  ;;  %v9080_v22 = vld [vmem:[#allocation71_spill] sm:$0xff]  ;;  %v9081_v23 = vld [vmem:[#allocation72_spill] sm:$0xff] }
 0x348   : > { %3036 = vmatpush1.msra.mxu0 %v7891_v24  ;;  %3107 = vmatpush1.msra.mxu1 %v7893_v25  ;;  %v9082_v24 = vld [vmem:[#allocation73_spill] sm:$0xff]  ;;  %v9083_v25 = vld [vmem:[#allocation74_spill] sm:$0xff] }
 0x349   : > { %3037 = vmatprep.subr.mxu0 %v7897_v51  ;;  %3108 = vmatprep.subr.mxu1 %v7899_v26  ;;  %v9084_v51 = vld [vmem:[#allocation75_spill] sm:$0xff]  ;;  %v9085_v26 = vld [vmem:[#allocation76_spill] sm:$0xff] }
 0x34a   : > { %3038 = vmatpush1.msra.mxu0 %v7903_v27  ;;  %3109 = vmatpush1.msra.mxu1 %v7905_v57  ;;  %v9086_v27 = vld [vmem:[#allocation77_spill] sm:$0xff]  ;;  %v9087_v57 = vld [vmem:[#allocation78_spill] sm:$0xff] }
 0x34b   : > { %3039 = vmatprep.subr.mxu0 %v7909_v28  ;;  %3110 = vmatprep.subr.mxu1 %v7911_v29  ;;  %v9088_v28 = vld [vmem:[#allocation79_spill] sm:$0xff]  ;;  %v9089_v29 = vld [vmem:[#allocation80_spill] sm:$0xff] }
 0x34c   : > { %3040 = vmatpush1.msra.mxu0 %v7915_v30  ;;  %3111 = vmatpush1.msra.mxu1 %v7917_v31  ;;  %v9090_v30 = vld [vmem:[#allocation81_spill] sm:$0xff]  ;;  %v9091_v31 = vld [vmem:[#allocation82_spill] sm:$0xff] }
 0x34d   : > { %3041 = vmatprep.subr.mxu0 %v7921_v32  ;;  %3112 = vmatprep.subr.mxu1 %v7923_v7  ;;  %v9092_v32 = vld [vmem:[#allocation83_spill] sm:$0xff]  ;;  %v9093_v7 = vld [vmem:[#allocation84_spill] sm:$0xff] }
 0x34e   : > { %3042 = vmatpush1.msra.mxu0 %v7927_v9  ;;  %3113 = vmatpush1.msra.mxu1 %v7929_v33  ;;  %v9094_v9 = vld [vmem:[#allocation85_spill] sm:$0xff]  ;;  %v9095_v33 = vld [vmem:[#allocation86_spill] sm:$0xff] }
 0x34f   : > { %3043 = vmatprep.subr.mxu0 %v7933_v34  ;;  %3114 = vmatprep.subr.mxu1 %v9046_v43  ;;  %v9096_v34 = vld [vmem:[#allocation87_spill] sm:$0xff]  ;;  %v9097_v43 = vld [vmem:[#allocation88_spill] sm:$0xff] }
 0x350   : > { %3044 = vmatpush1.msra.mxu0 %v9047_v44  ;;  %3115 = vmatpush1.msra.mxu1 %v9048_v14  ;;  %v9098_v44 = vld [vmem:[#allocation89_spill] sm:$0xff]  ;;  %v9099_v14 = vld [vmem:[#allocation90_spill] sm:$0xff] }
 0x351   : > { %3045 = vmatprep.subr.mxu0 %v9049_v41  ;;  %3116 = vmatprep.subr.mxu1 %v9050_v46  ;;  %v9100_v41 = vld [vmem:[#allocation91_spill] sm:$0xff]  ;;  %v9101_v46 = vld [vmem:[#allocation92_spill] sm:$0xff] }
 0x352   : > { %3046 = vmatpush1.msra.mxu0 %v9051_v47  ;;  %3117 = vmatpush1.msra.mxu1 %v9052_v48  ;;  %v9102_v47 = vld [vmem:[#allocation93_spill] sm:$0xff]  ;;  %v9103_v48 = vld [vmem:[#allocation94_spill] sm:$0xff] }
 0x353   : > { %3047 = vmatprep.subr.mxu0 %v9053_v49  ;;  %3118 = vmatprep.subr.mxu1 %v9054_v50  ;;  %v9104_v49 = vld [vmem:[#allocation95_spill] sm:$0xff]  ;;  %v9105_v50 = vld [vmem:[#allocation96_spill] sm:$0xff] }
 0x354   : > { %3048 = vmatpush1.msra.mxu0 %v9055_v52  ;;  %3119 = vmatpush1.msra.mxu1 %v9056_v53  ;;  %v9106_v52 = vld [vmem:[#allocation97_spill] sm:$0xff]  ;;  %v9107_v53 = vld [vmem:[#allocation98_spill] sm:$0xff] }
 0x355   : > { %3049 = vmatprep.subr.mxu0 %v9057_v55  ;;  %3120 = vmatprep.subr.mxu1 %v9058_v56  ;;  %v9108_v55 = vld [vmem:[#allocation99_spill] sm:$0xff]  ;;  %v9109_v56 = vld [vmem:[#allocation100_spill] sm:$0xff] }
 0x356   : > { %3050 = vmatpush1.msra.mxu0 %v9059_v59  ;;  %3121 = vmatpush1.msra.mxu1 %v9060_v60  ;;  %v9110_v59 = vld [vmem:[#allocation101_spill] sm:$0xff]  ;;  %v9111_v60 = vld [vmem:[#allocation102_spill] sm:$0xff] }
 0x357   : > { %3051 = vmatprep.subr.mxu0 %v9061_v61  ;;  %3122 = vmatprep.subr.mxu1 %v9062_v62  ;;  %v9112_v61 = vld [vmem:[#allocation103_spill] sm:$0xff]  ;;  %v9113_v62 = vld [vmem:[#allocation104_spill] sm:$0xff] }
 0x358   : > { %3052 = vmatpush2.msra.mxu0 %v9063_v63  ;;  %3123 = vmatpush2.msra.mxu1 %v9064_v0  ;;  %v9114_v63 = vld [vmem:[#allocation105_spill] sm:$0xff]  ;;  %v9115_v0 = vld [vmem:[#allocation106_spill] sm:$0xff] }
 0x359   : > { %3053 = vmatprep.subr.mxu0 %v9065_v2  ;;  %3124 = vmatprep.subr.mxu1 %v9066_v3  ;;  %v3011_v2 = vrot.slane %v7777_v36, 2  ;;  %v2786_v3 = vld [vmem:[#allocation8 + $0xf8] sm:$0xff] }
 0x35a   : > { %3054 = vmatpush2.msra.mxu0 %v9067_v4  ;;  %3125 = vmatpush2.msra.mxu1 %v9068_v5  ;;  %v2783_v4 = vld [vmem:[#allocation8 + $0xe0] sm:$0xff] }
 0x35b   : > { %3055 = vmatprep.subr.mxu0 %v9069_v6  ;;  %3126 = vmatprep.subr.mxu1 %v9070_v8  ;;  %v2847_v5 = vld [vmem:[#allocation8 + $0x2e0] sm:$0xff]  ;;  %v9117_v6 = vrot.slane %v7783_v39, 1  ;;  %v2781_v8 = vld [vmem:[#allocation8 + $0xd0] sm:$0xff] }
 0x35c   : > { %3056 = vmatpush2.msra.mxu0 %v9071_v10  ;;  %3127 = vmatpush2.msra.mxu1 %v9072_v11  ;;  %v2845_v10 = vld [vmem:[#allocation8 + $0x2d0] sm:$0xff]  ;;  %v2780_v11 = vld [vmem:[#allocation8 + $0xc8] sm:$0xff] }
 0x35d   : > { %3057 = vmatprep.subr.mxu0 %v9073_v12  ;;  %3128 = vmatprep.subr.mxu1 %v9074_v13  ;;  %v2844_v12 = vld [vmem:[#allocation8 + $0x2c8] sm:$0xff]  ;;  %v2779_v13 = vld [vmem:[#allocation8 + $0xc0] sm:$0xff] }
 0x35e   : > { %3058 = vmatpush2.msra.mxu0 %v9075_v16  ;;  %3129 = vmatpush2.msra.mxu1 %v9076_v18  ;;  %v2843_v16 = vld [vmem:[#allocation8 + $0x2c0] sm:$0xff]  ;;  %v2778_v18 = vld [vmem:[#allocation8 + $0xb8] sm:$0xff] }
 0x35f   : > { %3059 = vmatprep.subr.mxu0 %v9077_v19  ;;  %3130 = vmatprep.subr.mxu1 %v9078_v20  ;;  %v2842_v19 = vld [vmem:[#allocation8 + $0x2b8] sm:$0xff]  ;;  %v2777_v20 = vld [vmem:[#allocation8 + $0xb0] sm:$0xff] }
 0x360   : > { %3060 = vmatpush2.msra.mxu0 %v9079_v21  ;;  %3131 = vmatpush2.msra.mxu1 %v9080_v22  ;;  %v2841_v21 = vld [vmem:[#allocation8 + $0x2b0] sm:$0xff]  ;;  %v2776_v22 = vld [vmem:[#allocation8 + $0xa8] sm:$0xff] }
 0x361   : > { %3061 = vmatprep.subr.mxu0 %v9081_v23  ;;  %3132 = vmatprep.subr.mxu1 %v9082_v24  ;;  %v2840_v23 = vld [vmem:[#allocation8 + $0x2a8] sm:$0xff]  ;;  %v2775_v24 = vld [vmem:[#allocation8 + $0xa0] sm:$0xff] }
 0x362   : > { %3062 = vmatpush2.msra.mxu0 %v9083_v25  ;;  %3133 = vmatpush2.msra.mxu1 %v9084_v51  ;;  %v2839_v25 = vld [vmem:[#allocation8 + $0x2a0] sm:$0xff]  ;;  %v2774_v51 = vld [vmem:[#allocation8 + $0x98] sm:$0xff] }
 0x363   : > { %3063 = vmatprep.subr.mxu0 %v9085_v26  ;;  %3134 = vmatprep.subr.mxu1 %v9086_v27  ;;  %v2838_v26 = vld [vmem:[#allocation8 + $0x298] sm:$0xff]  ;;  %v2773_v27 = vld [vmem:[#allocation8 + $0x90] sm:$0xff] }
 0x364   : > { %3064 = vmatpush2.msra.mxu0 %v9087_v57  ;;  %3135 = vmatpush2.msra.mxu1 %v9088_v28  ;;  %v2837_v57 = vld [vmem:[#allocation8 + $0x290] sm:$0xff]  ;;  %v2772_v28 = vld [vmem:[#allocation8 + $0x88] sm:$0xff] }
 0x365   : > { %3065 = vmatprep.subr.mxu0 %v9089_v29  ;;  %3136 = vmatprep.subr.mxu1 %v9090_v30  ;;  %v2836_v29 = vld [vmem:[#allocation8 + $0x288] sm:$0xff]  ;;  %v2771_v30 = vld [vmem:[#allocation8 + $0x80] sm:$0xff] }
 0x366   : > { %3066 = vmatpush2.msra.mxu0 %v9091_v31  ;;  %3137 = vmatpush2.msra.mxu1 %v9092_v32  ;;  %v2835_v31 = vld [vmem:[#allocation8 + $0x280] sm:$0xff]  ;;  %v2770_v32 = vld [vmem:[#allocation8 + $0x78] sm:$0xff] }
 0x367   : > { %3067 = vmatprep.subr.mxu0 %v9093_v7  ;;  %3138 = vmatprep.subr.mxu1 %v9094_v9  ;;  %v2834_v7 = vld [vmem:[#allocation8 + $0x278] sm:$0xff]  ;;  %v2769_v9 = vld [vmem:[#allocation8 + $0x70] sm:$0xff] }
 0x368   : > { %3068 = vmatpush2.msra.mxu0 %v9095_v33  ;;  %3139 = vmatpush2.msra.mxu1 %v9096_v34  ;;  %v2833_v33 = vld [vmem:[#allocation8 + $0x270] sm:$0xff]  ;;  %v2768_v34 = vld [vmem:[#allocation8 + $0x68] sm:$0xff] }
 0x369   : > { %3069 = vmatprep.subr.mxu0 %v9097_v43  ;;  %3140 = vmatprep.subr.mxu1 %v9098_v44  ;;  %v2832_v43 = vld [vmem:[#allocation8 + $0x268] sm:$0xff]  ;;  %v2767_v44 = vld [vmem:[#allocation8 + $0x60] sm:$0xff] }
 0x36a   : > { %3070 = vmatpush2.msra.mxu0 %v9099_v14  ;;  %3141 = vmatpush2.msra.mxu1 %v9100_v41  ;;  %v2831_v14 = vld [vmem:[#allocation8 + $0x260] sm:$0xff]  ;;  %v2766_v41 = vld [vmem:[#allocation8 + $0x58] sm:$0xff] }
 0x36b   : > { %3071 = vmatprep.subr.mxu0 %v9101_v46  ;;  %3142 = vmatprep.subr.mxu1 %v9102_v47  ;;  %v2830_v46 = vld [vmem:[#allocation8 + $0x258] sm:$0xff]  ;;  %v2765_v47 = vld [vmem:[#allocation8 + $0x50] sm:$0xff] }
 0x36c   : > { %3072 = vmatpush2.msra.mxu0 %v9103_v48  ;;  %3143 = vmatpush2.msra.mxu1 %v9104_v49  ;;  %v2829_v48 = vld [vmem:[#allocation8 + $0x250] sm:$0xff]  ;;  %v2764_v49 = vld [vmem:[#allocation8 + $0x48] sm:$0xff] }
 0x36d   : > { %3073 = vmatprep.subr.mxu0 %v9105_v50  ;;  %3144 = vmatprep.subr.mxu1 %v9106_v52  ;;  %v2828_v50 = vld [vmem:[#allocation8 + $0x248] sm:$0xff]  ;;  %v2763_v52 = vld [vmem:[#allocation8 + $0x40] sm:$0xff] }
 0x36e   : > { %3074 = vmatpush2.msra.mxu0 %v9107_v53  ;;  %3145 = vmatpush2.msra.mxu1 %v9108_v55  ;;  %v2827_v53 = vld [vmem:[#allocation8 + $0x240] sm:$0xff]  ;;  %v2762_v55 = vld [vmem:[#allocation8 + $0x38] sm:$0xff] }
 0x36f   : > { %3075 = vmatprep.subr.mxu0 %v9109_v56  ;;  %3146 = vmatprep.subr.mxu1 %v9110_v59  ;;  %v2826_v56 = vld [vmem:[#allocation8 + $0x238] sm:$0xff]  ;;  %v2761_v59 = vld [vmem:[#allocation8 + $0x30] sm:$0xff] }
 0x370   : > { %3076 = vmatpush2.msra.mxu0 %v9111_v60  ;;  %3147 = vmatpush2.msra.mxu1 %v9112_v61  ;;  %v2825_v60 = vld [vmem:[#allocation8 + $0x230] sm:$0xff]  ;;  %v2760_v61 = vld [vmem:[#allocation8 + $0x28] sm:$0xff] }
 0x371   : > { %3077 = vmatprep.subr.mxu0 %v9113_v62  ;;  %3148 = vmatprep.subr.mxu1 %v8139_v35  ;;  %v3013_v35 = vrot.slane %v7779_v37, 2  ;;  %v2824_v62 = vld [vmem:[#allocation8 + $0x228] sm:$0xff] }
 0x372   : > { %3078 = vmatpush2.msra.mxu0 %v8143_v54  ;;  %3149 = vmatpush2.msra.mxu1 %v8145_v45  ;;  %v2850_v54 = vld [vmem:[#allocation8 + $0x2f8] sm:$0xff]  ;;  %v2784_v45 = vld [vmem:[#allocation8 + $0xe8] sm:$0xff] }
 0x373   : > { %3079 = vmatprep.subr.mxu0 %v8149_v42  ;;  %3150 = vmatprep.subr.mxu1 %v9114_v63  ;;  %v2785_v42 = vld [vmem:[#allocation8 + $0xf0] sm:$0xff]  ;;  %v2759_v63 = vld [vmem:[#allocation8 + $0x20] sm:$0xff] }
 0x374   : > { %3080 = vmatpush2.msra.mxu0 %v8155_v40  ;;  %3151 = vmatpush2.msra.mxu1 %v9115_v0  ;;  %v2849_v40 = vld [vmem:[#allocation8 + $0x2f0] sm:$0xff]  ;;  %v2823_v0 = vld [vmem:[#allocation8 + $0x220] sm:$0xff] }
 0x375   : > { %3081 = vmatprep.subr.mxu0 %v8161_v1  ;;  %3152 = vmatprep.subr.mxu1 %v8163_v58  ;;  %v2848_v1 = vld [vmem:[#allocation8 + $0x2e8] sm:$0xff]  ;;  %v9116_v58 = vrot.slane %v7781_v38, 1 }
 0x376   : > { %3082 = vmatpush2.msra.mxu0 %v8167_v15  ;;  %3153 = vmatpush2.msra.mxu1 %v8169_v17  ;;  %v2782_v15 = vld [vmem:[#allocation8 + $0xd8] sm:$0xff] }
 0x377   : > { %3084 = vmatmul.mubr.f32.vlgmr.msra.gmra.mxu0 %v3011_v2  ;;  %3155 = vmatmul.mubr.f32.vlgmr.msra.gmra.mxu1 %v3013_v35  ;;  %v2846_v17 = vld [vmem:[#allocation8 + $0x2d8] sm:$0xff] }
 0x378   : > { %3161 = vmatprep.subr.mxu0 %v2786_v3  ;;  %3232 = vmatprep.subr.mxu1 %v2850_v54  ;;  %v2758_v2 = vld [vmem:[#allocation8 + $0x18] sm:$0xff]  ;;  %v2757_v3 = vld [vmem:[#allocation8 + $0x10] sm:$0xff] }
 0x379   : > { %3162 = vmatpush1.msra.mxu0 %v2785_v42  ;;  %3225 = vmatprep.mubr.f32.mxu0 %v9116_v58  ;;  %v2822_v35 = vld [vmem:[#allocation8 + $0x218] sm:$0xff]  ;;  %v2821_v54 = vld [vmem:[#allocation8 + $0x210] sm:$0xff]  ;;  %v2756_v42 = vld [vmem:[#allocation8 + $0x8] sm:$0xff] }
 0x37a   : > { %3233 = vmatpush1.msra.mxu1 %v2849_v40  ;;  %3296 = vmatprep.mubr.f32.mxu1 %v9117_v6  ;;  %v2820_v40 = vld [vmem:[#allocation8 + $0x208] sm:$0xff]  ;;  %v2818_v58 = vld [vmem:[#allocation8 + $0x1f8] sm:$0xff]  ;;  %v2881_v6 = vld [vmem:[#allocation8 + $0x3f0] sm:$0xff] }
 0x37b   : > { %3163 = vmatprep.subr.mxu0 %v2784_v45  ;;  %3234 = vmatprep.subr.mxu1 %v2848_v1  ;;  %v2755_v45 = vld [vmem:[#allocation8] sm:$0xff] }
 0x37c   : > { %3164 = vmatpush1.msra.mxu0 %v2783_v4  ;;  %3235 = vmatpush1.msra.mxu1 %v2847_v5  ;;  %v2819_v1 = vld [vmem:[#allocation8 + $0x200] sm:$0xff]  ;;  %v2882_v4 = vld [vmem:[#allocation8 + $0x3f8] sm:$0xff]  ;;  %v2817_v5 = vld [vmem:[#allocation8 + $0x1f0] sm:$0xff] }
 0x37d   : > { %3165 = vmatprep.subr.mxu0 %v2782_v15  ;;  %3236 = vmatprep.subr.mxu1 %v2846_v17  ;;  %v2816_v15 = vld [vmem:[#allocation8 + $0x1e8] sm:$0xff] }
 0x37e   : > { %3166 = vmatpush1.msra.mxu0 %v2781_v8  ;;  %3237 = vmatpush1.msra.mxu1 %v2845_v10  ;;  %v2880_v17 = vld [vmem:[#allocation8 + $0x3e8] sm:$0xff]  ;;  %v2815_v8 = vld [vmem:[#allocation8 + $0x1e0] sm:$0xff] }
 0x37f   : > { %3167 = vmatprep.subr.mxu0 %v2780_v11  ;;  %3238 = vmatprep.subr.mxu1 %v2844_v12  ;;  %v2879_v10 = vld [vmem:[#allocation8 + $0x3e0] sm:$0xff]  ;;  %v2814_v11 = vld [vmem:[#allocation8 + $0x1d8] sm:$0xff] }
 0x380   : > { %3168 = vmatpush1.msra.mxu0 %v2779_v13  ;;  %3239 = vmatpush1.msra.mxu1 %v2843_v16  ;;  %v2878_v12 = vld [vmem:[#allocation8 + $0x3d8] sm:$0xff]  ;;  %v2813_v13 = vld [vmem:[#allocation8 + $0x1d0] sm:$0xff] }
 0x381   : > { %3169 = vmatprep.subr.mxu0 %v2778_v18  ;;  %3240 = vmatprep.subr.mxu1 %v2842_v19  ;;  %v2877_v16 = vld [vmem:[#allocation8 + $0x3d0] sm:$0xff]  ;;  %v2812_v18 = vld [vmem:[#allocation8 + $0x1c8] sm:$0xff] }
 0x382   : > { %3170 = vmatpush1.msra.mxu0 %v2777_v20  ;;  %3241 = vmatpush1.msra.mxu1 %v2841_v21  ;;  %v2876_v19 = vld [vmem:[#allocation8 + $0x3c8] sm:$0xff]  ;;  %v2811_v20 = vld [vmem:[#allocation8 + $0x1c0] sm:$0xff] }
 0x383   : > { %3171 = vmatprep.subr.mxu0 %v2776_v22  ;;  %3242 = vmatprep.subr.mxu1 %v2840_v23  ;;  %v2875_v21 = vld [vmem:[#allocation8 + $0x3c0] sm:$0xff]  ;;  %v2810_v22 = vld [vmem:[#allocation8 + $0x1b8] sm:$0xff] }
 0x384   : > { %3172 = vmatpush1.msra.mxu0 %v2775_v24  ;;  %3243 = vmatpush1.msra.mxu1 %v2839_v25  ;;  %v2874_v23 = vld [vmem:[#allocation8 + $0x3b8] sm:$0xff]  ;;  %v2809_v24 = vld [vmem:[#allocation8 + $0x1b0] sm:$0xff] }
 0x385   : > { %3173 = vmatprep.subr.mxu0 %v2774_v51  ;;  %3244 = vmatprep.subr.mxu1 %v2838_v26  ;;  %v2873_v25 = vld [vmem:[#allocation8 + $0x3b0] sm:$0xff]  ;;  %v2808_v51 = vld [vmem:[#allocation8 + $0x1a8] sm:$0xff] }
 0x386   : > { %3174 = vmatpush1.msra.mxu0 %v2773_v27  ;;  %3245 = vmatpush1.msra.mxu1 %v2837_v57  ;;  %v2872_v26 = vld [vmem:[#allocation8 + $0x3a8] sm:$0xff]  ;;  %v2807_v27 = vld [vmem:[#allocation8 + $0x1a0] sm:$0xff] }
 0x387   : > { %3175 = vmatprep.subr.mxu0 %v2772_v28  ;;  %3246 = vmatprep.subr.mxu1 %v2836_v29  ;;  %v2871_v57 = vld [vmem:[#allocation8 + $0x3a0] sm:$0xff]  ;;  %v2806_v28 = vld [vmem:[#allocation8 + $0x198] sm:$0xff] }
 0x388   : > { %3176 = vmatpush1.msra.mxu0 %v2771_v30  ;;  %3247 = vmatpush1.msra.mxu1 %v2835_v31  ;;  %v2870_v29 = vld [vmem:[#allocation8 + $0x398] sm:$0xff]  ;;  %v2805_v30 = vld [vmem:[#allocation8 + $0x190] sm:$0xff] }
 0x389   : > { %3177 = vmatprep.subr.mxu0 %v2770_v32  ;;  %3248 = vmatprep.subr.mxu1 %v2834_v7  ;;  %v2869_v31 = vld [vmem:[#allocation8 + $0x390] sm:$0xff]  ;;  %v2804_v32 = vld [vmem:[#allocation8 + $0x188] sm:$0xff] }
 0x38a   : > { %3178 = vmatpush1.msra.mxu0 %v2769_v9  ;;  %3249 = vmatpush1.msra.mxu1 %v2833_v33  ;;  %v2868_v7 = vld [vmem:[#allocation8 + $0x388] sm:$0xff]  ;;  %v2803_v9 = vld [vmem:[#allocation8 + $0x180] sm:$0xff] }
 0x38b   : > { %3179 = vmatprep.subr.mxu0 %v2768_v34  ;;  %3250 = vmatprep.subr.mxu1 %v2832_v43  ;;  %v2867_v33 = vld [vmem:[#allocation8 + $0x380] sm:$0xff]  ;;  %v2802_v34 = vld [vmem:[#allocation8 + $0x178] sm:$0xff] }
 0x38c   : > { %3180 = vmatpush1.msra.mxu0 %v2767_v44  ;;  %3251 = vmatpush1.msra.mxu1 %v2831_v14  ;;  %v2866_v43 = vld [vmem:[#allocation8 + $0x378] sm:$0xff]  ;;  %v2801_v44 = vld [vmem:[#allocation8 + $0x170] sm:$0xff] }
 0x38d   : > { %3181 = vmatprep.subr.mxu0 %v2766_v41  ;;  %3252 = vmatprep.subr.mxu1 %v2830_v46  ;;  %v2865_v14 = vld [vmem:[#allocation8 + $0x370] sm:$0xff]  ;;  %v2800_v41 = vld [vmem:[#allocation8 + $0x168] sm:$0xff] }
 0x38e   : > { %3182 = vmatpush1.msra.mxu0 %v2765_v47  ;;  %3253 = vmatpush1.msra.mxu1 %v2829_v48  ;;  %v2864_v46 = vld [vmem:[#allocation8 + $0x368] sm:$0xff]  ;;  %v2799_v47 = vld [vmem:[#allocation8 + $0x160] sm:$0xff] }
 0x38f   : > { %3183 = vmatprep.subr.mxu0 %v2764_v49  ;;  %3254 = vmatprep.subr.mxu1 %v2828_v50  ;;  %v2863_v48 = vld [vmem:[#allocation8 + $0x360] sm:$0xff]  ;;  %v2798_v49 = vld [vmem:[#allocation8 + $0x158] sm:$0xff] }
 0x390   : > { %3184 = vmatpush1.msra.mxu0 %v2763_v52  ;;  %3255 = vmatpush1.msra.mxu1 %v2827_v53  ;;  %v2862_v50 = vld [vmem:[#allocation8 + $0x358] sm:$0xff]  ;;  %v2797_v52 = vld [vmem:[#allocation8 + $0x150] sm:$0xff] }
 0x391   : > { %3185 = vmatprep.subr.mxu0 %v2762_v55  ;;  %3256 = vmatprep.subr.mxu1 %v2826_v56  ;;  %v2861_v53 = vld [vmem:[#allocation8 + $0x350] sm:$0xff]  ;;  %v2796_v55 = vld [vmem:[#allocation8 + $0x148] sm:$0xff] }
 0x392   : > { %3186 = vmatpush1.msra.mxu0 %v2761_v59  ;;  %3257 = vmatpush1.msra.mxu1 %v2825_v60  ;;  %v2860_v56 = vld [vmem:[#allocation8 + $0x348] sm:$0xff]  ;;  %v2795_v59 = vld [vmem:[#allocation8 + $0x140] sm:$0xff] }
 0x393   : > { %3187 = vmatprep.subr.mxu0 %v2760_v61  ;;  %3258 = vmatprep.subr.mxu1 %v2824_v62  ;;  %v2859_v60 = vld [vmem:[#allocation8 + $0x340] sm:$0xff]  ;;  %v2794_v61 = vld [vmem:[#allocation8 + $0x138] sm:$0xff] }
 0x394   : > { %3188 = vmatpush1.msra.mxu0 %v2759_v63  ;;  %3259 = vmatpush1.msra.mxu1 %v2823_v0  ;;  %v2858_v62 = vld [vmem:[#allocation8 + $0x338] sm:$0xff]  ;;  %v2793_v63 = vld [vmem:[#allocation8 + $0x130] sm:$0xff] }
 0x395   : > { %3189 = vmatprep.subr.mxu0 %v2758_v2  ;;  %3260 = vmatprep.subr.mxu1 %v2822_v35  ;;  %v2857_v0 = vld [vmem:[#allocation8 + $0x330] sm:$0xff]  ;;  %v2792_v2 = vld [vmem:[#allocation8 + $0x128] sm:$0xff] }
 0x396   : > { %3190 = vmatpush1.msra.mxu0 %v2757_v3  ;;  %3261 = vmatpush1.msra.mxu1 %v2821_v54  ;;  %v2856_v35 = vld [vmem:[#allocation8 + $0x328] sm:$0xff]  ;;  %v2791_v3 = vld [vmem:[#allocation8 + $0x120] sm:$0xff] }
 0x397   : > { %3191 = vmatprep.subr.mxu0 %v2756_v42  ;;  %3262 = vmatprep.subr.mxu1 %v2820_v40  ;;  %v2855_v54 = vld [vmem:[#allocation8 + $0x320] sm:$0xff]  ;;  %v2790_v42 = vld [vmem:[#allocation8 + $0x118] sm:$0xff] }
 0x398   : > { %3192 = vmatpush1.msra.mxu0 %v2755_v45  ;;  %3263 = vmatpush1.msra.mxu1 %v2819_v1  ;;  %v2854_v40 = vld [vmem:[#allocation8 + $0x318] sm:$0xff]  ;;  %v2789_v45 = vld [vmem:[#allocation8 + $0x110] sm:$0xff] }
 0x399   : > { %3193 = vmatprep.subr.mxu0 %v2818_v58  ;;  %3264 = vmatprep.subr.mxu1 %v2882_v4  ;;  %v2853_v1 = vld [vmem:[#allocation8 + $0x310] sm:$0xff]  ;;  %v2788_v58 = vld [vmem:[#allocation8 + $0x108] sm:$0xff] }
 0x39a   : > { %3194 = vmatpush2.msra.mxu0 %v2817_v5  ;;  %3265 = vmatpush2.msra.mxu1 %v2881_v6  ;;  %v2852_v4 = vld [vmem:[#allocation8 + $0x308] sm:$0xff]  ;;  %v2787_v5 = vld [vmem:[#allocation8 + $0x100] sm:$0xff] }
 0x39b   : > { %3195 = vmatprep.subr.mxu0 %v2816_v15  ;;  %3266 = vmatprep.subr.mxu1 %v2880_v17  ;;  %v2851_v6 = vld [vmem:[#allocation8 + $0x300] sm:$0xff]  ;;  %v3334_v15 = vld [vmem:[#allocation8 + $0x8f8] sm:$0xff] }
 0x39c   : > { %3196 = vmatpush2.msra.mxu0 %v2815_v8  ;;  %3267 = vmatpush2.msra.mxu1 %v2879_v10  ;;  %v3398_v17 = vld [vmem:[#allocation8 + $0xaf8] sm:$0xff]  ;;  %v3333_v8 = vld [vmem:[#allocation8 + $0x8f0] sm:$0xff]  ;;  %v9118_v10 = vrot.slane %v7777_v36, 1 }
 0x39d   : > { %3197 = vmatprep.subr.mxu0 %v2814_v11  ;;  %3268 = vmatprep.subr.mxu1 %v2878_v12  ;;  %v9119_v11 = vrot.slane %v7779_v37, 1  ;;  %v3432_v12 = vrot.slane %v7781_v38, 3 }
 0x39e   : > { %3198 = vmatpush2.msra.mxu0 %v2813_v13  ;;  %3269 = vmatpush2.msra.mxu1 %v2877_v16  ;;  %v3397_v13 = vld [vmem:[#allocation8 + $0xaf0] sm:$0xff]  ;;  %v3434_v16 = vrot.slane %v7783_v39, 3 }
 0x39f   : > { %3199 = vmatprep.subr.mxu0 %v2812_v18  ;;  %3270 = vmatprep.subr.mxu1 %v2876_v19  ;;  %v3332_v18 = vld [vmem:[#allocation8 + $0x8e8] sm:$0xff] }
 0x3a0   : > { %3200 = vmatpush2.msra.mxu0 %v2811_v20  ;;  %3271 = vmatpush2.msra.mxu1 %v2875_v21  ;;  %v3396_v19 = vld [vmem:[#allocation8 + $0xae8] sm:$0xff]  ;;  %v3331_v20 = vld [vmem:[#allocation8 + $0x8e0] sm:$0xff] }
 0x3a1   : > { %3201 = vmatprep.subr.mxu0 %v2810_v22  ;;  %3272 = vmatprep.subr.mxu1 %v2874_v23  ;;  %v3395_v21 = vld [vmem:[#allocation8 + $0xae0] sm:$0xff]  ;;  %v3330_v22 = vld [vmem:[#allocation8 + $0x8d8] sm:$0xff] }
 0x3a2   : > { %3202 = vmatpush2.msra.mxu0 %v2809_v24  ;;  %3273 = vmatpush2.msra.mxu1 %v2873_v25  ;;  %v3394_v23 = vld [vmem:[#allocation8 + $0xad8] sm:$0xff]  ;;  %v3329_v24 = vld [vmem:[#allocation8 + $0x8d0] sm:$0xff] }
 0x3a3   : > { %3203 = vmatprep.subr.mxu0 %v2808_v51  ;;  %3274 = vmatprep.subr.mxu1 %v2872_v26  ;;  %v3393_v25 = vld [vmem:[#allocation8 + $0xad0] sm:$0xff]  ;;  %v3328_v51 = vld [vmem:[#allocation8 + $0x8c8] sm:$0xff] }
 0x3a4   : > { %3204 = vmatpush2.msra.mxu0 %v2807_v27  ;;  %3275 = vmatpush2.msra.mxu1 %v2871_v57  ;;  %v3392_v26 = vld [vmem:[#allocation8 + $0xac8] sm:$0xff]  ;;  %v3327_v27 = vld [vmem:[#allocation8 + $0x8c0] sm:$0xff] }
 0x3a5   : > { %3205 = vmatprep.subr.mxu0 %v2806_v28  ;;  %3276 = vmatprep.subr.mxu1 %v2870_v29  ;;  %v3391_v57 = vld [vmem:[#allocation8 + $0xac0] sm:$0xff]  ;;  %v3326_v28 = vld [vmem:[#allocation8 + $0x8b8] sm:$0xff] }
 0x3a6   : > { %3206 = vmatpush2.msra.mxu0 %v2805_v30  ;;  %3277 = vmatpush2.msra.mxu1 %v2869_v31  ;;  %v3390_v29 = vld [vmem:[#allocation8 + $0xab8] sm:$0xff]  ;;  %v3325_v30 = vld [vmem:[#allocation8 + $0x8b0] sm:$0xff] }
 0x3a7   : > { %3207 = vmatprep.subr.mxu0 %v2804_v32  ;;  %3278 = vmatprep.subr.mxu1 %v2868_v7  ;;  %v3389_v31 = vld [vmem:[#allocation8 + $0xab0] sm:$0xff]  ;;  %v3324_v32 = vld [vmem:[#allocation8 + $0x8a8] sm:$0xff] }
 0x3a8   : > { %3208 = vmatpush2.msra.mxu0 %v2803_v9  ;;  %3279 = vmatpush2.msra.mxu1 %v2867_v33  ;;  %v3388_v7 = vld [vmem:[#allocation8 + $0xaa8] sm:$0xff]  ;;  %v3323_v9 = vld [vmem:[#allocation8 + $0x8a0] sm:$0xff] }
 0x3a9   : > { %3209 = vmatprep.subr.mxu0 %v2802_v34  ;;  %3280 = vmatprep.subr.mxu1 %v2866_v43  ;;  %v3387_v33 = vld [vmem:[#allocation8 + $0xaa0] sm:$0xff]  ;;  %v3322_v34 = vld [vmem:[#allocation8 + $0x898] sm:$0xff] }
 0x3aa   : > { %3210 = vmatpush2.msra.mxu0 %v2801_v44  ;;  %3281 = vmatpush2.msra.mxu1 %v2865_v14  ;;  %v3386_v43 = vld [vmem:[#allocation8 + $0xa98] sm:$0xff]  ;;  %v3321_v44 = vld [vmem:[#allocation8 + $0x890] sm:$0xff] }
 0x3ab   : > { %3211 = vmatprep.subr.mxu0 %v2800_v41  ;;  %3282 = vmatprep.subr.mxu1 %v2864_v46  ;;  %v3385_v14 = vld [vmem:[#allocation8 + $0xa90] sm:$0xff]  ;;  %v3320_v41 = vld [vmem:[#allocation8 + $0x888] sm:$0xff] }
 0x3ac   : > { %3212 = vmatpush2.msra.mxu0 %v2799_v47  ;;  %3283 = vmatpush2.msra.mxu1 %v2863_v48  ;;  %v3384_v46 = vld [vmem:[#allocation8 + $0xa88] sm:$0xff]  ;;  %v3319_v47 = vld [vmem:[#allocation8 + $0x880] sm:$0xff] }
 0x3ad   : > { %3213 = vmatprep.subr.mxu0 %v2798_v49  ;;  %3284 = vmatprep.subr.mxu1 %v2862_v50  ;;  %v3383_v48 = vld [vmem:[#allocation8 + $0xa80] sm:$0xff]  ;;  %v3318_v49 = vld [vmem:[#allocation8 + $0x878] sm:$0xff] }
 0x3ae   : > { %3214 = vmatpush2.msra.mxu0 %v2797_v52  ;;  %3285 = vmatpush2.msra.mxu1 %v2861_v53  ;;  %v3382_v50 = vld [vmem:[#allocation8 + $0xa78] sm:$0xff]  ;;  %v3317_v52 = vld [vmem:[#allocation8 + $0x870] sm:$0xff] }
 0x3af   : > { %3215 = vmatprep.subr.mxu0 %v2796_v55  ;;  %3286 = vmatprep.subr.mxu1 %v2860_v56  ;;  %v3381_v53 = vld [vmem:[#allocation8 + $0xa70] sm:$0xff]  ;;  %v3316_v55 = vld [vmem:[#allocation8 + $0x868] sm:$0xff] }
 0x3b0   : > { %3216 = vmatpush2.msra.mxu0 %v2795_v59  ;;  %3287 = vmatpush2.msra.mxu1 %v2859_v60  ;;  %v3380_v56 = vld [vmem:[#allocation8 + $0xa68] sm:$0xff]  ;;  %v3315_v59 = vld [vmem:[#allocation8 + $0x860] sm:$0xff] }
 0x3b1   : > { %3217 = vmatprep.subr.mxu0 %v2794_v61  ;;  %3288 = vmatprep.subr.mxu1 %v2858_v62  ;;  %v3379_v60 = vld [vmem:[#allocation8 + $0xa60] sm:$0xff]  ;;  %v3314_v61 = vld [vmem:[#allocation8 + $0x858] sm:$0xff] }
 0x3b2   : > { %3218 = vmatpush2.msra.mxu0 %v2793_v63  ;;  %3289 = vmatpush2.msra.mxu1 %v2857_v0  ;;  %v3378_v62 = vld [vmem:[#allocation8 + $0xa58] sm:$0xff]  ;;  %v3313_v63 = vld [vmem:[#allocation8 + $0x850] sm:$0xff] }
 0x3b3   : > { %3219 = vmatprep.subr.mxu0 %v2792_v2  ;;  %3290 = vmatprep.subr.mxu1 %v2856_v35  ;;  %v3377_v0 = vld [vmem:[#allocation8 + $0xa50] sm:$0xff]  ;;  %v3312_v2 = vld [vmem:[#allocation8 + $0x848] sm:$0xff] }
 0x3b4   : > { %3220 = vmatpush2.msra.mxu0 %v2791_v3  ;;  %3291 = vmatpush2.msra.mxu1 %v2855_v54  ;;  %v3376_v35 = vld [vmem:[#allocation8 + $0xa48] sm:$0xff]  ;;  %v3311_v3 = vld [vmem:[#allocation8 + $0x840] sm:$0xff] }
 0x3b5   : > { %3221 = vmatprep.subr.mxu0 %v2790_v42  ;;  %3292 = vmatprep.subr.mxu1 %v2854_v40  ;;  %v3375_v54 = vld [vmem:[#allocation8 + $0xa40] sm:$0xff]  ;;  %v3310_v42 = vld [vmem:[#allocation8 + $0x838] sm:$0xff] }
 0x3b6   : > { %3222 = vmatpush2.msra.mxu0 %v2789_v45  ;;  %3293 = vmatpush2.msra.mxu1 %v2853_v1  ;;  %v3374_v40 = vld [vmem:[#allocation8 + $0xa38] sm:$0xff]  ;;  %v3309_v45 = vld [vmem:[#allocation8 + $0x830] sm:$0xff] }
 0x3b7   : > { %3223 = vmatprep.subr.mxu0 %v2788_v58  ;;  %3294 = vmatprep.subr.mxu1 %v2852_v4  ;;  %v3373_v1 = vld [vmem:[#allocation8 + $0xa30] sm:$0xff]  ;;  %v3308_v58 = vld [vmem:[#allocation8 + $0x828] sm:$0xff] }
 0x3b8   : > { %3224 = vmatpush2.msra.mxu0 %v2787_v5  ;;  %3295 = vmatpush2.msra.mxu1 %v2851_v6  ;;  %v3372_v4 = vld [vmem:[#allocation8 + $0xa28] sm:$0xff]  ;;  %v3307_v5 = vld [vmem:[#allocation8 + $0x820] sm:$0xff] }
 0x3b9   : > { %3226 = vmatmul.mubr.f32.vlgmr.msra.gmra.mxu0 %v9118_v10  ;;  %3297 = vmatmul.mubr.f32.vlgmr.msra.gmra.mxu1 %v9119_v11  ;;  %v3371_v6 = vld [vmem:[#allocation8 + $0xa20] sm:$0xff]  ;;  %v3369_v10 = vld [vmem:[#allocation8 + $0xa10] sm:$0xff]  ;;  %v3304_v11 = vld [vmem:[#allocation8 + $0x808] sm:$0xff] }
 0x3ba   : > { %3439 = vmatprep.subr.mxu0 %v3334_v15  ;;  %3510 = vmatprep.subr.mxu1 %v3398_v17  ;;  %v3306_v15 = vld [vmem:[#allocation8 + $0x818] sm:$0xff] }
 0x3bb   : > { %3440 = vmatpush1.msra.mxu0 %v3333_v8  ;;  %3503 = vmatprep.mubr.f32.mxu0 %v3432_v12  ;;  %v3370_v17 = vld [vmem:[#allocation8 + $0xa18] sm:$0xff]  ;;  %v3305_v8 = vld [vmem:[#allocation8 + $0x810] sm:$0xff] }
 0x3bc   : > { %3511 = vmatpush1.msra.mxu1 %v3397_v13  ;;  %3574 = vmatprep.mubr.f32.mxu1 %v3434_v16  ;;  %v3368_v13 = vld [vmem:[#allocation8 + $0xa08] sm:$0xff] }
 0x3bd   : > { %3441 = vmatprep.subr.mxu0 %v3332_v18  ;;  %3512 = vmatprep.subr.mxu1 %v3396_v19  ;;  %v3303_v18 = vld [vmem:[#allocation8 + $0x800] sm:$0xff] }
 0x3be   : > { %3442 = vmatpush1.msra.mxu0 %v3331_v20  ;;  %3513 = vmatpush1.msra.mxu1 %v3395_v21  ;;  %v3367_v19 = vld [vmem:[#allocation8 + $0xa00] sm:$0xff]  ;;  %v3366_v20 = vld [vmem:[#allocation8 + $0x9f8] sm:$0xff] }
 0x3bf   : > { %3443 = vmatprep.subr.mxu0 %v3330_v22  ;;  %3514 = vmatprep.subr.mxu1 %v3394_v23  ;;  %v3430_v21 = vld [vmem:[#allocation8 + $0xbf8] sm:$0xff]  ;;  %v3365_v22 = vld [vmem:[#allocation8 + $0x9f0] sm:$0xff] }
 0x3c0   : > { %3444 = vmatpush1.msra.mxu0 %v3329_v24  ;;  %3515 = vmatpush1.msra.mxu1 %v3393_v25  ;;  %v3429_v23 = vld [vmem:[#allocation8 + $0xbf0] sm:$0xff]  ;;  %v3364_v24 = vld [vmem:[#allocation8 + $0x9e8] sm:$0xff] }
 0x3c1   : > { %3445 = vmatprep.subr.mxu0 %v3328_v51  ;;  %3516 = vmatprep.subr.mxu1 %v3392_v26  ;;  %v3428_v25 = vld [vmem:[#allocation8 + $0xbe8] sm:$0xff]  ;;  %v3363_v51 = vld [vmem:[#allocation8 + $0x9e0] sm:$0xff] }
 0x3c2   : > { %3446 = vmatpush1.msra.mxu0 %v3327_v27  ;;  %3517 = vmatpush1.msra.mxu1 %v3391_v57  ;;  %v3427_v26 = vld [vmem:[#allocation8 + $0xbe0] sm:$0xff]  ;;  %v3362_v27 = vld [vmem:[#allocation8 + $0x9d8] sm:$0xff] }
 0x3c3   : > { %3447 = vmatprep.subr.mxu0 %v3326_v28  ;;  %3518 = vmatprep.subr.mxu1 %v3390_v29  ;;  %v3426_v57 = vld [vmem:[#allocation8 + $0xbd8] sm:$0xff]  ;;  %v3361_v28 = vld [vmem:[#allocation8 + $0x9d0] sm:$0xff] }
 0x3c4   : > { %3448 = vmatpush1.msra.mxu0 %v3325_v30  ;;  %3519 = vmatpush1.msra.mxu1 %v3389_v31  ;;  %v3425_v29 = vld [vmem:[#allocation8 + $0xbd0] sm:$0xff]  ;;  %v3360_v30 = vld [vmem:[#allocation8 + $0x9c8] sm:$0xff] }
 0x3c5   : > { %3449 = vmatprep.subr.mxu0 %v3324_v32  ;;  %3520 = vmatprep.subr.mxu1 %v3388_v7  ;;  %v3424_v31 = vld [vmem:[#allocation8 + $0xbc8] sm:$0xff]  ;;  %v3359_v32 = vld [vmem:[#allocation8 + $0x9c0] sm:$0xff] }
 0x3c6   : > { %3450 = vmatpush1.msra.mxu0 %v3323_v9  ;;  %3521 = vmatpush1.msra.mxu1 %v3387_v33  ;;  %v3423_v7 = vld [vmem:[#allocation8 + $0xbc0] sm:$0xff]  ;;  %v3358_v9 = vld [vmem:[#allocation8 + $0x9b8] sm:$0xff] }
 0x3c7   : > { %3451 = vmatprep.subr.mxu0 %v3322_v34  ;;  %3522 = vmatprep.subr.mxu1 %v3386_v43  ;;  %v3422_v33 = vld [vmem:[#allocation8 + $0xbb8] sm:$0xff]  ;;  %v3357_v34 = vld [vmem:[#allocation8 + $0x9b0] sm:$0xff] }
 0x3c8   : > { %3452 = vmatpush1.msra.mxu0 %v3321_v44  ;;  %3523 = vmatpush1.msra.mxu1 %v3385_v14  ;;  %v3421_v43 = vld [vmem:[#allocation8 + $0xbb0] sm:$0xff]  ;;  %v3356_v44 = vld [vmem:[#allocation8 + $0x9a8] sm:$0xff] }
 0x3c9   : > { %3453 = vmatprep.subr.mxu0 %v3320_v41  ;;  %3524 = vmatprep.subr.mxu1 %v3384_v46  ;;  %v3420_v14 = vld [vmem:[#allocation8 + $0xba8] sm:$0xff]  ;;  %v3355_v41 = vld [vmem:[#allocation8 + $0x9a0] sm:$0xff] }
 0x3ca   : > { %3454 = vmatpush1.msra.mxu0 %v3319_v47  ;;  %3525 = vmatpush1.msra.mxu1 %v3383_v48  ;;  %v3419_v46 = vld [vmem:[#allocation8 + $0xba0] sm:$0xff]  ;;  %v3354_v47 = vld [vmem:[#allocation8 + $0x998] sm:$0xff] }
 0x3cb   : > { %3455 = vmatprep.subr.mxu0 %v3318_v49  ;;  %3526 = vmatprep.subr.mxu1 %v3382_v50  ;;  %v3418_v48 = vld [vmem:[#allocation8 + $0xb98] sm:$0xff]  ;;  %v3353_v49 = vld [vmem:[#allocation8 + $0x990] sm:$0xff] }
 0x3cc   : > { %3456 = vmatpush1.msra.mxu0 %v3317_v52  ;;  %3527 = vmatpush1.msra.mxu1 %v3381_v53  ;;  %v3417_v50 = vld [vmem:[#allocation8 + $0xb90] sm:$0xff]  ;;  %v3352_v52 = vld [vmem:[#allocation8 + $0x988] sm:$0xff] }
 0x3cd   : > { %3457 = vmatprep.subr.mxu0 %v3316_v55  ;;  %3528 = vmatprep.subr.mxu1 %v3380_v56  ;;  %v3416_v53 = vld [vmem:[#allocation8 + $0xb88] sm:$0xff]  ;;  %v3351_v55 = vld [vmem:[#allocation8 + $0x980] sm:$0xff] }
 0x3ce   : > { %3458 = vmatpush1.msra.mxu0 %v3315_v59  ;;  %3529 = vmatpush1.msra.mxu1 %v3379_v60  ;;  %v3415_v56 = vld [vmem:[#allocation8 + $0xb80] sm:$0xff]  ;;  %v3350_v59 = vld [vmem:[#allocation8 + $0x978] sm:$0xff] }
 0x3cf   : > { %3459 = vmatprep.subr.mxu0 %v3314_v61  ;;  %3530 = vmatprep.subr.mxu1 %v3378_v62  ;;  %v3414_v60 = vld [vmem:[#allocation8 + $0xb78] sm:$0xff]  ;;  %v3349_v61 = vld [vmem:[#allocation8 + $0x970] sm:$0xff] }
 0x3d0   : > { %3460 = vmatpush1.msra.mxu0 %v3313_v63  ;;  %3531 = vmatpush1.msra.mxu1 %v3377_v0  ;;  %v3413_v62 = vld [vmem:[#allocation8 + $0xb70] sm:$0xff]  ;;  %v3348_v63 = vld [vmem:[#allocation8 + $0x968] sm:$0xff] }
 0x3d1   : > { %3461 = vmatprep.subr.mxu0 %v3312_v2  ;;  %3532 = vmatprep.subr.mxu1 %v3376_v35  ;;  %v3412_v0 = vld [vmem:[#allocation8 + $0xb68] sm:$0xff]  ;;  %v3347_v2 = vld [vmem:[#allocation8 + $0x960] sm:$0xff] }
 0x3d2   : > { %3462 = vmatpush1.msra.mxu0 %v3311_v3  ;;  %3533 = vmatpush1.msra.mxu1 %v3375_v54  ;;  %v3411_v35 = vld [vmem:[#allocation8 + $0xb60] sm:$0xff]  ;;  %v3346_v3 = vld [vmem:[#allocation8 + $0x958] sm:$0xff] }
 0x3d3   : > { %3463 = vmatprep.subr.mxu0 %v3310_v42  ;;  %3534 = vmatprep.subr.mxu1 %v3374_v40  ;;  %v3410_v54 = vld [vmem:[#allocation8 + $0xb58] sm:$0xff]  ;;  %v3345_v42 = vld [vmem:[#allocation8 + $0x950] sm:$0xff] }
 0x3d4   : > { %3464 = vmatpush1.msra.mxu0 %v3309_v45  ;;  %3535 = vmatpush1.msra.mxu1 %v3373_v1  ;;  %v3409_v40 = vld [vmem:[#allocation8 + $0xb50] sm:$0xff]  ;;  %v3344_v45 = vld [vmem:[#allocation8 + $0x948] sm:$0xff] }
 0x3d5   : > { %3465 = vmatprep.subr.mxu0 %v3308_v58  ;;  %3536 = vmatprep.subr.mxu1 %v3372_v4  ;;  %v3408_v1 = vld [vmem:[#allocation8 + $0xb48] sm:$0xff]  ;;  %v2513_v58 = vpop.f32.mrf.mxu0  ;;  %v2584_v4 = vpop.f32.mrf.mxu1 }
 0x3d6   : > { %3466 = vmatpush1.msra.mxu0 %v3307_v5  ;;  %3537 = vmatpush1.msra.mxu1 %v3371_v6  ;;  %v3343_v5 = vld [vmem:[#allocation8 + $0x940] sm:$0xff] }
 0x3d7   : > { %3467 = vmatprep.subr.mxu0 %v3306_v15  ;;  %3538 = vmatprep.subr.mxu1 %v3370_v17  ;;  %v3407_v6 = vld [vmem:[#allocation8 + $0xb40] sm:$0xff]  ;;  %v3342_v15 = vld [vmem:[#allocation8 + $0x938] sm:$0xff] }
 0x3d8   : > { %3468 = vmatpush1.msra.mxu0 %v3305_v8  ;;  %3539 = vmatpush1.msra.mxu1 %v3369_v10  ;;  %v3406_v17 = vld [vmem:[#allocation8 + $0xb38] sm:$0xff]  ;;  %v3341_v8 = vld [vmem:[#allocation8 + $0x930] sm:$0xff] }
 0x3d9   : > { %3469 = vmatprep.subr.mxu0 %v3304_v11  ;;  %3540 = vmatprep.subr.mxu1 %v3368_v13  ;;  %v3405_v10 = vld [vmem:[#allocation8 + $0xb30] sm:$0xff]  ;;  %v3340_v11 = vld [vmem:[#allocation8 + $0x928] sm:$0xff] }
 0x3da   : > { %3470 = vmatpush1.msra.mxu0 %v3303_v18  ;;  %3541 = vmatpush1.msra.mxu1 %v3367_v19  ;;  %v3404_v13 = vld [vmem:[#allocation8 + $0xb28] sm:$0xff]  ;;  %v7424_v18 = vmov 1966171168  }
 0x3db   : > { %3471 = vmatprep.subr.mxu0 %v3366_v20  ;;  %3542 = vmatprep.subr.mxu1 %v3430_v21  ;;  %v2735_v19 = vunpack.c.l.s4 %v7424_v18  ;;  %v2515_v20 = vpop.f32.mrf.mxu0  ;;  %v2586_v21 = vpop.f32.mrf.mxu1  ;;  %v3752_v18 = vld [vmem:[#allocation8 + $0x4a0] sm:$0xff] }
 0x3dc   : > { %3472 = vmatpush2.msra.mxu0 %v3365_v22  ;;  %3543 = vmatpush2.msra.mxu1 %v3429_v23  ;;  %v3339_v22 = vld [vmem:[#allocation8 + $0x920] sm:$0xff] }
 0x3dd   : > { %3473 = vmatprep.subr.mxu0 %v3364_v24  ;;  %3544 = vmatprep.subr.mxu1 %v3428_v25  ;;  %v3403_v23 = vld [vmem:[#allocation8 + $0xb20] sm:$0xff]  ;;  %v2585_v24 = vadd.f32 %v2584_v4, %v2513_v58  ;;  %v3338_v25 = vld [vmem:[#allocation8 + $0x918] sm:$0xff]  ;;  %v3757_v58 = vld [vmem:[#allocation8 + $0x4c8] sm:$0xff] }
 0x3de   : > { %3474 = vmatpush2.msra.mxu0 %v3363_v51  ;;  %3545 = vmatpush2.msra.mxu1 %v3427_v26  ;;  %v3402_v51 = vld [vmem:[#allocation8 + $0xb18] sm:$0xff]  ;;  %v3337_v26 = vld [vmem:[#allocation8 + $0x910] sm:$0xff]  ;;  %v3821_v4 = vld [vmem:[#allocation8 + $0x6c8] sm:$0xff] }
 0x3df   : > { %3475 = vmatprep.subr.mxu0 %v3362_v27  ;;  %3546 = vmatprep.subr.mxu1 %v3426_v57  ;;  %v3401_v27 = vld [vmem:[#allocation8 + $0xb10] sm:$0xff] }
 0x3e0   : > { %3476 = vmatpush2.msra.mxu0 %v3361_v28  ;;  %3547 = vmatpush2.msra.mxu1 %v3425_v29  ;;  %v2587_v29 = vadd.f32 %v2586_v21, %v2515_v20  ;;  %v3751_v20 = vld [vmem:[#allocation8 + $0x498] sm:$0xff] }
 0x3e1   : > { %3477 = vmatprep.subr.mxu0 %v3360_v30  ;;  %3548 = vmatprep.subr.mxu1 %v3424_v31  ;;  %v3336_v30 = vld [vmem:[#allocation8 + $0x908] sm:$0xff]  ;;  %v3815_v21 = vld [vmem:[#allocation8 + $0x698] sm:$0xff] }
 0x3e2   : > { %3478 = vmatpush2.msra.mxu0 %v3359_v32  ;;  %3549 = vmatpush2.msra.mxu1 %v3423_v7  ;;  %v3400_v31 = vld [vmem:[#allocation8 + $0xb08] sm:$0xff]  ;;  %v2736_v7 = vunpack.c.0.s8 %v2735_v19  ;;  %v3816_v19 = vld [vmem:[#allocation8 + $0x6a0] sm:$0xff] }
 0x3e3   : > { %3479 = vmatprep.subr.mxu0 %v3358_v9  ;;  %3550 = vmatprep.subr.mxu1 %v3422_v33  ;;  %v3335_v9 = vld [vmem:[#allocation8 + $0x900] sm:$0xff] }
 0x3e4   : > { %3480 = vmatpush2.msra.mxu0 %v3357_v34  ;;  %3551 = vmatpush2.msra.mxu1 %v3421_v43  ;;  %v3399_v33 = vld [vmem:[#allocation8 + $0xb00] sm:$0xff] }
 0x3e5   : > { %3481 = vmatprep.subr.mxu0 %v3356_v44  ;;  %3552 = vmatprep.subr.mxu1 %v3420_v14  ;;  %v3431_v44 = vrot.slane %v7777_v36, 3  ;;  %v3433_v14 = vrot.slane %v7779_v37, 3 }
 0x3e6   : > { %3482 = vmatpush2.msra.mxu0 %v3355_v41  ;;  %3553 = vmatpush2.msra.mxu1 %v3419_v46  ;;  %v3763_v41 = vld [vmem:[#allocation8 + $0x4f8] sm:$0xff] }
 0x3e7   : > { %3483 = vmatprep.subr.mxu0 %v3354_v47  ;;  %3554 = vmatprep.subr.mxu1 %v3418_v48  ;;  %v3827_v46 = vld [vmem:[#allocation8 + $0x6f8] sm:$0xff] }
 0x3e8   : > { %3484 = vmatpush2.msra.mxu0 %v3353_v49  ;;  %3555 = vmatpush2.msra.mxu1 %v3417_v50  ;;  %v3762_v49 = vld [vmem:[#allocation8 + $0x4f0] sm:$0xff] }
 0x3e9   : > { %3485 = vmatprep.subr.mxu0 %v3352_v52  ;;  %3556 = vmatprep.subr.mxu1 %v3416_v53  ;;  %v9120_v52 = vld [vmem:[#allocation34_spill] sm:$0xff] }
 0x3ea   : > { %3486 = vmatpush2.msra.mxu0 %v3351_v55  ;;  %3557 = vmatpush2.msra.mxu1 %v3415_v56  ;;  %v8328_v53 = vsub.s32 %v2736_v7, %v9120_v52  ;;  %v3861_v55 = vrot.slane %v7781_v38, 4  ;;  %v3826_v56 = vld [vmem:[#allocation8 + $0x6f0] sm:$0xff]  ;;  %v3808_v7 = vld [vmem:[#allocation8 + $0x660] sm:$0xff] }
 0x3eb   : > { %3487 = vmatprep.subr.mxu0 %v3350_v59  ;;  %3558 = vmatprep.subr.mxu1 %v3414_v60  ;;  %v3863_v59 = vrot.slane %v7783_v39, 4  ;;  %v3738_v52 = vld [vmem:[#allocation8 + $0x430] sm:$0xff] }
 0x3ec   : > { %3488 = vmatpush2.msra.mxu0 %v3349_v61  ;;  %3559 = vmatpush2.msra.mxu1 %v3413_v62  ;;  %v3761_v61 = vld [vmem:[#allocation8 + $0x4e8] sm:$0xff] }
 0x3ed   : > { %3489 = vmatprep.subr.mxu0 %v3348_v63  ;;  %3560 = vmatprep.subr.mxu1 %v3412_v0  ;;  %v3825_v62 = vld [vmem:[#allocation8 + $0x6e8] sm:$0xff]  ;;  %v3760_v63 = vld [vmem:[#allocation8 + $0x4e0] sm:$0xff] }
 0x3ee   : > { %3490 = vmatpush2.msra.mxu0 %v3347_v2  ;;  %3561 = vmatpush2.msra.mxu1 %v3411_v35  ;;  %v3824_v0 = vld [vmem:[#allocation8 + $0x6e0] sm:$0xff]  ;;  %v3759_v35 = vld [vmem:[#allocation8 + $0x4d8] sm:$0xff] }
 0x3ef   : > { %3491 = vmatprep.subr.mxu0 %v3346_v3  ;;  %3562 = vmatprep.subr.mxu1 %v3410_v54  ;;  %v3823_v3 = vld [vmem:[#allocation8 + $0x6d8] sm:$0xff]  ;;  %v9121_v54 = vlaneseq }
 0x3f0   : > { %3492 = vmatpush2.msra.mxu0 %v3345_v42  ;;  %3563 = vmatpush2.msra.mxu1 %v3409_v40  ;;  %v3758_v40 = vld [vmem:[#allocation8 + $0x4d0] sm:$0xff]  ;;  %v5432_v42 = vld [vmem:[#allocation14 + $0xd8] sm:$0xff] }
 0x3f1   : > { %3493 = vmatprep.subr.mxu0 %v3344_v45  ;;  %3564 = vmatprep.subr.mxu1 %v3408_v1  ;;  %vm8338_vm8 = vcmp.lt.s32.totalorder %v9121_v54, 256  ;;  %v3822_v45 = vld [vmem:[#allocation8 + $0x6d0] sm:$0xff]  ;;  %v3732_v54 = vld [vmem:[#allocation8 + $0x400] sm:$0xff] }
 0x3f2   : > { %3494 = vmatpush2.msra.mxu0 %v3343_v5  ;;  %3565 = vmatpush2.msra.mxu1 %v3407_v6  ;;  %v3756_v5 = vld [vmem:[#allocation8 + $0x4c0] sm:$0xff] }
 0x3f3   : > { %3495 = vmatprep.subr.mxu0 %v3342_v15  ;;  %3566 = vmatprep.subr.mxu1 %v3406_v17  ;;  %v3820_v6 = vld [vmem:[#allocation8 + $0x6c0] sm:$0xff]  ;;  %v3755_v15 = vld [vmem:[#allocation8 + $0x4b8] sm:$0xff] }
 0x3f4   : > { %3496 = vmatpush2.msra.mxu0 %v3341_v8  ;;  %3567 = vmatpush2.msra.mxu1 %v3405_v10  ;;  %v3819_v17 = vld [vmem:[#allocation8 + $0x6b8] sm:$0xff]  ;;  %v3754_v8 = vld [vmem:[#allocation8 + $0x4b0] sm:$0xff] }
 0x3f5   : > { %3497 = vmatprep.subr.mxu0 %v3340_v11  ;;  %3568 = vmatprep.subr.mxu1 %v3404_v13  ;;  %v2655_v57 = vpop.f32.mrf.mxu0  ;;  %v2726_v28 = vpop.f32.mrf.mxu1  ;;  %v3818_v10 = vld [vmem:[#allocation8 + $0x6b0] sm:$0xff]  ;;  %v3753_v11 = vld [vmem:[#allocation8 + $0x4a8] sm:$0xff] }
 0x3f6   : > { %3498 = vmatpush2.msra.mxu0 %v3339_v22  ;;  %3569 = vmatpush2.msra.mxu1 %v3403_v23  ;;  %v2656_v32 = vadd.f32 %v2655_v57, %v2585_v24  ;;  %v3817_v13 = vld [vmem:[#allocation8 + $0x6a8] sm:$0xff]  ;;  %v3750_v22 = vld [vmem:[#allocation8 + $0x490] sm:$0xff]  ;;  %v3811_v57 = vld [vmem:[#allocation8 + $0x678] sm:$0xff] }
 0x3f7   : > { %3499 = vmatprep.subr.mxu0 %v3338_v25  ;;  %3570 = vmatprep.subr.mxu1 %v3402_v51  ;;  %v2657_v34 = vpop.f32.mrf.mxu0  ;;  %v2728_v47 = vpop.f32.mrf.mxu1  ;;  %v3814_v23 = vld [vmem:[#allocation8 + $0x690] sm:$0xff]  ;;  %v3749_v24 = vld [vmem:[#allocation8 + $0x488] sm:$0xff]  ;;  %v3748_v51 = vld [vmem:[#allocation8 + $0x480] sm:$0xff] }
 0x3f8   : > { %3500 = vmatpush2.msra.mxu0 %v3337_v26  ;;  %3571 = vmatpush2.msra.mxu1 %v3401_v27  ;;  %v2658_v43 = vadd.f32 %v2657_v34, %v2587_v29  ;;  %v2727_v48 = vadd.f32 %v2726_v28, %v2656_v32  ;;  %v3813_v25 = vld [vmem:[#allocation8 + $0x688] sm:$0xff]  ;;  %v3812_v26 = vld [vmem:[#allocation8 + $0x680] sm:$0xff]  ;;  %v3747_v27 = vld [vmem:[#allocation8 + $0x478] sm:$0xff] }
 0x3f9   : > { %3501 = vmatprep.subr.mxu0 %v3336_v30  ;;  %3572 = vmatprep.subr.mxu1 %v3400_v31  ;;  %v3746_v28 = vld [vmem:[#allocation8 + $0x470] sm:$0xff]  ;;  %v3745_v30 = vld [vmem:[#allocation8 + $0x468] sm:$0xff]  ;;  %v3744_v32 = vld [vmem:[#allocation8 + $0x460] sm:$0xff] }
 0x3fa   : > { %3502 = vmatpush2.msra.mxu0 %v3335_v9  ;;  %3573 = vmatpush2.msra.mxu1 %v3399_v33  ;;  %v2729_v50 = vadd.f32 %v2728_v47, %v2658_v43  ;;  %v3810_v29 = vld [vmem:[#allocation8 + $0x670] sm:$0xff]  ;;  %v3809_v31 = vld [vmem:[#allocation8 + $0x668] sm:$0xff]  ;;  %v3743_v9 = vld [vmem:[#allocation8 + $0x458] sm:$0xff] }
 0x3fb   : > { %3504 = vmatmul.mubr.f32.vlgmr.msra.gmra.mxu0 %v3431_v44  ;;  %3575 = vmatmul.mubr.f32.vlgmr.msra.gmra.mxu1 %v3433_v14  ;;  %v3807_v33 = vld [vmem:[#allocation8 + $0x658] sm:$0xff]  ;;  %v3742_v34 = vld [vmem:[#allocation8 + $0x450] sm:$0xff]  ;;  %v3740_v47 = vld [vmem:[#allocation8 + $0x440] sm:$0xff] }
 0x3fc   : > { %3868 = vmatprep.subr.mxu0 %v3763_v41  ;;  %3939 = vmatprep.subr.mxu1 %v3827_v46  ;;  %v2733_v60 = vcombine.low %v2727_v48, %v2729_v50  ;;  %v3806_v43 = vld [vmem:[#allocation8 + $0x650] sm:$0xff]  ;;  %v3741_v41 = vld [vmem:[#allocation8 + $0x448] sm:$0xff]  ;;  %v3804_v48 = vld [vmem:[#allocation8 + $0x640] sm:$0xff] }
 0x3fd   : > { %3869 = vmatpush1.msra.mxu0 %v3762_v49  ;;  %3932 = vmatprep.mubr.f32.mxu0 %v3861_v55  ;;  %v3805_v46 = vld [vmem:[#allocation8 + $0x648] sm:$0xff]  ;;  %v3739_v49 = vld [vmem:[#allocation8 + $0x438] sm:$0xff]  ;;  %v3802_v55 = vld [vmem:[#allocation8 + $0x630] sm:$0xff] }
 0x3fe   : > { %3940 = vmatpush1.msra.mxu1 %v3826_v56  ;;  %4003 = vmatprep.mubr.f32.mxu1 %v3863_v59  ;;  %v2740_v2 = vrot.slane %v2733_v60, %v8328_v53  ;;  %v3803_v50 = vld [vmem:[#allocation8 + $0x638] sm:$0xff]  ;;  %v3737_v56 = vld [vmem:[#allocation8 + $0x428] sm:$0xff]  ;;  %v3736_v60 = vld [vmem:[#allocation8 + $0x420] sm:$0xff] }
 0x3ff   : > { %3870 = vmatprep.subr.mxu0 %v3761_v61  ;;  %3941 = vmatprep.subr.mxu1 %v3825_v62  ;;  %v3801_v59 = vld [vmem:[#allocation8 + $0x628] sm:$0xff]  ;;  %v3800_v61 = vld [vmem:[#allocation8 + $0x620] sm:$0xff]  ;;  %v3735_v62 = vld [vmem:[#allocation8 + $0x418] sm:$0xff] }
 0x400   : > { %v2747_v1 = vrot.slane %v2740_v2, %v8328_v53  ;;  %3871 = vmatpush1.msra.mxu0 %v3760_v63  ;;  %3942 = vmatpush1.msra.mxu1 %v3824_v0  ;;  %v3799_v63 = vld [vmem:[#allocation8 + $0x618] sm:$0xff]  ;;  %v3734_v0 = vld [vmem:[#allocation8 + $0x410] sm:$0xff] }
 0x401   : > { %3872 = vmatprep.subr.mxu0 %v3759_v35  ;;  %3943 = vmatprep.subr.mxu1 %v3823_v3  ;;  %v3798_v2 = vld [vmem:[#allocation8 + $0x610] sm:$0xff]  ;;  %v3733_v35 = vld [vmem:[#allocation8 + $0x408] sm:$0xff] }
 0x402   : > { %2753 = vst.msk [vmem:[#allocation2] ss:$8 sm:$0x3] %vm8338_vm8, %v2747_v1  ;;  %3873 = vmatpush1.msra.mxu0 %v3758_v40  ;;  %3944 = vmatpush1.msra.mxu1 %v3822_v45  ;;  %v3797_v3 = vld [vmem:[#allocation8 + $0x608] sm:$0xff]  ;;  %v3796_v40 = vld [vmem:[#allocation8 + $0x600] sm:$0xff]  ;;  %v3795_v45 = vld [vmem:[#allocation8 + $0x5f8] sm:$0xff] }
 0x403   : > { %3874 = vmatprep.subr.mxu0 %v3757_v58  ;;  %3945 = vmatprep.subr.mxu1 %v3821_v4  ;;  %v3859_v1 = vld [vmem:[#allocation8 + $0x7f8] sm:$0xff]  ;;  %v3794_v58 = vld [vmem:[#allocation8 + $0x5f0] sm:$0xff] }
 0x404   : > { %3875 = vmatpush1.msra.mxu0 %v3756_v5  ;;  %3946 = vmatpush1.msra.mxu1 %v3820_v6  ;;  %v3858_v4 = vld [vmem:[#allocation8 + $0x7f0] sm:$0xff]  ;;  %v3793_v5 = vld [vmem:[#allocation8 + $0x5e8] sm:$0xff] }
 0x405   : > { %3876 = vmatprep.subr.mxu0 %v3755_v15  ;;  %3947 = vmatprep.subr.mxu1 %v3819_v17  ;;  %v3857_v6 = vld [vmem:[#allocation8 + $0x7e8] sm:$0xff]  ;;  %v3792_v15 = vld [vmem:[#allocation8 + $0x5e0] sm:$0xff] }
 0x406   : > { %3877 = vmatpush1.msra.mxu0 %v3754_v8  ;;  %3948 = vmatpush1.msra.mxu1 %v3818_v10  ;;  %v3856_v17 = vld [vmem:[#allocation8 + $0x7e0] sm:$0xff]  ;;  %v3791_v8 = vld [vmem:[#allocation8 + $0x5d8] sm:$0xff] }
 0x407   : > { %3878 = vmatprep.subr.mxu0 %v3753_v11  ;;  %3949 = vmatprep.subr.mxu1 %v3817_v13  ;;  %v3855_v10 = vld [vmem:[#allocation8 + $0x7d8] sm:$0xff]  ;;  %v3790_v11 = vld [vmem:[#allocation8 + $0x5d0] sm:$0xff] }
 0x408   : > { %3879 = vmatpush1.msra.mxu0 %v3752_v18  ;;  %3950 = vmatpush1.msra.mxu1 %v3816_v19  ;;  %v3854_v13 = vld [vmem:[#allocation8 + $0x7d0] sm:$0xff]  ;;  %v3789_v18 = vld [vmem:[#allocation8 + $0x5c8] sm:$0xff] }
 0x409   : > { %3880 = vmatprep.subr.mxu0 %v3751_v20  ;;  %3951 = vmatprep.subr.mxu1 %v3815_v21  ;;  %v3853_v19 = vld [vmem:[#allocation8 + $0x7c8] sm:$0xff]  ;;  %v3788_v20 = vld [vmem:[#allocation8 + $0x5c0] sm:$0xff] }
 0x40a   : > { %3881 = vmatpush1.msra.mxu0 %v3750_v22  ;;  %3952 = vmatpush1.msra.mxu1 %v3814_v23  ;;  %v3852_v21 = vld [vmem:[#allocation8 + $0x7c0] sm:$0xff]  ;;  %v3787_v22 = vld [vmem:[#allocation8 + $0x5b8] sm:$0xff] }
 0x40b   : > { %3882 = vmatprep.subr.mxu0 %v3749_v24  ;;  %3953 = vmatprep.subr.mxu1 %v3813_v25  ;;  %v3851_v23 = vld [vmem:[#allocation8 + $0x7b8] sm:$0xff]  ;;  %v3786_v24 = vld [vmem:[#allocation8 + $0x5b0] sm:$0xff] }
 0x40c   : > { %3883 = vmatpush1.msra.mxu0 %v3748_v51  ;;  %3954 = vmatpush1.msra.mxu1 %v3812_v26  ;;  %v3850_v25 = vld [vmem:[#allocation8 + $0x7b0] sm:$0xff]  ;;  %v3785_v51 = vld [vmem:[#allocation8 + $0x5a8] sm:$0xff] }
 0x40d   : > { %3884 = vmatprep.subr.mxu0 %v3747_v27  ;;  %3955 = vmatprep.subr.mxu1 %v3811_v57  ;;  %v3849_v26 = vld [vmem:[#allocation8 + $0x7a8] sm:$0xff]  ;;  %v3784_v27 = vld [vmem:[#allocation8 + $0x5a0] sm:$0xff] }
 0x40e   : > { %3885 = vmatpush1.msra.mxu0 %v3746_v28  ;;  %3956 = vmatpush1.msra.mxu1 %v3810_v29  ;;  %v3848_v57 = vld [vmem:[#allocation8 + $0x7a0] sm:$0xff]  ;;  %v3783_v28 = vld [vmem:[#allocation8 + $0x598] sm:$0xff] }
 0x40f   : > { %3886 = vmatprep.subr.mxu0 %v3745_v30  ;;  %3957 = vmatprep.subr.mxu1 %v3809_v31  ;;  %v3847_v29 = vld [vmem:[#allocation8 + $0x798] sm:$0xff]  ;;  %v3782_v30 = vld [vmem:[#allocation8 + $0x590] sm:$0xff] }
 0x410   : > { %3887 = vmatpush1.msra.mxu0 %v3744_v32  ;;  %3958 = vmatpush1.msra.mxu1 %v3808_v7  ;;  %v3846_v31 = vld [vmem:[#allocation8 + $0x790] sm:$0xff]  ;;  %v3781_v32 = vld [vmem:[#allocation8 + $0x588] sm:$0xff] }
 0x411   : > { %3888 = vmatprep.subr.mxu0 %v3743_v9  ;;  %3959 = vmatprep.subr.mxu1 %v3807_v33  ;;  %v3845_v7 = vld [vmem:[#allocation8 + $0x788] sm:$0xff]  ;;  %v3780_v9 = vld [vmem:[#allocation8 + $0x580] sm:$0xff] }
 0x412   : > { %3889 = vmatpush1.msra.mxu0 %v3742_v34  ;;  %3960 = vmatpush1.msra.mxu1 %v3806_v43  ;;  %v3844_v33 = vld [vmem:[#allocation8 + $0x780] sm:$0xff]  ;;  %v3779_v34 = vld [vmem:[#allocation8 + $0x578] sm:$0xff] }
 0x413   : > { %3890 = vmatprep.subr.mxu0 %v3741_v41  ;;  %3961 = vmatprep.subr.mxu1 %v3805_v46  ;;  %v3843_v43 = vld [vmem:[#allocation8 + $0x778] sm:$0xff]  ;;  %v3778_v41 = vld [vmem:[#allocation8 + $0x570] sm:$0xff] }
 0x414   : > { %3891 = vmatpush1.msra.mxu0 %v3740_v47  ;;  %3962 = vmatpush1.msra.mxu1 %v3804_v48  ;;  %v3842_v46 = vld [vmem:[#allocation8 + $0x770] sm:$0xff]  ;;  %v3777_v47 = vld [vmem:[#allocation8 + $0x568] sm:$0xff] }
 0x415   : > { %3892 = vmatprep.subr.mxu0 %v3739_v49  ;;  %3963 = vmatprep.subr.mxu1 %v3803_v50  ;;  %v3841_v48 = vld [vmem:[#allocation8 + $0x768] sm:$0xff]  ;;  %v3776_v49 = vld [vmem:[#allocation8 + $0x560] sm:$0xff] }
 0x416   : > { %3893 = vmatpush1.msra.mxu0 %v3738_v52  ;;  %3964 = vmatpush1.msra.mxu1 %v3802_v55  ;;  %v3840_v50 = vld [vmem:[#allocation8 + $0x760] sm:$0xff]  ;;  %v3775_v52 = vld [vmem:[#allocation8 + $0x558] sm:$0xff] }
 0x417   : > { %3894 = vmatprep.subr.mxu0 %v3737_v56  ;;  %3965 = vmatprep.subr.mxu1 %v3801_v59  ;;  %v3839_v55 = vld [vmem:[#allocation8 + $0x758] sm:$0xff]  ;;  %v3774_v56 = vld [vmem:[#allocation8 + $0x550] sm:$0xff] }
 0x418   : > { %3895 = vmatpush1.msra.mxu0 %v3736_v60  ;;  %3966 = vmatpush1.msra.mxu1 %v3800_v61  ;;  %v3838_v59 = vld [vmem:[#allocation8 + $0x750] sm:$0xff]  ;;  %v3773_v60 = vld [vmem:[#allocation8 + $0x548] sm:$0xff] }
 0x419   : > { %3896 = vmatprep.subr.mxu0 %v3735_v62  ;;  %3967 = vmatprep.subr.mxu1 %v3799_v63  ;;  %v3837_v61 = vld [vmem:[#allocation8 + $0x748] sm:$0xff]  ;;  %v3772_v62 = vld [vmem:[#allocation8 + $0x540] sm:$0xff] }
 0x41a   : > { %3897 = vmatpush1.msra.mxu0 %v3734_v0  ;;  %3968 = vmatpush1.msra.mxu1 %v3798_v2  ;;  %v3836_v63 = vld [vmem:[#allocation8 + $0x740] sm:$0xff]  ;;  %v3771_v0 = vld [vmem:[#allocation8 + $0x538] sm:$0xff] }
 0x41b   : > { %3898 = vmatprep.subr.mxu0 %v3733_v35  ;;  %3969 = vmatprep.subr.mxu1 %v3797_v3  ;;  %v3835_v2 = vld [vmem:[#allocation8 + $0x738] sm:$0xff]  ;;  %v3770_v35 = vld [vmem:[#allocation8 + $0x530] sm:$0xff] }
 0x41c   : > { %3899 = vmatpush1.msra.mxu0 %v3732_v54  ;;  %3970 = vmatpush1.msra.mxu1 %v3796_v40  ;;  %v3834_v3 = vld [vmem:[#allocation8 + $0x730] sm:$0xff]  ;;  %v3769_v54 = vld [vmem:[#allocation8 + $0x528] sm:$0xff] }
 0x41d   : > { %3900 = vmatprep.subr.mxu0 %v3795_v45  ;;  %3971 = vmatprep.subr.mxu1 %v3859_v1  ;;  %v3833_v40 = vld [vmem:[#allocation8 + $0x728] sm:$0xff]  ;;  %v3768_v45 = vld [vmem:[#allocation8 + $0x520] sm:$0xff] }
 0x41e   : > { %3901 = vmatpush2.msra.mxu0 %v3794_v58  ;;  %3972 = vmatpush2.msra.mxu1 %v3858_v4  ;;  %v3832_v1 = vld [vmem:[#allocation8 + $0x720] sm:$0xff]  ;;  %v3767_v58 = vld [vmem:[#allocation8 + $0x518] sm:$0xff] }
 0x41f   : > { %3902 = vmatprep.subr.mxu0 %v3793_v5  ;;  %3973 = vmatprep.subr.mxu1 %v3857_v6  ;;  %v3831_v4 = vld [vmem:[#allocation8 + $0x718] sm:$0xff]  ;;  %v3766_v5 = vld [vmem:[#allocation8 + $0x510] sm:$0xff] }
 0x420   : > { %3903 = vmatpush2.msra.mxu0 %v3792_v15  ;;  %3974 = vmatpush2.msra.mxu1 %v3856_v17  ;;  %v3830_v6 = vld [vmem:[#allocation8 + $0x710] sm:$0xff]  ;;  %v3765_v15 = vld [vmem:[#allocation8 + $0x508] sm:$0xff] }
 0x421   : > { %3904 = vmatprep.subr.mxu0 %v3791_v8  ;;  %3975 = vmatprep.subr.mxu1 %v3855_v10  ;;  %v3829_v17 = vld [vmem:[#allocation8 + $0x708] sm:$0xff]  ;;  %v3764_v8 = vld [vmem:[#allocation8 + $0x500] sm:$0xff] }
 0x422   : > { %3905 = vmatpush2.msra.mxu0 %v3790_v11  ;;  %3976 = vmatpush2.msra.mxu1 %v3854_v13  ;;  %v3828_v10 = vld [vmem:[#allocation8 + $0x700] sm:$0xff]  ;;  %v3860_v11 = vrot.slane %v7777_v36, 4  ;;  %v3862_v13 = vrot.slane %v7779_v37, 4 }
 0x423   : > { %3906 = vmatprep.subr.mxu0 %v3789_v18  ;;  %3977 = vmatprep.subr.mxu1 %v3853_v19  ;;  %v3635_v18 = vld [vmem:[#allocation8 + $0xf8] sm:$0xff] }
 0x424   : > { %3907 = vmatpush2.msra.mxu0 %v3788_v20  ;;  %3978 = vmatpush2.msra.mxu1 %v3852_v21  ;;  %v3699_v19 = vld [vmem:[#allocation8 + $0x2f8] sm:$0xff]  ;;  %v3634_v20 = vld [vmem:[#allocation8 + $0xf0] sm:$0xff] }
 0x425   : > { %3908 = vmatprep.subr.mxu0 %v3787_v22  ;;  %3979 = vmatprep.subr.mxu1 %v3851_v23  ;;  %v3698_v21 = vld [vmem:[#allocation8 + $0x2f0] sm:$0xff]  ;;  %v3633_v22 = vld [vmem:[#allocation8 + $0xe8] sm:$0xff] }
 0x426   : > { %3909 = vmatpush2.msra.mxu0 %v3786_v24  ;;  %3980 = vmatpush2.msra.mxu1 %v3850_v25  ;;  %v3697_v23 = vld [vmem:[#allocation8 + $0x2e8] sm:$0xff]  ;;  %v3632_v24 = vld [vmem:[#allocation8 + $0xe0] sm:$0xff] }
 0x427   : > { %3910 = vmatprep.subr.mxu0 %v3785_v51  ;;  %3981 = vmatprep.subr.mxu1 %v3849_v26  ;;  %v3696_v25 = vld [vmem:[#allocation8 + $0x2e0] sm:$0xff]  ;;  %v3631_v51 = vld [vmem:[#allocation8 + $0xd8] sm:$0xff] }
 0x428   : > { %3911 = vmatpush2.msra.mxu0 %v3784_v27  ;;  %3982 = vmatpush2.msra.mxu1 %v3848_v57  ;;  %v3695_v26 = vld [vmem:[#allocation8 + $0x2d8] sm:$0xff]  ;;  %v3630_v27 = vld [vmem:[#allocation8 + $0xd0] sm:$0xff] }
 0x429   : > { %3912 = vmatprep.subr.mxu0 %v3783_v28  ;;  %3983 = vmatprep.subr.mxu1 %v3847_v29  ;;  %v3694_v57 = vld [vmem:[#allocation8 + $0x2d0] sm:$0xff]  ;;  %v3629_v28 = vld [vmem:[#allocation8 + $0xc8] sm:$0xff] }
 0x42a   : > { %3913 = vmatpush2.msra.mxu0 %v3782_v30  ;;  %3984 = vmatpush2.msra.mxu1 %v3846_v31  ;;  %v3693_v29 = vld [vmem:[#allocation8 + $0x2c8] sm:$0xff]  ;;  %v3628_v30 = vld [vmem:[#allocation8 + $0xc0] sm:$0xff]  ;;  %v3627_v31 = vld [vmem:[#allocation8 + $0xb8] sm:$0xff] }
 0x42b   : > { %3914 = vmatprep.subr.mxu0 %v3781_v32  ;;  %3985 = vmatprep.subr.mxu1 %v3845_v7  ;;  %v3691_v32 = vld [vmem:[#allocation8 + $0x2b8] sm:$0xff]  ;;  %v3690_v7 = vld [vmem:[#allocation8 + $0x2b0] sm:$0xff] }
 0x42c   : > { %3915 = vmatpush2.msra.mxu0 %v3780_v9  ;;  %3986 = vmatpush2.msra.mxu1 %v3844_v33  ;;  %v3625_v9 = vld [vmem:[#allocation8 + $0xa8] sm:$0xff] }
 0x42d   : > { %3916 = vmatprep.subr.mxu0 %v3779_v34  ;;  %3987 = vmatprep.subr.mxu1 %v3843_v43  ;;  %v3689_v33 = vld [vmem:[#allocation8 + $0x2a8] sm:$0xff]  ;;  %v3624_v34 = vld [vmem:[#allocation8 + $0xa0] sm:$0xff] }
 0x42e   : > { %3917 = vmatpush2.msra.mxu0 %v3778_v41  ;;  %3988 = vmatpush2.msra.mxu1 %v3842_v46  ;;  %v3688_v43 = vld [vmem:[#allocation8 + $0x2a0] sm:$0xff]  ;;  %v3623_v41 = vld [vmem:[#allocation8 + $0x98] sm:$0xff] }
 0x42f   : > { %3918 = vmatprep.subr.mxu0 %v3777_v47  ;;  %3989 = vmatprep.subr.mxu1 %v3841_v48  ;;  %v3687_v46 = vld [vmem:[#allocation8 + $0x298] sm:$0xff]  ;;  %v3622_v47 = vld [vmem:[#allocation8 + $0x90] sm:$0xff] }
 0x430   : > { %3919 = vmatpush2.msra.mxu0 %v3776_v49  ;;  %3990 = vmatpush2.msra.mxu1 %v3840_v50  ;;  %v3686_v48 = vld [vmem:[#allocation8 + $0x290] sm:$0xff]  ;;  %v3621_v49 = vld [vmem:[#allocation8 + $0x88] sm:$0xff] }
 0x431   : > { %3920 = vmatprep.subr.mxu0 %v3775_v52  ;;  %3991 = vmatprep.subr.mxu1 %v3839_v55  ;;  %v3685_v50 = vld [vmem:[#allocation8 + $0x288] sm:$0xff]  ;;  %v3620_v52 = vld [vmem:[#allocation8 + $0x80] sm:$0xff] }
 0x432   : > { %3921 = vmatpush2.msra.mxu0 %v3774_v56  ;;  %3992 = vmatpush2.msra.mxu1 %v3838_v59  ;;  %v3684_v55 = vld [vmem:[#allocation8 + $0x280] sm:$0xff]  ;;  %v3619_v56 = vld [vmem:[#allocation8 + $0x78] sm:$0xff] }
 0x433   : > { %3922 = vmatprep.subr.mxu0 %v3773_v60  ;;  %3993 = vmatprep.subr.mxu1 %v3837_v61  ;;  %v3683_v59 = vld [vmem:[#allocation8 + $0x278] sm:$0xff]  ;;  %v3618_v60 = vld [vmem:[#allocation8 + $0x70] sm:$0xff] }
 0x434   : > { %3923 = vmatpush2.msra.mxu0 %v3772_v62  ;;  %3994 = vmatpush2.msra.mxu1 %v3836_v63  ;;  %v3682_v61 = vld [vmem:[#allocation8 + $0x270] sm:$0xff]  ;;  %v3617_v62 = vld [vmem:[#allocation8 + $0x68] sm:$0xff] }
 0x435   : > { %3924 = vmatprep.subr.mxu0 %v3771_v0  ;;  %3995 = vmatprep.subr.mxu1 %v3835_v2  ;;  %v3681_v63 = vld [vmem:[#allocation8 + $0x268] sm:$0xff]  ;;  %v3616_v0 = vld [vmem:[#allocation8 + $0x60] sm:$0xff] }
 0x436   : > { %3925 = vmatpush2.msra.mxu0 %v3770_v35  ;;  %3996 = vmatpush2.msra.mxu1 %v3834_v3  ;;  %v3680_v2 = vld [vmem:[#allocation8 + $0x260] sm:$0xff]  ;;  %v3615_v35 = vld [vmem:[#allocation8 + $0x58] sm:$0xff] }
 0x437   : > { %3926 = vmatprep.subr.mxu0 %v3769_v54  ;;  %3997 = vmatprep.subr.mxu1 %v3833_v40  ;;  %v3679_v3 = vld [vmem:[#allocation8 + $0x258] sm:$0xff]  ;;  %v3614_v54 = vld [vmem:[#allocation8 + $0x50] sm:$0xff] }
 0x438   : > { %3927 = vmatpush2.msra.mxu0 %v3768_v45  ;;  %3998 = vmatpush2.msra.mxu1 %v3832_v1  ;;  %v3678_v40 = vld [vmem:[#allocation8 + $0x250] sm:$0xff]  ;;  %v3613_v45 = vld [vmem:[#allocation8 + $0x48] sm:$0xff] }
 0x439   : > { %3928 = vmatprep.subr.mxu0 %v3767_v58  ;;  %3999 = vmatprep.subr.mxu1 %v3831_v4  ;;  %v3677_v1 = vld [vmem:[#allocation8 + $0x248] sm:$0xff]  ;;  %v3612_v58 = vld [vmem:[#allocation8 + $0x40] sm:$0xff] }
 0x43a   : > { %3929 = vmatpush2.msra.mxu0 %v3766_v5  ;;  %4000 = vmatpush2.msra.mxu1 %v3830_v6  ;;  %v3676_v4 = vld [vmem:[#allocation8 + $0x240] sm:$0xff]  ;;  %v3611_v5 = vld [vmem:[#allocation8 + $0x38] sm:$0xff] }
 0x43b   : > { %3930 = vmatprep.subr.mxu0 %v3765_v15  ;;  %4001 = vmatprep.subr.mxu1 %v3829_v17  ;;  %v3675_v6 = vld [vmem:[#allocation8 + $0x238] sm:$0xff]  ;;  %v3610_v15 = vld [vmem:[#allocation8 + $0x30] sm:$0xff] }
 0x43c   : > { %3931 = vmatpush2.msra.mxu0 %v3764_v8  ;;  %4002 = vmatpush2.msra.mxu1 %v3828_v10  ;;  %v3674_v17 = vld [vmem:[#allocation8 + $0x230] sm:$0xff]  ;;  %v3609_v8 = vld [vmem:[#allocation8 + $0x28] sm:$0xff] }
 0x43d   : > { %3933 = vmatmul.mubr.f32.vlgmr.msra.gmra.mxu0 %v3860_v11  ;;  %4004 = vmatmul.mubr.f32.vlgmr.msra.gmra.mxu1 %v3862_v13  ;;  %v3673_v10 = vld [vmem:[#allocation8 + $0x228] sm:$0xff]  ;;  %v3608_v11 = vld [vmem:[#allocation8 + $0x20] sm:$0xff] }
 0x43e   : > { %4010 = vmatprep.subr.mxu0 %v3635_v18  ;;  %4081 = vmatprep.subr.mxu1 %v3699_v19  ;;  %v3672_v13 = vld [vmem:[#allocation8 + $0x220] sm:$0xff]  ;;  %v3607_v18 = vld [vmem:[#allocation8 + $0x18] sm:$0xff] }
 0x43f   : > { %4011 = vmatpush1.msra.mxu0 %v3634_v20  ;;  %4074 = vmatprep.mubr.f32.mxu0 %v3432_v12  ;;  %v3692_v12 = vld [vmem:[#allocation8 + $0x2c0] sm:$0xff]  ;;  %v3671_v19 = vld [vmem:[#allocation8 + $0x218] sm:$0xff]  ;;  %v3606_v20 = vld [vmem:[#allocation8 + $0x10] sm:$0xff] }
 0x440   : > { %4082 = vmatpush1.msra.mxu1 %v3698_v21  ;;  %4145 = vmatprep.mubr.f32.mxu1 %v3434_v16  ;;  %v3626_v16 = vld [vmem:[#allocation8 + $0xb0] sm:$0xff] }
 0x441   : > { %4012 = vmatprep.subr.mxu0 %v3633_v22  ;;  %4083 = vmatprep.subr.mxu1 %v3697_v23  ;;  %v3670_v21 = vld [vmem:[#allocation8 + $0x210] sm:$0xff]  ;;  %v3605_v22 = vld [vmem:[#allocation8 + $0x8] sm:$0xff] }
 0x442   : > { %4013 = vmatpush1.msra.mxu0 %v3632_v24  ;;  %4084 = vmatpush1.msra.mxu1 %v3696_v25  ;;  %v3669_v23 = vld [vmem:[#allocation8 + $0x208] sm:$0xff]  ;;  %v3604_v24 = vld [vmem:[#allocation8] sm:$0xff] }
 0x443   : > { %4014 = vmatprep.subr.mxu0 %v3631_v51  ;;  %4085 = vmatprep.subr.mxu1 %v3695_v26  ;;  %v3668_v25 = vld [vmem:[#allocation8 + $0x200] sm:$0xff]  ;;  %v3667_v51 = vld [vmem:[#allocation8 + $0x1f8] sm:$0xff] }
 0x444   : > { %4015 = vmatpush1.msra.mxu0 %v3630_v27  ;;  %4086 = vmatpush1.msra.mxu1 %v3694_v57  ;;  %v3731_v26 = vld [vmem:[#allocation8 + $0x3f8] sm:$0xff]  ;;  %v3666_v27 = vld [vmem:[#allocation8 + $0x1f0] sm:$0xff] }
 0x445   : > { %4016 = vmatprep.subr.mxu0 %v3629_v28  ;;  %4087 = vmatprep.subr.mxu1 %v3693_v29  ;;  %v3730_v57 = vld [vmem:[#allocation8 + $0x3f0] sm:$0xff]  ;;  %v3665_v28 = vld [vmem:[#allocation8 + $0x1e8] sm:$0xff] }
 0x446   : > { %4017 = vmatpush1.msra.mxu0 %v3628_v30  ;;  %4088 = vmatpush1.msra.mxu1 %v3692_v12  ;;  %v3729_v29 = vld [vmem:[#allocation8 + $0x3e8] sm:$0xff]  ;;  %v3664_v30 = vld [vmem:[#allocation8 + $0x1e0] sm:$0xff] }
 0x447   : > { %4018 = vmatprep.subr.mxu0 %v3627_v31  ;;  %4089 = vmatprep.subr.mxu1 %v3691_v32  ;;  %v3728_v12 = vld [vmem:[#allocation8 + $0x3e0] sm:$0xff]  ;;  %v3663_v31 = vld [vmem:[#allocation8 + $0x1d8] sm:$0xff] }
 0x448   : > { %4019 = vmatpush1.msra.mxu0 %v3626_v16  ;;  %4090 = vmatpush1.msra.mxu1 %v3690_v7  ;;  %v3727_v32 = vld [vmem:[#allocation8 + $0x3d8] sm:$0xff]  ;;  %v3662_v16 = vld [vmem:[#allocation8 + $0x1d0] sm:$0xff] }
 0x449   : > { %4020 = vmatprep.subr.mxu0 %v3625_v9  ;;  %4091 = vmatprep.subr.mxu1 %v3689_v33  ;;  %v3726_v7 = vld [vmem:[#allocation8 + $0x3d0] sm:$0xff]  ;;  %v3661_v9 = vld [vmem:[#allocation8 + $0x1c8] sm:$0xff] }
 0x44a   : > { %4021 = vmatpush1.msra.mxu0 %v3624_v34  ;;  %4092 = vmatpush1.msra.mxu1 %v3688_v43  ;;  %v3725_v33 = vld [vmem:[#allocation8 + $0x3c8] sm:$0xff]  ;;  %v3660_v34 = vld [vmem:[#allocation8 + $0x1c0] sm:$0xff] }
 0x44b   : > { %4022 = vmatprep.subr.mxu0 %v3623_v41  ;;  %4093 = vmatprep.subr.mxu1 %v3687_v46  ;;  %v3724_v43 = vld [vmem:[#allocation8 + $0x3c0] sm:$0xff]  ;;  %v3659_v41 = vld [vmem:[#allocation8 + $0x1b8] sm:$0xff] }
 0x44c   : > { %4023 = vmatpush1.msra.mxu0 %v3622_v47  ;;  %4094 = vmatpush1.msra.mxu1 %v3686_v48  ;;  %v3723_v46 = vld [vmem:[#allocation8 + $0x3b8] sm:$0xff]  ;;  %v3658_v47 = vld [vmem:[#allocation8 + $0x1b0] sm:$0xff] }
 0x44d   : > { %4024 = vmatprep.subr.mxu0 %v3621_v49  ;;  %4095 = vmatprep.subr.mxu1 %v3685_v50  ;;  %v3722_v48 = vld [vmem:[#allocation8 + $0x3b0] sm:$0xff]  ;;  %v3657_v49 = vld [vmem:[#allocation8 + $0x1a8] sm:$0xff] }
 0x44e   : > { %4025 = vmatpush1.msra.mxu0 %v3620_v52  ;;  %4096 = vmatpush1.msra.mxu1 %v3684_v55  ;;  %v3721_v50 = vld [vmem:[#allocation8 + $0x3a8] sm:$0xff]  ;;  %v3656_v52 = vld [vmem:[#allocation8 + $0x1a0] sm:$0xff] }
 0x44f   : > { %4026 = vmatprep.subr.mxu0 %v3619_v56  ;;  %4097 = vmatprep.subr.mxu1 %v3683_v59  ;;  %v3720_v55 = vld [vmem:[#allocation8 + $0x3a0] sm:$0xff]  ;;  %v3655_v56 = vld [vmem:[#allocation8 + $0x198] sm:$0xff] }
 0x450   : > { %4027 = vmatpush1.msra.mxu0 %v3618_v60  ;;  %4098 = vmatpush1.msra.mxu1 %v3682_v61  ;;  %v3719_v59 = vld [vmem:[#allocation8 + $0x398] sm:$0xff]  ;;  %v3654_v60 = vld [vmem:[#allocation8 + $0x190] sm:$0xff] }
 0x451   : > { %4028 = vmatprep.subr.mxu0 %v3617_v62  ;;  %4099 = vmatprep.subr.mxu1 %v3681_v63  ;;  %v3718_v61 = vld [vmem:[#allocation8 + $0x390] sm:$0xff]  ;;  %v3653_v62 = vld [vmem:[#allocation8 + $0x188] sm:$0xff] }
 0x452   : > { %4029 = vmatpush1.msra.mxu0 %v3616_v0  ;;  %4100 = vmatpush1.msra.mxu1 %v3680_v2  ;;  %v3717_v63 = vld [vmem:[#allocation8 + $0x388] sm:$0xff]  ;;  %v3652_v0 = vld [vmem:[#allocation8 + $0x180] sm:$0xff] }
 0x453   : > { %4030 = vmatprep.subr.mxu0 %v3615_v35  ;;  %4101 = vmatprep.subr.mxu1 %v3679_v3  ;;  %v3716_v2 = vld [vmem:[#allocation8 + $0x380] sm:$0xff]  ;;  %v3651_v35 = vld [vmem:[#allocation8 + $0x178] sm:$0xff] }
 0x454   : > { %4031 = vmatpush1.msra.mxu0 %v3614_v54  ;;  %4102 = vmatpush1.msra.mxu1 %v3678_v40  ;;  %v3715_v3 = vld [vmem:[#allocation8 + $0x378] sm:$0xff]  ;;  %v3650_v54 = vld [vmem:[#allocation8 + $0x170] sm:$0xff] }
 0x455   : > { %4032 = vmatprep.subr.mxu0 %v3613_v45  ;;  %4103 = vmatprep.subr.mxu1 %v3677_v1  ;;  %v3714_v40 = vld [vmem:[#allocation8 + $0x370] sm:$0xff]  ;;  %v3649_v45 = vld [vmem:[#allocation8 + $0x168] sm:$0xff] }
 0x456   : > { %4033 = vmatpush1.msra.mxu0 %v3612_v58  ;;  %4104 = vmatpush1.msra.mxu1 %v3676_v4  ;;  %v3713_v1 = vld [vmem:[#allocation8 + $0x368] sm:$0xff]  ;;  %v3648_v58 = vld [vmem:[#allocation8 + $0x160] sm:$0xff] }
 0x457   : > { %4034 = vmatprep.subr.mxu0 %v3611_v5  ;;  %4105 = vmatprep.subr.mxu1 %v3675_v6  ;;  %v3712_v4 = vld [vmem:[#allocation8 + $0x360] sm:$0xff]  ;;  %v3647_v5 = vld [vmem:[#allocation8 + $0x158] sm:$0xff] }
 0x458   : > { %4035 = vmatpush1.msra.mxu0 %v3610_v15  ;;  %4106 = vmatpush1.msra.mxu1 %v3674_v17  ;;  %v3711_v6 = vld [vmem:[#allocation8 + $0x358] sm:$0xff]  ;;  %v3646_v15 = vld [vmem:[#allocation8 + $0x150] sm:$0xff] }
 0x459   : > { %4036 = vmatprep.subr.mxu0 %v3609_v8  ;;  %4107 = vmatprep.subr.mxu1 %v3673_v10  ;;  %v3710_v17 = vld [vmem:[#allocation8 + $0x350] sm:$0xff]  ;;  %v3645_v8 = vld [vmem:[#allocation8 + $0x148] sm:$0xff] }
 0x45a   : > { %4037 = vmatpush1.msra.mxu0 %v3608_v11  ;;  %4108 = vmatpush1.msra.mxu1 %v3672_v13  ;;  %v3709_v10 = vld [vmem:[#allocation8 + $0x348] sm:$0xff]  ;;  %v3644_v11 = vld [vmem:[#allocation8 + $0x140] sm:$0xff] }
 0x45b   : > { %4038 = vmatprep.subr.mxu0 %v3607_v18  ;;  %4109 = vmatprep.subr.mxu1 %v3671_v19  ;;  %v3708_v13 = vld [vmem:[#allocation8 + $0x340] sm:$0xff]  ;;  %v3643_v18 = vld [vmem:[#allocation8 + $0x138] sm:$0xff] }
 0x45c   : > { %4039 = vmatpush1.msra.mxu0 %v3606_v20  ;;  %4110 = vmatpush1.msra.mxu1 %v3670_v21  ;;  %v3707_v19 = vld [vmem:[#allocation8 + $0x338] sm:$0xff]  ;;  %v3642_v20 = vld [vmem:[#allocation8 + $0x130] sm:$0xff] }
 0x45d   : > { %4040 = vmatprep.subr.mxu0 %v3605_v22  ;;  %4111 = vmatprep.subr.mxu1 %v3669_v23  ;;  %v3706_v21 = vld [vmem:[#allocation8 + $0x330] sm:$0xff]  ;;  %v3641_v22 = vld [vmem:[#allocation8 + $0x128] sm:$0xff] }
 0x45e   : > { %4041 = vmatpush1.msra.mxu0 %v3604_v24  ;;  %4112 = vmatpush1.msra.mxu1 %v3668_v25  ;;  %v3705_v23 = vld [vmem:[#allocation8 + $0x328] sm:$0xff]  ;;  %v3640_v24 = vld [vmem:[#allocation8 + $0x120] sm:$0xff] }
 0x45f   : > { %4042 = vmatprep.subr.mxu0 %v3667_v51  ;;  %4113 = vmatprep.subr.mxu1 %v3731_v26  ;;  %v3704_v25 = vld [vmem:[#allocation8 + $0x320] sm:$0xff]  ;;  %v3639_v51 = vld [vmem:[#allocation8 + $0x118] sm:$0xff] }
 0x460   : > { %4043 = vmatpush2.msra.mxu0 %v3666_v27  ;;  %4114 = vmatpush2.msra.mxu1 %v3730_v57  ;;  %v3703_v26 = vld [vmem:[#allocation8 + $0x318] sm:$0xff]  ;;  %v3638_v27 = vld [vmem:[#allocation8 + $0x110] sm:$0xff] }
 0x461   : > { %4044 = vmatprep.subr.mxu0 %v3665_v28  ;;  %4115 = vmatprep.subr.mxu1 %v3729_v29  ;;  %v3702_v57 = vld [vmem:[#allocation8 + $0x310] sm:$0xff]  ;;  %v3637_v28 = vld [vmem:[#allocation8 + $0x108] sm:$0xff] }
 0x462   : > { %4045 = vmatpush2.msra.mxu0 %v3664_v30  ;;  %4116 = vmatpush2.msra.mxu1 %v3728_v12  ;;  %v3701_v29 = vld [vmem:[#allocation8 + $0x308] sm:$0xff]  ;;  %v3636_v30 = vld [vmem:[#allocation8 + $0x100] sm:$0xff] }
 0x463   : > { %4046 = vmatprep.subr.mxu0 %v3663_v31  ;;  %4117 = vmatprep.subr.mxu1 %v3727_v32  ;;  %v3700_v12 = vld [vmem:[#allocation8 + $0x300] sm:$0xff]  ;;  %v4183_v31 = vld [vmem:[#allocation8 + $0x8f8] sm:$0xff] }
 0x464   : > { %4047 = vmatpush2.msra.mxu0 %v3662_v16  ;;  %4118 = vmatpush2.msra.mxu1 %v3726_v7  ;;  %v4247_v32 = vld [vmem:[#allocation8 + $0xaf8] sm:$0xff]  ;;  %v4182_v16 = vld [vmem:[#allocation8 + $0x8f0] sm:$0xff]  ;;  %v4281_v7 = vrot.slane %v7781_v38, 5 }
 0x465   : > { %4048 = vmatprep.subr.mxu0 %v3661_v9  ;;  %4119 = vmatprep.subr.mxu1 %v3725_v33  ;;  %v4246_v9 = vld [vmem:[#allocation8 + $0xaf0] sm:$0xff]  ;;  %v4283_v33 = vrot.slane %v7783_v39, 5 }
 0x466   : > { %4049 = vmatpush2.msra.mxu0 %v3660_v34  ;;  %4120 = vmatpush2.msra.mxu1 %v3724_v43  ;;  %v4181_v34 = vld [vmem:[#allocation8 + $0x8e8] sm:$0xff] }
 0x467   : > { %4050 = vmatprep.subr.mxu0 %v3659_v41  ;;  %4121 = vmatprep.subr.mxu1 %v3723_v46  ;;  %v4245_v43 = vld [vmem:[#allocation8 + $0xae8] sm:$0xff]  ;;  %v4180_v41 = vld [vmem:[#allocation8 + $0x8e0] sm:$0xff] }
 0x468   : > { %4051 = vmatpush2.msra.mxu0 %v3658_v47  ;;  %4122 = vmatpush2.msra.mxu1 %v3722_v48  ;;  %v4244_v46 = vld [vmem:[#allocation8 + $0xae0] sm:$0xff]  ;;  %v4178_v47 = vld [vmem:[#allocation8 + $0x8d0] sm:$0xff] }
 0x469   : > { %4052 = vmatprep.subr.mxu0 %v3657_v49  ;;  %4123 = vmatprep.subr.mxu1 %v3721_v50  ;;  %v4242_v48 = vld [vmem:[#allocation8 + $0xad0] sm:$0xff]  ;;  %v4177_v49 = vld [vmem:[#allocation8 + $0x8c8] sm:$0xff] }
 0x46a   : > { %4053 = vmatpush2.msra.mxu0 %v3656_v52  ;;  %4124 = vmatpush2.msra.mxu1 %v3720_v55  ;;  %v4241_v50 = vld [vmem:[#allocation8 + $0xac8] sm:$0xff]  ;;  %v4176_v52 = vld [vmem:[#allocation8 + $0x8c0] sm:$0xff] }
 0x46b   : > { %4054 = vmatprep.subr.mxu0 %v3655_v56  ;;  %4125 = vmatprep.subr.mxu1 %v3719_v59  ;;  %v4240_v55 = vld [vmem:[#allocation8 + $0xac0] sm:$0xff]  ;;  %v4175_v56 = vld [vmem:[#allocation8 + $0x8b8] sm:$0xff] }
 0x46c   : > { %4055 = vmatpush2.msra.mxu0 %v3654_v60  ;;  %4126 = vmatpush2.msra.mxu1 %v3718_v61  ;;  %v4239_v59 = vld [vmem:[#allocation8 + $0xab8] sm:$0xff]  ;;  %v4174_v60 = vld [vmem:[#allocation8 + $0x8b0] sm:$0xff] }
 0x46d   : > { %4056 = vmatprep.subr.mxu0 %v3653_v62  ;;  %4127 = vmatprep.subr.mxu1 %v3717_v63  ;;  %v4238_v61 = vld [vmem:[#allocation8 + $0xab0] sm:$0xff]  ;;  %v4173_v62 = vld [vmem:[#allocation8 + $0x8a8] sm:$0xff] }
 0x46e   : > { %4057 = vmatpush2.msra.mxu0 %v3652_v0  ;;  %4128 = vmatpush2.msra.mxu1 %v3716_v2  ;;  %v4237_v63 = vld [vmem:[#allocation8 + $0xaa8] sm:$0xff]  ;;  %v4172_v0 = vld [vmem:[#allocation8 + $0x8a0] sm:$0xff] }
 0x46f   : > { %4058 = vmatprep.subr.mxu0 %v3651_v35  ;;  %4129 = vmatprep.subr.mxu1 %v3715_v3  ;;  %v4236_v2 = vld [vmem:[#allocation8 + $0xaa0] sm:$0xff]  ;;  %v4171_v35 = vld [vmem:[#allocation8 + $0x898] sm:$0xff] }
 0x470   : > { %4059 = vmatpush2.msra.mxu0 %v3650_v54  ;;  %4130 = vmatpush2.msra.mxu1 %v3714_v40  ;;  %v4235_v3 = vld [vmem:[#allocation8 + $0xa98] sm:$0xff]  ;;  %v4170_v54 = vld [vmem:[#allocation8 + $0x890] sm:$0xff] }
 0x471   : > { %4060 = vmatprep.subr.mxu0 %v3649_v45  ;;  %4131 = vmatprep.subr.mxu1 %v3713_v1  ;;  %v4234_v40 = vld [vmem:[#allocation8 + $0xa90] sm:$0xff]  ;;  %v4169_v45 = vld [vmem:[#allocation8 + $0x888] sm:$0xff] }
 0x472   : > { %4061 = vmatpush2.msra.mxu0 %v3648_v58  ;;  %4132 = vmatpush2.msra.mxu1 %v3712_v4  ;;  %v4233_v1 = vld [vmem:[#allocation8 + $0xa88] sm:$0xff]  ;;  %v4168_v58 = vld [vmem:[#allocation8 + $0x880] sm:$0xff] }
 0x473   : > { %4062 = vmatprep.subr.mxu0 %v3647_v5  ;;  %4133 = vmatprep.subr.mxu1 %v3711_v6  ;;  %v4232_v4 = vld [vmem:[#allocation8 + $0xa80] sm:$0xff]  ;;  %v4167_v5 = vld [vmem:[#allocation8 + $0x878] sm:$0xff] }
 0x474   : > { %4063 = vmatpush2.msra.mxu0 %v3646_v15  ;;  %4134 = vmatpush2.msra.mxu1 %v3710_v17  ;;  %v4231_v6 = vld [vmem:[#allocation8 + $0xa78] sm:$0xff]  ;;  %v4166_v15 = vld [vmem:[#allocation8 + $0x870] sm:$0xff] }
 0x475   : > { %4064 = vmatprep.subr.mxu0 %v3645_v8  ;;  %4135 = vmatprep.subr.mxu1 %v3709_v10  ;;  %v4230_v17 = vld [vmem:[#allocation8 + $0xa70] sm:$0xff]  ;;  %v4165_v8 = vld [vmem:[#allocation8 + $0x868] sm:$0xff] }
 0x476   : > { %4065 = vmatpush2.msra.mxu0 %v3644_v11  ;;  %4136 = vmatpush2.msra.mxu1 %v3708_v13  ;;  %v4229_v10 = vld [vmem:[#allocation8 + $0xa68] sm:$0xff]  ;;  %v4164_v11 = vld [vmem:[#allocation8 + $0x860] sm:$0xff] }
 0x477   : > { %4066 = vmatprep.subr.mxu0 %v3643_v18  ;;  %4137 = vmatprep.subr.mxu1 %v3707_v19  ;;  %v4228_v13 = vld [vmem:[#allocation8 + $0xa60] sm:$0xff]  ;;  %v4163_v18 = vld [vmem:[#allocation8 + $0x858] sm:$0xff] }
 0x478   : > { %4067 = vmatpush2.msra.mxu0 %v3642_v20  ;;  %4138 = vmatpush2.msra.mxu1 %v3706_v21  ;;  %v4227_v19 = vld [vmem:[#allocation8 + $0xa58] sm:$0xff]  ;;  %v4162_v20 = vld [vmem:[#allocation8 + $0x850] sm:$0xff] }
 0x479   : > { %4068 = vmatprep.subr.mxu0 %v3641_v22  ;;  %4139 = vmatprep.subr.mxu1 %v3705_v23  ;;  %v4226_v21 = vld [vmem:[#allocation8 + $0xa50] sm:$0xff]  ;;  %v4161_v22 = vld [vmem:[#allocation8 + $0x848] sm:$0xff] }
 0x47a   : > { %4069 = vmatpush2.msra.mxu0 %v3640_v24  ;;  %4140 = vmatpush2.msra.mxu1 %v3704_v25  ;;  %v4225_v23 = vld [vmem:[#allocation8 + $0xa48] sm:$0xff]  ;;  %v4160_v24 = vld [vmem:[#allocation8 + $0x840] sm:$0xff] }
 0x47b   : > { %4070 = vmatprep.subr.mxu0 %v3639_v51  ;;  %4141 = vmatprep.subr.mxu1 %v3703_v26  ;;  %v4224_v25 = vld [vmem:[#allocation8 + $0xa40] sm:$0xff]  ;;  %v4159_v51 = vld [vmem:[#allocation8 + $0x838] sm:$0xff] }
 0x47c   : > { %4071 = vmatpush2.msra.mxu0 %v3638_v27  ;;  %4142 = vmatpush2.msra.mxu1 %v3702_v57  ;;  %v4223_v26 = vld [vmem:[#allocation8 + $0xa38] sm:$0xff]  ;;  %v4158_v27 = vld [vmem:[#allocation8 + $0x830] sm:$0xff] }
 0x47d   : > { %4072 = vmatprep.subr.mxu0 %v3637_v28  ;;  %4143 = vmatprep.subr.mxu1 %v3701_v29  ;;  %v4222_v57 = vld [vmem:[#allocation8 + $0xa30] sm:$0xff]  ;;  %v4157_v28 = vld [vmem:[#allocation8 + $0x828] sm:$0xff] }
 0x47e   : > { %4073 = vmatpush2.msra.mxu0 %v3636_v30  ;;  %4144 = vmatpush2.msra.mxu1 %v3700_v12  ;;  %v4221_v29 = vld [vmem:[#allocation8 + $0xa28] sm:$0xff]  ;;  %v4156_v30 = vld [vmem:[#allocation8 + $0x820] sm:$0xff] }
 0x47f   : > { %4075 = vmatmul.mubr.f32.vlgmr.msra.gmra.mxu0 %v3431_v44  ;;  %4146 = vmatmul.mubr.f32.vlgmr.msra.gmra.mxu1 %v3433_v14  ;;  %v4179_v44 = vld [vmem:[#allocation8 + $0x8d8] sm:$0xff]  ;;  %v4220_v12 = vld [vmem:[#allocation8 + $0xa20] sm:$0xff] }
 0x480   : > { %4288 = vmatprep.subr.mxu0 %v4183_v31  ;;  %4359 = vmatprep.subr.mxu1 %v4247_v32  ;;  %v4243_v14 = vld [vmem:[#allocation8 + $0xad8] sm:$0xff] }
 0x481   : > { %4289 = vmatpush1.msra.mxu0 %v4182_v16  ;;  %4352 = vmatprep.mubr.f32.mxu0 %v4281_v7  ;;  %v4155_v31 = vld [vmem:[#allocation8 + $0x818] sm:$0xff]  ;;  %v4154_v16 = vld [vmem:[#allocation8 + $0x810] sm:$0xff] }
 0x482   : > { %4360 = vmatpush1.msra.mxu1 %v4246_v9  ;;  %4423 = vmatprep.mubr.f32.mxu1 %v4283_v33  ;;  %v4219_v32 = vld [vmem:[#allocation8 + $0xa18] sm:$0xff]  ;;  %v4218_v9 = vld [vmem:[#allocation8 + $0xa10] sm:$0xff] }
 0x483   : > { %4290 = vmatprep.subr.mxu0 %v4181_v34  ;;  %4361 = vmatprep.subr.mxu1 %v4245_v43  ;;  %v4153_v34 = vld [vmem:[#allocation8 + $0x808] sm:$0xff] }
 0x484   : > { %4291 = vmatpush1.msra.mxu0 %v4180_v41  ;;  %4362 = vmatpush1.msra.mxu1 %v4244_v46  ;;  %v4217_v43 = vld [vmem:[#allocation8 + $0xa08] sm:$0xff]  ;;  %v4152_v41 = vld [vmem:[#allocation8 + $0x800] sm:$0xff] }
 0x485   : > { %4292 = vmatprep.subr.mxu0 %v4179_v44  ;;  %4363 = vmatprep.subr.mxu1 %v4243_v14  ;;  %v4216_v46 = vld [vmem:[#allocation8 + $0xa00] sm:$0xff]  ;;  %v4215_v44 = vld [vmem:[#allocation8 + $0x9f8] sm:$0xff] }
 0x486   : > { %4293 = vmatpush1.msra.mxu0 %v4178_v47  ;;  %4364 = vmatpush1.msra.mxu1 %v4242_v48  ;;  %v4279_v14 = vld [vmem:[#allocation8 + $0xbf8] sm:$0xff]  ;;  %v4214_v47 = vld [vmem:[#allocation8 + $0x9f0] sm:$0xff] }
 0x487   : > { %4294 = vmatprep.subr.mxu0 %v4177_v49  ;;  %4365 = vmatprep.subr.mxu1 %v4241_v50  ;;  %v4278_v48 = vld [vmem:[#allocation8 + $0xbf0] sm:$0xff]  ;;  %v4213_v49 = vld [vmem:[#allocation8 + $0x9e8] sm:$0xff] }
 0x488   : > { %4295 = vmatpush1.msra.mxu0 %v4176_v52  ;;  %4366 = vmatpush1.msra.mxu1 %v4240_v55  ;;  %v4277_v50 = vld [vmem:[#allocation8 + $0xbe8] sm:$0xff]  ;;  %v4212_v52 = vld [vmem:[#allocation8 + $0x9e0] sm:$0xff] }
 0x489   : > { %4296 = vmatprep.subr.mxu0 %v4175_v56  ;;  %4367 = vmatprep.subr.mxu1 %v4239_v59  ;;  %v4276_v55 = vld [vmem:[#allocation8 + $0xbe0] sm:$0xff]  ;;  %v4211_v56 = vld [vmem:[#allocation8 + $0x9d8] sm:$0xff] }
 0x48a   : > { %4297 = vmatpush1.msra.mxu0 %v4174_v60  ;;  %4368 = vmatpush1.msra.mxu1 %v4238_v61  ;;  %v4275_v59 = vld [vmem:[#allocation8 + $0xbd8] sm:$0xff]  ;;  %v4210_v60 = vld [vmem:[#allocation8 + $0x9d0] sm:$0xff] }
 0x48b   : > { %4298 = vmatprep.subr.mxu0 %v4173_v62  ;;  %4369 = vmatprep.subr.mxu1 %v4237_v63  ;;  %v4274_v61 = vld [vmem:[#allocation8 + $0xbd0] sm:$0xff]  ;;  %v4209_v62 = vld [vmem:[#allocation8 + $0x9c8] sm:$0xff] }
 0x48c   : > { %4299 = vmatpush1.msra.mxu0 %v4172_v0  ;;  %4370 = vmatpush1.msra.mxu1 %v4236_v2  ;;  %v4273_v63 = vld [vmem:[#allocation8 + $0xbc8] sm:$0xff]  ;;  %v4208_v0 = vld [vmem:[#allocation8 + $0x9c0] sm:$0xff] }
 0x48d   : > { %4300 = vmatprep.subr.mxu0 %v4171_v35  ;;  %4371 = vmatprep.subr.mxu1 %v4235_v3  ;;  %v4272_v2 = vld [vmem:[#allocation8 + $0xbc0] sm:$0xff]  ;;  %v4207_v35 = vld [vmem:[#allocation8 + $0x9b8] sm:$0xff] }
 0x48e   : > { %4301 = vmatpush1.msra.mxu0 %v4170_v54  ;;  %4372 = vmatpush1.msra.mxu1 %v4234_v40  ;;  %v4271_v3 = vld [vmem:[#allocation8 + $0xbb8] sm:$0xff]  ;;  %v4206_v54 = vld [vmem:[#allocation8 + $0x9b0] sm:$0xff] }
 0x48f   : > { %4302 = vmatprep.subr.mxu0 %v4169_v45  ;;  %4373 = vmatprep.subr.mxu1 %v4233_v1  ;;  %v4270_v40 = vld [vmem:[#allocation8 + $0xbb0] sm:$0xff]  ;;  %v4205_v45 = vld [vmem:[#allocation8 + $0x9a8] sm:$0xff] }
 0x490   : > { %4303 = vmatpush1.msra.mxu0 %v4168_v58  ;;  %4374 = vmatpush1.msra.mxu1 %v4232_v4  ;;  %v4269_v1 = vld [vmem:[#allocation8 + $0xba8] sm:$0xff]  ;;  %v4204_v58 = vld [vmem:[#allocation8 + $0x9a0] sm:$0xff] }
 0x491   : > { %4304 = vmatprep.subr.mxu0 %v4167_v5  ;;  %4375 = vmatprep.subr.mxu1 %v4231_v6  ;;  %v4268_v4 = vld [vmem:[#allocation8 + $0xba0] sm:$0xff]  ;;  %v4203_v5 = vld [vmem:[#allocation8 + $0x998] sm:$0xff] }
 0x492   : > { %4305 = vmatpush1.msra.mxu0 %v4166_v15  ;;  %4376 = vmatpush1.msra.mxu1 %v4230_v17  ;;  %v4267_v6 = vld [vmem:[#allocation8 + $0xb98] sm:$0xff]  ;;  %v4202_v15 = vld [vmem:[#allocation8 + $0x990] sm:$0xff] }
 0x493   : > { %4306 = vmatprep.subr.mxu0 %v4165_v8  ;;  %4377 = vmatprep.subr.mxu1 %v4229_v10  ;;  %v4266_v17 = vld [vmem:[#allocation8 + $0xb90] sm:$0xff]  ;;  %v4201_v8 = vld [vmem:[#allocation8 + $0x988] sm:$0xff] }
 0x494   : > { %4307 = vmatpush1.msra.mxu0 %v4164_v11  ;;  %4378 = vmatpush1.msra.mxu1 %v4228_v13  ;;  %v4265_v10 = vld [vmem:[#allocation8 + $0xb88] sm:$0xff]  ;;  %v3085_v11 = vpop.f32.mrf.mxu0  ;;  %v4200_v13 = vld [vmem:[#allocation8 + $0x980] sm:$0xff] }
 0x495   : > { %4308 = vmatprep.subr.mxu0 %v4163_v18  ;;  %4379 = vmatprep.subr.mxu1 %v4227_v19  ;;  %v4264_v18 = vld [vmem:[#allocation8 + $0xb80] sm:$0xff]  ;;  %v4199_v19 = vld [vmem:[#allocation8 + $0x978] sm:$0xff] }
 0x496   : > { %4309 = vmatpush1.msra.mxu0 %v4162_v20  ;;  %4380 = vmatpush1.msra.mxu1 %v4226_v21  ;;  %v4263_v20 = vld [vmem:[#allocation8 + $0xb78] sm:$0xff]  ;;  %v3156_v21 = vpop.f32.mrf.mxu1 }
 0x497   : > { %4310 = vmatprep.subr.mxu0 %v4161_v22  ;;  %4381 = vmatprep.subr.mxu1 %v4225_v23  ;;  %v4198_v22 = vld [vmem:[#allocation8 + $0x970] sm:$0xff] }
 0x498   : > { %4311 = vmatpush1.msra.mxu0 %v4160_v24  ;;  %4382 = vmatpush1.msra.mxu1 %v4224_v25  ;;  %v4262_v23 = vld [vmem:[#allocation8 + $0xb70] sm:$0xff]  ;;  %v4197_v24 = vld [vmem:[#allocation8 + $0x968] sm:$0xff] }
 0x499   : > { %4312 = vmatprep.subr.mxu0 %v4159_v51  ;;  %4383 = vmatprep.subr.mxu1 %v4223_v26  ;;  %v4261_v25 = vld [vmem:[#allocation8 + $0xb68] sm:$0xff]  ;;  %v3087_v51 = vpop.f32.mrf.mxu0  ;;  %v4196_v26 = vld [vmem:[#allocation8 + $0x960] sm:$0xff] }
 0x49a   : > { %4313 = vmatpush1.msra.mxu0 %v4158_v27  ;;  %4384 = vmatpush1.msra.mxu1 %v4222_v57  ;;  %v4260_v27 = vld [vmem:[#allocation8 + $0xb60] sm:$0xff]  ;;  %v4195_v57 = vld [vmem:[#allocation8 + $0x958] sm:$0xff] }
 0x49b   : > { %4314 = vmatprep.subr.mxu0 %v4157_v28  ;;  %4385 = vmatprep.subr.mxu1 %v4221_v29  ;;  %v4259_v28 = vld [vmem:[#allocation8 + $0xb58] sm:$0xff]  ;;  %v3158_v29 = vpop.f32.mrf.mxu1 }
 0x49c   : > { %4315 = vmatpush1.msra.mxu0 %v4156_v30  ;;  %4386 = vmatpush1.msra.mxu1 %v4220_v12  ;;  %v3227_v30 = vpop.f32.mrf.mxu0  ;;  %v4194_v12 = vld [vmem:[#allocation8 + $0x950] sm:$0xff] }
 0x49d   : > { %4316 = vmatprep.subr.mxu0 %v4155_v31  ;;  %4387 = vmatprep.subr.mxu1 %v4219_v32  ;;  %v4258_v31 = vld [vmem:[#allocation8 + $0xb50] sm:$0xff]  ;;  %v4193_v32 = vld [vmem:[#allocation8 + $0x948] sm:$0xff] }
 0x49e   : > { %4317 = vmatpush1.msra.mxu0 %v4154_v16  ;;  %4388 = vmatpush1.msra.mxu1 %v4218_v9  ;;  %v4257_v16 = vld [vmem:[#allocation8 + $0xb48] sm:$0xff]  ;;  %v3298_v9 = vpop.f32.mrf.mxu1 }
 0x49f   : > { %4318 = vmatprep.subr.mxu0 %v4153_v34  ;;  %4389 = vmatprep.subr.mxu1 %v4217_v43  ;;  %v4192_v34 = vld [vmem:[#allocation8 + $0x940] sm:$0xff] }
 0x4a0   : > { %4319 = vmatpush1.msra.mxu0 %v4152_v41  ;;  %4390 = vmatpush1.msra.mxu1 %v4216_v46  ;;  %v4256_v43 = vld [vmem:[#allocation8 + $0xb40] sm:$0xff]  ;;  %v4191_v41 = vld [vmem:[#allocation8 + $0x938] sm:$0xff] }
 0x4a1   : > { %4320 = vmatprep.subr.mxu0 %v4215_v44  ;;  %4391 = vmatprep.subr.mxu1 %v4279_v14  ;;  %v4255_v46 = vld [vmem:[#allocation8 + $0xb38] sm:$0xff]  ;;  %v3229_v44 = vpop.f32.mrf.mxu0  ;;  %v4190_v14 = vld [vmem:[#allocation8 + $0x930] sm:$0xff] }
 0x4a2   : > { %4321 = vmatpush2.msra.mxu0 %v4214_v47  ;;  %4392 = vmatpush2.msra.mxu1 %v4278_v48  ;;  %v4254_v47 = vld [vmem:[#allocation8 + $0xb30] sm:$0xff]  ;;  %v3157_v48 = vadd.f32 %v3156_v21, %v3085_v11  ;;  %v4612_v11 = vld [vmem:[#allocation8 + $0x4f8] sm:$0xff]  ;;  %v4710_v21 = vrot.slane %v7781_v38, 6 }
 0x4a3   : > { %4322 = vmatprep.subr.mxu0 %v4213_v49  ;;  %4393 = vmatprep.subr.mxu1 %v4277_v50  ;;  %v3159_v49 = vadd.f32 %v3158_v29, %v3087_v51  ;;  %v4189_v50 = vld [vmem:[#allocation8 + $0x928] sm:$0xff]  ;;  %v4672_v29 = vld [vmem:[#allocation8 + $0x6d8] sm:$0xff] }
 0x4a4   : > { %4323 = vmatpush2.msra.mxu0 %v4212_v52  ;;  %4394 = vmatpush2.msra.mxu1 %v4276_v55  ;;  %v4253_v52 = vld [vmem:[#allocation8 + $0xb28] sm:$0xff]  ;;  %v3300_v55 = vpop.f32.mrf.mxu1 }
 0x4a5   : > { %4324 = vmatprep.subr.mxu0 %v4211_v56  ;;  %4395 = vmatprep.subr.mxu1 %v4275_v59  ;;  %v4188_v56 = vld [vmem:[#allocation8 + $0x920] sm:$0xff]  ;;  %v4674_v51 = vld [vmem:[#allocation8 + $0x6e8] sm:$0xff] }
 0x4a6   : > { %4325 = vmatpush2.msra.mxu0 %v4210_v60  ;;  %4396 = vmatpush2.msra.mxu1 %v4274_v61  ;;  %v4252_v59 = vld [vmem:[#allocation8 + $0xb20] sm:$0xff]  ;;  %v3228_v60 = vadd.f32 %v3227_v30, %v3157_v48  ;;  %v3230_v61 = vadd.f32 %v3229_v44, %v3159_v49  ;;  %v4607_v30 = vld [vmem:[#allocation8 + $0x4d0] sm:$0xff] }
 0x4a7   : > { %4326 = vmatprep.subr.mxu0 %v4209_v62  ;;  %4397 = vmatprep.subr.mxu1 %v4273_v63  ;;  %v4187_v62 = vld [vmem:[#allocation8 + $0x918] sm:$0xff]  ;;  %v4667_v44 = vld [vmem:[#allocation8 + $0x6b0] sm:$0xff]  ;;  %v4601_v48 = vld [vmem:[#allocation8 + $0x4a0] sm:$0xff] }
 0x4a8   : > { %4327 = vmatpush2.msra.mxu0 %v4208_v0  ;;  %4398 = vmatpush2.msra.mxu1 %v4272_v2  ;;  %v4251_v63 = vld [vmem:[#allocation8 + $0xb18] sm:$0xff]  ;;  %v4186_v0 = vld [vmem:[#allocation8 + $0x910] sm:$0xff]  ;;  %v4665_v49 = vld [vmem:[#allocation8 + $0x6a0] sm:$0xff] }
 0x4a9   : > { %4328 = vmatprep.subr.mxu0 %v4207_v35  ;;  %4399 = vmatprep.subr.mxu1 %v4271_v3  ;;  %v4250_v2 = vld [vmem:[#allocation8 + $0xb10] sm:$0xff] }
 0x4aa   : > { %4329 = vmatpush2.msra.mxu0 %v4206_v54  ;;  %4400 = vmatpush2.msra.mxu1 %v4270_v40  ;;  %v4185_v54 = vld [vmem:[#allocation8 + $0x908] sm:$0xff] }
 0x4ab   : > { %4330 = vmatprep.subr.mxu0 %v4205_v45  ;;  %4401 = vmatprep.subr.mxu1 %v4269_v1  ;;  %v4249_v40 = vld [vmem:[#allocation8 + $0xb08] sm:$0xff]  ;;  %v4184_v1 = vld [vmem:[#allocation8 + $0x900] sm:$0xff] }
 0x4ac   : > { %4331 = vmatpush2.msra.mxu0 %v4204_v58  ;;  %4402 = vmatpush2.msra.mxu1 %v4268_v4  ;;  %v4248_v58 = vld [vmem:[#allocation8 + $0xb00] sm:$0xff] }
 0x4ad   : > { %4332 = vmatprep.subr.mxu0 %v4203_v5  ;;  %4403 = vmatprep.subr.mxu1 %v4267_v6  ;;  %v3299_v6 = vadd.f32 %v3298_v9, %v3228_v60  ;;  %v4605_v9 = vld [vmem:[#allocation8 + $0x4c0] sm:$0xff]  ;;  %v4662_v60 = vld [vmem:[#allocation8 + $0x688] sm:$0xff] }
 0x4ae   : > { %4333 = vmatpush2.msra.mxu0 %v4202_v15  ;;  %4404 = vmatpush2.msra.mxu1 %v4266_v17  ;;  %v3301_v15 = vadd.f32 %v3300_v55, %v3230_v61  ;;  %v4599_v55 = vld [vmem:[#allocation8 + $0x490] sm:$0xff]  ;;  %v4597_v61 = vld [vmem:[#allocation8 + $0x480] sm:$0xff] }
 0x4af   : > { %4334 = vmatprep.subr.mxu0 %v4201_v8  ;;  %4405 = vmatprep.subr.mxu1 %v4265_v10  ;;  %v4280_v8 = vrot.slane %v7777_v36, 5  ;;  %v4282_v10 = vrot.slane %v7779_v37, 5 }
 0x4b0   : > { %4335 = vmatpush2.msra.mxu0 %v4200_v13  ;;  %4406 = vmatpush2.msra.mxu1 %v4264_v18  ;;  %v4676_v13 = vld [vmem:[#allocation8 + $0x6f8] sm:$0xff] }
 0x4b1   : > { %4336 = vmatprep.subr.mxu0 %v4199_v19  ;;  %4407 = vmatprep.subr.mxu1 %v4263_v20  ;;  %v4611_v19 = vld [vmem:[#allocation8 + $0x4f0] sm:$0xff] }
 0x4b2   : > { %4337 = vmatpush2.msra.mxu0 %v4198_v22  ;;  %4408 = vmatpush2.msra.mxu1 %v4262_v23  ;;  %v4675_v22 = vld [vmem:[#allocation8 + $0x6f0] sm:$0xff]  ;;  %v4712_v23 = vrot.slane %v7783_v39, 6 }
 0x4b3   : > { %4338 = vmatprep.subr.mxu0 %v4197_v24  ;;  %4409 = vmatprep.subr.mxu1 %v4261_v25  ;;  %v4610_v25 = vld [vmem:[#allocation8 + $0x4e8] sm:$0xff] }
 0x4b4   : > { %4339 = vmatpush2.msra.mxu0 %v4196_v26  ;;  %4410 = vmatpush2.msra.mxu1 %v4260_v27  ;;  %v4609_v26 = vld [vmem:[#allocation8 + $0x4e0] sm:$0xff] }
 0x4b5   : > { %4340 = vmatprep.subr.mxu0 %v4195_v57  ;;  %4411 = vmatprep.subr.mxu1 %v4259_v28  ;;  %v4673_v27 = vld [vmem:[#allocation8 + $0x6e0] sm:$0xff]  ;;  %v4608_v28 = vld [vmem:[#allocation8 + $0x4d8] sm:$0xff] }
 0x4b6   : > { %4341 = vmatpush2.msra.mxu0 %v4194_v12  ;;  %4412 = vmatpush2.msra.mxu1 %v4258_v31  ;;  %v4671_v12 = vld [vmem:[#allocation8 + $0x6d0] sm:$0xff] }
 0x4b7   : > { %4342 = vmatprep.subr.mxu0 %v4193_v32  ;;  %4413 = vmatprep.subr.mxu1 %v4257_v16  ;;  %v4606_v32 = vld [vmem:[#allocation8 + $0x4c8] sm:$0xff] }
 0x4b8   : > { %4343 = vmatpush2.msra.mxu0 %v4192_v34  ;;  %4414 = vmatpush2.msra.mxu1 %v4256_v43  ;;  %v4670_v16 = vld [vmem:[#allocation8 + $0x6c8] sm:$0xff]  ;;  %v4669_v34 = vld [vmem:[#allocation8 + $0x6c0] sm:$0xff]  ;;  %v4604_v43 = vld [vmem:[#allocation8 + $0x4b8] sm:$0xff] }
 0x4b9   : > { %4344 = vmatprep.subr.mxu0 %v4191_v41  ;;  %4415 = vmatprep.subr.mxu1 %v4255_v46  ;;  %v4668_v41 = vld [vmem:[#allocation8 + $0x6b8] sm:$0xff]  ;;  %v4603_v46 = vld [vmem:[#allocation8 + $0x4b0] sm:$0xff] }
 0x4ba   : > { %4345 = vmatpush2.msra.mxu0 %v4190_v14  ;;  %4416 = vmatpush2.msra.mxu1 %v4254_v47  ;;  %v4602_v14 = vld [vmem:[#allocation8 + $0x4a8] sm:$0xff] }
 0x4bb   : > { %4346 = vmatprep.subr.mxu0 %v4189_v50  ;;  %4417 = vmatprep.subr.mxu1 %v4253_v52  ;;  %v3505_v35 = vpop.f32.mrf.mxu0  ;;  %v3576_v3 = vpop.f32.mrf.mxu1  ;;  %v4666_v47 = vld [vmem:[#allocation8 + $0x6a8] sm:$0xff]  ;;  %v4600_v50 = vld [vmem:[#allocation8 + $0x498] sm:$0xff] }
 0x4bc   : > { %4347 = vmatpush2.msra.mxu0 %v4188_v56  ;;  %4418 = vmatpush2.msra.mxu1 %v4252_v59  ;;  %v3577_v45 = vadd.f32 %v3576_v3, %v3505_v35  ;;  %v4664_v52 = vld [vmem:[#allocation8 + $0x698] sm:$0xff]  ;;  %v4663_v56 = vld [vmem:[#allocation8 + $0x690] sm:$0xff]  ;;  %v4598_v59 = vld [vmem:[#allocation8 + $0x488] sm:$0xff] }
 0x4bd   : > { %4348 = vmatprep.subr.mxu0 %v4187_v62  ;;  %4419 = vmatprep.subr.mxu1 %v4251_v63  ;;  %v3507_v4 = vpop.f32.mrf.mxu0  ;;  %v3578_v5 = vpop.f32.mrf.mxu1  ;;  %v4661_v62 = vld [vmem:[#allocation8 + $0x680] sm:$0xff]  ;;  %v4596_v63 = vld [vmem:[#allocation8 + $0x478] sm:$0xff]  ;;  %v4659_v35 = vld [vmem:[#allocation8 + $0x670] sm:$0xff] }
 0x4be   : > { %4349 = vmatpush2.msra.mxu0 %v4186_v0  ;;  %4420 = vmatpush2.msra.mxu1 %v4250_v2  ;;  %v3579_v17 = vadd.f32 %v3578_v5, %v3507_v4  ;;  %v3581_v18 = vadd.f32 %v3577_v45, %v3299_v6  ;;  %v4660_v0 = vld [vmem:[#allocation8 + $0x678] sm:$0xff]  ;;  %v4595_v2 = vld [vmem:[#allocation8 + $0x470] sm:$0xff]  ;;  %v4594_v3 = vld [vmem:[#allocation8 + $0x468] sm:$0xff] }
 0x4bf   : > { %4350 = vmatprep.subr.mxu0 %v4185_v54  ;;  %4421 = vmatprep.subr.mxu1 %v4249_v40  ;;  %v4658_v54 = vld [vmem:[#allocation8 + $0x668] sm:$0xff]  ;;  %v4593_v40 = vld [vmem:[#allocation8 + $0x460] sm:$0xff]  ;;  %v4591_v4 = vld [vmem:[#allocation8 + $0x450] sm:$0xff] }
 0x4c0   : > { %4351 = vmatpush2.msra.mxu0 %v4184_v1  ;;  %4422 = vmatpush2.msra.mxu1 %v4248_v58  ;;  %v3582_v20 = vadd.f32 %v3579_v17, %v3301_v15  ;;  %v4657_v45 = vld [vmem:[#allocation8 + $0x660] sm:$0xff]  ;;  %v4592_v1 = vld [vmem:[#allocation8 + $0x458] sm:$0xff]  ;;  %v4655_v5 = vld [vmem:[#allocation8 + $0x650] sm:$0xff] }
 0x4c1   : > { %4353 = vmatmul.mubr.f32.vlgmr.msra.gmra.mxu0 %v4280_v8  ;;  %4424 = vmatmul.mubr.f32.vlgmr.msra.gmra.mxu1 %v4282_v10  ;;  %v4656_v58 = vld [vmem:[#allocation8 + $0x658] sm:$0xff]  ;;  %v4590_v6 = vld [vmem:[#allocation8 + $0x448] sm:$0xff]  ;;  %v4589_v17 = vld [vmem:[#allocation8 + $0x440] sm:$0xff] }
 0x4c2   : > { %4717 = vmatprep.subr.mxu0 %v4612_v11  ;;  %4788 = vmatprep.subr.mxu1 %v4676_v13  ;;  %v3585_v24 = vcombine.low %v3581_v18, %v3582_v20  ;;  %v4654_v15 = vld [vmem:[#allocation8 + $0x648] sm:$0xff]  ;;  %v4653_v11 = vld [vmem:[#allocation8 + $0x640] sm:$0xff]  ;;  %v4588_v13 = vld [vmem:[#allocation8 + $0x438] sm:$0xff] }
 0x4c3   : > { %4718 = vmatpush1.msra.mxu0 %v4611_v19  ;;  %4781 = vmatprep.mubr.f32.mxu0 %v4710_v21  ;;  %v4652_v18 = vld [vmem:[#allocation8 + $0x638] sm:$0xff]  ;;  %v4587_v19 = vld [vmem:[#allocation8 + $0x430] sm:$0xff]  ;;  %v4586_v21 = vld [vmem:[#allocation8 + $0x428] sm:$0xff] }
 0x4c4   : > { %4789 = vmatpush1.msra.mxu1 %v4675_v22  ;;  %4852 = vmatprep.mubr.f32.mxu1 %v4712_v23  ;;  %v3592_v57 = vrot.slane %v3585_v24, %v8328_v53  ;;  %v4651_v20 = vld [vmem:[#allocation8 + $0x630] sm:$0xff]  ;;  %v4650_v22 = vld [vmem:[#allocation8 + $0x628] sm:$0xff]  ;;  %v4585_v23 = vld [vmem:[#allocation8 + $0x420] sm:$0xff] }
 0x4c5   : > { %4719 = vmatprep.subr.mxu0 %v4610_v25  ;;  %4790 = vmatprep.subr.mxu1 %v4674_v51  ;;  %v4649_v24 = vld [vmem:[#allocation8 + $0x620] sm:$0xff]  ;;  %v4584_v25 = vld [vmem:[#allocation8 + $0x418] sm:$0xff] }
 0x4c6   : > { %v3599_v31 = vrot.slane %v3592_v57, %v8328_v53  ;;  %4720 = vmatpush1.msra.mxu0 %v4609_v26  ;;  %4791 = vmatpush1.msra.mxu1 %v4673_v27  ;;  %v4648_v51 = vld [vmem:[#allocation8 + $0x618] sm:$0xff]  ;;  %v4583_v26 = vld [vmem:[#allocation8 + $0x410] sm:$0xff]  ;;  %v4582_v57 = vld [vmem:[#allocation8 + $0x408] sm:$0xff] }
 0x4c7   : > { %4721 = vmatprep.subr.mxu0 %v4608_v28  ;;  %4792 = vmatprep.subr.mxu1 %v4672_v29  ;;  %v4647_v27 = vld [vmem:[#allocation8 + $0x610] sm:$0xff]  ;;  %v4646_v28 = vld [vmem:[#allocation8 + $0x608] sm:$0xff]  ;;  %v4581_v29 = vld [vmem:[#allocation8 + $0x400] sm:$0xff] }
 0x4c8   : > { %3602 = vst.msk [vmem:[#allocation2 + $0x1] ss:$8 sm:$0x3] %vm8338_vm8, %v3599_v31  ;;  %4722 = vmatpush1.msra.mxu0 %v4607_v30  ;;  %4793 = vmatpush1.msra.mxu1 %v4671_v12  ;;  %v4645_v30 = vld [vmem:[#allocation8 + $0x600] sm:$0xff]  ;;  %v4644_v12 = vld [vmem:[#allocation8 + $0x5f8] sm:$0xff] }
 0x4c9   : > { %4723 = vmatprep.subr.mxu0 %v4606_v32  ;;  %4794 = vmatprep.subr.mxu1 %v4670_v16  ;;  %v4708_v31 = vld [vmem:[#allocation8 + $0x7f8] sm:$0xff]  ;;  %v4643_v32 = vld [vmem:[#allocation8 + $0x5f0] sm:$0xff] }
 0x4ca   : > { %4724 = vmatpush1.msra.mxu0 %v4605_v9  ;;  %4795 = vmatpush1.msra.mxu1 %v4669_v34  ;;  %v4707_v16 = vld [vmem:[#allocation8 + $0x7f0] sm:$0xff]  ;;  %v4642_v9 = vld [vmem:[#allocation8 + $0x5e8] sm:$0xff] }
 0x4cb   : > { %4725 = vmatprep.subr.mxu0 %v4604_v43  ;;  %4796 = vmatprep.subr.mxu1 %v4668_v41  ;;  %v4706_v34 = vld [vmem:[#allocation8 + $0x7e8] sm:$0xff]  ;;  %v4641_v43 = vld [vmem:[#allocation8 + $0x5e0] sm:$0xff] }
 0x4cc   : > { %4726 = vmatpush1.msra.mxu0 %v4603_v46  ;;  %4797 = vmatpush1.msra.mxu1 %v4667_v44  ;;  %v4705_v41 = vld [vmem:[#allocation8 + $0x7e0] sm:$0xff]  ;;  %v4640_v46 = vld [vmem:[#allocation8 + $0x5d8] sm:$0xff] }
 0x4cd   : > { %4727 = vmatprep.subr.mxu0 %v4602_v14  ;;  %4798 = vmatprep.subr.mxu1 %v4666_v47  ;;  %v4704_v44 = vld [vmem:[#allocation8 + $0x7d8] sm:$0xff]  ;;  %v4639_v14 = vld [vmem:[#allocation8 + $0x5d0] sm:$0xff] }
 0x4ce   : > { %4728 = vmatpush1.msra.mxu0 %v4601_v48  ;;  %4799 = vmatpush1.msra.mxu1 %v4665_v49  ;;  %v4703_v47 = vld [vmem:[#allocation8 + $0x7d0] sm:$0xff]  ;;  %v4638_v48 = vld [vmem:[#allocation8 + $0x5c8] sm:$0xff] }
 0x4cf   : > { %4729 = vmatprep.subr.mxu0 %v4600_v50  ;;  %4800 = vmatprep.subr.mxu1 %v4664_v52  ;;  %v4702_v49 = vld [vmem:[#allocation8 + $0x7c8] sm:$0xff]  ;;  %v4637_v50 = vld [vmem:[#allocation8 + $0x5c0] sm:$0xff] }
 0x4d0   : > { %4730 = vmatpush1.msra.mxu0 %v4599_v55  ;;  %4801 = vmatpush1.msra.mxu1 %v4663_v56  ;;  %v4701_v52 = vld [vmem:[#allocation8 + $0x7c0] sm:$0xff]  ;;  %v4636_v55 = vld [vmem:[#allocation8 + $0x5b8] sm:$0xff] }
 0x4d1   : > { %4731 = vmatprep.subr.mxu0 %v4598_v59  ;;  %4802 = vmatprep.subr.mxu1 %v4662_v60  ;;  %v4700_v56 = vld [vmem:[#allocation8 + $0x7b8] sm:$0xff]  ;;  %v4635_v59 = vld [vmem:[#allocation8 + $0x5b0] sm:$0xff] }
 0x4d2   : > { %4732 = vmatpush1.msra.mxu0 %v4597_v61  ;;  %4803 = vmatpush1.msra.mxu1 %v4661_v62  ;;  %v4699_v60 = vld [vmem:[#allocation8 + $0x7b0] sm:$0xff]  ;;  %v4634_v61 = vld [vmem:[#allocation8 + $0x5a8] sm:$0xff] }
 0x4d3   : > { %4733 = vmatprep.subr.mxu0 %v4596_v63  ;;  %4804 = vmatprep.subr.mxu1 %v4660_v0  ;;  %v4698_v62 = vld [vmem:[#allocation8 + $0x7a8] sm:$0xff]  ;;  %v4633_v63 = vld [vmem:[#allocation8 + $0x5a0] sm:$0xff] }
 0x4d4   : > { %4734 = vmatpush1.msra.mxu0 %v4595_v2  ;;  %4805 = vmatpush1.msra.mxu1 %v4659_v35  ;;  %v4697_v0 = vld [vmem:[#allocation8 + $0x7a0] sm:$0xff]  ;;  %v4632_v2 = vld [vmem:[#allocation8 + $0x598] sm:$0xff] }
 0x4d5   : > { %4735 = vmatprep.subr.mxu0 %v4594_v3  ;;  %4806 = vmatprep.subr.mxu1 %v4658_v54  ;;  %v4696_v35 = vld [vmem:[#allocation8 + $0x798] sm:$0xff]  ;;  %v4631_v3 = vld [vmem:[#allocation8 + $0x590] sm:$0xff] }
 0x4d6   : > { %4736 = vmatpush1.msra.mxu0 %v4593_v40  ;;  %4807 = vmatpush1.msra.mxu1 %v4657_v45  ;;  %v4695_v54 = vld [vmem:[#allocation8 + $0x790] sm:$0xff]  ;;  %v4630_v40 = vld [vmem:[#allocation8 + $0x588] sm:$0xff] }
 0x4d7   : > { %4737 = vmatprep.subr.mxu0 %v4592_v1  ;;  %4808 = vmatprep.subr.mxu1 %v4656_v58  ;;  %v4694_v45 = vld [vmem:[#allocation8 + $0x788] sm:$0xff]  ;;  %v4629_v1 = vld [vmem:[#allocation8 + $0x580] sm:$0xff] }
 0x4d8   : > { %4738 = vmatpush1.msra.mxu0 %v4591_v4  ;;  %4809 = vmatpush1.msra.mxu1 %v4655_v5  ;;  %v4693_v58 = vld [vmem:[#allocation8 + $0x780] sm:$0xff]  ;;  %v4628_v4 = vld [vmem:[#allocation8 + $0x578] sm:$0xff] }
 0x4d9   : > { %4739 = vmatprep.subr.mxu0 %v4590_v6  ;;  %4810 = vmatprep.subr.mxu1 %v4654_v15  ;;  %v4692_v5 = vld [vmem:[#allocation8 + $0x778] sm:$0xff]  ;;  %v4627_v6 = vld [vmem:[#allocation8 + $0x570] sm:$0xff] }
 0x4da   : > { %4740 = vmatpush1.msra.mxu0 %v4589_v17  ;;  %4811 = vmatpush1.msra.mxu1 %v4653_v11  ;;  %v4691_v15 = vld [vmem:[#allocation8 + $0x770] sm:$0xff]  ;;  %v4626_v17 = vld [vmem:[#allocation8 + $0x568] sm:$0xff] }
 0x4db   : > { %4741 = vmatprep.subr.mxu0 %v4588_v13  ;;  %4812 = vmatprep.subr.mxu1 %v4652_v18  ;;  %v4690_v11 = vld [vmem:[#allocation8 + $0x768] sm:$0xff]  ;;  %v4625_v13 = vld [vmem:[#allocation8 + $0x560] sm:$0xff] }
 0x4dc   : > { %4742 = vmatpush1.msra.mxu0 %v4587_v19  ;;  %4813 = vmatpush1.msra.mxu1 %v4651_v20  ;;  %v4689_v18 = vld [vmem:[#allocation8 + $0x760] sm:$0xff]  ;;  %v4624_v19 = vld [vmem:[#allocation8 + $0x558] sm:$0xff] }
 0x4dd   : > { %4743 = vmatprep.subr.mxu0 %v4586_v21  ;;  %4814 = vmatprep.subr.mxu1 %v4650_v22  ;;  %v4688_v20 = vld [vmem:[#allocation8 + $0x758] sm:$0xff]  ;;  %v4623_v21 = vld [vmem:[#allocation8 + $0x550] sm:$0xff] }
 0x4de   : > { %4744 = vmatpush1.msra.mxu0 %v4585_v23  ;;  %4815 = vmatpush1.msra.mxu1 %v4649_v24  ;;  %v4687_v22 = vld [vmem:[#allocation8 + $0x750] sm:$0xff]  ;;  %v4622_v23 = vld [vmem:[#allocation8 + $0x548] sm:$0xff] }
 0x4df   : > { %4745 = vmatprep.subr.mxu0 %v4584_v25  ;;  %4816 = vmatprep.subr.mxu1 %v4648_v51  ;;  %v4686_v24 = vld [vmem:[#allocation8 + $0x748] sm:$0xff]  ;;  %v4621_v25 = vld [vmem:[#allocation8 + $0x540] sm:$0xff] }
 0x4e0   : > { %4746 = vmatpush1.msra.mxu0 %v4583_v26  ;;  %4817 = vmatpush1.msra.mxu1 %v4647_v27  ;;  %v4685_v51 = vld [vmem:[#allocation8 + $0x740] sm:$0xff]  ;;  %v4620_v26 = vld [vmem:[#allocation8 + $0x538] sm:$0xff] }
 0x4e1   : > { %4747 = vmatprep.subr.mxu0 %v4582_v57  ;;  %4818 = vmatprep.subr.mxu1 %v4646_v28  ;;  %v4684_v27 = vld [vmem:[#allocation8 + $0x738] sm:$0xff]  ;;  %v4619_v57 = vld [vmem:[#allocation8 + $0x530] sm:$0xff] }
 0x4e2   : > { %4748 = vmatpush1.msra.mxu0 %v4581_v29  ;;  %4819 = vmatpush1.msra.mxu1 %v4645_v30  ;;  %v4683_v28 = vld [vmem:[#allocation8 + $0x730] sm:$0xff]  ;;  %v4618_v29 = vld [vmem:[#allocation8 + $0x528] sm:$0xff] }
 0x4e3   : > { %4749 = vmatprep.subr.mxu0 %v4644_v12  ;;  %4820 = vmatprep.subr.mxu1 %v4708_v31  ;;  %v4682_v30 = vld [vmem:[#allocation8 + $0x728] sm:$0xff]  ;;  %v4617_v12 = vld [vmem:[#allocation8 + $0x520] sm:$0xff] }
 0x4e4   : > { %4750 = vmatpush2.msra.mxu0 %v4643_v32  ;;  %4821 = vmatpush2.msra.mxu1 %v4707_v16  ;;  %v4681_v31 = vld [vmem:[#allocation8 + $0x720] sm:$0xff]  ;;  %v4616_v32 = vld [vmem:[#allocation8 + $0x518] sm:$0xff] }
 0x4e5   : > { %4751 = vmatprep.subr.mxu0 %v4642_v9  ;;  %4822 = vmatprep.subr.mxu1 %v4706_v34  ;;  %v4680_v16 = vld [vmem:[#allocation8 + $0x718] sm:$0xff]  ;;  %v4615_v9 = vld [vmem:[#allocation8 + $0x510] sm:$0xff] }
 0x4e6   : > { %4752 = vmatpush2.msra.mxu0 %v4641_v43  ;;  %4823 = vmatpush2.msra.mxu1 %v4705_v41  ;;  %v4679_v34 = vld [vmem:[#allocation8 + $0x710] sm:$0xff]  ;;  %v4614_v43 = vld [vmem:[#allocation8 + $0x508] sm:$0xff] }
 0x4e7   : > { %4753 = vmatprep.subr.mxu0 %v4640_v46  ;;  %4824 = vmatprep.subr.mxu1 %v4704_v44  ;;  %v4678_v41 = vld [vmem:[#allocation8 + $0x708] sm:$0xff]  ;;  %v4613_v46 = vld [vmem:[#allocation8 + $0x500] sm:$0xff] }
 0x4e8   : > { %4754 = vmatpush2.msra.mxu0 %v4639_v14  ;;  %4825 = vmatpush2.msra.mxu1 %v4703_v47  ;;  %v4677_v44 = vld [vmem:[#allocation8 + $0x700] sm:$0xff]  ;;  %v4709_v14 = vrot.slane %v7777_v36, 6  ;;  %v4711_v47 = vrot.slane %v7779_v37, 6 }
 0x4e9   : > { %4755 = vmatprep.subr.mxu0 %v4638_v48  ;;  %4826 = vmatprep.subr.mxu1 %v4702_v49  ;;  %v4484_v48 = vld [vmem:[#allocation8 + $0xf8] sm:$0xff] }
 0x4ea   : > { %4756 = vmatpush2.msra.mxu0 %v4637_v50  ;;  %4827 = vmatpush2.msra.mxu1 %v4701_v52  ;;  %v4548_v49 = vld [vmem:[#allocation8 + $0x2f8] sm:$0xff]  ;;  %v4483_v50 = vld [vmem:[#allocation8 + $0xf0] sm:$0xff] }
 0x4eb   : > { %4757 = vmatprep.subr.mxu0 %v4636_v55  ;;  %4828 = vmatprep.subr.mxu1 %v4700_v56  ;;  %v4547_v52 = vld [vmem:[#allocation8 + $0x2f0] sm:$0xff]  ;;  %v4482_v55 = vld [vmem:[#allocation8 + $0xe8] sm:$0xff] }
 0x4ec   : > { %4758 = vmatpush2.msra.mxu0 %v4635_v59  ;;  %4829 = vmatpush2.msra.mxu1 %v4699_v60  ;;  %v4546_v56 = vld [vmem:[#allocation8 + $0x2e8] sm:$0xff]  ;;  %v4481_v59 = vld [vmem:[#allocation8 + $0xe0] sm:$0xff] }
 0x4ed   : > { %4759 = vmatprep.subr.mxu0 %v4634_v61  ;;  %4830 = vmatprep.subr.mxu1 %v4698_v62  ;;  %v4545_v60 = vld [vmem:[#allocation8 + $0x2e0] sm:$0xff]  ;;  %v4480_v61 = vld [vmem:[#allocation8 + $0xd8] sm:$0xff] }
 0x4ee   : > { %4760 = vmatpush2.msra.mxu0 %v4633_v63  ;;  %4831 = vmatpush2.msra.mxu1 %v4697_v0  ;;  %v4544_v62 = vld [vmem:[#allocation8 + $0x2d8] sm:$0xff]  ;;  %v4479_v63 = vld [vmem:[#allocation8 + $0xd0] sm:$0xff] }
 0x4ef   : > { %4761 = vmatprep.subr.mxu0 %v4632_v2  ;;  %4832 = vmatprep.subr.mxu1 %v4696_v35  ;;  %v4543_v0 = vld [vmem:[#allocation8 + $0x2d0] sm:$0xff]  ;;  %v4478_v2 = vld [vmem:[#allocation8 + $0xc8] sm:$0xff] }
 0x4f0   : > { %4762 = vmatpush2.msra.mxu0 %v4631_v3  ;;  %4833 = vmatpush2.msra.mxu1 %v4695_v54  ;;  %v4542_v35 = vld [vmem:[#allocation8 + $0x2c8] sm:$0xff]  ;;  %v4477_v3 = vld [vmem:[#allocation8 + $0xc0] sm:$0xff]  ;;  %v4476_v54 = vld [vmem:[#allocation8 + $0xb8] sm:$0xff] }
 0x4f1   : > { %4763 = vmatprep.subr.mxu0 %v4630_v40  ;;  %4834 = vmatprep.subr.mxu1 %v4694_v45  ;;  %v4540_v40 = vld [vmem:[#allocation8 + $0x2b8] sm:$0xff]  ;;  %v4539_v45 = vld [vmem:[#allocation8 + $0x2b0] sm:$0xff] }
 0x4f2   : > { %4764 = vmatpush2.msra.mxu0 %v4629_v1  ;;  %4835 = vmatpush2.msra.mxu1 %v4693_v58  ;;  %v4474_v1 = vld [vmem:[#allocation8 + $0xa8] sm:$0xff] }
 0x4f3   : > { %4765 = vmatprep.subr.mxu0 %v4628_v4  ;;  %4836 = vmatprep.subr.mxu1 %v4692_v5  ;;  %v4538_v58 = vld [vmem:[#allocation8 + $0x2a8] sm:$0xff]  ;;  %v4473_v4 = vld [vmem:[#allocation8 + $0xa0] sm:$0xff] }
 0x4f4   : > { %4766 = vmatpush2.msra.mxu0 %v4627_v6  ;;  %4837 = vmatpush2.msra.mxu1 %v4691_v15  ;;  %v4537_v5 = vld [vmem:[#allocation8 + $0x2a0] sm:$0xff]  ;;  %v4472_v6 = vld [vmem:[#allocation8 + $0x98] sm:$0xff] }
 0x4f5   : > { %4767 = vmatprep.subr.mxu0 %v4626_v17  ;;  %4838 = vmatprep.subr.mxu1 %v4690_v11  ;;  %v4536_v15 = vld [vmem:[#allocation8 + $0x298] sm:$0xff]  ;;  %v4471_v17 = vld [vmem:[#allocation8 + $0x90] sm:$0xff] }
 0x4f6   : > { %4768 = vmatpush2.msra.mxu0 %v4625_v13  ;;  %4839 = vmatpush2.msra.mxu1 %v4689_v18  ;;  %v4535_v11 = vld [vmem:[#allocation8 + $0x290] sm:$0xff]  ;;  %v4470_v13 = vld [vmem:[#allocation8 + $0x88] sm:$0xff] }
 0x4f7   : > { %4769 = vmatprep.subr.mxu0 %v4624_v19  ;;  %4840 = vmatprep.subr.mxu1 %v4688_v20  ;;  %v4534_v18 = vld [vmem:[#allocation8 + $0x288] sm:$0xff]  ;;  %v4469_v19 = vld [vmem:[#allocation8 + $0x80] sm:$0xff] }
 0x4f8   : > { %4770 = vmatpush2.msra.mxu0 %v4623_v21  ;;  %4841 = vmatpush2.msra.mxu1 %v4687_v22  ;;  %v4533_v20 = vld [vmem:[#allocation8 + $0x280] sm:$0xff]  ;;  %v4468_v21 = vld [vmem:[#allocation8 + $0x78] sm:$0xff] }
 0x4f9   : > { %4771 = vmatprep.subr.mxu0 %v4622_v23  ;;  %4842 = vmatprep.subr.mxu1 %v4686_v24  ;;  %v4532_v22 = vld [vmem:[#allocation8 + $0x278] sm:$0xff]  ;;  %v4467_v23 = vld [vmem:[#allocation8 + $0x70] sm:$0xff] }
 0x4fa   : > { %4772 = vmatpush2.msra.mxu0 %v4621_v25  ;;  %4843 = vmatpush2.msra.mxu1 %v4685_v51  ;;  %v4531_v24 = vld [vmem:[#allocation8 + $0x270] sm:$0xff]  ;;  %v4466_v25 = vld [vmem:[#allocation8 + $0x68] sm:$0xff] }
 0x4fb   : > { %4773 = vmatprep.subr.mxu0 %v4620_v26  ;;  %4844 = vmatprep.subr.mxu1 %v4684_v27  ;;  %v4530_v51 = vld [vmem:[#allocation8 + $0x268] sm:$0xff]  ;;  %v4465_v26 = vld [vmem:[#allocation8 + $0x60] sm:$0xff] }
 0x4fc   : > { %4774 = vmatpush2.msra.mxu0 %v4619_v57  ;;  %4845 = vmatpush2.msra.mxu1 %v4683_v28  ;;  %v4529_v27 = vld [vmem:[#allocation8 + $0x260] sm:$0xff]  ;;  %v4464_v57 = vld [vmem:[#allocation8 + $0x58] sm:$0xff] }
 0x4fd   : > { %4775 = vmatprep.subr.mxu0 %v4618_v29  ;;  %4846 = vmatprep.subr.mxu1 %v4682_v30  ;;  %v4528_v28 = vld [vmem:[#allocation8 + $0x258] sm:$0xff]  ;;  %v4463_v29 = vld [vmem:[#allocation8 + $0x50] sm:$0xff] }
 0x4fe   : > { %4776 = vmatpush2.msra.mxu0 %v4617_v12  ;;  %4847 = vmatpush2.msra.mxu1 %v4681_v31  ;;  %v4527_v30 = vld [vmem:[#allocation8 + $0x250] sm:$0xff]  ;;  %v4462_v12 = vld [vmem:[#allocation8 + $0x48] sm:$0xff] }
 0x4ff   : > { %4777 = vmatprep.subr.mxu0 %v4616_v32  ;;  %4848 = vmatprep.subr.mxu1 %v4680_v16  ;;  %v4526_v31 = vld [vmem:[#allocation8 + $0x248] sm:$0xff]  ;;  %v4461_v32 = vld [vmem:[#allocation8 + $0x40] sm:$0xff] }
 0x500   : > { %4778 = vmatpush2.msra.mxu0 %v4615_v9  ;;  %4849 = vmatpush2.msra.mxu1 %v4679_v34  ;;  %v4525_v16 = vld [vmem:[#allocation8 + $0x240] sm:$0xff]  ;;  %v4460_v9 = vld [vmem:[#allocation8 + $0x38] sm:$0xff] }
 0x501   : > { %4779 = vmatprep.subr.mxu0 %v4614_v43  ;;  %4850 = vmatprep.subr.mxu1 %v4678_v41  ;;  %v4524_v34 = vld [vmem:[#allocation8 + $0x238] sm:$0xff]  ;;  %v4459_v43 = vld [vmem:[#allocation8 + $0x30] sm:$0xff] }
 0x502   : > { %4780 = vmatpush2.msra.mxu0 %v4613_v46  ;;  %4851 = vmatpush2.msra.mxu1 %v4677_v44  ;;  %v4523_v41 = vld [vmem:[#allocation8 + $0x230] sm:$0xff]  ;;  %v4458_v46 = vld [vmem:[#allocation8 + $0x28] sm:$0xff] }
 0x503   : > { %4782 = vmatmul.mubr.f32.vlgmr.msra.gmra.mxu0 %v4709_v14  ;;  %4853 = vmatmul.mubr.f32.vlgmr.msra.gmra.mxu1 %v4711_v47  ;;  %v4522_v44 = vld [vmem:[#allocation8 + $0x228] sm:$0xff]  ;;  %v4457_v14 = vld [vmem:[#allocation8 + $0x20] sm:$0xff] }
 0x504   : > { %4859 = vmatprep.subr.mxu0 %v4484_v48  ;;  %4930 = vmatprep.subr.mxu1 %v4548_v49  ;;  %v4521_v47 = vld [vmem:[#allocation8 + $0x220] sm:$0xff]  ;;  %v4456_v48 = vld [vmem:[#allocation8 + $0x18] sm:$0xff] }
 0x505   : > { %4860 = vmatpush1.msra.mxu0 %v4483_v50  ;;  %4923 = vmatprep.mubr.f32.mxu0 %v4281_v7  ;;  %v4541_v7 = vld [vmem:[#allocation8 + $0x2c0] sm:$0xff]  ;;  %v4520_v49 = vld [vmem:[#allocation8 + $0x218] sm:$0xff]  ;;  %v4455_v50 = vld [vmem:[#allocation8 + $0x10] sm:$0xff] }
 0x506   : > { %4931 = vmatpush1.msra.mxu1 %v4547_v52  ;;  %4994 = vmatprep.mubr.f32.mxu1 %v4283_v33  ;;  %v4475_v33 = vld [vmem:[#allocation8 + $0xb0] sm:$0xff] }
 0x507   : > { %4861 = vmatprep.subr.mxu0 %v4482_v55  ;;  %4932 = vmatprep.subr.mxu1 %v4546_v56  ;;  %v4519_v52 = vld [vmem:[#allocation8 + $0x210] sm:$0xff]  ;;  %v4454_v55 = vld [vmem:[#allocation8 + $0x8] sm:$0xff] }
 0x508   : > { %4862 = vmatpush1.msra.mxu0 %v4481_v59  ;;  %4933 = vmatpush1.msra.mxu1 %v4545_v60  ;;  %v4518_v56 = vld [vmem:[#allocation8 + $0x208] sm:$0xff]  ;;  %v4453_v59 = vld [vmem:[#allocation8] sm:$0xff] }
 0x509   : > { %4863 = vmatprep.subr.mxu0 %v4480_v61  ;;  %4934 = vmatprep.subr.mxu1 %v4544_v62  ;;  %v4517_v60 = vld [vmem:[#allocation8 + $0x200] sm:$0xff]  ;;  %v4516_v61 = vld [vmem:[#allocation8 + $0x1f8] sm:$0xff] }
 0x50a   : > { %4864 = vmatpush1.msra.mxu0 %v4479_v63  ;;  %4935 = vmatpush1.msra.mxu1 %v4543_v0  ;;  %v4580_v62 = vld [vmem:[#allocation8 + $0x3f8] sm:$0xff]  ;;  %v4515_v63 = vld [vmem:[#allocation8 + $0x1f0] sm:$0xff] }
 0x50b   : > { %4865 = vmatprep.subr.mxu0 %v4478_v2  ;;  %4936 = vmatprep.subr.mxu1 %v4542_v35  ;;  %v4579_v0 = vld [vmem:[#allocation8 + $0x3f0] sm:$0xff]  ;;  %v4514_v2 = vld [vmem:[#allocation8 + $0x1e8] sm:$0xff] }
 0x50c   : > { %4866 = vmatpush1.msra.mxu0 %v4477_v3  ;;  %4937 = vmatpush1.msra.mxu1 %v4541_v7  ;;  %v4578_v35 = vld [vmem:[#allocation8 + $0x3e8] sm:$0xff]  ;;  %v4513_v3 = vld [vmem:[#allocation8 + $0x1e0] sm:$0xff] }
 0x50d   : > { %4867 = vmatprep.subr.mxu0 %v4476_v54  ;;  %4938 = vmatprep.subr.mxu1 %v4540_v40  ;;  %v4577_v7 = vld [vmem:[#allocation8 + $0x3e0] sm:$0xff]  ;;  %v4512_v54 = vld [vmem:[#allocation8 + $0x1d8] sm:$0xff] }
 0x50e   : > { %4868 = vmatpush1.msra.mxu0 %v4475_v33  ;;  %4939 = vmatpush1.msra.mxu1 %v4539_v45  ;;  %v4576_v40 = vld [vmem:[#allocation8 + $0x3d8] sm:$0xff]  ;;  %v4511_v33 = vld [vmem:[#allocation8 + $0x1d0] sm:$0xff] }
 0x50f   : > { %4869 = vmatprep.subr.mxu0 %v4474_v1  ;;  %4940 = vmatprep.subr.mxu1 %v4538_v58  ;;  %v4575_v45 = vld [vmem:[#allocation8 + $0x3d0] sm:$0xff]  ;;  %v4510_v1 = vld [vmem:[#allocation8 + $0x1c8] sm:$0xff] }
 0x510   : > { %4870 = vmatpush1.msra.mxu0 %v4473_v4  ;;  %4941 = vmatpush1.msra.mxu1 %v4537_v5  ;;  %v4574_v58 = vld [vmem:[#allocation8 + $0x3c8] sm:$0xff]  ;;  %v4509_v4 = vld [vmem:[#allocation8 + $0x1c0] sm:$0xff] }
 0x511   : > { %4871 = vmatprep.subr.mxu0 %v4472_v6  ;;  %4942 = vmatprep.subr.mxu1 %v4536_v15  ;;  %v4573_v5 = vld [vmem:[#allocation8 + $0x3c0] sm:$0xff]  ;;  %v4508_v6 = vld [vmem:[#allocation8 + $0x1b8] sm:$0xff] }
 0x512   : > { %4872 = vmatpush1.msra.mxu0 %v4471_v17  ;;  %4943 = vmatpush1.msra.mxu1 %v4535_v11  ;;  %v4572_v15 = vld [vmem:[#allocation8 + $0x3b8] sm:$0xff]  ;;  %v4507_v17 = vld [vmem:[#allocation8 + $0x1b0] sm:$0xff] }
 0x513   : > { %4873 = vmatprep.subr.mxu0 %v4470_v13  ;;  %4944 = vmatprep.subr.mxu1 %v4534_v18  ;;  %v4571_v11 = vld [vmem:[#allocation8 + $0x3b0] sm:$0xff]  ;;  %v4506_v13 = vld [vmem:[#allocation8 + $0x1a8] sm:$0xff] }
 0x514   : > { %4874 = vmatpush1.msra.mxu0 %v4469_v19  ;;  %4945 = vmatpush1.msra.mxu1 %v4533_v20  ;;  %v4570_v18 = vld [vmem:[#allocation8 + $0x3a8] sm:$0xff]  ;;  %v4505_v19 = vld [vmem:[#allocation8 + $0x1a0] sm:$0xff] }
 0x515   : > { %4875 = vmatprep.subr.mxu0 %v4468_v21  ;;  %4946 = vmatprep.subr.mxu1 %v4532_v22  ;;  %v4569_v20 = vld [vmem:[#allocation8 + $0x3a0] sm:$0xff]  ;;  %v4504_v21 = vld [vmem:[#allocation8 + $0x198] sm:$0xff] }
 0x516   : > { %4876 = vmatpush1.msra.mxu0 %v4467_v23  ;;  %4947 = vmatpush1.msra.mxu1 %v4531_v24  ;;  %v4568_v22 = vld [vmem:[#allocation8 + $0x398] sm:$0xff]  ;;  %v4503_v23 = vld [vmem:[#allocation8 + $0x190] sm:$0xff] }
 0x517   : > { %4877 = vmatprep.subr.mxu0 %v4466_v25  ;;  %4948 = vmatprep.subr.mxu1 %v4530_v51  ;;  %v4567_v24 = vld [vmem:[#allocation8 + $0x390] sm:$0xff]  ;;  %v4502_v25 = vld [vmem:[#allocation8 + $0x188] sm:$0xff] }
 0x518   : > { %4878 = vmatpush1.msra.mxu0 %v4465_v26  ;;  %4949 = vmatpush1.msra.mxu1 %v4529_v27  ;;  %v4566_v51 = vld [vmem:[#allocation8 + $0x388] sm:$0xff]  ;;  %v4501_v26 = vld [vmem:[#allocation8 + $0x180] sm:$0xff] }
 0x519   : > { %4879 = vmatprep.subr.mxu0 %v4464_v57  ;;  %4950 = vmatprep.subr.mxu1 %v4528_v28  ;;  %v4565_v27 = vld [vmem:[#allocation8 + $0x380] sm:$0xff]  ;;  %v4500_v57 = vld [vmem:[#allocation8 + $0x178] sm:$0xff] }
 0x51a   : > { %4880 = vmatpush1.msra.mxu0 %v4463_v29  ;;  %4951 = vmatpush1.msra.mxu1 %v4527_v30  ;;  %v4564_v28 = vld [vmem:[#allocation8 + $0x378] sm:$0xff]  ;;  %v4499_v29 = vld [vmem:[#allocation8 + $0x170] sm:$0xff] }
 0x51b   : > { %4881 = vmatprep.subr.mxu0 %v4462_v12  ;;  %4952 = vmatprep.subr.mxu1 %v4526_v31  ;;  %v4563_v30 = vld [vmem:[#allocation8 + $0x370] sm:$0xff]  ;;  %v4498_v12 = vld [vmem:[#allocation8 + $0x168] sm:$0xff] }
 0x51c   : > { %4882 = vmatpush1.msra.mxu0 %v4461_v32  ;;  %4953 = vmatpush1.msra.mxu1 %v4525_v16  ;;  %v4562_v31 = vld [vmem:[#allocation8 + $0x368] sm:$0xff]  ;;  %v4497_v32 = vld [vmem:[#allocation8 + $0x160] sm:$0xff] }
 0x51d   : > { %4883 = vmatprep.subr.mxu0 %v4460_v9  ;;  %4954 = vmatprep.subr.mxu1 %v4524_v34  ;;  %v4561_v16 = vld [vmem:[#allocation8 + $0x360] sm:$0xff]  ;;  %v4496_v9 = vld [vmem:[#allocation8 + $0x158] sm:$0xff] }
 0x51e   : > { %4884 = vmatpush1.msra.mxu0 %v4459_v43  ;;  %4955 = vmatpush1.msra.mxu1 %v4523_v41  ;;  %v4560_v34 = vld [vmem:[#allocation8 + $0x358] sm:$0xff]  ;;  %v4495_v43 = vld [vmem:[#allocation8 + $0x150] sm:$0xff] }
 0x51f   : > { %4885 = vmatprep.subr.mxu0 %v4458_v46  ;;  %4956 = vmatprep.subr.mxu1 %v4522_v44  ;;  %v4559_v41 = vld [vmem:[#allocation8 + $0x350] sm:$0xff]  ;;  %v4494_v46 = vld [vmem:[#allocation8 + $0x148] sm:$0xff] }
 0x520   : > { %4886 = vmatpush1.msra.mxu0 %v4457_v14  ;;  %4957 = vmatpush1.msra.mxu1 %v4521_v47  ;;  %v4558_v44 = vld [vmem:[#allocation8 + $0x348] sm:$0xff]  ;;  %v4493_v14 = vld [vmem:[#allocation8 + $0x140] sm:$0xff] }
 0x521   : > { %4887 = vmatprep.subr.mxu0 %v4456_v48  ;;  %4958 = vmatprep.subr.mxu1 %v4520_v49  ;;  %v4557_v47 = vld [vmem:[#allocation8 + $0x340] sm:$0xff]  ;;  %v4492_v48 = vld [vmem:[#allocation8 + $0x138] sm:$0xff] }
 0x522   : > { %4888 = vmatpush1.msra.mxu0 %v4455_v50  ;;  %4959 = vmatpush1.msra.mxu1 %v4519_v52  ;;  %v4556_v49 = vld [vmem:[#allocation8 + $0x338] sm:$0xff]  ;;  %v4491_v50 = vld [vmem:[#allocation8 + $0x130] sm:$0xff] }
 0x523   : > { %4889 = vmatprep.subr.mxu0 %v4454_v55  ;;  %4960 = vmatprep.subr.mxu1 %v4518_v56  ;;  %v4555_v52 = vld [vmem:[#allocation8 + $0x330] sm:$0xff]  ;;  %v4490_v55 = vld [vmem:[#allocation8 + $0x128] sm:$0xff] }
 0x524   : > { %4890 = vmatpush1.msra.mxu0 %v4453_v59  ;;  %4961 = vmatpush1.msra.mxu1 %v4517_v60  ;;  %v4554_v56 = vld [vmem:[#allocation8 + $0x328] sm:$0xff]  ;;  %v4489_v59 = vld [vmem:[#allocation8 + $0x120] sm:$0xff] }
 0x525   : > { %4891 = vmatprep.subr.mxu0 %v4516_v61  ;;  %4962 = vmatprep.subr.mxu1 %v4580_v62  ;;  %v4553_v60 = vld [vmem:[#allocation8 + $0x320] sm:$0xff]  ;;  %v4488_v61 = vld [vmem:[#allocation8 + $0x118] sm:$0xff] }
 0x526   : > { %4892 = vmatpush2.msra.mxu0 %v4515_v63  ;;  %4963 = vmatpush2.msra.mxu1 %v4579_v0  ;;  %v4552_v62 = vld [vmem:[#allocation8 + $0x318] sm:$0xff]  ;;  %v4487_v63 = vld [vmem:[#allocation8 + $0x110] sm:$0xff] }
 0x527   : > { %4893 = vmatprep.subr.mxu0 %v4514_v2  ;;  %4964 = vmatprep.subr.mxu1 %v4578_v35  ;;  %v4551_v0 = vld [vmem:[#allocation8 + $0x310] sm:$0xff]  ;;  %v4486_v2 = vld [vmem:[#allocation8 + $0x108] sm:$0xff] }
 0x528   : > { %4894 = vmatpush2.msra.mxu0 %v4513_v3  ;;  %4965 = vmatpush2.msra.mxu1 %v4577_v7  ;;  %v4550_v35 = vld [vmem:[#allocation8 + $0x308] sm:$0xff]  ;;  %v4485_v3 = vld [vmem:[#allocation8 + $0x100] sm:$0xff] }
 0x529   : > { %4895 = vmatprep.subr.mxu0 %v4512_v54  ;;  %4966 = vmatprep.subr.mxu1 %v4576_v40  ;;  %v4549_v7 = vld [vmem:[#allocation8 + $0x300] sm:$0xff]  ;;  %v5032_v54 = vld [vmem:[#allocation8 + $0x8f8] sm:$0xff] }
 0x52a   : > { %4896 = vmatpush2.msra.mxu0 %v4511_v33  ;;  %4967 = vmatpush2.msra.mxu1 %v4575_v45  ;;  %v5096_v40 = vld [vmem:[#allocation8 + $0xaf8] sm:$0xff]  ;;  %v5031_v33 = vld [vmem:[#allocation8 + $0x8f0] sm:$0xff]  ;;  %v5130_v45 = vrot.slane %v7781_v38, 7  ;;  %v5026_v38 = vld [vmem:[#allocation8 + $0x8c8] sm:$0xff] }
 0x52b   : > { %4897 = vmatprep.subr.mxu0 %v4510_v1  ;;  %4968 = vmatprep.subr.mxu1 %v4574_v58  ;;  %v5095_v1 = vld [vmem:[#allocation8 + $0xaf0] sm:$0xff]  ;;  %v5132_v58 = vrot.slane %v7783_v39, 7  ;;  %v5025_v39 = vld [vmem:[#allocation8 + $0x8c0] sm:$0xff] }
 0x52c   : > { %4898 = vmatpush2.msra.mxu0 %v4509_v4  ;;  %4969 = vmatpush2.msra.mxu1 %v4573_v5  ;;  %v5030_v4 = vld [vmem:[#allocation8 + $0x8e8] sm:$0xff] }
 0x52d   : > { %4899 = vmatprep.subr.mxu0 %v4508_v6  ;;  %4970 = vmatprep.subr.mxu1 %v4572_v15  ;;  %v5094_v5 = vld [vmem:[#allocation8 + $0xae8] sm:$0xff]  ;;  %v5029_v6 = vld [vmem:[#allocation8 + $0x8e0] sm:$0xff] }
 0x52e   : > { %4900 = vmatpush2.msra.mxu0 %v4507_v17  ;;  %4971 = vmatpush2.msra.mxu1 %v4571_v11  ;;  %v5093_v15 = vld [vmem:[#allocation8 + $0xae0] sm:$0xff]  ;;  %v5028_v17 = vld [vmem:[#allocation8 + $0x8d8] sm:$0xff]  ;;  %v5091_v11 = vld [vmem:[#allocation8 + $0xad0] sm:$0xff] }
 0x52f   : > { %4901 = vmatprep.subr.mxu0 %v4506_v13  ;;  %4972 = vmatprep.subr.mxu1 %v4570_v18  ;;  %v5090_v13 = vld [vmem:[#allocation8 + $0xac8] sm:$0xff]  ;;  %v5089_v18 = vld [vmem:[#allocation8 + $0xac0] sm:$0xff] }
 0x530   : > { %4902 = vmatpush2.msra.mxu0 %v4505_v19  ;;  %4973 = vmatpush2.msra.mxu1 %v4569_v20  ;;  %v5024_v19 = vld [vmem:[#allocation8 + $0x8b8] sm:$0xff] }
 0x531   : > { %4903 = vmatprep.subr.mxu0 %v4504_v21  ;;  %4974 = vmatprep.subr.mxu1 %v4568_v22  ;;  %v5088_v20 = vld [vmem:[#allocation8 + $0xab8] sm:$0xff]  ;;  %v5023_v21 = vld [vmem:[#allocation8 + $0x8b0] sm:$0xff] }
 0x532   : > { %4904 = vmatpush2.msra.mxu0 %v4503_v23  ;;  %4975 = vmatpush2.msra.mxu1 %v4567_v24  ;;  %v5087_v22 = vld [vmem:[#allocation8 + $0xab0] sm:$0xff]  ;;  %v5022_v23 = vld [vmem:[#allocation8 + $0x8a8] sm:$0xff] }
 0x533   : > { %4905 = vmatprep.subr.mxu0 %v4502_v25  ;;  %4976 = vmatprep.subr.mxu1 %v4566_v51  ;;  %v5086_v24 = vld [vmem:[#allocation8 + $0xaa8] sm:$0xff]  ;;  %v5021_v25 = vld [vmem:[#allocation8 + $0x8a0] sm:$0xff] }
 0x534   : > { %4906 = vmatpush2.msra.mxu0 %v4501_v26  ;;  %4977 = vmatpush2.msra.mxu1 %v4565_v27  ;;  %v5085_v51 = vld [vmem:[#allocation8 + $0xaa0] sm:$0xff]  ;;  %v5020_v26 = vld [vmem:[#allocation8 + $0x898] sm:$0xff] }
 0x535   : > { %4907 = vmatprep.subr.mxu0 %v4500_v57  ;;  %4978 = vmatprep.subr.mxu1 %v4564_v28  ;;  %v5084_v27 = vld [vmem:[#allocation8 + $0xa98] sm:$0xff]  ;;  %v5019_v57 = vld [vmem:[#allocation8 + $0x890] sm:$0xff] }
 0x536   : > { %4908 = vmatpush2.msra.mxu0 %v4499_v29  ;;  %4979 = vmatpush2.msra.mxu1 %v4563_v30  ;;  %v5083_v28 = vld [vmem:[#allocation8 + $0xa90] sm:$0xff]  ;;  %v5018_v29 = vld [vmem:[#allocation8 + $0x888] sm:$0xff] }
 0x537   : > { %4909 = vmatprep.subr.mxu0 %v4498_v12  ;;  %4980 = vmatprep.subr.mxu1 %v4562_v31  ;;  %v5082_v30 = vld [vmem:[#allocation8 + $0xa88] sm:$0xff]  ;;  %v5017_v12 = vld [vmem:[#allocation8 + $0x880] sm:$0xff] }
 0x538   : > { %4910 = vmatpush2.msra.mxu0 %v4497_v32  ;;  %4981 = vmatpush2.msra.mxu1 %v4561_v16  ;;  %v5081_v31 = vld [vmem:[#allocation8 + $0xa80] sm:$0xff]  ;;  %v5016_v32 = vld [vmem:[#allocation8 + $0x878] sm:$0xff] }
 0x539   : > { %4911 = vmatprep.subr.mxu0 %v4496_v9  ;;  %4982 = vmatprep.subr.mxu1 %v4560_v34  ;;  %v5080_v16 = vld [vmem:[#allocation8 + $0xa78] sm:$0xff]  ;;  %v5015_v9 = vld [vmem:[#allocation8 + $0x870] sm:$0xff] }
 0x53a   : > { %4912 = vmatpush2.msra.mxu0 %v4495_v43  ;;  %4983 = vmatpush2.msra.mxu1 %v4559_v41  ;;  %v5079_v34 = vld [vmem:[#allocation8 + $0xa70] sm:$0xff]  ;;  %v5014_v43 = vld [vmem:[#allocation8 + $0x868] sm:$0xff] }
 0x53b   : > { %4913 = vmatprep.subr.mxu0 %v4494_v46  ;;  %4984 = vmatprep.subr.mxu1 %v4558_v44  ;;  %v5078_v41 = vld [vmem:[#allocation8 + $0xa68] sm:$0xff]  ;;  %v5013_v46 = vld [vmem:[#allocation8 + $0x860] sm:$0xff] }
 0x53c   : > { %4914 = vmatpush2.msra.mxu0 %v4493_v14  ;;  %4985 = vmatpush2.msra.mxu1 %v4557_v47  ;;  %v5077_v44 = vld [vmem:[#allocation8 + $0xa60] sm:$0xff]  ;;  %v5012_v14 = vld [vmem:[#allocation8 + $0x858] sm:$0xff] }
 0x53d   : > { %4915 = vmatprep.subr.mxu0 %v4492_v48  ;;  %4986 = vmatprep.subr.mxu1 %v4556_v49  ;;  %v5076_v47 = vld [vmem:[#allocation8 + $0xa58] sm:$0xff]  ;;  %v5011_v48 = vld [vmem:[#allocation8 + $0x850] sm:$0xff] }
 0x53e   : > { %4916 = vmatpush2.msra.mxu0 %v4491_v50  ;;  %4987 = vmatpush2.msra.mxu1 %v4555_v52  ;;  %v5075_v49 = vld [vmem:[#allocation8 + $0xa50] sm:$0xff]  ;;  %v5010_v50 = vld [vmem:[#allocation8 + $0x848] sm:$0xff] }
 0x53f   : > { %4917 = vmatprep.subr.mxu0 %v4490_v55  ;;  %4988 = vmatprep.subr.mxu1 %v4554_v56  ;;  %v5074_v52 = vld [vmem:[#allocation8 + $0xa48] sm:$0xff]  ;;  %v5009_v55 = vld [vmem:[#allocation8 + $0x840] sm:$0xff] }
 0x540   : > { %4918 = vmatpush2.msra.mxu0 %v4489_v59  ;;  %4989 = vmatpush2.msra.mxu1 %v4553_v60  ;;  %v5073_v56 = vld [vmem:[#allocation8 + $0xa40] sm:$0xff]  ;;  %v5008_v59 = vld [vmem:[#allocation8 + $0x838] sm:$0xff] }
 0x541   : > { %4919 = vmatprep.subr.mxu0 %v4488_v61  ;;  %4990 = vmatprep.subr.mxu1 %v4552_v62  ;;  %v5072_v60 = vld [vmem:[#allocation8 + $0xa38] sm:$0xff]  ;;  %v5007_v61 = vld [vmem:[#allocation8 + $0x830] sm:$0xff] }
 0x542   : > { %4920 = vmatpush2.msra.mxu0 %v4487_v63  ;;  %4991 = vmatpush2.msra.mxu1 %v4551_v0  ;;  %v5071_v62 = vld [vmem:[#allocation8 + $0xa30] sm:$0xff]  ;;  %v5006_v63 = vld [vmem:[#allocation8 + $0x828] sm:$0xff] }
 0x543   : > { %4921 = vmatprep.subr.mxu0 %v4486_v2  ;;  %4992 = vmatprep.subr.mxu1 %v4550_v35  ;;  %v5070_v0 = vld [vmem:[#allocation8 + $0xa28] sm:$0xff]  ;;  %v5005_v2 = vld [vmem:[#allocation8 + $0x820] sm:$0xff] }
 0x544   : > { %4922 = vmatpush2.msra.mxu0 %v4485_v3  ;;  %4993 = vmatpush2.msra.mxu1 %v4549_v7  ;;  %v5069_v35 = vld [vmem:[#allocation8 + $0xa20] sm:$0xff]  ;;  %v5004_v3 = vld [vmem:[#allocation8 + $0x818] sm:$0xff] }
 0x545   : > { %4924 = vmatmul.mubr.f32.vlgmr.msra.gmra.mxu0 %v4280_v8  ;;  %4995 = vmatmul.mubr.f32.vlgmr.msra.gmra.mxu1 %v4282_v10  ;;  %v5092_v8 = vld [vmem:[#allocation8 + $0xad8] sm:$0xff]  ;;  %v5027_v10 = vld [vmem:[#allocation8 + $0x8d0] sm:$0xff] }
 0x546   : > { %5137 = vmatprep.subr.mxu0 %v5032_v54  ;;  %5208 = vmatprep.subr.mxu1 %v5096_v40  ;;  %v5068_v7 = vld [vmem:[#allocation8 + $0xa18] sm:$0xff]  ;;  %v5003_v54 = vld [vmem:[#allocation8 + $0x810] sm:$0xff] }
 0x547   : > { %5138 = vmatpush1.msra.mxu0 %v5031_v33  ;;  %5201 = vmatprep.mubr.f32.mxu0 %v5130_v45  ;;  %v5067_v40 = vld [vmem:[#allocation8 + $0xa10] sm:$0xff]  ;;  %v5002_v33 = vld [vmem:[#allocation8 + $0x808] sm:$0xff] }
 0x548   : > { %5209 = vmatpush1.msra.mxu1 %v5095_v1  ;;  %5272 = vmatprep.mubr.f32.mxu1 %v5132_v58  ;;  %v5066_v45 = vld [vmem:[#allocation8 + $0xa08] sm:$0xff]  ;;  %v5001_v1 = vld [vmem:[#allocation8 + $0x800] sm:$0xff] }
 0x549   : > { %5139 = vmatprep.subr.mxu0 %v5030_v4  ;;  %5210 = vmatprep.subr.mxu1 %v5094_v5  ;;  %v5065_v58 = vld [vmem:[#allocation8 + $0xa00] sm:$0xff]  ;;  %v5064_v4 = vld [vmem:[#allocation8 + $0x9f8] sm:$0xff] }
 0x54a   : > { %5140 = vmatpush1.msra.mxu0 %v5029_v6  ;;  %5211 = vmatpush1.msra.mxu1 %v5093_v15  ;;  %v5128_v5 = vld [vmem:[#allocation8 + $0xbf8] sm:$0xff]  ;;  %v5063_v6 = vld [vmem:[#allocation8 + $0x9f0] sm:$0xff] }
 0x54b   : > { %5141 = vmatprep.subr.mxu0 %v5028_v17  ;;  %5212 = vmatprep.subr.mxu1 %v5092_v8  ;;  %v5127_v15 = vld [vmem:[#allocation8 + $0xbf0] sm:$0xff]  ;;  %v5062_v17 = vld [vmem:[#allocation8 + $0x9e8] sm:$0xff] }
 0x54c   : > { %5142 = vmatpush1.msra.mxu0 %v5027_v10  ;;  %5213 = vmatpush1.msra.mxu1 %v5091_v11  ;;  %v5126_v8 = vld [vmem:[#allocation8 + $0xbe8] sm:$0xff]  ;;  %v5061_v10 = vld [vmem:[#allocation8 + $0x9e0] sm:$0xff] }
 0x54d   : > { %5143 = vmatprep.subr.mxu0 %v5026_v38  ;;  %5214 = vmatprep.subr.mxu1 %v5090_v13  ;;  %v5125_v11 = vld [vmem:[#allocation8 + $0xbe0] sm:$0xff]  ;;  %v5060_v38 = vld [vmem:[#allocation8 + $0x9d8] sm:$0xff] }
 0x54e   : > { %5144 = vmatpush1.msra.mxu0 %v5025_v39  ;;  %5215 = vmatpush1.msra.mxu1 %v5089_v18  ;;  %v5124_v13 = vld [vmem:[#allocation8 + $0xbd8] sm:$0xff]  ;;  %v5059_v39 = vld [vmem:[#allocation8 + $0x9d0] sm:$0xff] }
 0x54f   : > { %5145 = vmatprep.subr.mxu0 %v5024_v19  ;;  %5216 = vmatprep.subr.mxu1 %v5088_v20  ;;  %v5123_v18 = vld [vmem:[#allocation8 + $0xbd0] sm:$0xff]  ;;  %v5058_v19 = vld [vmem:[#allocation8 + $0x9c8] sm:$0xff] }
 0x550   : > { %5146 = vmatpush1.msra.mxu0 %v5023_v21  ;;  %5217 = vmatpush1.msra.mxu1 %v5087_v22  ;;  %v5122_v20 = vld [vmem:[#allocation8 + $0xbc8] sm:$0xff]  ;;  %v5057_v21 = vld [vmem:[#allocation8 + $0x9c0] sm:$0xff] }
 0x551   : > { %5147 = vmatprep.subr.mxu0 %v5022_v23  ;;  %5218 = vmatprep.subr.mxu1 %v5086_v24  ;;  %v5121_v22 = vld [vmem:[#allocation8 + $0xbc0] sm:$0xff]  ;;  %v5056_v23 = vld [vmem:[#allocation8 + $0x9b8] sm:$0xff] }
 0x552   : > { %5148 = vmatpush1.msra.mxu0 %v5021_v25  ;;  %5219 = vmatpush1.msra.mxu1 %v5085_v51  ;;  %v5120_v24 = vld [vmem:[#allocation8 + $0xbb8] sm:$0xff]  ;;  %v5055_v25 = vld [vmem:[#allocation8 + $0x9b0] sm:$0xff] }
 0x553   : > { %5149 = vmatprep.subr.mxu0 %v5020_v26  ;;  %5220 = vmatprep.subr.mxu1 %v5084_v27  ;;  %v5119_v51 = vld [vmem:[#allocation8 + $0xbb0] sm:$0xff]  ;;  %v5054_v26 = vld [vmem:[#allocation8 + $0x9a8] sm:$0xff] }
 0x554   : > { %5150 = vmatpush1.msra.mxu0 %v5019_v57  ;;  %5221 = vmatpush1.msra.mxu1 %v5083_v28  ;;  %v5118_v27 = vld [vmem:[#allocation8 + $0xba8] sm:$0xff]  ;;  %v5053_v57 = vld [vmem:[#allocation8 + $0x9a0] sm:$0xff] }
 0x555   : > { %5151 = vmatprep.subr.mxu0 %v5018_v29  ;;  %5222 = vmatprep.subr.mxu1 %v5082_v30  ;;  %v5117_v28 = vld [vmem:[#allocation8 + $0xba0] sm:$0xff]  ;;  %v5052_v29 = vld [vmem:[#allocation8 + $0x998] sm:$0xff] }
 0x556   : > { %5152 = vmatpush1.msra.mxu0 %v5017_v12  ;;  %5223 = vmatpush1.msra.mxu1 %v5081_v31  ;;  %v5116_v30 = vld [vmem:[#allocation8 + $0xb98] sm:$0xff]  ;;  %v5051_v12 = vld [vmem:[#allocation8 + $0x990] sm:$0xff] }
 0x557   : > { %5153 = vmatprep.subr.mxu0 %v5016_v32  ;;  %5224 = vmatprep.subr.mxu1 %v5080_v16  ;;  %v5115_v31 = vld [vmem:[#allocation8 + $0xb90] sm:$0xff]  ;;  %v5050_v32 = vld [vmem:[#allocation8 + $0x988] sm:$0xff] }
 0x558   : > { %5154 = vmatpush1.msra.mxu0 %v5015_v9  ;;  %5225 = vmatpush1.msra.mxu1 %v5079_v34  ;;  %v5114_v16 = vld [vmem:[#allocation8 + $0xb88] sm:$0xff]  ;;  %v3934_v9 = vpop.f32.mrf.mxu0  ;;  %v5049_v34 = vld [vmem:[#allocation8 + $0x980] sm:$0xff] }
 0x559   : > { %5155 = vmatprep.subr.mxu0 %v5014_v43  ;;  %5226 = vmatprep.subr.mxu1 %v5078_v41  ;;  %v5113_v43 = vld [vmem:[#allocation8 + $0xb80] sm:$0xff]  ;;  %v5048_v41 = vld [vmem:[#allocation8 + $0x978] sm:$0xff] }
 0x55a   : > { %5156 = vmatpush1.msra.mxu0 %v5013_v46  ;;  %5227 = vmatpush1.msra.mxu1 %v5077_v44  ;;  %v5112_v46 = vld [vmem:[#allocation8 + $0xb78] sm:$0xff]  ;;  %v4005_v44 = vpop.f32.mrf.mxu1 }
 0x55b   : > { %5157 = vmatprep.subr.mxu0 %v5012_v14  ;;  %5228 = vmatprep.subr.mxu1 %v5076_v47  ;;  %v5047_v14 = vld [vmem:[#allocation8 + $0x970] sm:$0xff] }
 0x55c   : > { %5158 = vmatpush1.msra.mxu0 %v5011_v48  ;;  %5229 = vmatpush1.msra.mxu1 %v5075_v49  ;;  %v5111_v47 = vld [vmem:[#allocation8 + $0xb70] sm:$0xff]  ;;  %v5046_v48 = vld [vmem:[#allocation8 + $0x968] sm:$0xff] }
 0x55d   : > { %5159 = vmatprep.subr.mxu0 %v5010_v50  ;;  %5230 = vmatprep.subr.mxu1 %v5074_v52  ;;  %v5110_v49 = vld [vmem:[#allocation8 + $0xb68] sm:$0xff]  ;;  %v3936_v50 = vpop.f32.mrf.mxu0  ;;  %v5045_v52 = vld [vmem:[#allocation8 + $0x960] sm:$0xff] }
 0x55e   : > { %5160 = vmatpush1.msra.mxu0 %v5009_v55  ;;  %5231 = vmatpush1.msra.mxu1 %v5073_v56  ;;  %v5109_v55 = vld [vmem:[#allocation8 + $0xb60] sm:$0xff]  ;;  %v5044_v56 = vld [vmem:[#allocation8 + $0x958] sm:$0xff] }
 0x55f   : > { %5161 = vmatprep.subr.mxu0 %v5008_v59  ;;  %5232 = vmatprep.subr.mxu1 %v5072_v60  ;;  %v5108_v59 = vld [vmem:[#allocation8 + $0xb58] sm:$0xff]  ;;  %v4007_v60 = vpop.f32.mrf.mxu1 }
 0x560   : > { %5162 = vmatpush1.msra.mxu0 %v5007_v61  ;;  %5233 = vmatpush1.msra.mxu1 %v5071_v62  ;;  %v4076_v61 = vpop.f32.mrf.mxu0  ;;  %v5043_v62 = vld [vmem:[#allocation8 + $0x950] sm:$0xff] }
 0x561   : > { %5163 = vmatprep.subr.mxu0 %v5006_v63  ;;  %5234 = vmatprep.subr.mxu1 %v5070_v0  ;;  %v5107_v63 = vld [vmem:[#allocation8 + $0xb50] sm:$0xff]  ;;  %v5042_v0 = vld [vmem:[#allocation8 + $0x948] sm:$0xff] }
 0x562   : > { %5164 = vmatpush1.msra.mxu0 %v5005_v2  ;;  %5235 = vmatpush1.msra.mxu1 %v5069_v35  ;;  %v5106_v2 = vld [vmem:[#allocation8 + $0xb48] sm:$0xff]  ;;  %v4147_v35 = vpop.f32.mrf.mxu1 }
 0x563   : > { %5165 = vmatprep.subr.mxu0 %v5004_v3  ;;  %5236 = vmatprep.subr.mxu1 %v5068_v7  ;;  %v5041_v3 = vld [vmem:[#allocation8 + $0x940] sm:$0xff] }
 0x564   : > { %5166 = vmatpush1.msra.mxu0 %v5003_v54  ;;  %5237 = vmatpush1.msra.mxu1 %v5067_v40  ;;  %v5105_v7 = vld [vmem:[#allocation8 + $0xb40] sm:$0xff]  ;;  %v5040_v54 = vld [vmem:[#allocation8 + $0x938] sm:$0xff] }
 0x565   : > { %5167 = vmatprep.subr.mxu0 %v5002_v33  ;;  %5238 = vmatprep.subr.mxu1 %v5066_v45  ;;  %v5104_v40 = vld [vmem:[#allocation8 + $0xb38] sm:$0xff]  ;;  %v4078_v33 = vpop.f32.mrf.mxu0  ;;  %v5039_v45 = vld [vmem:[#allocation8 + $0x930] sm:$0xff] }
 0x566   : > { %5168 = vmatpush1.msra.mxu0 %v5001_v1  ;;  %5239 = vmatpush1.msra.mxu1 %v5065_v58  ;;  %v5103_v1 = vld [vmem:[#allocation8 + $0xb30] sm:$0xff]  ;;  %v4006_v58 = vadd.f32 %v4005_v44, %v3934_v9 }
 0x567   : > { %5169 = vmatprep.subr.mxu0 %v5064_v4  ;;  %5240 = vmatprep.subr.mxu1 %v5128_v5  ;;  %v4008_v4 = vadd.f32 %v4007_v60, %v3936_v50  ;;  %v5038_v5 = vld [vmem:[#allocation8 + $0x928] sm:$0xff] }
 0x568   : > { %5170 = vmatpush2.msra.mxu0 %v5063_v6  ;;  %5241 = vmatpush2.msra.mxu1 %v5127_v15  ;;  %v5102_v6 = vld [vmem:[#allocation8 + $0xb28] sm:$0xff]  ;;  %v4149_v15 = vpop.f32.mrf.mxu1 }
 0x569   : > { %5171 = vmatprep.subr.mxu0 %v5062_v17  ;;  %5242 = vmatprep.subr.mxu1 %v5126_v8  ;;  %v5037_v17 = vld [vmem:[#allocation8 + $0x920] sm:$0xff] }
 0x56a   : > { %5172 = vmatpush2.msra.mxu0 %v5061_v10  ;;  %5243 = vmatpush2.msra.mxu1 %v5125_v11  ;;  %v5101_v8 = vld [vmem:[#allocation8 + $0xb20] sm:$0xff]  ;;  %v4077_v10 = vadd.f32 %v4076_v61, %v4006_v58  ;;  %v4079_v11 = vadd.f32 %v4078_v33, %v4008_v4 }
 0x56b   : > { %5173 = vmatprep.subr.mxu0 %v5060_v38  ;;  %5244 = vmatprep.subr.mxu1 %v5124_v13  ;;  %v5036_v38 = vld [vmem:[#allocation8 + $0x918] sm:$0xff] }
 0x56c   : > { %5174 = vmatpush2.msra.mxu0 %v5059_v39  ;;  %5245 = vmatpush2.msra.mxu1 %v5123_v18  ;;  %v5100_v13 = vld [vmem:[#allocation8 + $0xb18] sm:$0xff]  ;;  %v5035_v39 = vld [vmem:[#allocation8 + $0x910] sm:$0xff] }
 0x56d   : > { %5175 = vmatprep.subr.mxu0 %v5058_v19  ;;  %5246 = vmatprep.subr.mxu1 %v5122_v20  ;;  %v5099_v18 = vld [vmem:[#allocation8 + $0xb10] sm:$0xff]  ;;  %v9124_v33 = vld [vmem:[#allocation35_spill] sm:$0xff] }
 0x56e   : > { %5176 = vmatpush2.msra.mxu0 %v5057_v21  ;;  %5247 = vmatpush2.msra.mxu1 %v5121_v22  ;;  %v5034_v21 = vld [vmem:[#allocation8 + $0x908] sm:$0xff] }
 0x56f   : > { %5177 = vmatprep.subr.mxu0 %v5056_v23  ;;  %5248 = vmatprep.subr.mxu1 %v5120_v24  ;;  %v5098_v22 = vld [vmem:[#allocation8 + $0xb08] sm:$0xff]  ;;  %v5033_v24 = vld [vmem:[#allocation8 + $0x900] sm:$0xff] }
 0x570   : > { %5178 = vmatpush2.msra.mxu0 %v5055_v25  ;;  %5249 = vmatpush2.msra.mxu1 %v5119_v51  ;;  %v5097_v25 = vld [vmem:[#allocation8 + $0xb00] sm:$0xff] }
 0x571   : > { %5179 = vmatprep.subr.mxu0 %v5054_v26  ;;  %5250 = vmatprep.subr.mxu1 %v5118_v27  ;;  %v4148_v27 = vadd.f32 %v4147_v35, %v4077_v10  ;;  %v5436_v10 = vld [vmem:[#allocation14 + $0xf8] sm:$0xff] }
 0x572   : > { %5180 = vmatpush2.msra.mxu0 %v5053_v57  ;;  %5251 = vmatpush2.msra.mxu1 %v5117_v28  ;;  %v4150_v57 = vadd.f32 %v4149_v15, %v4079_v11  ;;  %v5503_v11 = vld [vmem:[#allocation14 + $0x2f8] sm:$0xff] }
 0x573   : > { %5181 = vmatprep.subr.mxu0 %v5052_v29  ;;  %5252 = vmatprep.subr.mxu1 %v5116_v30  ;;  %v5129_v29 = vrot.slane %v7777_v36, 7  ;;  %v5131_v30 = vrot.slane %v7779_v37, 7 }
 0x574   : > { %5182 = vmatpush2.msra.mxu0 %v5051_v12  ;;  %5253 = vmatpush2.msra.mxu1 %v5115_v31 }
 0x575   : > { %5183 = vmatprep.subr.mxu0 %v5050_v32  ;;  %5254 = vmatprep.subr.mxu1 %v5114_v16 }
 0x576   : > { %5184 = vmatpush2.msra.mxu0 %v5049_v34  ;;  %5255 = vmatpush2.msra.mxu1 %v5113_v43  ;;  %v7425_v34 = vmov 0.0  }
 0x577   : > { %5185 = vmatprep.subr.mxu0 %v5048_v41  ;;  %5256 = vmatprep.subr.mxu1 %v5112_v46  ;;  %5401 = vst.msk [vmem:[#allocation2 + $0x5] ss:$8 sm:$0x3] %vm8338_vm8, %v7425_v34 }
 0x578   : > { %5186 = vmatpush2.msra.mxu0 %v5047_v14  ;;  %5257 = vmatpush2.msra.mxu1 %v5111_v47 }
 0x579   : > { %5187 = vmatprep.subr.mxu0 %v5046_v48  ;;  %5258 = vmatprep.subr.mxu1 %v5110_v49 }
 0x57a   : > { %5188 = vmatpush2.msra.mxu0 %v5045_v52  ;;  %5259 = vmatpush2.msra.mxu1 %v5109_v55 }
 0x57b   : > { %5189 = vmatprep.subr.mxu0 %v5044_v56  ;;  %5260 = vmatprep.subr.mxu1 %v5108_v59 }
 0x57c   : > { %5190 = vmatpush2.msra.mxu0 %v5043_v62  ;;  %5261 = vmatpush2.msra.mxu1 %v5107_v63 }
 0x57d   : > { %5191 = vmatprep.subr.mxu0 %v5042_v0  ;;  %5262 = vmatprep.subr.mxu1 %v5106_v2 }
 0x57e   : > { %5192 = vmatpush2.msra.mxu0 %v5041_v3  ;;  %5263 = vmatpush2.msra.mxu1 %v5105_v7 }
 0x57f   : > { %5193 = vmatprep.subr.mxu0 %v5040_v54  ;;  %5264 = vmatprep.subr.mxu1 %v5104_v40  ;;  %v5304_v40 = vld [vmem:[#allocation9] sm:$0x3] }
 0x580   : > { %5194 = vmatpush2.msra.mxu0 %v5039_v45  ;;  %5265 = vmatpush2.msra.mxu1 %v5103_v1  ;;  %v5309_v45 = vrot.slane %v5304_v40, %v9124_v33  ;;  %v9125_v1 = vld [vmem:[#allocation36_spill] sm:$0xff] }
 0x581   : > { %5195 = vmatprep.subr.mxu0 %v5038_v5  ;;  %5266 = vmatprep.subr.mxu1 %v5102_v6  ;;  %v4354_v19 = vpop.f32.mrf.mxu0  ;;  %v4425_v20 = vpop.f32.mrf.mxu1  ;;  %v5313_v58 = vrot.slane %v5304_v40, %v9125_v1  ;;  %v5486_v40 = vld [vmem:[#allocation14 + $0x270] sm:$0xff] }
 0x582   : > { %5196 = vmatpush2.msra.mxu0 %v5037_v17  ;;  %5267 = vmatpush2.msra.mxu1 %v5101_v8  ;;  %v4426_v23 = vadd.f32 %v4425_v20, %v4354_v19  ;;  %v5433_v19 = vld [vmem:[#allocation14 + $0xe0] sm:$0xff] }
 0x583   : > { %5197 = vmatprep.subr.mxu0 %v5036_v38  ;;  %5268 = vmatprep.subr.mxu1 %v5100_v13  ;;  %v4356_v51 = vpop.f32.mrf.mxu0  ;;  %v4427_v26 = vpop.f32.mrf.mxu1  ;;  %v5435_v38 = vld [vmem:[#allocation14 + $0xf0] sm:$0xff]  ;;  %v5500_v20 = vld [vmem:[#allocation14 + $0x2e0] sm:$0xff] }
 0x584   : > { %5198 = vmatpush2.msra.mxu0 %v5035_v39  ;;  %5269 = vmatpush2.msra.mxu1 %v5099_v18  ;;  %v4428_v28 = vadd.f32 %v4427_v26, %v4356_v51  ;;  %v4430_v12 = vadd.f32 %v4426_v23, %v4148_v27  ;;  %v5502_v13 = vld [vmem:[#allocation14 + $0x2f0] sm:$0xff]  ;;  %v5434_v39 = vld [vmem:[#allocation14 + $0xe8] sm:$0xff]  ;;  %v5429_v51 = vld [vmem:[#allocation14 + $0xc0] sm:$0xff] }
 0x585   : > { %5199 = vmatprep.subr.mxu0 %v5034_v21  ;;  %5270 = vmatprep.subr.mxu1 %v5098_v22  ;;  %v5501_v18 = vld [vmem:[#allocation14 + $0x2e8] sm:$0xff]  ;;  %v5499_v21 = vld [vmem:[#allocation14 + $0x2d8] sm:$0xff]  ;;  %v5431_v22 = vld [vmem:[#allocation14 + $0xd0] sm:$0xff] }
 0x586   : > { %5200 = vmatpush2.msra.mxu0 %v5033_v24  ;;  %5271 = vmatpush2.msra.mxu1 %v5097_v25  ;;  %v4431_v31 = vadd.f32 %v4428_v28, %v4150_v57  ;;  %v5498_v23 = vld [vmem:[#allocation14 + $0x2d0] sm:$0xff]  ;;  %v5430_v24 = vld [vmem:[#allocation14 + $0xc8] sm:$0xff]  ;;  %v5496_v26 = vld [vmem:[#allocation14 + $0x2c0] sm:$0xff] }
 0x587   : > { %5202 = vmatmul.mubr.f32.vlgmr.msra.gmra.mxu0 %v5129_v29  ;;  %5273 = vmatmul.mubr.f32.vlgmr.msra.gmra.mxu1 %v5131_v30  ;;  %v5497_v25 = vld [vmem:[#allocation14 + $0x2c8] sm:$0xff]  ;;  %v5428_v27 = vld [vmem:[#allocation14 + $0xb8] sm:$0xff]  ;;  %v5427_v28 = vld [vmem:[#allocation14 + $0xb0] sm:$0xff] }
 0x588   : > { %v4434_v32 = vcombine.low %v4430_v12, %v4431_v31  ;;  %5613 = vmatprep.subr.mxu1 %v5436_v10  ;;  %5542 = vmatprep.subr.mxu0 %v5503_v11  ;;  %v5495_v57 = vld [vmem:[#allocation14 + $0x2b8] sm:$0xff]  ;;  %v5494_v29 = vld [vmem:[#allocation14 + $0x2b0] sm:$0xff]  ;;  %v5426_v30 = vld [vmem:[#allocation14 + $0xa8] sm:$0xff] }
 0x589   : > { %5614 = vmatpush1.msra.mxu1 %v5435_v38  ;;  %5543 = vmatpush1.msra.mxu0 %v5502_v13  ;;  %v5481_v10 = vld [vmem:[#allocation14 + $0x248] sm:$0xff]  ;;  %v5413_v11 = vld [vmem:[#allocation14 + $0x40] sm:$0xff]  ;;  %v5412_v13 = vld [vmem:[#allocation14 + $0x38] sm:$0xff] }
 0x58a   : > { %v4441_v16 = vrot.slane %v4434_v32, %v8328_v53  ;;  %5615 = vmatprep.subr.mxu1 %v5434_v39  ;;  %5544 = vmatprep.subr.mxu0 %v5501_v18  ;;  %v5480_v38 = vld [vmem:[#allocation14 + $0x240] sm:$0xff]  ;;  %v5479_v39 = vld [vmem:[#allocation14 + $0x238] sm:$0xff]  ;;  %v5411_v18 = vld [vmem:[#allocation14 + $0x30] sm:$0xff] }
 0x58b   : > { %5616 = vmatpush1.msra.mxu1 %v5433_v19  ;;  %5545 = vmatpush1.msra.mxu0 %v5500_v20  ;;  %v5478_v19 = vld [vmem:[#allocation14 + $0x230] sm:$0xff]  ;;  %v5410_v20 = vld [vmem:[#allocation14 + $0x28] sm:$0xff] }
 0x58c   : > { %v4448_v9 = vrot.slane %v4441_v16, %v8328_v53  ;;  %5617 = vmatprep.subr.mxu1 %v5432_v42  ;;  %5546 = vmatprep.subr.mxu0 %v5499_v21  ;;  %v5477_v42 = vld [vmem:[#allocation14 + $0x228] sm:$0xff]  ;;  %v5409_v21 = vld [vmem:[#allocation14 + $0x20] sm:$0xff] }
 0x58d   : > { %5618 = vmatpush1.msra.mxu1 %v5431_v22  ;;  %5547 = vmatpush1.msra.mxu0 %v5498_v23  ;;  %v5476_v22 = vld [vmem:[#allocation14 + $0x220] sm:$0xff]  ;;  %v5408_v23 = vld [vmem:[#allocation14 + $0x18] sm:$0xff] }
 0x58e   : > { %4451 = vst.msk [vmem:[#allocation2 + $0x2] ss:$8 sm:$0x3] %vm8338_vm8, %v4448_v9  ;;  %5619 = vmatprep.subr.mxu1 %v5430_v24  ;;  %5548 = vmatprep.subr.mxu0 %v5497_v25  ;;  %v5475_v24 = vld [vmem:[#allocation14 + $0x218] sm:$0xff]  ;;  %v5407_v25 = vld [vmem:[#allocation14 + $0x10] sm:$0xff] }
 0x58f   : > { %5620 = vmatpush1.msra.mxu1 %v5429_v51  ;;  %5549 = vmatpush1.msra.mxu0 %v5496_v26  ;;  %v5474_v51 = vld [vmem:[#allocation14 + $0x210] sm:$0xff]  ;;  %v5406_v26 = vld [vmem:[#allocation14 + $0x8] sm:$0xff] }
 0x590   : > { %5621 = vmatprep.subr.mxu1 %v5428_v27  ;;  %5550 = vmatprep.subr.mxu0 %v5495_v57  ;;  %v5473_v27 = vld [vmem:[#allocation14 + $0x208] sm:$0xff]  ;;  %v5405_v57 = vld [vmem:[#allocation14] sm:$0xff] }
 0x591   : > { %5622 = vmatpush1.msra.mxu1 %v5427_v28  ;;  %5551 = vmatpush1.msra.mxu0 %v5494_v29  ;;  %v5472_v28 = vld [vmem:[#allocation14 + $0x200] sm:$0xff]  ;;  %v5468_v29 = vld [vmem:[#allocation14 + $0x1f8] sm:$0xff] }
 0x592   : > { %5623 = vmatprep.subr.mxu1 %v5426_v30  ;;  %v5535_v30 = vld [vmem:[#allocation14 + $0x3f8] sm:$0xff] }
 0x5c3   : > { %v4783_v36 = vpop.f32.mrf.mxu0  ;;  %v4854_v37 = vpop.f32.mrf.mxu1 }
 0x5c4   : > { %v4855_v47 = vadd.f32 %v4854_v37, %v4783_v36 }
 0x5c5   : > { %v4785_v43 = vpop.f32.mrf.mxu0  ;;  %v4856_v41 = vpop.f32.mrf.mxu1 }
 0x5c6   : > { %v4857_v48 = vadd.f32 %v4856_v41, %v4785_v43 }
 0x605   : > { %v4925_v46 = vpop.f32.mrf.mxu0  ;;  %v4996_v44 = vpop.f32.mrf.mxu1 }
 0x606   : > { %v4926_v50 = vadd.f32 %v4925_v46, %v4855_v47 }
 0x607   : > { %v4927_v14 = vpop.f32.mrf.mxu0  ;;  %v4998_v49 = vpop.f32.mrf.mxu1 }
 0x608   : > { %v4928_v52 = vadd.f32 %v4927_v14, %v4857_v48  ;;  %v4997_v62 = vadd.f32 %v4996_v44, %v4926_v50 }
 0x60a   : > { %v4999_v63 = vadd.f32 %v4998_v49, %v4928_v52  ;;  %v5493_v52 = vld [vmem:[#allocation14 + $0x2a8] sm:$0xff] }
 0x60b   : > { %5552 = vmatprep.subr.mxu0 %v5493_v52  ;;  %v5527_v52 = vld [vmem:[#allocation14 + $0x3b8] sm:$0xff] }
 0x647   : > { %v5203_v55 = vpop.f32.mrf.mxu0  ;;  %v5274_v56 = vpop.f32.mrf.mxu1 }
 0x648   : > { %v5275_v59 = vadd.f32 %v5274_v56, %v5203_v55  ;;  %v5425_v55 = vld [vmem:[#allocation14 + $0xa0] sm:$0xff] }
 0x649   : > { %v5205_v60 = vpop.f32.mrf.mxu0  ;;  %v5276_v61 = vpop.f32.mrf.mxu1  ;;  %5624 = vmatpush1.msra.mxu1 %v5425_v55  ;;  %v5492_v56 = vld [vmem:[#allocation14 + $0x2a0] sm:$0xff]  ;;  %v5459_v55 = vld [vmem:[#allocation14 + $0x1b0] sm:$0xff] }
 0x64a   : > { %v5277_v0 = vadd.f32 %v5276_v61, %v5205_v60  ;;  %v5279_v2 = vadd.f32 %v5275_v59, %v4997_v62  ;;  %v5424_v59 = vld [vmem:[#allocation14 + $0x98] sm:$0xff]  ;;  %5553 = vmatpush1.msra.mxu0 %v5492_v56  ;;  %v5423_v61 = vld [vmem:[#allocation14 + $0x90] sm:$0xff] }
 0x64b   : > { %5625 = vmatprep.subr.mxu1 %v5424_v59  ;;  %v5491_v60 = vld [vmem:[#allocation14 + $0x298] sm:$0xff]  ;;  %v5490_v62 = vld [vmem:[#allocation14 + $0x290] sm:$0xff]  ;;  %v5458_v59 = vld [vmem:[#allocation14 + $0x1a8] sm:$0xff] }
 0x64c   : > { %v5280_v35 = vadd.f32 %v5277_v0, %v4999_v63  ;;  %5554 = vmatprep.subr.mxu0 %v5491_v60  ;;  %5626 = vmatpush1.msra.mxu1 %v5423_v61  ;;  %v5422_v63 = vld [vmem:[#allocation14 + $0x88] sm:$0xff]  ;;  %v5526_v56 = vld [vmem:[#allocation14 + $0x3b0] sm:$0xff]  ;;  %v5457_v61 = vld [vmem:[#allocation14 + $0x1a0] sm:$0xff] }
 0x64d   : > { %5555 = vmatpush1.msra.mxu0 %v5490_v62  ;;  %5627 = vmatprep.subr.mxu1 %v5422_v63  ;;  %v5489_v0 = vld [vmem:[#allocation14 + $0x288] sm:$0xff]  ;;  %v5524_v62 = vld [vmem:[#allocation14 + $0x3a0] sm:$0xff]  ;;  %v5456_v63 = vld [vmem:[#allocation14 + $0x198] sm:$0xff] }
 0x64e   : > { %v5283_v3 = vcombine.low %v5279_v2, %v5280_v35  ;;  %v5421_v2 = vld [vmem:[#allocation14 + $0x80] sm:$0xff]  ;;  %5556 = vmatprep.subr.mxu0 %v5489_v0  ;;  %v5525_v60 = vld [vmem:[#allocation14 + $0x3a8] sm:$0xff]  ;;  %v5523_v0 = vld [vmem:[#allocation14 + $0x398] sm:$0xff] }
 0x64f   : > { %5628 = vmatpush1.msra.mxu1 %v5421_v2  ;;  %v5488_v35 = vld [vmem:[#allocation14 + $0x280] sm:$0xff]  ;;  %v5455_v2 = vld [vmem:[#allocation14 + $0x190] sm:$0xff] }
 0x650   : > { %v5290_v7 = vrot.slane %v5283_v3, %v8328_v53  ;;  %v5420_v3 = vld [vmem:[#allocation14 + $0x78] sm:$0xff]  ;;  %5557 = vmatpush1.msra.mxu0 %v5488_v35  ;;  %v5522_v35 = vld [vmem:[#allocation14 + $0x390] sm:$0xff] }
 0x651   : > { %5629 = vmatprep.subr.mxu1 %v5420_v3  ;;  %v5454_v3 = vld [vmem:[#allocation14 + $0x188] sm:$0xff] }
 0x652   : > { %v5297_v54 = vrot.slane %v5290_v7, %v8328_v53  ;;  %v5487_v7 = vld [vmem:[#allocation14 + $0x278] sm:$0xff] }
 0x653   : > { %5558 = vmatprep.subr.mxu0 %v5487_v7  ;;  %v5521_v7 = vld [vmem:[#allocation14 + $0x388] sm:$0xff] }
 0x654   : > { %5300 = vst.msk [vmem:[#allocation2 + $0x3] ss:$8 sm:$0x3] %vm8338_vm8, %v5297_v54  ;;  %v5419_v54 = vld [vmem:[#allocation14 + $0x70] sm:$0xff]  ;;  %5559 = vmatpush1.msra.mxu0 %v5486_v40  ;;  %v5520_v40 = vld [vmem:[#allocation14 + $0x380] sm:$0xff] }
 0x655   : > { %5630 = vmatpush1.msra.mxu1 %v5419_v54  ;;  %v5453_v54 = vld [vmem:[#allocation14 + $0x180] sm:$0xff] }
 0x65b   : > { %v5302_v4 = vld [vmem:[#allocation2] sm:$0xf]  ;;  %v5303_v5 = vld [vmem:[#allocation2 + $0x8] sm:$0xf] }
 0x65c   : > { %v5316_v6 = vadd.f32 %v5309_v45, %v5302_v4  ;;  %v5317_v15 = vadd.f32 %v5313_v58, %v5303_v5  ;;  %5390 = vst.msk [vmem:[#allocation2] ss:$8 sm:$0x3] %vm8338_vm8, %v7425_v34  ;;  %v5418_v45 = vld [vmem:[#allocation14 + $0x68] sm:$0xff]  ;;  %v5417_v4 = vld [vmem:[#allocation14 + $0x60] sm:$0xff] }
 0x65d   : > { %5631 = vmatprep.subr.mxu1 %v5418_v45  ;;  %v5485_v58 = vld [vmem:[#allocation14 + $0x268] sm:$0xff]  ;;  %v5484_v5 = vld [vmem:[#allocation14 + $0x260] sm:$0xff]  ;;  %v5452_v45 = vld [vmem:[#allocation14 + $0x178] sm:$0xff] }
 0x65e   : > { %v5318_v17 = vsel %vm1984_vm3, %v5316_v6, 0.0  ;;  %v5319_v8 = vsel %vm1984_vm3, %v5317_v15, 0.0  ;;  %5560 = vmatprep.subr.mxu0 %v5485_v58  ;;  %5632 = vmatpush1.msra.mxu1 %v5417_v4  ;;  %v5519_v58 = vld [vmem:[#allocation14 + $0x378] sm:$0xff]  ;;  %v5451_v4 = vld [vmem:[#allocation14 + $0x170] sm:$0xff] }
 0x65f   : > { %v5320_v53 = vadd.f32 %v5319_v8, %v5318_v17  ;;  %5561 = vmatpush1.msra.mxu0 %v5484_v5  ;;  %v5415_v17 = vld [vmem:[#allocation14 + $0x50] sm:$0xff] }
 0x660   : > { %v5482_v8 = vld [vmem:[#allocation14 + $0x250] sm:$0xff] }
 0x661   : > { %5321 = vadd.xlane.f32.xlu0 %v5320_v53  ;;  %v5414_v53 = vld [vmem:[#allocation14 + $0x48] sm:$0xff]  ;;  %v5518_v5 = vld [vmem:[#allocation14 + $0x370] sm:$0xff] }
 0x6ea   : > { %v5322_v12 = vpop.xlane.xlu0 %5321 }
 0x6eb   : > { %v5324_v31 = vmul.f32 0.00390625, %v5322_v12  ;;  %v5467_v12 = vld [vmem:[#allocation14 + $0x1f0] sm:$0xff] }
 0x6ed   : > { %v5325_v32 = vsel %vm1984_vm3, %v5324_v31, 0.0  ;;  %v5534_v31 = vld [vmem:[#allocation14 + $0x3f0] sm:$0xff] }
 0x6ee   : > { %v5326_v16 = vrot.slane %v5325_v32, 4 }
 0x6f0   : > { %v5327_v9 = vadd.f32 %v5326_v16, %v5325_v32  ;;  %v5466_v32 = vld [vmem:[#allocation14 + $0x1e8] sm:$0xff] }
 0x6f1   : > { %v5533_v16 = vld [vmem:[#allocation14 + $0x3e8] sm:$0xff] }
 0x6f2   : > { %v5328_v34 = vrot.slane %v5327_v9, 2 }
 0x6f4   : > { %v5329_v36 = vadd.f32 %v5328_v34, %v5327_v9  ;;  %v5465_v9 = vld [vmem:[#allocation14 + $0x1e0] sm:$0xff] }
 0x6f5   : > { %v5532_v34 = vld [vmem:[#allocation14 + $0x3e0] sm:$0xff] }
 0x6f6   : > { %v5330_v37 = vrot.slane %v5329_v36, 1 }
 0x6f8   : > { %v5331_v43 = vadd.f32 %v5330_v37, %v5329_v36  ;;  %v5464_v36 = vld [vmem:[#allocation14 + $0x1d8] sm:$0xff] }
 0x6f9   : > { %v5531_v37 = vld [vmem:[#allocation14 + $0x3d8] sm:$0xff] }
 0x6fa   : > { %v5333_v41 = vmul.f32 0.25, %v5331_v43  ;;  %v5463_v43 = vld [vmem:[#allocation14 + $0x1d0] sm:$0xff] }
 0x6fc   : > { %v8404_v46 = vsub.f32 %v5316_v6, %v5333_v41  ;;  %v8406_v44 = vsub.f32 %v5317_v15, %v5333_v41  ;;  %v5416_v6 = vld [vmem:[#allocation14 + $0x58] sm:$0xff]  ;;  %v5530_v41 = vld [vmem:[#allocation14 + $0x3d0] sm:$0xff] }
 0x6fd   : > { %5633 = vmatprep.subr.mxu1 %v5416_v6  ;;  %v5483_v15 = vld [vmem:[#allocation14 + $0x258] sm:$0xff]  ;;  %v5450_v6 = vld [vmem:[#allocation14 + $0x168] sm:$0xff] }
 0x6fe   : > { %v5336_v14 = vmul.f32 %v8404_v46, %v8404_v46  ;;  %v5337_v47 = vmul.f32 %v8406_v44, %v8406_v44  ;;  %5562 = vmatprep.subr.mxu0 %v5483_v15  ;;  %5634 = vmatpush1.msra.mxu1 %v5415_v17  ;;  %v5517_v15 = vld [vmem:[#allocation14 + $0x368] sm:$0xff]  ;;  %v5449_v17 = vld [vmem:[#allocation14 + $0x160] sm:$0xff] }
 0x6ff   : > { %5563 = vmatpush1.msra.mxu0 %v5482_v8  ;;  %5635 = vmatprep.subr.mxu1 %v5414_v53  ;;  %v5516_v8 = vld [vmem:[#allocation14 + $0x360] sm:$0xff]  ;;  %v5448_v53 = vld [vmem:[#allocation14 + $0x158] sm:$0xff] }
 0x700   : > { %v5338_v48 = vsel %vm1984_vm3, %v5336_v14, 0.0  ;;  %v5339_v49 = vsel %vm1984_vm3, %v5337_v47, 0.0  ;;  %5564 = vmatprep.subr.mxu0 %v5481_v10  ;;  %5636 = vmatpush1.msra.mxu1 %v5413_v11  ;;  %v5462_v14 = vld [vmem:[#allocation14 + $0x1c8] sm:$0xff]  ;;  %v5515_v10 = vld [vmem:[#allocation14 + $0x358] sm:$0xff]  ;;  %v5447_v11 = vld [vmem:[#allocation14 + $0x150] sm:$0xff] }
 0x701   : > { %v5340_v50 = vadd.f32 %v5339_v49, %v5338_v48  ;;  %5565 = vmatpush1.msra.mxu0 %v5480_v38  ;;  %5637 = vmatprep.subr.mxu1 %v5412_v13  ;;  %v5529_v47 = vld [vmem:[#allocation14 + $0x3c8] sm:$0xff]  ;;  %v5461_v48 = vld [vmem:[#allocation14 + $0x1c0] sm:$0xff]  ;;  %v5514_v38 = vld [vmem:[#allocation14 + $0x350] sm:$0xff] }
 0x702   : > { %5566 = vmatprep.subr.mxu0 %v5479_v39  ;;  %5638 = vmatpush1.msra.mxu1 %v5411_v18  ;;  %v5528_v49 = vld [vmem:[#allocation14 + $0x3c0] sm:$0xff]  ;;  %v5446_v13 = vld [vmem:[#allocation14 + $0x148] sm:$0xff] }
 0x703   : > { %5341 = vadd.xlane.f32.xlu0 %v5340_v50  ;;  %5567 = vmatpush1.msra.mxu0 %v5478_v19  ;;  %v5460_v50 = vld [vmem:[#allocation14 + $0x1b8] sm:$0xff]  ;;  %v5513_v39 = vld [vmem:[#allocation14 + $0x348] sm:$0xff]  ;;  %v5445_v18 = vld [vmem:[#allocation14 + $0x140] sm:$0xff] }
 0x704   : > { %5639 = vmatprep.subr.mxu1 %v5410_v20  ;;  %5568 = vmatprep.subr.mxu0 %v5477_v42  ;;  %v5512_v19 = vld [vmem:[#allocation14 + $0x340] sm:$0xff]  ;;  %v5444_v20 = vld [vmem:[#allocation14 + $0x138] sm:$0xff] }
 0x705   : > { %5640 = vmatpush1.msra.mxu1 %v5409_v21  ;;  %5569 = vmatpush1.msra.mxu0 %v5476_v22  ;;  %v5511_v42 = vld [vmem:[#allocation14 + $0x338] sm:$0xff]  ;;  %v5443_v21 = vld [vmem:[#allocation14 + $0x130] sm:$0xff] }
 0x706   : > { %5641 = vmatprep.subr.mxu1 %v5408_v23  ;;  %5570 = vmatprep.subr.mxu0 %v5475_v24  ;;  %v5510_v22 = vld [vmem:[#allocation14 + $0x330] sm:$0xff]  ;;  %v5442_v23 = vld [vmem:[#allocation14 + $0x128] sm:$0xff] }
 0x707   : > { %5642 = vmatpush1.msra.mxu1 %v5407_v25  ;;  %5571 = vmatpush1.msra.mxu0 %v5474_v51  ;;  %v5509_v24 = vld [vmem:[#allocation14 + $0x328] sm:$0xff]  ;;  %v5441_v25 = vld [vmem:[#allocation14 + $0x120] sm:$0xff] }
 0x708   : > { %5643 = vmatprep.subr.mxu1 %v5406_v26  ;;  %5572 = vmatprep.subr.mxu0 %v5473_v27  ;;  %v5508_v51 = vld [vmem:[#allocation14 + $0x320] sm:$0xff]  ;;  %v5440_v26 = vld [vmem:[#allocation14 + $0x118] sm:$0xff] }
 0x709   : > { %5644 = vmatpush1.msra.mxu1 %v5405_v57  ;;  %5573 = vmatpush1.msra.mxu0 %v5472_v28  ;;  %v5507_v27 = vld [vmem:[#allocation14 + $0x318] sm:$0xff]  ;;  %v5439_v57 = vld [vmem:[#allocation14 + $0x110] sm:$0xff] }
 0x70a   : > { %5645 = vmatprep.subr.mxu1 %v5468_v29  ;;  %5574 = vmatprep.subr.mxu0 %v5535_v30  ;;  %v5506_v28 = vld [vmem:[#allocation14 + $0x310] sm:$0xff]  ;;  %v5438_v29 = vld [vmem:[#allocation14 + $0x108] sm:$0xff] }
 0x70b   : > { %5646 = vmatpush2.msra.mxu1 %v5467_v12  ;;  %5575 = vmatpush2.msra.mxu0 %v5534_v31  ;;  %v5505_v30 = vld [vmem:[#allocation14 + $0x308] sm:$0xff]  ;;  %v5437_v12 = vld [vmem:[#allocation14 + $0x100] sm:$0xff] }
 0x70c   : > { %5647 = vmatprep.subr.mxu1 %v5466_v32  ;;  %5576 = vmatprep.subr.mxu0 %v5533_v16  ;;  %v5504_v31 = vld [vmem:[#allocation14 + $0x300] sm:$0xff]  ;;  %v5718_v32 = vld [vmem:[#allocation14 + $0x4f8] sm:$0xff] }
 0x70d   : > { %5648 = vmatpush2.msra.mxu1 %v5465_v9  ;;  %5577 = vmatpush2.msra.mxu0 %v5532_v34 }
 0x70e   : > { %5649 = vmatprep.subr.mxu1 %v5464_v36  ;;  %5578 = vmatprep.subr.mxu0 %v5531_v37 }
 0x70f   : > { %5650 = vmatpush2.msra.mxu1 %v5463_v43  ;;  %5579 = vmatpush2.msra.mxu0 %v5530_v41 }
 0x710   : > { %5651 = vmatprep.subr.mxu1 %v5462_v14  ;;  %5580 = vmatprep.subr.mxu0 %v5529_v47 }
 0x711   : > { %5652 = vmatpush2.msra.mxu1 %v5461_v48  ;;  %5581 = vmatpush2.msra.mxu0 %v5528_v49 }
 0x712   : > { %5653 = vmatprep.subr.mxu1 %v5460_v50  ;;  %5582 = vmatprep.subr.mxu0 %v5527_v52  ;;  %v5356_v50 = vld [vmem:[#allocation11] sm:$0x3]  ;;  %v5370_v52 = vld [vmem:[#allocation12] sm:$0x3] }
 0x713   : > { %5654 = vmatpush2.msra.mxu1 %v5459_v55  ;;  %5583 = vmatpush2.msra.mxu0 %v5526_v56  ;;  %v5361_v55 = vrot.slane %v5356_v50, %v9124_v33  ;;  %v5365_v56 = vrot.slane %v5356_v50, %v9125_v1  ;;  %v5746_v50 = vld [vmem:[#allocation14 + $0x5d8] sm:$0xff] }
 0x714   : > { %5655 = vmatprep.subr.mxu1 %v5458_v59  ;;  %5584 = vmatprep.subr.mxu0 %v5525_v60  ;;  %v5375_v60 = vrot.slane %v5370_v52, %v9124_v33 }
 0x715   : > { %5656 = vmatpush2.msra.mxu1 %v5457_v61  ;;  %5585 = vmatpush2.msra.mxu0 %v5524_v62  ;;  %v5379_v61 = vrot.slane %v5370_v52, %v9125_v1  ;;  %v5745_v52 = vld [vmem:[#allocation14 + $0x5d0] sm:$0xff] }
 0x716   : > { %5657 = vmatprep.subr.mxu1 %v5456_v63  ;;  %5586 = vmatprep.subr.mxu0 %v5523_v0 }
 0x717   : > { %5658 = vmatpush2.msra.mxu1 %v5455_v2  ;;  %5587 = vmatpush2.msra.mxu0 %v5522_v35 }
 0x718   : > { %5659 = vmatprep.subr.mxu1 %v5454_v3  ;;  %5588 = vmatprep.subr.mxu0 %v5521_v7 }
 0x719   : > { %5660 = vmatpush2.msra.mxu1 %v5453_v54  ;;  %5589 = vmatpush2.msra.mxu0 %v5520_v40 }
 0x71a   : > { %5661 = vmatprep.subr.mxu1 %v5452_v45  ;;  %5590 = vmatprep.subr.mxu0 %v5519_v58 }
 0x71b   : > { %5662 = vmatpush2.msra.mxu1 %v5451_v4  ;;  %5591 = vmatpush2.msra.mxu0 %v5518_v5 }
 0x71c   : > { %5663 = vmatprep.subr.mxu1 %v5450_v6  ;;  %5592 = vmatprep.subr.mxu0 %v5517_v15 }
 0x71d   : > { %5664 = vmatpush2.msra.mxu1 %v5449_v17  ;;  %5593 = vmatpush2.msra.mxu0 %v5516_v8 }
 0x71e   : > { %5665 = vmatprep.subr.mxu1 %v5448_v53  ;;  %5594 = vmatprep.subr.mxu0 %v5515_v10  ;;  %v5717_v53 = vld [vmem:[#allocation14 + $0x4f0] sm:$0xff]  ;;  %v5716_v10 = vld [vmem:[#allocation14 + $0x4e8] sm:$0xff] }
 0x71f   : > { %5666 = vmatpush2.msra.mxu1 %v5447_v11  ;;  %5595 = vmatpush2.msra.mxu0 %v5514_v38  ;;  %v5715_v38 = vld [vmem:[#allocation14 + $0x4e0] sm:$0xff] }
 0x720   : > { %5667 = vmatprep.subr.mxu1 %v5446_v13  ;;  %5596 = vmatprep.subr.mxu0 %v5513_v39  ;;  %v5714_v13 = vld [vmem:[#allocation14 + $0x4d8] sm:$0xff]  ;;  %v5713_v39 = vld [vmem:[#allocation14 + $0x4d0] sm:$0xff] }
 0x721   : > { %5668 = vmatpush2.msra.mxu1 %v5445_v18  ;;  %5597 = vmatpush2.msra.mxu0 %v5512_v19  ;;  %v5712_v18 = vld [vmem:[#allocation14 + $0x4c8] sm:$0xff]  ;;  %v5711_v19 = vld [vmem:[#allocation14 + $0x4c0] sm:$0xff] }
 0x722   : > { %5669 = vmatprep.subr.mxu1 %v5444_v20  ;;  %5598 = vmatprep.subr.mxu0 %v5511_v42  ;;  %v5710_v20 = vld [vmem:[#allocation14 + $0x4b8] sm:$0xff]  ;;  %v5709_v42 = vld [vmem:[#allocation14 + $0x4b0] sm:$0xff] }
 0x723   : > { %5670 = vmatpush2.msra.mxu1 %v5443_v21  ;;  %5599 = vmatpush2.msra.mxu0 %v5510_v22  ;;  %v5708_v21 = vld [vmem:[#allocation14 + $0x4a8] sm:$0xff]  ;;  %v5707_v22 = vld [vmem:[#allocation14 + $0x4a0] sm:$0xff] }
 0x724   : > { %5671 = vmatprep.subr.mxu1 %v5442_v23  ;;  %5600 = vmatprep.subr.mxu0 %v5509_v24  ;;  %v5706_v23 = vld [vmem:[#allocation14 + $0x498] sm:$0xff]  ;;  %v5705_v24 = vld [vmem:[#allocation14 + $0x490] sm:$0xff] }
 0x725   : > { %5672 = vmatpush2.msra.mxu1 %v5441_v25  ;;  %5601 = vmatpush2.msra.mxu0 %v5508_v51  ;;  %v5704_v25 = vld [vmem:[#allocation14 + $0x488] sm:$0xff]  ;;  %v5703_v51 = vld [vmem:[#allocation14 + $0x480] sm:$0xff] }
 0x726   : > { %5673 = vmatprep.subr.mxu1 %v5440_v26  ;;  %5602 = vmatprep.subr.mxu0 %v5507_v27  ;;  %v5702_v26 = vld [vmem:[#allocation14 + $0x478] sm:$0xff]  ;;  %v5701_v27 = vld [vmem:[#allocation14 + $0x470] sm:$0xff] }
 0x727   : > { %5674 = vmatpush2.msra.mxu1 %v5439_v57  ;;  %5603 = vmatpush2.msra.mxu0 %v5506_v28  ;;  %v5700_v57 = vld [vmem:[#allocation14 + $0x468] sm:$0xff]  ;;  %v5699_v28 = vld [vmem:[#allocation14 + $0x460] sm:$0xff] }
 0x728   : > { %5675 = vmatprep.subr.mxu1 %v5438_v29  ;;  %5604 = vmatprep.subr.mxu0 %v5505_v30  ;;  %v5698_v29 = vld [vmem:[#allocation14 + $0x458] sm:$0xff]  ;;  %v5697_v30 = vld [vmem:[#allocation14 + $0x450] sm:$0xff] }
 0x729   : > { %5676 = vmatpush2.msra.mxu1 %v5437_v12  ;;  %5605 = vmatpush2.msra.mxu0 %v5504_v31  ;;  %v5696_v12 = vld [vmem:[#allocation14 + $0x448] sm:$0xff]  ;;  %v5695_v31 = vld [vmem:[#allocation14 + $0x440] sm:$0xff] }
 0x72a   : > { %5757 = vmatprep.subr.mxu0 %v5718_v32  ;;  %v5694_v32 = vld [vmem:[#allocation14 + $0x438] sm:$0xff] }
 0x78c   : > { %v5342_v16 = vpop.xlane.xlu0 %5341 }
 0x78d   : > { %v5343_v9 = vmul.f32 0.00390625, %v5342_v16  ;;  %v5693_v16 = vld [vmem:[#allocation14 + $0x430] sm:$0xff] }
 0x78f   : > { %v5344_v34 = vsel %vm1984_vm3, %v5343_v9, 0.0  ;;  %v5692_v9 = vld [vmem:[#allocation14 + $0x428] sm:$0xff] }
 0x790   : > { %v5345_v36 = vrot.slane %v5344_v34, 4 }
 0x792   : > { %v5346_v37 = vadd.f32 %v5345_v36, %v5344_v34  ;;  %v5691_v34 = vld [vmem:[#allocation14 + $0x420] sm:$0xff]  ;;  %v5690_v36 = vld [vmem:[#allocation14 + $0x418] sm:$0xff] }
 0x794   : > { %v5347_v43 = vrot.slane %v5346_v37, 2 }
 0x796   : > { %v5348_v41 = vadd.f32 %v5347_v43, %v5346_v37  ;;  %v5689_v37 = vld [vmem:[#allocation14 + $0x410] sm:$0xff]  ;;  %v5688_v43 = vld [vmem:[#allocation14 + $0x408] sm:$0xff] }
 0x798   : > { %v5349_v14 = vrot.slane %v5348_v41, 1 }
 0x79a   : > { %v5350_v47 = vadd.f32 %v5349_v14, %v5348_v41  ;;  %v5687_v41 = vld [vmem:[#allocation14 + $0x400] sm:$0xff]  ;;  %v5750_v14 = vld [vmem:[#allocation14 + $0x5f8] sm:$0xff] }
 0x79c   : > { %v5351_v48 = vmul.f32 0.25, %v5350_v47  ;;  %v5749_v47 = vld [vmem:[#allocation14 + $0x5f0] sm:$0xff] }
 0x79e   : > { %v5352_v49 = vadd.f32 1e-05, %v5351_v48  ;;  %v5748_v48 = vld [vmem:[#allocation14 + $0x5e8] sm:$0xff] }
 0x7a0   : > { %6988 = vrsqrt.f32 %v5352_v49  ;;  %v5747_v49 = vld [vmem:[#allocation14 + $0x5e0] sm:$0xff] }
 0x7ad   : > { %v6989_v59 = vpop.eup %6988 }
 0x7ae   : > { %v5354_v62 = vmul.f32 %v6989_v59, %v8404_v46  ;;  %v5355_v63 = vmul.f32 %v6989_v59, %v8406_v44  ;;  %v5742_v59 = vld [vmem:[#allocation14 + $0x5b8] sm:$0xff] }
 0x7b0   : > { %v5368_v0 = vmul.f32 %v5361_v55, %v5354_v62  ;;  %v5369_v2 = vmul.f32 %v5365_v56, %v5355_v63  ;;  %v5744_v55 = vld [vmem:[#allocation14 + $0x5c8] sm:$0xff]  ;;  %v5743_v56 = vld [vmem:[#allocation14 + $0x5c0] sm:$0xff]  ;;  %v5738_v63 = vld [vmem:[#allocation14 + $0x598] sm:$0xff] }
 0x7b1   : > { %v5739_v62 = vld [vmem:[#allocation14 + $0x5a0] sm:$0xff] }
 0x7b2   : > { %v5382_v35 = vadd.f32 %v5375_v60, %v5368_v0  ;;  %v5383_v3 = vadd.f32 %v5379_v61, %v5369_v2  ;;  %v5741_v60 = vld [vmem:[#allocation14 + $0x5b0] sm:$0xff]  ;;  %v5740_v61 = vld [vmem:[#allocation14 + $0x5a8] sm:$0xff] }
 0x7b3   : > { %v5737_v0 = vld [vmem:[#allocation14 + $0x590] sm:$0xff]  ;;  %v5736_v2 = vld [vmem:[#allocation14 + $0x588] sm:$0xff] }
 0x7b4   : > { %vm5384_vm9 = vcmp.ge.f32.partialorder %v5382_v35, 0.0  ;;  %vm5385_vm10 = vcmp.ge.f32.partialorder %v5383_v3, 0.0  ;;  %v5386_v7 = vmul.f32 0.01, %v5382_v35  ;;  %v5387_v54 = vmul.f32 0.01, %v5383_v3 }
 0x7b6   : > { %v5388_v40 = vsel %vm5384_vm9, %v5382_v35, %v5386_v7  ;;  %v5389_v45 = vsel %vm5385_vm10, %v5383_v3, %v5387_v54  ;;  %v5735_v35 = vld [vmem:[#allocation14 + $0x580] sm:$0xff]  ;;  %v5734_v3 = vld [vmem:[#allocation14 + $0x578] sm:$0xff]  ;;  %v5733_v7 = vld [vmem:[#allocation14 + $0x570] sm:$0xff] }
 0x7b7   : > { %v5394_v58 = vrot.slane %v5388_v40, 7  ;;  %v5395_v4 = vrot.slane %v5389_v45, 7  ;;  %v5732_v54 = vld [vmem:[#allocation14 + $0x568] sm:$0xff]  ;;  %v5731_v40 = vld [vmem:[#allocation14 + $0x560] sm:$0xff]  ;;  %v5730_v45 = vld [vmem:[#allocation14 + $0x558] sm:$0xff] }
 0x7b9   : > { %5398 = vst [vmem:[#allocation2] sm:$0x1e] %v5394_v58  ;;  %5399 = vst [vmem:[#allocation2 + $0x8] sm:$0x1e] %v5395_v4  ;;  %v5729_v58 = vld [vmem:[#allocation14 + $0x550] sm:$0xff]  ;;  %v5728_v4 = vld [vmem:[#allocation14 + $0x548] sm:$0xff] }
 0x7c0   : > { %v5404_v5 = vld [vmem:[#allocation2 + $0x8] sm:$0xf]  ;;  %v5403_v6 = vld [vmem:[#allocation2] sm:$0xf] }
 0x7c1   : > { %v5470_v15 = vld [vmem:[#allocation2 + $0x8] sm:$0x1e]  ;;  %5677 = vmatprep.mubr.f32.mxu1 %v5404_v5  ;;  %v5469_v44 = vld [vmem:[#allocation2] sm:$0x1e] }
 0x7c2   : > { %v5539_v46 = vrot.slane %v5470_v15, 1  ;;  %v5685_v17 = vld [vmem:[#allocation2 + $0x8] sm:$0x3c]  ;;  %5678 = vmatmul.mubr.f32.vlgmr.msra.gmra.mxu1 %v5403_v6  ;;  %v5538_v8 = vrot.slane %v5469_v44, 1  ;;  %v5727_v5 = vld [vmem:[#allocation14 + $0x540] sm:$0xff]  ;;  %v5726_v6 = vld [vmem:[#allocation14 + $0x538] sm:$0xff] }
 0x7c3   : > { %v5754_v11 = vrot.slane %v5685_v17, 2  ;;  %v5725_v15 = vld [vmem:[#allocation14 + $0x530] sm:$0xff]  ;;  %v5723_v44 = vld [vmem:[#allocation14 + $0x520] sm:$0xff]  ;;  %v5722_v17 = vld [vmem:[#allocation14 + $0x518] sm:$0xff] }
 0x7c4   : > { %5606 = vmatprep.mubr.f32.mxu0 %v5539_v46  ;;  %v5724_v46 = vld [vmem:[#allocation14 + $0x528] sm:$0xff] }
 0x7c5   : > { %5607 = vmatmul.mubr.f32.vlgmr.msra.gmra.mxu0 %v5538_v8  ;;  %v5721_v8 = vld [vmem:[#allocation14 + $0x510] sm:$0xff] }
 0x7c6   : > { %5758 = vmatpush1.msra.mxu0 %v5717_v53  ;;  %5821 = vmatprep.mubr.f32.mxu0 %v5754_v11  ;;  %v5720_v53 = vld [vmem:[#allocation14 + $0x508] sm:$0xff]  ;;  %v5719_v11 = vld [vmem:[#allocation14 + $0x500] sm:$0xff] }
 0x7c7   : > { %5759 = vmatprep.subr.mxu0 %v5716_v10  ;;  %v5684_v10 = vld [vmem:[#allocation2] sm:$0x3c] }
 0x7c8   : > { %5760 = vmatpush1.msra.mxu0 %v5715_v38  ;;  %v5753_v38 = vrot.slane %v5684_v10, 2  ;;  %v6636_v10 = vld [vmem:[%s8860_s11 + $0x250] sm:$0xff] }
 0x7c9   : > { %5761 = vmatprep.subr.mxu0 %v5714_v13 }
 0x7ca   : > { %5762 = vmatpush1.msra.mxu0 %v5713_v39 }
 0x7cb   : > { %5763 = vmatprep.subr.mxu0 %v5712_v18  ;;  %v5830_v18 = vld [vmem:[#allocation15] sm:$0x3] }
 0x7cc   : > { %5764 = vmatpush1.msra.mxu0 %v5711_v19 }
 0x7cd   : > { %5765 = vmatprep.subr.mxu0 %v5710_v20 }
 0x7ce   : > { %5766 = vmatpush1.msra.mxu0 %v5709_v42  ;;  %v5835_v42 = vrot.slane %v5830_v18, %v9124_v33 }
 0x7cf   : > { %5767 = vmatprep.subr.mxu0 %v5708_v21 }
 0x7d0   : > { %5768 = vmatpush1.msra.mxu0 %v5707_v22 }
 0x7d1   : > { %5769 = vmatprep.subr.mxu0 %v5706_v23 }
 0x7d2   : > { %5770 = vmatpush1.msra.mxu0 %v5705_v24 }
 0x7d3   : > { %5771 = vmatprep.subr.mxu0 %v5704_v25  ;;  %v5839_v25 = vrot.slane %v5830_v18, %v9125_v1  ;;  %v6602_v18 = vld [vmem:[%s8860_s11 + $0x140] sm:$0xff] }
 0x7d4   : > { %5772 = vmatpush1.msra.mxu0 %v5703_v51 }
 0x7d5   : > { %5773 = vmatprep.subr.mxu0 %v5702_v26 }
 0x7d6   : > { %5774 = vmatpush1.msra.mxu0 %v5701_v27 }
 0x7d7   : > { %5775 = vmatprep.subr.mxu0 %v5700_v57 }
 0x7d8   : > { %5776 = vmatpush1.msra.mxu0 %v5699_v28 }
 0x7d9   : > { %5777 = vmatprep.subr.mxu0 %v5698_v29 }
 0x7da   : > { %5778 = vmatpush1.msra.mxu0 %v5697_v30 }
 0x7db   : > { %5779 = vmatprep.subr.mxu0 %v5696_v12 }
 0x7dc   : > { %5780 = vmatpush1.msra.mxu0 %v5695_v31 }
 0x7dd   : > { %5781 = vmatprep.subr.mxu0 %v5694_v32 }
 0x7de   : > { %5782 = vmatpush1.msra.mxu0 %v5693_v16 }
 0x7df   : > { %5783 = vmatprep.subr.mxu0 %v5692_v9 }
 0x7e0   : > { %5784 = vmatpush1.msra.mxu0 %v5691_v34 }
 0x7e1   : > { %5785 = vmatprep.subr.mxu0 %v5690_v36 }
 0x7e2   : > { %5786 = vmatpush1.msra.mxu0 %v5689_v37 }
 0x7e3   : > { %5787 = vmatprep.subr.mxu0 %v5688_v43 }
 0x7e4   : > { %5788 = vmatpush1.msra.mxu0 %v5687_v41 }
 0x7e5   : > { %5789 = vmatprep.subr.mxu0 %v5750_v14 }
 0x7e6   : > { %5790 = vmatpush2.msra.mxu0 %v5749_v47 }
 0x7e7   : > { %5791 = vmatprep.subr.mxu0 %v5748_v48 }
 0x7e8   : > { %5792 = vmatpush2.msra.mxu0 %v5747_v49 }
 0x7e9   : > { %5793 = vmatprep.subr.mxu0 %v5746_v50 }
 0x7ea   : > { %5794 = vmatpush2.msra.mxu0 %v5745_v52 }
 0x7eb   : > { %5795 = vmatprep.subr.mxu0 %v5744_v55 }
 0x7ec   : > { %5796 = vmatpush2.msra.mxu0 %v5743_v56  ;;  %v6625_v56 = vld [vmem:[%s8860_s11 + $0x1f8] sm:$0xff] }
 0x7ed   : > { %5797 = vmatprep.subr.mxu0 %v5742_v59  ;;  %6693 = vmatprep.subr.mxu1 %v6625_v56  ;;  %v6609_v59 = vld [vmem:[%s8860_s11 + $0x178] sm:$0xff]  ;;  %v6627_v56 = vld [vmem:[%s8860_s11 + $0x208] sm:$0xff] }
 0x7ee   : > { %5798 = vmatpush2.msra.mxu0 %v5741_v60  ;;  %v6657_v60 = vld [vmem:[%s8860_s11 + $0x2f8] sm:$0xff]  ;;  %6694 = vmatpush3.msra.mxu1 %v6609_v59  ;;  %v6594_v59 = vld [vmem:[%s8860_s11 + $0x100] sm:$0xff] }
 0x7ef   : > { %5799 = vmatprep.subr.mxu0 %v5740_v61  ;;  %v6624_v61 = vld [vmem:[%s8860_s11 + $0x1f0] sm:$0xff] }
 0x7f0   : > { %5800 = vmatpush2.msra.mxu0 %v5739_v62  ;;  %v6641_v62 = vld [vmem:[%s8860_s11 + $0x278] sm:$0xff]  ;;  %6695 = vmatprep.subr.mxu1 %v6624_v61 }
 0x7f1   : > { %5801 = vmatprep.subr.mxu0 %v5738_v63  ;;  %v6608_v63 = vld [vmem:[%s8860_s11 + $0x170] sm:$0xff]  ;;  %v5945_v61 = vld [vmem:[%s8860_s11 + $0xf8] sm:$0xff] }
 0x7f2   : > { %5802 = vmatpush2.msra.mxu0 %v5737_v0  ;;  %v6656_v0 = vld [vmem:[%s8860_s11 + $0x2f0] sm:$0xff]  ;;  %6696 = vmatpush3.msra.mxu1 %v6608_v63 }
 0x7f3   : > { %5803 = vmatprep.subr.mxu0 %v5736_v2  ;;  %v6623_v2 = vld [vmem:[%s8860_s11 + $0x1e8] sm:$0xff] }
 0x7f4   : > { %5804 = vmatpush2.msra.mxu0 %v5735_v35  ;;  %v6640_v35 = vld [vmem:[%s8860_s11 + $0x270] sm:$0xff]  ;;  %6697 = vmatprep.subr.mxu1 %v6623_v2 }
 0x7f5   : > { %5805 = vmatprep.subr.mxu0 %v5734_v3  ;;  %v6607_v3 = vld [vmem:[%s8860_s11 + $0x168] sm:$0xff] }
 0x7f6   : > { %5806 = vmatpush2.msra.mxu0 %v5733_v7  ;;  %v6655_v7 = vld [vmem:[%s8860_s11 + $0x2e8] sm:$0xff]  ;;  %6698 = vmatpush3.msra.mxu1 %v6607_v3 }
 0x7f7   : > { %5807 = vmatprep.subr.mxu0 %v5732_v54  ;;  %v6622_v54 = vld [vmem:[%s8860_s11 + $0x1e0] sm:$0xff] }
 0x7f8   : > { %5808 = vmatpush2.msra.mxu0 %v5731_v40  ;;  %v6639_v40 = vld [vmem:[%s8860_s11 + $0x268] sm:$0xff]  ;;  %6699 = vmatprep.subr.mxu1 %v6622_v54 }
 0x7f9   : > { %5809 = vmatprep.subr.mxu0 %v5730_v45  ;;  %v6606_v45 = vld [vmem:[%s8860_s11 + $0x160] sm:$0xff] }
 0x7fa   : > { %5810 = vmatpush2.msra.mxu0 %v5729_v58  ;;  %v6654_v58 = vld [vmem:[%s8860_s11 + $0x2e0] sm:$0xff]  ;;  %6700 = vmatpush3.msra.mxu1 %v6606_v45 }
 0x7fb   : > { %5811 = vmatprep.subr.mxu0 %v5728_v4  ;;  %v6621_v4 = vld [vmem:[%s8860_s11 + $0x1d8] sm:$0xff] }
 0x7fc   : > { %5812 = vmatpush2.msra.mxu0 %v5727_v5  ;;  %v6638_v5 = vld [vmem:[%s8860_s11 + $0x260] sm:$0xff]  ;;  %6701 = vmatprep.subr.mxu1 %v6621_v4 }
 0x7fd   : > { %5813 = vmatprep.subr.mxu0 %v5726_v6  ;;  %v6605_v6 = vld [vmem:[%s8860_s11 + $0x158] sm:$0xff] }
 0x7fe   : > { %5814 = vmatpush2.msra.mxu0 %v5725_v15  ;;  %v6653_v15 = vld [vmem:[%s8860_s11 + $0x2d8] sm:$0xff]  ;;  %6702 = vmatpush3.msra.mxu1 %v6605_v6 }
 0x7ff   : > { %5815 = vmatprep.subr.mxu0 %v5724_v46  ;;  %v6620_v46 = vld [vmem:[%s8860_s11 + $0x1d0] sm:$0xff]  ;;  %v5894_v6 = vld [vmem:[#allocation18] sm:$0x3] }
 0x800   : > { %5816 = vmatpush2.msra.mxu0 %v5723_v44  ;;  %v6637_v44 = vld [vmem:[%s8860_s11 + $0x258] sm:$0xff]  ;;  %6703 = vmatprep.subr.mxu1 %v6620_v46 }
 0x801   : > { %5817 = vmatprep.subr.mxu0 %v5722_v17  ;;  %v6604_v17 = vld [vmem:[%s8860_s11 + $0x150] sm:$0xff] }
 0x802   : > { %5818 = vmatpush2.msra.mxu0 %v5721_v8  ;;  %v6652_v8 = vld [vmem:[%s8860_s11 + $0x2d0] sm:$0xff]  ;;  %6704 = vmatpush3.msra.mxu1 %v6604_v17 }
 0x803   : > { %5819 = vmatprep.subr.mxu0 %v5720_v53  ;;  %v6619_v53 = vld [vmem:[%s8860_s11 + $0x1c8] sm:$0xff] }
 0x804   : > { %5820 = vmatpush2.msra.mxu0 %v5719_v11  ;;  %v6603_v11 = vld [vmem:[%s8860_s11 + $0x148] sm:$0xff]  ;;  %6705 = vmatprep.subr.mxu1 %v6619_v53  ;;  %v5903_v53 = vrot.slane %v5894_v6, %v9125_v1 }
 0x805   : > { %5822 = vmatmul.mubr.f32.vlgmr.msra.gmra.mxu0 %v5753_v38  ;;  %6763 = vmatprep.subr.mxu0 %v6657_v60  ;;  %v6651_v38 = vld [vmem:[%s8860_s11 + $0x2c8] sm:$0xff]  ;;  %v6642_v60 = vld [vmem:[%s8860_s11 + $0x280] sm:$0xff] }
 0x806   : > { %6764 = vmatpush3.msra.mxu0 %v6641_v62  ;;  %6706 = vmatpush3.msra.mxu1 %v6603_v11  ;;  %v6626_v62 = vld [vmem:[%s8860_s11 + $0x200] sm:$0xff] }
 0x807   : > { %6765 = vmatprep.subr.mxu0 %v6656_v0 }
 0x808   : > { %6766 = vmatpush3.msra.mxu0 %v6640_v35 }
 0x809   : > { %6767 = vmatprep.subr.mxu0 %v6655_v7 }
 0x80a   : > { %6768 = vmatpush3.msra.mxu0 %v6639_v40 }
 0x80b   : > { %6769 = vmatprep.subr.mxu0 %v6654_v58 }
 0x80c   : > { %6770 = vmatpush3.msra.mxu0 %v6638_v5  ;;  %v5880_v5 = vld [vmem:[#allocation17] sm:$0x3] }
 0x80d   : > { %6771 = vmatprep.subr.mxu0 %v6653_v15  ;;  %v5885_v15 = vrot.slane %v5880_v5, %v9124_v33  ;;  %v5889_v46 = vrot.slane %v5880_v5, %v9125_v1  ;;  %v6668_v5 = vld [vmem:[%s8860_s11 + $0x350] sm:$0xff] }
 0x80e   : > { %6772 = vmatpush3.msra.mxu0 %v6637_v44 }
 0x80f   : > { %6773 = vmatprep.subr.mxu0 %v6652_v8  ;;  %v5899_v8 = vrot.slane %v5894_v6, %v9124_v33  ;;  %v6683_v6 = vld [vmem:[%s8860_s11 + $0x3c8] sm:$0xff] }
 0x810   : > { %6774 = vmatpush3.msra.mxu0 %v6636_v10 }
 0x811   : > { %6775 = vmatprep.subr.mxu0 %v6651_v38 }
 0x882   : > { %v5679_v39 = vpop.f32.mrf.mxu1 }
 0x884   : > { %v5681_v21 = vpop.f32.mrf.mxu1 }
 0x885   : > { %v5608_v13 = vpop.f32.mrf.mxu0 }
 0x886   : > { %v5680_v20 = vadd.f32 %v5679_v39, %v5608_v13  ;;  %v6618_v13 = vld [vmem:[%s8860_s11 + $0x1c0] sm:$0xff]  ;;  %v6635_v39 = vld [vmem:[%s8860_s11 + $0x248] sm:$0xff] }
 0x887   : > { %v5610_v19 = vpop.f32.mrf.mxu0  ;;  %6707 = vmatprep.subr.mxu1 %v6618_v13  ;;  %6776 = vmatpush3.msra.mxu0 %v6635_v39 }
 0x888   : > { %v5682_v23 = vadd.f32 %v5681_v21, %v5610_v19  ;;  %v6650_v19 = vld [vmem:[%s8860_s11 + $0x2c0] sm:$0xff]  ;;  %v6601_v21 = vld [vmem:[%s8860_s11 + $0x138] sm:$0xff]  ;;  %6708 = vmatpush3.msra.mxu1 %v6602_v18 }
 0x889   : > { %6777 = vmatprep.subr.mxu0 %v6650_v19 }
 0x8c5   : > { %v5823_v22 = vpop.f32.mrf.mxu0 }
 0x8c6   : > { %v5828_v24 = vadd.f32 %v5823_v22, %v5680_v20  ;;  %v6617_v20 = vld [vmem:[%s8860_s11 + $0x1b8] sm:$0xff] }
 0x8c7   : > { %v5825_v51 = vpop.f32.mrf.mxu0  ;;  %v6649_v22 = vld [vmem:[%s8860_s11 + $0x2b8] sm:$0xff]  ;;  %6709 = vmatprep.subr.mxu1 %v6617_v20 }
 0x8c8   : > { %v5842_v26 = vadd.f32 %v5835_v42, %v5828_v24  ;;  %v5829_v27 = vadd.f32 %v5825_v51, %v5682_v23  ;;  %v6634_v42 = vld [vmem:[%s8860_s11 + $0x240] sm:$0xff]  ;;  %v6616_v23 = vld [vmem:[%s8860_s11 + $0x1b0] sm:$0xff]  ;;  %v6633_v24 = vld [vmem:[%s8860_s11 + $0x238] sm:$0xff]  ;;  %6710 = vmatpush3.msra.mxu1 %v6601_v21 }
 0x8c9   : > { %6778 = vmatpush3.msra.mxu0 %v6634_v42  ;;  %v6648_v51 = vld [vmem:[%s8860_s11 + $0x2b0] sm:$0xff]  ;;  %6711 = vmatprep.subr.mxu1 %v6616_v23  ;;  %v5929_v21 = vld [vmem:[%s8860_s11 + $0x78] sm:$0xff] }
 0x8ca   : > { %v5843_v57 = vadd.f32 %v5839_v25, %v5829_v27  ;;  %v5844_v28 = vsel %vm1984_vm3, %v5842_v26, 0.0  ;;  %v6600_v25 = vld [vmem:[%s8860_s11 + $0x130] sm:$0xff]  ;;  %6779 = vmatprep.subr.mxu0 %v6649_v22 }
 0x8cb   : > { %v6632_v27 = vld [vmem:[%s8860_s11 + $0x230] sm:$0xff]  ;;  %6780 = vmatpush3.msra.mxu0 %v6633_v24  ;;  %6712 = vmatpush3.msra.mxu1 %v6600_v25  ;;  %v5943_v24 = vld [vmem:[%s8860_s11 + $0xe8] sm:$0xff] }
 0x8cc   : > { %v5845_v29 = vsel %vm1984_vm3, %v5843_v57, 0.0  ;;  %6781 = vmatprep.subr.mxu0 %v6648_v51  ;;  %v5944_v22 = vld [vmem:[%s8860_s11 + $0xf0] sm:$0xff]  ;;  %v5927_v25 = vld [vmem:[%s8860_s11 + $0x68] sm:$0xff]  ;;  %v5942_v51 = vld [vmem:[%s8860_s11 + $0xe0] sm:$0xff] }
 0x8cd   : > { %v5846_v30 = vadd.f32 %v5845_v29, %v5844_v28  ;;  %v6647_v28 = vld [vmem:[%s8860_s11 + $0x2a8] sm:$0xff]  ;;  %v6614_v29 = vld [vmem:[%s8860_s11 + $0x1a0] sm:$0xff]  ;;  %6782 = vmatpush3.msra.mxu0 %v6632_v27  ;;  %v5928_v23 = vld [vmem:[%s8860_s11 + $0x70] sm:$0xff] }
 0x8ce   : > { %6783 = vmatprep.subr.mxu0 %v6647_v28  ;;  %v5941_v27 = vld [vmem:[%s8860_s11 + $0xd8] sm:$0xff]  ;;  %v5940_v28 = vld [vmem:[%s8860_s11 + $0xd0] sm:$0xff] }
 0x8cf   : > { %5847 = vadd.xlane.f32.xlu1 %v5846_v30  ;;  %v6631_v30 = vld [vmem:[%s8860_s11 + $0x228] sm:$0xff] }
 0x8d0   : > { %6784 = vmatpush3.msra.mxu0 %v6631_v30  ;;  %v5939_v30 = vld [vmem:[%s8860_s11 + $0xc8] sm:$0xff] }
 0x958   : > { %v5848_v12 = vpop.xlane.xlu1 %5847 }
 0x959   : > { %v5849_v31 = vmul.f32 0.00390625, %v5848_v12  ;;  %v6598_v12 = vld [vmem:[%s8860_s11 + $0x120] sm:$0xff] }
 0x95b   : > { %v5850_v32 = vsel %vm1984_vm3, %v5849_v31, 0.0  ;;  %v6646_v31 = vld [vmem:[%s8860_s11 + $0x2a0] sm:$0xff] }
 0x95c   : > { %v5851_v16 = vrot.slane %v5850_v32, 4  ;;  %6785 = vmatprep.subr.mxu0 %v6646_v31  ;;  %v5938_v31 = vld [vmem:[%s8860_s11 + $0xc0] sm:$0xff] }
 0x95e   : > { %v5852_v9 = vadd.f32 %v5851_v16, %v5850_v32  ;;  %v6613_v32 = vld [vmem:[%s8860_s11 + $0x198] sm:$0xff]  ;;  %v6630_v16 = vld [vmem:[%s8860_s11 + $0x220] sm:$0xff] }
 0x95f   : > { %6786 = vmatpush3.msra.mxu0 %v6630_v16  ;;  %v5937_v16 = vld [vmem:[%s8860_s11 + $0xb8] sm:$0xff] }
 0x960   : > { %v5853_v34 = vrot.slane %v5852_v9, 2 }
 0x962   : > { %v5854_v36 = vadd.f32 %v5853_v34, %v5852_v9  ;;  %v6597_v9 = vld [vmem:[%s8860_s11 + $0x118] sm:$0xff] }
 0x963   : > { %v6645_v34 = vld [vmem:[%s8860_s11 + $0x298] sm:$0xff] }
 0x964   : > { %v5855_v37 = vrot.slane %v5854_v36, 1  ;;  %6787 = vmatprep.subr.mxu0 %v6645_v34  ;;  %v5936_v34 = vld [vmem:[%s8860_s11 + $0xb0] sm:$0xff] }
 0x966   : > { %v5856_v43 = vadd.f32 %v5855_v37, %v5854_v36  ;;  %v6612_v36 = vld [vmem:[%s8860_s11 + $0x190] sm:$0xff]  ;;  %v6629_v37 = vld [vmem:[%s8860_s11 + $0x218] sm:$0xff] }
 0x967   : > { %6788 = vmatpush3.msra.mxu0 %v6629_v37  ;;  %v5935_v37 = vld [vmem:[%s8860_s11 + $0xa8] sm:$0xff] }
 0x968   : > { %v5857_v41 = vmul.f32 0.25, %v5856_v43  ;;  %v6596_v43 = vld [vmem:[%s8860_s11 + $0x110] sm:$0xff] }
 0x96a   : > { %v8426_v14 = vsub.f32 %v5842_v26, %v5857_v41  ;;  %v8428_v47 = vsub.f32 %v5843_v57, %v5857_v41  ;;  %v6615_v26 = vld [vmem:[%s8860_s11 + $0x1a8] sm:$0xff]  ;;  %v6644_v41 = vld [vmem:[%s8860_s11 + $0x290] sm:$0xff] }
 0x96b   : > { %v6599_v57 = vld [vmem:[%s8860_s11 + $0x128] sm:$0xff]  ;;  %6713 = vmatprep.subr.mxu1 %v6615_v26  ;;  %6789 = vmatprep.subr.mxu0 %v6644_v41  ;;  %v5926_v26 = vld [vmem:[%s8860_s11 + $0x60] sm:$0xff] }
 0x96c   : > { %v5860_v48 = vmul.f32 %v8426_v14, %v8426_v14  ;;  %v5861_v49 = vmul.f32 %v8428_v47, %v8428_v47  ;;  %6714 = vmatpush3.msra.mxu1 %v6599_v57  ;;  %v5925_v57 = vld [vmem:[%s8860_s11 + $0x58] sm:$0xff]  ;;  %v5934_v41 = vld [vmem:[%s8860_s11 + $0xa0] sm:$0xff] }
 0x96d   : > { %6715 = vmatprep.subr.mxu1 %v6614_v29  ;;  %v5924_v29 = vld [vmem:[%s8860_s11 + $0x50] sm:$0xff] }
 0x96e   : > { %v5862_v50 = vsel %vm1984_vm3, %v5860_v48, 0.0  ;;  %v5863_v52 = vsel %vm1984_vm3, %v5861_v49, 0.0  ;;  %6716 = vmatpush3.msra.mxu1 %v6598_v12  ;;  %v6611_v48 = vld [vmem:[%s8860_s11 + $0x188] sm:$0xff]  ;;  %v6628_v49 = vld [vmem:[%s8860_s11 + $0x210] sm:$0xff] }
 0x96f   : > { %v5864_v55 = vadd.f32 %v5863_v52, %v5862_v50  ;;  %6717 = vmatprep.subr.mxu1 %v6613_v32  ;;  %v6595_v50 = vld [vmem:[%s8860_s11 + $0x108] sm:$0xff]  ;;  %6790 = vmatpush3.msra.mxu0 %v6628_v49  ;;  %v5922_v32 = vld [vmem:[%s8860_s11 + $0x40] sm:$0xff]  ;;  %v5933_v49 = vld [vmem:[%s8860_s11 + $0x98] sm:$0xff] }
 0x970   : > { %6718 = vmatpush3.msra.mxu1 %v6597_v9  ;;  %v6643_v52 = vld [vmem:[%s8860_s11 + $0x288] sm:$0xff]  ;;  %v5921_v9 = vld [vmem:[%s8860_s11 + $0x38] sm:$0xff] }
 0x971   : > { %5865 = vadd.xlane.f32.xlu1 %v5864_v55  ;;  %6719 = vmatprep.subr.mxu1 %v6612_v36  ;;  %v6610_v55 = vld [vmem:[%s8860_s11 + $0x180] sm:$0xff]  ;;  %v5923_v12 = vld [vmem:[%s8860_s11 + $0x48] sm:$0xff]  ;;  %v5920_v36 = vld [vmem:[%s8860_s11 + $0x30] sm:$0xff] }
 0x972   : > { %6720 = vmatpush3.msra.mxu1 %v6596_v43  ;;  %6791 = vmatprep.subr.mxu0 %v6643_v52  ;;  %v5919_v43 = vld [vmem:[%s8860_s11 + $0x28] sm:$0xff]  ;;  %v5932_v52 = vld [vmem:[%s8860_s11 + $0x90] sm:$0xff] }
 0x973   : > { %6721 = vmatprep.subr.mxu1 %v6611_v48  ;;  %6792 = vmatpush3.msra.mxu0 %v6627_v56  ;;  %v5918_v48 = vld [vmem:[%s8860_s11 + $0x20] sm:$0xff]  ;;  %v5931_v56 = vld [vmem:[%s8860_s11 + $0x88] sm:$0xff] }
 0x974   : > { %6722 = vmatpush3.msra.mxu1 %v6595_v50  ;;  %6793 = vmatprep.subr.mxu0 %v6642_v60  ;;  %v5917_v50 = vld [vmem:[%s8860_s11 + $0x18] sm:$0xff]  ;;  %v5930_v60 = vld [vmem:[%s8860_s11 + $0x80] sm:$0xff] }
 0x975   : > { %6723 = vmatprep.subr.mxu1 %v6610_v55  ;;  %6794 = vmatpush3.msra.mxu0 %v6626_v62  ;;  %v5916_v55 = vld [vmem:[%s8860_s11 + $0x10] sm:$0xff]  ;;  %v6689_v62 = vld [vmem:[%s8860_s11 + $0x3f8] sm:$0xff] }
 0x976   : > { %6724 = vmatpush3.msra.mxu1 %v6594_v59  ;;  %v5915_v59 = vld [vmem:[%s8860_s11 + $0x8] sm:$0xff] }
 0x977   : > { %6728 = vmatprep.subr.mxu1 %v5945_v61  ;;  %v5914_v61 = vld [vmem:[%s8860_s11] sm:$0xff] }
 0x9fa   : > { %v5866_v63 = vpop.xlane.xlu1 %5865 }
 0x9fb   : > { %v5867_v0 = vmul.f32 0.00390625, %v5866_v63  ;;  %v6673_v63 = vld [vmem:[%s8860_s11 + $0x378] sm:$0xff] }
 0x9fd   : > { %v5868_v2 = vsel %vm1984_vm3, %v5867_v0, 0.0 }
 0x9fe   : > { %v5869_v35 = vrot.slane %v5868_v2, 4 }
 0xa00   : > { %v5870_v3 = vadd.f32 %v5869_v35, %v5868_v2  ;;  %v6688_v2 = vld [vmem:[%s8860_s11 + $0x3f0] sm:$0xff] }
 0xa01   : > { %v6672_v35 = vld [vmem:[%s8860_s11 + $0x370] sm:$0xff] }
 0xa02   : > { %v5871_v7 = vrot.slane %v5870_v3, 2 }
 0xa04   : > { %v5872_v54 = vadd.f32 %v5871_v7, %v5870_v3  ;;  %v6687_v3 = vld [vmem:[%s8860_s11 + $0x3e8] sm:$0xff] }
 0xa05   : > { %v6671_v7 = vld [vmem:[%s8860_s11 + $0x368] sm:$0xff] }
 0xa06   : > { %v5873_v40 = vrot.slane %v5872_v54, 1 }
 0xa08   : > { %v5874_v45 = vadd.f32 %v5873_v40, %v5872_v54  ;;  %v6686_v54 = vld [vmem:[%s8860_s11 + $0x3e0] sm:$0xff] }
 0xa09   : > { %v6670_v40 = vld [vmem:[%s8860_s11 + $0x360] sm:$0xff] }
 0xa0a   : > { %v5875_v58 = vmul.f32 0.25, %v5874_v45  ;;  %v6685_v45 = vld [vmem:[%s8860_s11 + $0x3d8] sm:$0xff] }
 0xa0c   : > { %v5876_v4 = vadd.f32 1e-05, %v5875_v58  ;;  %v6669_v58 = vld [vmem:[%s8860_s11 + $0x358] sm:$0xff] }
 0xa0e   : > { %6990 = vrsqrt.f32 %v5876_v4  ;;  %v6684_v4 = vld [vmem:[%s8860_s11 + $0x3d0] sm:$0xff] }
 0xa1b   : > { %v6991_v44 = vpop.eup %6990 }
 0xa1c   : > { %v5879_v17 = vmul.f32 %v6991_v44, %v8428_v47  ;;  %v5878_v10 = vmul.f32 %v6991_v44, %v8426_v14  ;;  %v6666_v44 = vld [vmem:[%s8860_s11 + $0x340] sm:$0xff] }
 0xa1e   : > { %v5893_v11 = vmul.f32 %v5889_v46, %v5879_v17  ;;  %v5892_v38 = vmul.f32 %v5885_v15, %v5878_v10  ;;  %v6667_v15 = vld [vmem:[%s8860_s11 + $0x348] sm:$0xff]  ;;  %v6682_v46 = vld [vmem:[%s8860_s11 + $0x3c0] sm:$0xff]  ;;  %v6681_v17 = vld [vmem:[%s8860_s11 + $0x3b8] sm:$0xff] }
 0xa1f   : > { %v6664_v10 = vld [vmem:[%s8860_s11 + $0x330] sm:$0xff] }
 0xa20   : > { %v5907_v13 = vadd.f32 %v5903_v53, %v5893_v11  ;;  %v5906_v39 = vadd.f32 %v5899_v8, %v5892_v38  ;;  %v6665_v8 = vld [vmem:[%s8860_s11 + $0x338] sm:$0xff]  ;;  %v6680_v53 = vld [vmem:[%s8860_s11 + $0x3b0] sm:$0xff]  ;;  %v6679_v11 = vld [vmem:[%s8860_s11 + $0x3a8] sm:$0xff] }
 0xa21   : > { %v6663_v38 = vld [vmem:[%s8860_s11 + $0x328] sm:$0xff] }
 0xa22   : > { %vm5909_vm11 = vcmp.ge.f32.partialorder %v5907_v13, 0.0  ;;  %v5911_v18 = vmul.f32 0.01, %v5907_v13  ;;  %vm5908_vm12 = vcmp.ge.f32.partialorder %v5906_v39, 0.0  ;;  %v5910_v19 = vmul.f32 0.01, %v5906_v39 }
 0xa24   : > { %v8638_v20 = vsel %vm5909_vm11, %v5907_v13, %v5911_v18  ;;  %v8640_v42 = vsel %vm5908_vm12, %v5906_v39, %v5910_v19  ;;  %v6678_v13 = vld [vmem:[%s8860_s11 + $0x3a0] sm:$0xff]  ;;  %v6677_v18 = vld [vmem:[%s8860_s11 + $0x398] sm:$0xff] }
 0xa25   : > { %v5982_v47 = vrot.slane %v8638_v20, 1  ;;  %v6159_v33 = vrot.slane %v8638_v20, 2  ;;  %v5981_v1 = vrot.slane %v8640_v42, 1  ;;  %v6158_v14 = vrot.slane %v8640_v42, 2  ;;  %v6662_v39 = vld [vmem:[%s8860_s11 + $0x320] sm:$0xff]  ;;  %v6661_v19 = vld [vmem:[%s8860_s11 + $0x318] sm:$0xff] }
 0xa26   : > { %v6267_v0 = vrot.slane %v8638_v20, 3 }
 0xa27   : > { %6049 = vmatprep.mubr.f32.mxu1 %v5982_v47  ;;  %6226 = vmatprep.mubr.f32.mxu0 %v6159_v33  ;;  %v6660_v47 = vld [vmem:[%s8860_s11 + $0x310] sm:$0xff]  ;;  %v6675_v33 = vld [vmem:[%s8860_s11 + $0x388] sm:$0xff] }
 0xa28   : > { %6050 = vmatmul.mubr.f32.vlgmr.msra.gmra.mxu1 %v5981_v1  ;;  %6227 = vmatmul.mubr.f32.vlgmr.msra.gmra.mxu0 %v6158_v14  ;;  %v6659_v1 = vld [vmem:[%s8860_s11 + $0x308] sm:$0xff]  ;;  %v6674_v14 = vld [vmem:[%s8860_s11 + $0x380] sm:$0xff] }
 0xa29   : > { %6729 = vmatpush3.msra.mxu1 %v5929_v21  ;;  %6119 = vmatprep.mubr.f32.mxu1 %v8638_v20  ;;  %v6676_v20 = vld [vmem:[%s8860_s11 + $0x390] sm:$0xff]  ;;  %v6658_v21 = vld [vmem:[%s8860_s11 + $0x300] sm:$0xff] }
 0xa2a   : > { %6730 = vmatprep.subr.mxu1 %v5944_v22  ;;  %v6266_v22 = vrot.slane %v8640_v42, 3 }
 0xa2b   : > { %6731 = vmatpush3.msra.mxu1 %v5928_v23 }
 0xa2c   : > { %6732 = vmatprep.subr.mxu1 %v5943_v24 }
 0xa2d   : > { %6733 = vmatpush3.msra.mxu1 %v5927_v25 }
 0xa2e   : > { %6734 = vmatprep.subr.mxu1 %v5942_v51 }
 0xa2f   : > { %6735 = vmatpush3.msra.mxu1 %v5926_v26 }
 0xa30   : > { %6736 = vmatprep.subr.mxu1 %v5941_v27 }
 0xa31   : > { %6737 = vmatpush3.msra.mxu1 %v5925_v57 }
 0xa32   : > { %6738 = vmatprep.subr.mxu1 %v5940_v28 }
 0xa33   : > { %6739 = vmatpush3.msra.mxu1 %v5924_v29 }
 0xa34   : > { %6740 = vmatprep.subr.mxu1 %v5939_v30 }
 0xa35   : > { %6741 = vmatpush3.msra.mxu1 %v5923_v12 }
 0xa36   : > { %6742 = vmatprep.subr.mxu1 %v5938_v31 }
 0xa37   : > { %6743 = vmatpush3.msra.mxu1 %v5922_v32 }
 0xa38   : > { %6744 = vmatprep.subr.mxu1 %v5937_v16 }
 0xa39   : > { %6745 = vmatpush3.msra.mxu1 %v5921_v9  ;;  %v6341_v9 = vld [vmem:[#allocation20] sm:$0x1] }
 0xa3a   : > { %6746 = vmatprep.subr.mxu1 %v5936_v34 }
 0xa3b   : > { %6747 = vmatpush3.msra.mxu1 %v5920_v36 }
 0xa3c   : > { %6748 = vmatprep.subr.mxu1 %v5935_v37 }
 0xa3d   : > { %6749 = vmatpush3.msra.mxu1 %v5919_v43 }
 0xa3e   : > { %6750 = vmatprep.subr.mxu1 %v5934_v41 }
 0xa3f   : > { %6751 = vmatpush3.msra.mxu1 %v5918_v48 }
 0xa40   : > { %6752 = vmatprep.subr.mxu1 %v5933_v49 }
 0xa41   : > { %6753 = vmatpush3.msra.mxu1 %v5917_v50 }
 0xa42   : > { %6754 = vmatprep.subr.mxu1 %v5932_v52 }
 0xa43   : > { %6755 = vmatpush3.msra.mxu1 %v5916_v55 }
 0xa44   : > { %6756 = vmatprep.subr.mxu1 %v5931_v56 }
 0xa45   : > { %6757 = vmatpush3.msra.mxu1 %v5915_v59  ;;  %v6360_v59 = vld [vmem:[#allocation21] sm:$0x1] }
 0xa46   : > { %6758 = vmatprep.subr.mxu1 %v5930_v60 }
 0xa47   : > { %6759 = vmatpush3.msra.mxu1 %v5914_v61  ;;  %v6362_v61 = vld [vmem:[#allocation23] sm:$0x1] }
 0xa48   : > { %6120 = vmatmul.mubr.f32.vlgmr.msra.gmra.mxu1 %v8640_v42  ;;  %6798 = vmatprep.subr.mxu1 %v6689_v62 }
 0xa49   : > { %6799 = vmatpush3.msra.mxu1 %v6673_v63  ;;  %6334 = vmatprep.mubr.f32.mxu1 %v6267_v0 }
 0xa4a   : > { %6800 = vmatprep.subr.mxu1 %v6688_v2  ;;  %v6367_v2 = vld [vmem:[#allocation24] sm:$0x1] }
 0xa4b   : > { %6801 = vmatpush3.msra.mxu1 %v6672_v35 }
 0xa4c   : > { %6802 = vmatprep.subr.mxu1 %v6687_v3 }
 0xa4d   : > { %6803 = vmatpush3.msra.mxu1 %v6671_v7 }
 0xa4e   : > { %6804 = vmatprep.subr.mxu1 %v6686_v54  ;;  %v6372_v54 = vld [vmem:[#allocation3] sm:$0x1] }
 0xa4f   : > { %6805 = vmatpush3.msra.mxu1 %v6670_v40 }
 0xa50   : > { %6806 = vmatprep.subr.mxu1 %v6685_v45 }
 0xa51   : > { %6807 = vmatpush3.msra.mxu1 %v6669_v58 }
 0xa52   : > { %6808 = vmatprep.subr.mxu1 %v6684_v4 }
 0xa53   : > { %6809 = vmatpush3.msra.mxu1 %v6668_v5 }
 0xa54   : > { %6810 = vmatprep.subr.mxu1 %v6683_v6 }
 0xa55   : > { %6811 = vmatpush3.msra.mxu1 %v6667_v15 }
 0xa56   : > { %6812 = vmatprep.subr.mxu1 %v6682_v46 }
 0xa57   : > { %6813 = vmatpush3.msra.mxu1 %v6666_v44 }
 0xa58   : > { %6814 = vmatprep.subr.mxu1 %v6681_v17 }
 0xa59   : > { %6815 = vmatpush3.msra.mxu1 %v6665_v8 }
 0xa5a   : > { %6816 = vmatprep.subr.mxu1 %v6680_v53 }
 0xa5b   : > { %6817 = vmatpush3.msra.mxu1 %v6664_v10 }
 0xa5c   : > { %6818 = vmatprep.subr.mxu1 %v6679_v11 }
 0xa5d   : > { %6819 = vmatpush3.msra.mxu1 %v6663_v38 }
 0xa5e   : > { %6820 = vmatprep.subr.mxu1 %v6678_v13 }
 0xa5f   : > { %6821 = vmatpush3.msra.mxu1 %v6662_v39 }
 0xa60   : > { %6822 = vmatprep.subr.mxu1 %v6677_v18 }
 0xa61   : > { %6823 = vmatpush3.msra.mxu1 %v6661_v19 }
 0xa62   : > { %6824 = vmatprep.subr.mxu1 %v6676_v20 }
 0xa63   : > { %6825 = vmatpush3.msra.mxu1 %v6660_v47 }
 0xa64   : > { %6826 = vmatprep.subr.mxu1 %v6675_v33 }
 0xa65   : > { %6827 = vmatpush3.msra.mxu1 %v6659_v1 }
 0xa66   : > { %6828 = vmatprep.subr.mxu1 %v6674_v14 }
 0xa67   : > { %6829 = vmatpush3.msra.mxu1 %v6658_v21 }
 0xa68   : > { %6335 = vmatmul.mubr.f32.vlgmr.msra.gmra.mxu1 %v6266_v22 }
 0xae8   : > { %v6725_v23 = vpop.f32.mrf.mxu1  ;;  %v6795_v26 = vpop.f32.mrf.mxu0 }
 0xaea   : > { %v6726_v24 = vpop.f32.mrf.mxu1  ;;  %v6796_v28 = vpop.f32.mrf.mxu0 }
 0xaeb   : > { %v6727_v57 = vadd.f32 %v6726_v24, %v6725_v23  ;;  %v6797_v12 = vadd.f32 %v6796_v28, %v6795_v26 }
 0xb08   : > { %v6760_v25 = vpop.f32.mrf.mxu1 }
 0xb0a   : > { %v6761_v51 = vpop.f32.mrf.mxu1 }
 0xb0b   : > { %v6762_v27 = vadd.f32 %v6761_v51, %v6760_v25 }
 0xb0d   : > { %v6122_v29 = vadd.f32 %v6762_v27, %v6727_v57 }
 0xb0f   : > { %v6232_v32 = vadd.f32 %v6797_v12, %v6122_v29 }
 0xb28   : > { %v6830_v30 = vpop.f32.mrf.mxu1 }
 0xb2a   : > { %v6831_v31 = vpop.f32.mrf.mxu1 }
 0xb2b   : > { %v6832_v16 = vadd.f32 %v6831_v31, %v6830_v30 }
 0xb2d   : > { %v6340_v34 = vadd.f32 %v6832_v16, %v6232_v32 }
 0xb2f   : > { %v6342_v42 = vadd.f32 %v6341_v9, %v6340_v34 }
 0xb31   : > { %v6344_v36 = vsel %vm6343_vm13, %v6342_v42, 0.0 }
 0xb32   : > { %6345 = vadd.xlane.f32.xlu0 %v6344_v36 }
 0xbbb   : > { %v6346_v37 = vpop.xlane.xlu0 %6345 }
 0xbbc   : > { %v6348_v43 = vmul.f32 0.125, %v6346_v37 }
 0xbbe   : > { %v6350_v41 = vsub.f32 %v6342_v42, %v6348_v43 }
 0xbc0   : > { %v6351_v48 = vmul.f32 %v6350_v41, %v6350_v41 }
 0xbc2   : > { %v6352_v49 = vsel %vm6343_vm13, %v6351_v48, 0.0 }
 0xbc3   : > { %6353 = vadd.xlane.f32.xlu1 %v6352_v49 }
 0xc4c   : > { %v6354_v50 = vpop.xlane.xlu1 %6353 }
 0xc4d   : > { %v6355_v52 = vmul.f32 0.125, %v6354_v50 }
 0xc4f   : > { %v6357_v55 = vadd.f32 1e-05, %v6355_v52 }
 0xc51   : > { %6992 = vrsqrt.f32 %v6357_v55 }
 0xc5e   : > { %v6993_v56 = vpop.eup %6992 }
 0xc5f   : > { %v6359_v60 = vmul.f32 %v6993_v56, %v6350_v41 }
 0xc61   : > { %v6361_v62 = vmul.f32 %v6360_v59, %v6359_v60 }
 0xc63   : > { %v6363_v63 = vadd.f32 %v6362_v61, %v6361_v62 }
 0xc65   : > { %vm6364_vm14 = vcmp.ge.f32.partialorder %v6363_v63, 0.0  ;;  %v6365_v0 = vmul.f32 0.01, %v6363_v63 }
 0xc67   : > { %v6366_v35 = vsel %vm6364_vm14, %v6363_v63, %v6365_v0 }
 0xc68   : > { %v6368_v3 = vmul.f32 %v6367_v2, %v6366_v35 }
 0xc6a   : > { %v6369_v7 = vsel %vm6343_vm13, %v6368_v3, 0.0 }
 0xc6b   : > { %6370 = vadd.xlane.f32.xlu0 %v6369_v7 }
 0xcf4   : > { %v6371_v40 = vpop.xlane.xlu0 %6370 }
 0xcf5   : > { %v6373_v45 = vadd.f32 %v6372_v54, %v6371_v40 }
 0xcf7   : > { %6375 = vst.msk [vmem:[%s728_s21] sm:$0x1] %vm6374_vm15, %v6373_v45 }
 0xcf8 PF: > { %s37_s26 = sadd.s32 1, %s7404_s26  }
 0xcf9   : > { %p34_p12 = scmp.ge.s32.totalorder %s37_s26, 4  }
 0xcfb   :  { %36 = sbr.rel (!%p34_p12) target bundleno = 11 (0xb), region = 190 }
 0xd00   :  { %6393 = vsyncpa [#allocation5], 1 }
 0xd01   :  { %6395 = vsyncpa [#allocation5 + $0x1], 1 }
 0xd02   :  { %6396 = vsyncpa [#allocation7], 1 }
 0xd03   :  { %6397 = vsyncpa [#allocation10], 1 }
 0xd04   :  { %6398 = vsyncpa [#allocation13], 1 }
 0xd05   :  { %6399 = vsyncpa [#allocation16], 1 }
 0xd06   :  { %6400 = vsyncpa [#allocation19], 1 }
 0xd07   :  { %6401 = vsyncpa [#allocation22], 1 }
 0xd08   :  { %6402 = vsyncpa [#allocation25], 1 }

</bundles_post_ra>
